<compile_context>
chip_gen: v7x
topology: tpu7x:2x2x1
jax: 0.10.0
libtpu: 0.0.40
codegen_flags: <defaults>
</compile_context>

<pallas_src>
import functools

import numpy as np
import jax
import jax.numpy as jnp
from jax.experimental import pallas as pl
from jax.experimental.pallas import tpu as pltpu


# Set to jnp.bfloat16 on v6e/v7x for ~2x MXU throughput and half the weight
# DMA bytes on the FC layers (accumulation / epilogue stay f32 regardless).
COMPUTE_DTYPE = jnp.float32

_VMEM_LIMIT = 32 * 1024 * 1024  # safe on v5e/v6e/v7x for the tile sizes below


def _round_up(x, m):
    return -(-x // m) * m


# ---------------------------------------------------------------------------
# Pallas kernel: tiled GEMM with fused bias add + optional LeakyReLU
# ---------------------------------------------------------------------------
def _gemm_bias_act_kernel(x_ref, w_ref, b_ref, o_ref, acc_ref, *, slope):
    k = pl.program_id(2)

    @pl.when(k == 0)
    def _():
        acc_ref[...] = jnp.zeros_like(acc_ref)

    acc_ref[...] += jnp.dot(
        x_ref[...], w_ref[...], preferred_element_type=jnp.float32
    )

    @pl.when(k == pl.num_programs(2) - 1)
    def _():
        y = acc_ref[...] + b_ref[...]            # f32 epilogue
        if slope is not None:
            y = jnp.where(y >= 0, y, slope * y)  # LeakyReLU
        o_ref[...] = y.astype(o_ref.dtype)


def _pick_m(M):
    """Batch-like dim: keep it small (sublane multiple of 8)."""
    Mp = _round_up(M, 8)
    if Mp <= 256:
        return Mp, Mp            # single full-extent M block
    Mp = _round_up(M, 128)
    return Mp, 128


def _pick_k(K):
    if K <= 2048:
        return K, K              # full extent: no pad, single k step
    return _round_up(K, 512), 512


def _pick_n(N):
    if N <= 512:
        return N, N              # full extent: no pad
    # keep >=2 N blocks so both v7x TensorCores get a "parallel" axis
    return _round_up(N, 256), 256


def prep_fc(w, b):
    """Hoisted weight prep for a torch Linear (w: (out, in), b: (out,))."""
    N, K = w.shape
    Kp, tk = _pick_k(K)
    Np, tn = _pick_n(N)
    wt = jnp.pad(jnp.transpose(w).astype(COMPUTE_DTYPE),
                 ((0, Kp - K), (0, Np - N)))
    bp = jnp.pad(b.astype(jnp.float32), (0, Np - N)).reshape(1, Np)
    return dict(w=wt, b=bp, K=K, N=N, Kp=Kp, Np=Np, tk=tk, tn=tn)


def pallas_fc(x, p, slope=None):
    """y = act(x @ w + b) with w/b pre-transposed/padded at prep time."""
    M, K = x.shape
    assert K == p["K"], (K, p["K"])
    Mp, tm = _pick_m(M)
    tk, tn = p["tk"], p["tn"]
    xq = jnp.pad(x.astype(p["w"].dtype), ((0, Mp - M), (0, p["Kp"] - K)))

    out = pl.pallas_call(
        functools.partial(_gemm_bias_act_kernel, slope=slope),
        out_shape=jax.ShapeDtypeStruct((Mp, p["Np"]), jnp.float32),
        grid_spec=pltpu.PrefetchScalarGridSpec(
            num_scalar_prefetch=0,
            grid=(Mp // tm, p["Np"] // tn, p["Kp"] // tk),
            in_specs=[
                pl.BlockSpec((tm, tk), lambda i, j, k: (i, k)),
                pl.BlockSpec((tk, tn), lambda i, j, k: (k, j)),
                pl.BlockSpec((1, tn), lambda i, j, k: (0, j)),
            ],
            out_specs=pl.BlockSpec((tm, tn), lambda i, j, k: (i, j)),
            scratch_shapes=[pltpu.VMEM((tm, tn), jnp.float32)],
        ),
        compiler_params=pltpu.CompilerParams(
            dimension_semantics=("parallel", "parallel", "arbitrary"),
            vmem_limit_bytes=_VMEM_LIMIT,
        ),
    )(xq, p["w"], p["b"])
    return out[:M, :p["N"]]


# ---------------------------------------------------------------------------
# Fused ConvLayer kernel: 3x3 conv (pad=1, stride s) + bias + LeakyReLU(0.2)
# The (ky,kx) tap gather happens in-kernel on contiguous slices; for stride 2
# the input is parity-split (even/odd rows x cols) in cheap JAX glue so every
# tap read stays unit-stride.  No im2col blow-up, no pad-to-128 zeros.
# ---------------------------------------------------------------------------
def _conv3x3_kernel(x_ref, w_ref, b_ref, o_ref, *, stride, slope):
    # x_ref: (1, P, Hs, Ws, Cin)  parity-split zero-padded input (one sample)
    # w_ref: (3, 3, Cin, Cout); b_ref: (1, Cout); o_ref: (1, ho, wo, Cout)
    _, ho, wo, cout = o_ref.shape
    bias = b_ref[...]                                   # (1, Cout)
    wk = [[w_ref[ky, kx] for kx in range(3)] for ky in range(3)]
    for i in range(ho):                                 # ho is small & static
        acc = jnp.zeros((wo, cout), jnp.float32)
        for ky in range(3):
            for kx in range(3):
                p = (ky % stride) * stride + (kx % stride)
                r = i + ky // stride
                c = kx // stride
                tap = x_ref[0, p, r, c:c + wo, :]       # (wo, Cin) contiguous
                acc = acc + jnp.dot(tap, wk[ky][kx],
                                    preferred_element_type=jnp.float32)
        y = acc + bias
        y = jnp.where(y >= 0, y, slope * y)
        o_ref[0, i] = y.astype(o_ref.dtype)


def prep_conv(w_oihw, b, stride):
    """Hoisted weight prep for one ConvLayer."""
    cout, cin, _, _ = w_oihw.shape
    cin_p = _round_up(cin, 8)
    w_hwio = jnp.transpose(w_oihw, (2, 3, 1, 0)).astype(COMPUTE_DTYPE)
    w_hwio = jnp.pad(w_hwio, ((0, 0), (0, 0), (0, cin_p - cin), (0, 0)))
    bp = b.astype(jnp.float32).reshape(1, cout)
    return dict(w=w_hwio, b=bp, stride=stride,
                cin=cin, cin_p=cin_p, cout=cout)


def pallas_conv3x3_lrelu(x_nhwc, p):
    n, h, w, cin = x_nhwc.shape
    s, cout, cin_p = p["stride"], p["cout"], p["cin_p"]
    ho = (h + 2 - 3) // s + 1
    wo = (w + 2 - 3) // s + 1

    x = x_nhwc.astype(p["w"].dtype)
    if cin_p != cin:
        x = jnp.pad(x, ((0, 0), (0, 0), (0, 0), (0, cin_p - cin)))
    xp = jnp.pad(x, ((0, 0), (1, 1), (1, 1), (0, 0)))

    if s == 1:
        xs = xp[:, None]                               # (n, 1, h+2, w+2, cin)
    else:
        assert h % 2 == 0 and w % 2 == 0, (h, w)
        parts = [xp[:, a::2, c::2, :] for a in range(2) for c in range(2)]
        xs = jnp.stack(parts, axis=1)                  # (n, 4, ho+1, wo+1, cin)

    _, P, Hs, Ws, _ = xs.shape
    out = pl.pallas_call(
        functools.partial(_conv3x3_kernel, stride=s, slope=0.2),
        out_shape=jax.ShapeDtypeStruct((n, ho, wo, cout), jnp.float32),
        grid_spec=pltpu.PrefetchScalarGridSpec(
            num_scalar_prefetch=0,
            grid=(n,),
            in_specs=[
                pl.BlockSpec((1, P, Hs, Ws, cin_p),
                             lambda i: (i, 0, 0, 0, 0)),
                pl.BlockSpec(p["w"].shape, lambda i: (0, 0, 0, 0)),
                pl.BlockSpec((1, cout), lambda i: (0, 0)),
            ],
            out_specs=pl.BlockSpec((1, ho, wo, cout), lambda i: (i, 0, 0, 0)),
        ),
        compiler_params=pltpu.CompilerParams(
            dimension_semantics=("parallel",),          # batch across TCs
            vmem_limit_bytes=_VMEM_LIMIT,
        ),
    )(xs, p["w"], p["b"])
    return out


# ---------------------------------------------------------------------------
# Full SpectrogramEncoder forward (Pallas path)
# ---------------------------------------------------------------------------
def pallas_forward(x_nchw, params):
    x = jnp.transpose(x_nchw, (0, 2, 3, 1))            # NCHW -> NHWC
    for cp in params["convs"]:
        x = pallas_conv3x3_lrelu(x, cp)
    n = x.shape[0]
    # torch nn.Flatten flattens NCHW -> (N, C*H*W); reproduce that order.
    x = jnp.transpose(x, (0, 3, 1, 2)).reshape(n, -1)
    # NOTE: FC1+FC2 could be fused into one pallas_call keeping the FC1 output
    # in VMEM; skipped here (small win at batch=2, two calls stay general).
    x = pallas_fc(x, params["fc1"], slope=0.2)          # FC + lrelu
    x = pallas_fc(x, params["fc2"], slope=None)         # FC (no act)
    return x.reshape(-1, params["out_feat"])


# ---------------------------------------------------------------------------
# Pure-JAX reference (mirrors the PyTorch forward)
# ---------------------------------------------------------------------------
def reference_forward(x_nchw, conv_params, fc_params, out_feat):
    x = x_nchw
    for (w, b, s) in conv_params:
        x = jax.lax.conv_general_dilated(
            x, w, (s, s), ((1, 1), (1, 1)),
            dimension_numbers=("NCHW", "OIHW", "NCHW"),
            precision=jax.lax.Precision.HIGHEST,
        )
        x = x + b[None, :, None, None]
        x = jnp.where(x >= 0, x, 0.2 * x)
    x = x.reshape(x.shape[0], -1)
    fc1_w, fc1_b, fc2_w, fc2_b = fc_params
    x = jnp.dot(x, fc1_w.T, precision=jax.lax.Precision.HIGHEST) + fc1_b
    x = jnp.where(x >= 0, x, 0.2 * x)
    x = jnp.dot(x, fc2_w.T, precision=jax.lax.Precision.HIGHEST) + fc2_b
    return x.reshape(-1, out_feat)


# ---------------------------------------------------------------------------
# Deterministic parameter construction (mirrors SpectrogramEncoder.__init__)
# ---------------------------------------------------------------------------
def build_params(key, in_res=16, in_ch=1, depth=2, out_ch=4, max_filters=16,
                 output_feature_size=32):
    specs = []
    res = in_res
    res //= 2
    specs.append((in_ch, out_ch, 2))
    prev_ch = out_ch
    for _ in range(depth):
        specs.append((prev_ch, out_ch, 1))
        prev_ch = out_ch
        out_ch *= 2
        if out_ch > max_filters:
            out_ch = max_filters
        res //= 2
        specs.append((prev_ch, out_ch, 2))
        prev_ch = out_ch

    conv_params = []
    for (cin, cout, stride) in specs:
        key, kw, kb = jax.random.split(key, 3)
        bound = 1.0 / np.sqrt(cin * 9)
        w = jax.random.uniform(kw, (cout, cin, 3, 3), jnp.float32, -bound, bound)
        b = jax.random.uniform(kb, (cout,), jnp.float32, -bound, bound)
        conv_params.append((w, b, stride))

    # FC sizes: the torch module hard-codes 2048*2*2 == flatten size under the
    # default config; use the consistent flatten size for this small config.
    fc_in = prev_ch * res * res
    fc_hidden = fc_in

    key, k1, k2, k3, k4 = jax.random.split(key, 5)
    b1 = 1.0 / np.sqrt(fc_in)
    fc1_w = jax.random.uniform(k1, (fc_hidden, fc_in), jnp.float32, -b1, b1)
    fc1_b = jax.random.uniform(k2, (fc_hidden,), jnp.float32, -b1, b1)
    b2 = 1.0 / np.sqrt(fc_hidden)
    fc2_w = jax.random.uniform(k3, (output_feature_size, fc_hidden),
                               jnp.float32, -b2, b2)
    fc2_b = jax.random.uniform(k4, (output_feature_size,), jnp.float32, -b2, b2)

    fc_params = (fc1_w, fc1_b, fc2_w, fc2_b)
    return conv_params, fc_params, output_feature_size


def prepare_params(conv_params, fc_params, out_feat):
    """One-time weight prep (transposes / pads / casts hoisted out of forward)."""
    fc1_w, fc1_b, fc2_w, fc2_b = fc_params
    return dict(
        convs=[prep_conv(w, b, s) for (w, b, s) in conv_params],
        fc1=prep_fc(fc1_w, fc1_b),
        fc2=prep_fc(fc2_w, fc2_b),
        out_feat=out_feat,
    )


if __name__ == "__main__":
    key = jax.random.PRNGKey(0)
    key, pkey, xkey = jax.random.split(key, 3)

    conv_params, fc_params, out_feat = build_params(pkey)
    params = prepare_params(conv_params, fc_params, out_feat)

    # small config consistent with the module: N=2, C=1, 16x16 spectrogram
    x = jax.random.normal(xkey, (2, 1, 16, 16), dtype=jnp.float32)

    fwd = jax.jit(functools.partial(pallas_forward, params=params))
    out = jax.block_until_ready(fwd(x))

    ref = jax.block_until_ready(
        reference_forward(x, conv_params, fc_params, out_feat))

    assert out.shape == (2, out_feat), out.shape
    assert np.allclose(np.asarray(out), np.asarray(ref), rtol=5e-2, atol=5e-2), (
        "max abs diff %g" % float(np.max(np.abs(np.asarray(out) - np.asarray(ref)))))

    print("KERNEL_OK")
</pallas_src>

<mosaic_0001>
module attributes {stable_mosaic.version = 11 : i64} {
  func.func @_conv3x3_kernel(%arg0: i32, %arg1: memref<1x1x10x10x8xf32, #tpu.memory_space<vmem>>, %arg2: memref<3x3x8x4xf32, #tpu.memory_space<vmem>>, %arg3: memref<1x4xf32, #tpu.memory_space<vmem>>, %arg4: memref<1x8x8x4xf32, #tpu.memory_space<vmem>>) attributes {dimension_semantics = [#tpu.dimension_semantics<parallel>], iteration_bounds = array<i64: 2>, scalar_prefetch = 0 : i64, scratch_operands = 0 : i64, tpu.core_type = #tpu.core_type<tc>, window_params = [{transform_indices = @transform_0, window_bounds = array<i64: 1, 1, 10, 10, 8>}, {pipeline_mode = #tpu.pipeline_mode<synchronous>, transform_indices = @transform_1, window_bounds = array<i64: 3, 3, 8, 4>}, {pipeline_mode = #tpu.pipeline_mode<synchronous>, transform_indices = @transform_2, window_bounds = array<i64: 1, 4>}, {transform_indices = @transform_3, window_bounds = array<i64: 1, 8, 8, 4>}]} {
    %c0 = arith.constant 0 : index
    %c0_0 = arith.constant 0 : index
    %0 = vector.load %arg3[%c0, %c0_0] : memref<1x4xf32, #tpu.memory_space<vmem>>, vector<1x4xf32>
    %c0_1 = arith.constant 0 : index
    %c0_2 = arith.constant 0 : index
    %c0_3 = arith.constant 0 : index
    %c0_4 = arith.constant 0 : index
    %1 = vector.load %arg2[%c0_1, %c0_2, %c0_3, %c0_4] : memref<3x3x8x4xf32, #tpu.memory_space<vmem>>, vector<1x1x8x4xf32>
    %2 = vector.shape_cast %1 : vector<1x1x8x4xf32> to vector<8x4xf32>
    %c0_5 = arith.constant 0 : index
    %c1 = arith.constant 1 : index
    %c0_6 = arith.constant 0 : index
    %c0_7 = arith.constant 0 : index
    %3 = vector.load %arg2[%c0_5, %c1, %c0_6, %c0_7] : memref<3x3x8x4xf32, #tpu.memory_space<vmem>>, vector<1x1x8x4xf32>
    %4 = vector.shape_cast %3 : vector<1x1x8x4xf32> to vector<8x4xf32>
    %c0_8 = arith.constant 0 : index
    %c2 = arith.constant 2 : index
    %c0_9 = arith.constant 0 : index
    %c0_10 = arith.constant 0 : index
    %5 = vector.load %arg2[%c0_8, %c2, %c0_9, %c0_10] : memref<3x3x8x4xf32, #tpu.memory_space<vmem>>, vector<1x1x8x4xf32>
    %6 = vector.shape_cast %5 : vector<1x1x8x4xf32> to vector<8x4xf32>
    %c1_11 = arith.constant 1 : index
    %c0_12 = arith.constant 0 : index
    %c0_13 = arith.constant 0 : index
    %c0_14 = arith.constant 0 : index
    %7 = vector.load %arg2[%c1_11, %c0_12, %c0_13, %c0_14] : memref<3x3x8x4xf32, #tpu.memory_space<vmem>>, vector<1x1x8x4xf32>
    %8 = vector.shape_cast %7 : vector<1x1x8x4xf32> to vector<8x4xf32>
    %c1_15 = arith.constant 1 : index
    %c1_16 = arith.constant 1 : index
    %c0_17 = arith.constant 0 : index
    %c0_18 = arith.constant 0 : index
    %9 = vector.load %arg2[%c1_15, %c1_16, %c0_17, %c0_18] : memref<3x3x8x4xf32, #tpu.memory_space<vmem>>, vector<1x1x8x4xf32>
    %10 = vector.shape_cast %9 : vector<1x1x8x4xf32> to vector<8x4xf32>
    %c1_19 = arith.constant 1 : index
    %c2_20 = arith.constant 2 : index
    %c0_21 = arith.constant 0 : index
    %c0_22 = arith.constant 0 : index
    %11 = vector.load %arg2[%c1_19, %c2_20, %c0_21, %c0_22] : memref<3x3x8x4xf32, #tpu.memory_space<vmem>>, vector<1x1x8x4xf32>
    %12 = vector.shape_cast %11 : vector<1x1x8x4xf32> to vector<8x4xf32>
    %c2_23 = arith.constant 2 : index
    %c0_24 = arith.constant 0 : index
    %c0_25 = arith.constant 0 : index
    %c0_26 = arith.constant 0 : index
    %13 = vector.load %arg2[%c2_23, %c0_24, %c0_25, %c0_26] : memref<3x3x8x4xf32, #tpu.memory_space<vmem>>, vector<1x1x8x4xf32>
    %14 = vector.shape_cast %13 : vector<1x1x8x4xf32> to vector<8x4xf32>
    %c2_27 = arith.constant 2 : index
    %c1_28 = arith.constant 1 : index
    %c0_29 = arith.constant 0 : index
    %c0_30 = arith.constant 0 : index
    %15 = vector.load %arg2[%c2_27, %c1_28, %c0_29, %c0_30] : memref<3x3x8x4xf32, #tpu.memory_space<vmem>>, vector<1x1x8x4xf32>
    %16 = vector.shape_cast %15 : vector<1x1x8x4xf32> to vector<8x4xf32>
    %c2_31 = arith.constant 2 : index
    %c2_32 = arith.constant 2 : index
    %c0_33 = arith.constant 0 : index
    %c0_34 = arith.constant 0 : index
    %17 = vector.load %arg2[%c2_31, %c2_32, %c0_33, %c0_34] : memref<3x3x8x4xf32, #tpu.memory_space<vmem>>, vector<1x1x8x4xf32>
    %18 = vector.shape_cast %17 : vector<1x1x8x4xf32> to vector<8x4xf32>
    %cst = arith.constant 0.000000e+00 : f32
    %19 = vector.broadcast %cst : f32 to vector<8x4xf32>
    %c0_35 = arith.constant 0 : index
    %c0_36 = arith.constant 0 : index
    %c0_37 = arith.constant 0 : index
    %c0_38 = arith.constant 0 : index
    %c0_39 = arith.constant 0 : index
    %20 = vector.load %arg1[%c0_35, %c0_36, %c0_37, %c0_38, %c0_39] : memref<1x1x10x10x8xf32, #tpu.memory_space<vmem>>, vector<1x1x1x8x8xf32>
    %21 = vector.shape_cast %20 : vector<1x1x1x8x8xf32> to vector<8x8xf32>
    %cst_40 = arith.constant dense<0.000000e+00> : vector<8x4xf32>
    %22 = tpu.matmul %21, %2, %cst_40 {dimension_numbers = #tpu.dot_dimension_numbers<[1], [0], [0], [1], [0, 0, 1, 1], [], []>} : vector<8x8xf32>, vector<8x4xf32>, vector<8x4xf32> -> vector<8x4xf32>
    %23 = arith.addf %19, %22 : vector<8x4xf32>
    %c0_41 = arith.constant 0 : index
    %c0_42 = arith.constant 0 : index
    %c0_43 = arith.constant 0 : index
    %c1_44 = arith.constant 1 : index
    %c0_45 = arith.constant 0 : index
    %24 = vector.load %arg1[%c0_41, %c0_42, %c0_43, %c1_44, %c0_45] : memref<1x1x10x10x8xf32, #tpu.memory_space<vmem>>, vector<1x1x1x8x8xf32>
    %25 = vector.shape_cast %24 : vector<1x1x1x8x8xf32> to vector<8x8xf32>
    %cst_46 = arith.constant dense<0.000000e+00> : vector<8x4xf32>
    %26 = tpu.matmul %25, %4, %cst_46 {dimension_numbers = #tpu.dot_dimension_numbers<[1], [0], [0], [1], [0, 0, 1, 1], [], []>} : vector<8x8xf32>, vector<8x4xf32>, vector<8x4xf32> -> vector<8x4xf32>
    %27 = arith.addf %23, %26 : vector<8x4xf32>
    %c0_47 = arith.constant 0 : index
    %c0_48 = arith.constant 0 : index
    %c0_49 = arith.constant 0 : index
    %c2_50 = arith.constant 2 : index
    %c0_51 = arith.constant 0 : index
    %28 = vector.load %arg1[%c0_47, %c0_48, %c0_49, %c2_50, %c0_51] : memref<1x1x10x10x8xf32, #tpu.memory_space<vmem>>, vector<1x1x1x8x8xf32>
    %29 = vector.shape_cast %28 : vector<1x1x1x8x8xf32> to vector<8x8xf32>
    %cst_52 = arith.constant dense<0.000000e+00> : vector<8x4xf32>
    %30 = tpu.matmul %29, %6, %cst_52 {dimension_numbers = #tpu.dot_dimension_numbers<[1], [0], [0], [1], [0, 0, 1, 1], [], []>} : vector<8x8xf32>, vector<8x4xf32>, vector<8x4xf32> -> vector<8x4xf32>
    %31 = arith.addf %27, %30 : vector<8x4xf32>
    %c0_53 = arith.constant 0 : index
    %c0_54 = arith.constant 0 : index
    %c1_55 = arith.constant 1 : index
    %c0_56 = arith.constant 0 : index
    %c0_57 = arith.constant 0 : index
    %32 = vector.load %arg1[%c0_53, %c0_54, %c1_55, %c0_56, %c0_57] : memref<1x1x10x10x8xf32, #tpu.memory_space<vmem>>, vector<1x1x1x8x8xf32>
    %33 = vector.shape_cast %32 : vector<1x1x1x8x8xf32> to vector<8x8xf32>
    %cst_58 = arith.constant dense<0.000000e+00> : vector<8x4xf32>
    %34 = tpu.matmul %33, %8, %cst_58 {dimension_numbers = #tpu.dot_dimension_numbers<[1], [0], [0], [1], [0, 0, 1, 1], [], []>} : vector<8x8xf32>, vector<8x4xf32>, vector<8x4xf32> -> vector<8x4xf32>
    %35 = arith.addf %31, %34 : vector<8x4xf32>
    %c0_59 = arith.constant 0 : index
    %c0_60 = arith.constant 0 : index
    %c1_61 = arith.constant 1 : index
    %c1_62 = arith.constant 1 : index
    %c0_63 = arith.constant 0 : index
    %36 = vector.load %arg1[%c0_59, %c0_60, %c1_61, %c1_62, %c0_63] : memref<1x1x10x10x8xf32, #tpu.memory_space<vmem>>, vector<1x1x1x8x8xf32>
    %37 = vector.shape_cast %36 : vector<1x1x1x8x8xf32> to vector<8x8xf32>
    %cst_64 = arith.constant dense<0.000000e+00> : vector<8x4xf32>
    %38 = tpu.matmul %37, %10, %cst_64 {dimension_numbers = #tpu.dot_dimension_numbers<[1], [0], [0], [1], [0, 0, 1, 1], [], []>} : vector<8x8xf32>, vector<8x4xf32>, vector<8x4xf32> -> vector<8x4xf32>
    %39 = arith.addf %35, %38 : vector<8x4xf32>
    %c0_65 = arith.constant 0 : index
    %c0_66 = arith.constant 0 : index
    %c1_67 = arith.constant 1 : index
    %c2_68 = arith.constant 2 : index
    %c0_69 = arith.constant 0 : index
    %40 = vector.load %arg1[%c0_65, %c0_66, %c1_67, %c2_68, %c0_69] : memref<1x1x10x10x8xf32, #tpu.memory_space<vmem>>, vector<1x1x1x8x8xf32>
    %41 = vector.shape_cast %40 : vector<1x1x1x8x8xf32> to vector<8x8xf32>
    %cst_70 = arith.constant dense<0.000000e+00> : vector<8x4xf32>
    %42 = tpu.matmul %41, %12, %cst_70 {dimension_numbers = #tpu.dot_dimension_numbers<[1], [0], [0], [1], [0, 0, 1, 1], [], []>} : vector<8x8xf32>, vector<8x4xf32>, vector<8x4xf32> -> vector<8x4xf32>
    %43 = arith.addf %39, %42 : vector<8x4xf32>
    %c0_71 = arith.constant 0 : index
    %c0_72 = arith.constant 0 : index
    %c2_73 = arith.constant 2 : index
    %c0_74 = arith.constant 0 : index
    %c0_75 = arith.constant 0 : index
    %44 = vector.load %arg1[%c0_71, %c0_72, %c2_73, %c0_74, %c0_75] : memref<1x1x10x10x8xf32, #tpu.memory_space<vmem>>, vector<1x1x1x8x8xf32>
    %45 = vector.shape_cast %44 : vector<1x1x1x8x8xf32> to vector<8x8xf32>
    %cst_76 = arith.constant dense<0.000000e+00> : vector<8x4xf32>
    %46 = tpu.matmul %45, %14, %cst_76 {dimension_numbers = #tpu.dot_dimension_numbers<[1], [0], [0], [1], [0, 0, 1, 1], [], []>} : vector<8x8xf32>, vector<8x4xf32>, vector<8x4xf32> -> vector<8x4xf32>
    %47 = arith.addf %43, %46 : vector<8x4xf32>
    %c0_77 = arith.constant 0 : index
    %c0_78 = arith.constant 0 : index
    %c2_79 = arith.constant 2 : index
    %c1_80 = arith.constant 1 : index
    %c0_81 = arith.constant 0 : index
    %48 = vector.load %arg1[%c0_77, %c0_78, %c2_79, %c1_80, %c0_81] : memref<1x1x10x10x8xf32, #tpu.memory_space<vmem>>, vector<1x1x1x8x8xf32>
    %49 = vector.shape_cast %48 : vector<1x1x1x8x8xf32> to vector<8x8xf32>
    %cst_82 = arith.constant dense<0.000000e+00> : vector<8x4xf32>
    %50 = tpu.matmul %49, %16, %cst_82 {dimension_numbers = #tpu.dot_dimension_numbers<[1], [0], [0], [1], [0, 0, 1, 1], [], []>} : vector<8x8xf32>, vector<8x4xf32>, vector<8x4xf32> -> vector<8x4xf32>
    %51 = arith.addf %47, %50 : vector<8x4xf32>
    %c0_83 = arith.constant 0 : index
    %c0_84 = arith.constant 0 : index
    %c2_85 = arith.constant 2 : index
    %c2_86 = arith.constant 2 : index
    %c0_87 = arith.constant 0 : index
    %52 = vector.load %arg1[%c0_83, %c0_84, %c2_85, %c2_86, %c0_87] : memref<1x1x10x10x8xf32, #tpu.memory_space<vmem>>, vector<1x1x1x8x8xf32>
    %53 = vector.shape_cast %52 : vector<1x1x1x8x8xf32> to vector<8x8xf32>
    %cst_88 = arith.constant dense<0.000000e+00> : vector<8x4xf32>
    %54 = tpu.matmul %53, %18, %cst_88 {dimension_numbers = #tpu.dot_dimension_numbers<[1], [0], [0], [1], [0, 0, 1, 1], [], []>} : vector<8x8xf32>, vector<8x4xf32>, vector<8x4xf32> -> vector<8x4xf32>
    %55 = arith.addf %51, %54 : vector<8x4xf32>
    %56 = vector.broadcast %0 : vector<1x4xf32> to vector<8x4xf32>
    %57 = arith.addf %55, %56 : vector<8x4xf32>
    %cst_89 = arith.constant 0.000000e+00 : f32
    %58 = vector.broadcast %cst_89 : f32 to vector<8x4xf32>
    %59 = arith.cmpf oge, %57, %58 : vector<8x4xf32>
    %cst_90 = arith.constant 2.000000e-01 : f32
    %60 = vector.broadcast %cst_90 : f32 to vector<8x4xf32>
    %61 = arith.mulf %60, %57 : vector<8x4xf32>
    %62 = arith.select %59, %57, %61 : vector<8x4xi1>, vector<8x4xf32>
    %c0_91 = arith.constant 0 : index
    %c0_92 = arith.constant 0 : index
    %c0_93 = arith.constant 0 : index
    %c0_94 = arith.constant 0 : index
    %63 = vector.load %arg4[%c0_91, %c0_92, %c0_93, %c0_94] : memref<1x8x8x4xf32, #tpu.memory_space<vmem>>, vector<1x1x8x4xf32>
    %64 = vector.shape_cast %63 : vector<1x1x8x4xf32> to vector<8x4xf32>
    %65 = vector.shape_cast %62 : vector<8x4xf32> to vector<1x1x8x4xf32>
    tpu.vector_store %arg4[%c0_91, %c0_92, %c0_93, %c0_94], %65 {strides = array<i32>} : memref<1x8x8x4xf32, #tpu.memory_space<vmem>>, vector<1x1x8x4xf32>,
    %cst_95 = arith.constant 0.000000e+00 : f32
    %66 = vector.broadcast %cst_95 : f32 to vector<8x4xf32>
    %c0_96 = arith.constant 0 : index
    %c0_97 = arith.constant 0 : index
    %c1_98 = arith.constant 1 : index
    %c0_99 = arith.constant 0 : index
    %c0_100 = arith.constant 0 : index
    %67 = vector.load %arg1[%c0_96, %c0_97, %c1_98, %c0_99, %c0_100] : memref<1x1x10x10x8xf32, #tpu.memory_space<vmem>>, vector<1x1x1x8x8xf32>
    %68 = vector.shape_cast %67 : vector<1x1x1x8x8xf32> to vector<8x8xf32>
    %cst_101 = arith.constant dense<0.000000e+00> : vector<8x4xf32>
    %69 = tpu.matmul %68, %2, %cst_101 {dimension_numbers = #tpu.dot_dimension_numbers<[1], [0], [0], [1], [0, 0, 1, 1], [], []>} : vector<8x8xf32>, vector<8x4xf32>, vector<8x4xf32> -> vector<8x4xf32>
    %70 = arith.addf %66, %69 : vector<8x4xf32>
    %c0_102 = arith.constant 0 : index
    %c0_103 = arith.constant 0 : index
    %c1_104 = arith.constant 1 : index
    %c1_105 = arith.constant 1 : index
    %c0_106 = arith.constant 0 : index
    %71 = vector.load %arg1[%c0_102, %c0_103, %c1_104, %c1_105, %c0_106] : memref<1x1x10x10x8xf32, #tpu.memory_space<vmem>>, vector<1x1x1x8x8xf32>
    %72 = vector.shape_cast %71 : vector<1x1x1x8x8xf32> to vector<8x8xf32>
    %cst_107 = arith.constant dense<0.000000e+00> : vector<8x4xf32>
    %73 = tpu.matmul %72, %4, %cst_107 {dimension_numbers = #tpu.dot_dimension_numbers<[1], [0], [0], [1], [0, 0, 1, 1], [], []>} : vector<8x8xf32>, vector<8x4xf32>, vector<8x4xf32> -> vector<8x4xf32>
    %74 = arith.addf %70, %73 : vector<8x4xf32>
    %c0_108 = arith.constant 0 : index
    %c0_109 = arith.constant 0 : index
    %c1_110 = arith.constant 1 : index
    %c2_111 = arith.constant 2 : index
    %c0_112 = arith.constant 0 : index
    %75 = vector.load %arg1[%c0_108, %c0_109, %c1_110, %c2_111, %c0_112] : memref<1x1x10x10x8xf32, #tpu.memory_space<vmem>>, vector<1x1x1x8x8xf32>
    %76 = vector.shape_cast %75 : vector<1x1x1x8x8xf32> to vector<8x8xf32>
    %cst_113 = arith.constant dense<0.000000e+00> : vector<8x4xf32>
    %77 = tpu.matmul %76, %6, %cst_113 {dimension_numbers = #tpu.dot_dimension_numbers<[1], [0], [0], [1], [0, 0, 1, 1], [], []>} : vector<8x8xf32>, vector<8x4xf32>, vector<8x4xf32> -> vector<8x4xf32>
    %78 = arith.addf %74, %77 : vector<8x4xf32>
    %c0_114 = arith.constant 0 : index
    %c0_115 = arith.constant 0 : index
    %c2_116 = arith.constant 2 : index
    %c0_117 = arith.constant 0 : index
    %c0_118 = arith.constant 0 : index
    %79 = vector.load %arg1[%c0_114, %c0_115, %c2_116, %c0_117, %c0_118] : memref<1x1x10x10x8xf32, #tpu.memory_space<vmem>>, vector<1x1x1x8x8xf32>
    %80 = vector.shape_cast %79 : vector<1x1x1x8x8xf32> to vector<8x8xf32>
    %cst_119 = arith.constant dense<0.000000e+00> : vector<8x4xf32>
    %81 = tpu.matmul %80, %8, %cst_119 {dimension_numbers = #tpu.dot_dimension_numbers<[1], [0], [0], [1], [0, 0, 1, 1], [], []>} : vector<8x8xf32>, vector<8x4xf32>, vector<8x4xf32> -> vector<8x4xf32>
    %82 = arith.addf %78, %81 : vector<8x4xf32>
    %c0_120 = arith.constant 0 : index
    %c0_121 = arith.constant 0 : index
    %c2_122 = arith.constant 2 : index
    %c1_123 = arith.constant 1 : index
    %c0_124 = arith.constant 0 : index
    %83 = vector.load %arg1[%c0_120, %c0_121, %c2_122, %c1_123, %c0_124] : memref<1x1x10x10x8xf32, #tpu.memory_space<vmem>>, vector<1x1x1x8x8xf32>
    %84 = vector.shape_cast %83 : vector<1x1x1x8x8xf32> to vector<8x8xf32>
    %cst_125 = arith.constant dense<0.000000e+00> : vector<8x4xf32>
    %85 = tpu.matmul %84, %10, %cst_125 {dimension_numbers = #tpu.dot_dimension_numbers<[1], [0], [0], [1], [0, 0, 1, 1], [], []>} : vector<8x8xf32>, vector<8x4xf32>, vector<8x4xf32> -> vector<8x4xf32>
    %86 = arith.addf %82, %85 : vector<8x4xf32>
    %c0_126 = arith.constant 0 : index
    %c0_127 = arith.constant 0 : index
    %c2_128 = arith.constant 2 : index
    %c2_129 = arith.constant 2 : index
    %c0_130 = arith.constant 0 : index
    %87 = vector.load %arg1[%c0_126, %c0_127, %c2_128, %c2_129, %c0_130] : memref<1x1x10x10x8xf32, #tpu.memory_space<vmem>>, vector<1x1x1x8x8xf32>
    %88 = vector.shape_cast %87 : vector<1x1x1x8x8xf32> to vector<8x8xf32>
    %cst_131 = arith.constant dense<0.000000e+00> : vector<8x4xf32>
    %89 = tpu.matmul %88, %12, %cst_131 {dimension_numbers = #tpu.dot_dimension_numbers<[1], [0], [0], [1], [0, 0, 1, 1], [], []>} : vector<8x8xf32>, vector<8x4xf32>, vector<8x4xf32> -> vector<8x4xf32>
    %90 = arith.addf %86, %89 : vector<8x4xf32>
    %c0_132 = arith.constant 0 : index
    %c0_133 = arith.constant 0 : index
    %c3 = arith.constant 3 : index
    %c0_134 = arith.constant 0 : index
    %c0_135 = arith.constant 0 : index
    %91 = vector.load %arg1[%c0_132, %c0_133, %c3, %c0_134, %c0_135] : memref<1x1x10x10x8xf32, #tpu.memory_space<vmem>>, vector<1x1x1x8x8xf32>
    %92 = vector.shape_cast %91 : vector<1x1x1x8x8xf32> to vector<8x8xf32>
    %cst_136 = arith.constant dense<0.000000e+00> : vector<8x4xf32>
    %93 = tpu.matmul %92, %14, %cst_136 {dimension_numbers = #tpu.dot_dimension_numbers<[1], [0], [0], [1], [0, 0, 1, 1], [], []>} : vector<8x8xf32>, vector<8x4xf32>, vector<8x4xf32> -> vector<8x4xf32>
    %94 = arith.addf %90, %93 : vector<8x4xf32>
    %c0_137 = arith.constant 0 : index
    %c0_138 = arith.constant 0 : index
    %c3_139 = arith.constant 3 : index
    %c1_140 = arith.constant 1 : index
    %c0_141 = arith.constant 0 : index
    %95 = vector.load %arg1[%c0_137, %c0_138, %c3_139, %c1_140, %c0_141] : memref<1x1x10x10x8xf32, #tpu.memory_space<vmem>>, vector<1x1x1x8x8xf32>
    %96 = vector.shape_cast %95 : vector<1x1x1x8x8xf32> to vector<8x8xf32>
    %cst_142 = arith.constant dense<0.000000e+00> : vector<8x4xf32>
    %97 = tpu.matmul %96, %16, %cst_142 {dimension_numbers = #tpu.dot_dimension_numbers<[1], [0], [0], [1], [0, 0, 1, 1], [], []>} : vector<8x8xf32>, vector<8x4xf32>, vector<8x4xf32> -> vector<8x4xf32>
    %98 = arith.addf %94, %97 : vector<8x4xf32>
    %c0_143 = arith.constant 0 : index
    %c0_144 = arith.constant 0 : index
    %c3_145 = arith.constant 3 : index
    %c2_146 = arith.constant 2 : index
    %c0_147 = arith.constant 0 : index
    %99 = vector.load %arg1[%c0_143, %c0_144, %c3_145, %c2_146, %c0_147] : memref<1x1x10x10x8xf32, #tpu.memory_space<vmem>>, vector<1x1x1x8x8xf32>
    %100 = vector.shape_cast %99 : vector<1x1x1x8x8xf32> to vector<8x8xf32>
    %cst_148 = arith.constant dense<0.000000e+00> : vector<8x4xf32>
    %101 = tpu.matmul %100, %18, %cst_148 {dimension_numbers = #tpu.dot_dimension_numbers<[1], [0], [0], [1], [0, 0, 1, 1], [], []>} : vector<8x8xf32>, vector<8x4xf32>, vector<8x4xf32> -> vector<8x4xf32>
    %102 = arith.addf %98, %101 : vector<8x4xf32>
    %103 = vector.broadcast %0 : vector<1x4xf32> to vector<8x4xf32>
    %104 = arith.addf %102, %103 : vector<8x4xf32>
    %cst_149 = arith.constant 0.000000e+00 : f32
    %105 = vector.broadcast %cst_149 : f32 to vector<8x4xf32>
    %106 = arith.cmpf oge, %104, %105 : vector<8x4xf32>
    %cst_150 = arith.constant 2.000000e-01 : f32
    %107 = vector.broadcast %cst_150 : f32 to vector<8x4xf32>
    %108 = arith.mulf %107, %104 : vector<8x4xf32>
    %109 = arith.select %106, %104, %108 : vector<8x4xi1>, vector<8x4xf32>
    %c0_151 = arith.constant 0 : index
    %c1_152 = arith.constant 1 : index
    %c0_153 = arith.constant 0 : index
    %c0_154 = arith.constant 0 : index
    %110 = vector.load %arg4[%c0_151, %c1_152, %c0_153, %c0_154] : memref<1x8x8x4xf32, #tpu.memory_space<vmem>>, vector<1x1x8x4xf32>
    %111 = vector.shape_cast %110 : vector<1x1x8x4xf32> to vector<8x4xf32>
    %112 = vector.shape_cast %109 : vector<8x4xf32> to vector<1x1x8x4xf32>
    tpu.vector_store %arg4[%c0_151, %c1_152, %c0_153, %c0_154], %112 {strides = array<i32>} : memref<1x8x8x4xf32, #tpu.memory_space<vmem>>, vector<1x1x8x4xf32>,
    %cst_155 = arith.constant 0.000000e+00 : f32
    %113 = vector.broadcast %cst_155 : f32 to vector<8x4xf32>
    %c0_156 = arith.constant 0 : index
    %c0_157 = arith.constant 0 : index
    %c2_158 = arith.constant 2 : index
    %c0_159 = arith.constant 0 : index
    %c0_160 = arith.constant 0 : index
    %114 = vector.load %arg1[%c0_156, %c0_157, %c2_158, %c0_159, %c0_160] : memref<1x1x10x10x8xf32, #tpu.memory_space<vmem>>, vector<1x1x1x8x8xf32>
    %115 = vector.shape_cast %114 : vector<1x1x1x8x8xf32> to vector<8x8xf32>
    %cst_161 = arith.constant dense<0.000000e+00> : vector<8x4xf32>
    %116 = tpu.matmul %115, %2, %cst_161 {dimension_numbers = #tpu.dot_dimension_numbers<[1], [0], [0], [1], [0, 0, 1, 1], [], []>} : vector<8x8xf32>, vector<8x4xf32>, vector<8x4xf32> -> vector<8x4xf32>
    %117 = arith.addf %113, %116 : vector<8x4xf32>
    %c0_162 = arith.constant 0 : index
    %c0_163 = arith.constant 0 : index
    %c2_164 = arith.constant 2 : index
    %c1_165 = arith.constant 1 : index
    %c0_166 = arith.constant 0 : index
    %118 = vector.load %arg1[%c0_162, %c0_163, %c2_164, %c1_165, %c0_166] : memref<1x1x10x10x8xf32, #tpu.memory_space<vmem>>, vector<1x1x1x8x8xf32>
    %119 = vector.shape_cast %118 : vector<1x1x1x8x8xf32> to vector<8x8xf32>
    %cst_167 = arith.constant dense<0.000000e+00> : vector<8x4xf32>
    %120 = tpu.matmul %119, %4, %cst_167 {dimension_numbers = #tpu.dot_dimension_numbers<[1], [0], [0], [1], [0, 0, 1, 1], [], []>} : vector<8x8xf32>, vector<8x4xf32>, vector<8x4xf32> -> vector<8x4xf32>
    %121 = arith.addf %117, %120 : vector<8x4xf32>
    %c0_168 = arith.constant 0 : index
    %c0_169 = arith.constant 0 : index
    %c2_170 = arith.constant 2 : index
    %c2_171 = arith.constant 2 : index
    %c0_172 = arith.constant 0 : index
    %122 = vector.load %arg1[%c0_168, %c0_169, %c2_170, %c2_171, %c0_172] : memref<1x1x10x10x8xf32, #tpu.memory_space<vmem>>, vector<1x1x1x8x8xf32>
    %123 = vector.shape_cast %122 : vector<1x1x1x8x8xf32> to vector<8x8xf32>
    %cst_173 = arith.constant dense<0.000000e+00> : vector<8x4xf32>
    %124 = tpu.matmul %123, %6, %cst_173 {dimension_numbers = #tpu.dot_dimension_numbers<[1], [0], [0], [1], [0, 0, 1, 1], [], []>} : vector<8x8xf32>, vector<8x4xf32>, vector<8x4xf32> -> vector<8x4xf32>
    %125 = arith.addf %121, %124 : vector<8x4xf32>
    %c0_174 = arith.constant 0 : index
    %c0_175 = arith.constant 0 : index
    %c3_176 = arith.constant 3 : index
    %c0_177 = arith.constant 0 : index
    %c0_178 = arith.constant 0 : index
    %126 = vector.load %arg1[%c0_174, %c0_175, %c3_176, %c0_177, %c0_178] : memref<1x1x10x10x8xf32, #tpu.memory_space<vmem>>, vector<1x1x1x8x8xf32>
    %127 = vector.shape_cast %126 : vector<1x1x1x8x8xf32> to vector<8x8xf32>
    %cst_179 = arith.constant dense<0.000000e+00> : vector<8x4xf32>
    %128 = tpu.matmul %127, %8, %cst_179 {dimension_numbers = #tpu.dot_dimension_numbers<[1], [0], [0], [1], [0, 0, 1, 1], [], []>} : vector<8x8xf32>, vector<8x4xf32>, vector<8x4xf32> -> vector<8x4xf32>
    %129 = arith.addf %125, %128 : vector<8x4xf32>
    %c0_180 = arith.constant 0 : index
    %c0_181 = arith.constant 0 : index
    %c3_182 = arith.constant 3 : index
    %c1_183 = arith.constant 1 : index
    %c0_184 = arith.constant 0 : index
    %130 = vector.load %arg1[%c0_180, %c0_181, %c3_182, %c1_183, %c0_184] : memref<1x1x10x10x8xf32, #tpu.memory_space<vmem>>, vector<1x1x1x8x8xf32>
    %131 = vector.shape_cast %130 : vector<1x1x1x8x8xf32> to vector<8x8xf32>
    %cst_185 = arith.constant dense<0.000000e+00> : vector<8x4xf32>
    %132 = tpu.matmul %131, %10, %cst_185 {dimension_numbers = #tpu.dot_dimension_numbers<[1], [0], [0], [1], [0, 0, 1, 1], [], []>} : vector<8x8xf32>, vector<8x4xf32>, vector<8x4xf32> -> vector<8x4xf32>
    %133 = arith.addf %129, %132 : vector<8x4xf32>
    %c0_186 = arith.constant 0 : index
    %c0_187 = arith.constant 0 : index
    %c3_188 = arith.constant 3 : index
    %c2_189 = arith.constant 2 : index
    %c0_190 = arith.constant 0 : index
    %134 = vector.load %arg1[%c0_186, %c0_187, %c3_188, %c2_189, %c0_190] : memref<1x1x10x10x8xf32, #tpu.memory_space<vmem>>, vector<1x1x1x8x8xf32>
    %135 = vector.shape_cast %134 : vector<1x1x1x8x8xf32> to vector<8x8xf32>
    %cst_191 = arith.constant dense<0.000000e+00> : vector<8x4xf32>
    %136 = tpu.matmul %135, %12, %cst_191 {dimension_numbers = #tpu.dot_dimension_numbers<[1], [0], [0], [1], [0, 0, 1, 1], [], []>} : vector<8x8xf32>, vector<8x4xf32>, vector<8x4xf32> -> vector<8x4xf32>
    %137 = arith.addf %133, %136 : vector<8x4xf32>
    %c0_192 = arith.constant 0 : index
    %c0_193 = arith.constant 0 : index
    %c4 = arith.constant 4 : index
    %c0_194 = arith.constant 0 : index
    %c0_195 = arith.constant 0 : index
    %138 = vector.load %arg1[%c0_192, %c0_193, %c4, %c0_194, %c0_195] : memref<1x1x10x10x8xf32, #tpu.memory_space<vmem>>, vector<1x1x1x8x8xf32>
    %139 = vector.shape_cast %138 : vector<1x1x1x8x8xf32> to vector<8x8xf32>
    %cst_196 = arith.constant dense<0.000000e+00> : vector<8x4xf32>
    %140 = tpu.matmul %139, %14, %cst_196 {dimension_numbers = #tpu.dot_dimension_numbers<[1], [0], [0], [1], [0, 0, 1, 1], [], []>} : vector<8x8xf32>, vector<8x4xf32>, vector<8x4xf32> -> vector<8x4xf32>
    %141 = arith.addf %137, %140 : vector<8x4xf32>
    %c0_197 = arith.constant 0 : index
    %c0_198 = arith.constant 0 : index
    %c4_199 = arith.constant 4 : index
    %c1_200 = arith.constant 1 : index
    %c0_201 = arith.constant 0 : index
    %142 = vector.load %arg1[%c0_197, %c0_198, %c4_199, %c1_200, %c0_201] : memref<1x1x10x10x8xf32, #tpu.memory_space<vmem>>, vector<1x1x1x8x8xf32>
    %143 = vector.shape_cast %142 : vector<1x1x1x8x8xf32> to vector<8x8xf32>
    %cst_202 = arith.constant dense<0.000000e+00> : vector<8x4xf32>
    %144 = tpu.matmul %143, %16, %cst_202 {dimension_numbers = #tpu.dot_dimension_numbers<[1], [0], [0], [1], [0, 0, 1, 1], [], []>} : vector<8x8xf32>, vector<8x4xf32>, vector<8x4xf32> -> vector<8x4xf32>
    %145 = arith.addf %141, %144 : vector<8x4xf32>
    %c0_203 = arith.constant 0 : index
    %c0_204 = arith.constant 0 : index
    %c4_205 = arith.constant 4 : index
    %c2_206 = arith.constant 2 : index
    %c0_207 = arith.constant 0 : index
    %146 = vector.load %arg1[%c0_203, %c0_204, %c4_205, %c2_206, %c0_207] : memref<1x1x10x10x8xf32, #tpu.memory_space<vmem>>, vector<1x1x1x8x8xf32>
    %147 = vector.shape_cast %146 : vector<1x1x1x8x8xf32> to vector<8x8xf32>
    %cst_208 = arith.constant dense<0.000000e+00> : vector<8x4xf32>
    %148 = tpu.matmul %147, %18, %cst_208 {dimension_numbers = #tpu.dot_dimension_numbers<[1], [0], [0], [1], [0, 0, 1, 1], [], []>} : vector<8x8xf32>, vector<8x4xf32>, vector<8x4xf32> -> vector<8x4xf32>
    %149 = arith.addf %145, %148 : vector<8x4xf32>
    %150 = vector.broadcast %0 : vector<1x4xf32> to vector<8x4xf32>
    %151 = arith.addf %149, %150 : vector<8x4xf32>
    %cst_209 = arith.constant 0.000000e+00 : f32
    %152 = vector.broadcast %cst_209 : f32 to vector<8x4xf32>
    %153 = arith.cmpf oge, %151, %152 : vector<8x4xf32>
    %cst_210 = arith.constant 2.000000e-01 : f32
    %154 = vector.broadcast %cst_210 : f32 to vector<8x4xf32>
    %155 = arith.mulf %154, %151 : vector<8x4xf32>
    %156 = arith.select %153, %151, %155 : vector<8x4xi1>, vector<8x4xf32>
    %c0_211 = arith.constant 0 : index
    %c2_212 = arith.constant 2 : index
    %c0_213 = arith.constant 0 : index
    %c0_214 = arith.constant 0 : index
    %157 = vector.load %arg4[%c0_211, %c2_212, %c0_213, %c0_214] : memref<1x8x8x4xf32, #tpu.memory_space<vmem>>, vector<1x1x8x4xf32>
    %158 = vector.shape_cast %157 : vector<1x1x8x4xf32> to vector<8x4xf32>
    %159 = vector.shape_cast %156 : vector<8x4xf32> to vector<1x1x8x4xf32>
    tpu.vector_store %arg4[%c0_211, %c2_212, %c0_213, %c0_214], %159 {strides = array<i32>} : memref<1x8x8x4xf32, #tpu.memory_space<vmem>>, vector<1x1x8x4xf32>,
    %cst_215 = arith.constant 0.000000e+00 : f32
    %160 = vector.broadcast %cst_215 : f32 to vector<8x4xf32>
    %c0_216 = arith.constant 0 : index
    %c0_217 = arith.constant 0 : index
    %c3_218 = arith.constant 3 : index
    %c0_219 = arith.constant 0 : index
    %c0_220 = arith.constant 0 : index
    %161 = vector.load %arg1[%c0_216, %c0_217, %c3_218, %c0_219, %c0_220] : memref<1x1x10x10x8xf32, #tpu.memory_space<vmem>>, vector<1x1x1x8x8xf32>
    %162 = vector.shape_cast %161 : vector<1x1x1x8x8xf32> to vector<8x8xf32>
    %cst_221 = arith.constant dense<0.000000e+00> : vector<8x4xf32>
    %163 = tpu.matmul %162, %2, %cst_221 {dimension_numbers = #tpu.dot_dimension_numbers<[1], [0], [0], [1], [0, 0, 1, 1], [], []>} : vector<8x8xf32>, vector<8x4xf32>, vector<8x4xf32> -> vector<8x4xf32>
    %164 = arith.addf %160, %163 : vector<8x4xf32>
    %c0_222 = arith.constant 0 : index
    %c0_223 = arith.constant 0 : index
    %c3_224 = arith.constant 3 : index
    %c1_225 = arith.constant 1 : index
    %c0_226 = arith.constant 0 : index
    %165 = vector.load %arg1[%c0_222, %c0_223, %c3_224, %c1_225, %c0_226] : memref<1x1x10x10x8xf32, #tpu.memory_space<vmem>>, vector<1x1x1x8x8xf32>
    %166 = vector.shape_cast %165 : vector<1x1x1x8x8xf32> to vector<8x8xf32>
    %cst_227 = arith.constant dense<0.000000e+00> : vector<8x4xf32>
    %167 = tpu.matmul %166, %4, %cst_227 {dimension_numbers = #tpu.dot_dimension_numbers<[1], [0], [0], [1], [0, 0, 1, 1], [], []>} : vector<8x8xf32>, vector<8x4xf32>, vector<8x4xf32> -> vector<8x4xf32>
    %168 = arith.addf %164, %167 : vector<8x4xf32>
    %c0_228 = arith.constant 0 : index
    %c0_229 = arith.constant 0 : index
    %c3_230 = arith.constant 3 : index
    %c2_231 = arith.constant 2 : index
    %c0_232 = arith.constant 0 : index
    %169 = vector.load %arg1[%c0_228, %c0_229, %c3_230, %c2_231, %c0_232] : memref<1x1x10x10x8xf32, #tpu.memory_space<vmem>>, vector<1x1x1x8x8xf32>
    %170 = vector.shape_cast %169 : vector<1x1x1x8x8xf32> to vector<8x8xf32>
    %cst_233 = arith.constant dense<0.000000e+00> : vector<8x4xf32>
    %171 = tpu.matmul %170, %6, %cst_233 {dimension_numbers = #tpu.dot_dimension_numbers<[1], [0], [0], [1], [0, 0, 1, 1], [], []>} : vector<8x8xf32>, vector<8x4xf32>, vector<8x4xf32> -> vector<8x4xf32>
    %172 = arith.addf %168, %171 : vector<8x4xf32>
    %c0_234 = arith.constant 0 : index
    %c0_235 = arith.constant 0 : index
    %c4_236 = arith.constant 4 : index
    %c0_237 = arith.constant 0 : index
    %c0_238 = arith.constant 0 : index
    %173 = vector.load %arg1[%c0_234, %c0_235, %c4_236, %c0_237, %c0_238] : memref<1x1x10x10x8xf32, #tpu.memory_space<vmem>>, vector<1x1x1x8x8xf32>
    %174 = vector.shape_cast %173 : vector<1x1x1x8x8xf32> to vector<8x8xf32>
    %cst_239 = arith.constant dense<0.000000e+00> : vector<8x4xf32>
    %175 = tpu.matmul %174, %8, %cst_239 {dimension_numbers = #tpu.dot_dimension_numbers<[1], [0], [0], [1], [0, 0, 1, 1], [], []>} : vector<8x8xf32>, vector<8x4xf32>, vector<8x4xf32> -> vector<8x4xf32>
    %176 = arith.addf %172, %175 : vector<8x4xf32>
    %c0_240 = arith.constant 0 : index
    %c0_241 = arith.constant 0 : index
    %c4_242 = arith.constant 4 : index
    %c1_243 = arith.constant 1 : index
    %c0_244 = arith.constant 0 : index
    %177 = vector.load %arg1[%c0_240, %c0_241, %c4_242, %c1_243, %c0_244] : memref<1x1x10x10x8xf32, #tpu.memory_space<vmem>>, vector<1x1x1x8x8xf32>
    %178 = vector.shape_cast %177 : vector<1x1x1x8x8xf32> to vector<8x8xf32>
    %cst_245 = arith.constant dense<0.000000e+00> : vector<8x4xf32>
    %179 = tpu.matmul %178, %10, %cst_245 {dimension_numbers = #tpu.dot_dimension_numbers<[1], [0], [0], [1], [0, 0, 1, 1], [], []>} : vector<8x8xf32>, vector<8x4xf32>, vector<8x4xf32> -> vector<8x4xf32>
    %180 = arith.addf %176, %179 : vector<8x4xf32>
    %c0_246 = arith.constant 0 : index
    %c0_247 = arith.constant 0 : index
    %c4_248 = arith.constant 4 : index
    %c2_249 = arith.constant 2 : index
    %c0_250 = arith.constant 0 : index
    %181 = vector.load %arg1[%c0_246, %c0_247, %c4_248, %c2_249, %c0_250] : memref<1x1x10x10x8xf32, #tpu.memory_space<vmem>>, vector<1x1x1x8x8xf32>
    %182 = vector.shape_cast %181 : vector<1x1x1x8x8xf32> to vector<8x8xf32>
    %cst_251 = arith.constant dense<0.000000e+00> : vector<8x4xf32>
    %183 = tpu.matmul %182, %12, %cst_251 {dimension_numbers = #tpu.dot_dimension_numbers<[1], [0], [0], [1], [0, 0, 1, 1], [], []>} : vector<8x8xf32>, vector<8x4xf32>, vector<8x4xf32> -> vector<8x4xf32>
    %184 = arith.addf %180, %183 : vector<8x4xf32>
    %c0_252 = arith.constant 0 : index
    %c0_253 = arith.constant 0 : index
    %c5 = arith.constant 5 : index
    %c0_254 = arith.constant 0 : index
    %c0_255 = arith.constant 0 : index
    %185 = vector.load %arg1[%c0_252, %c0_253, %c5, %c0_254, %c0_255] : memref<1x1x10x10x8xf32, #tpu.memory_space<vmem>>, vector<1x1x1x8x8xf32>
    %186 = vector.shape_cast %185 : vector<1x1x1x8x8xf32> to vector<8x8xf32>
    %cst_256 = arith.constant dense<0.000000e+00> : vector<8x4xf32>
    %187 = tpu.matmul %186, %14, %cst_256 {dimension_numbers = #tpu.dot_dimension_numbers<[1], [0], [0], [1], [0, 0, 1, 1], [], []>} : vector<8x8xf32>, vector<8x4xf32>, vector<8x4xf32> -> vector<8x4xf32>
    %188 = arith.addf %184, %187 : vector<8x4xf32>
    %c0_257 = arith.constant 0 : index
    %c0_258 = arith.constant 0 : index
    %c5_259 = arith.constant 5 : index
    %c1_260 = arith.constant 1 : index
    %c0_261 = arith.constant 0 : index
    %189 = vector.load %arg1[%c0_257, %c0_258, %c5_259, %c1_260, %c0_261] : memref<1x1x10x10x8xf32, #tpu.memory_space<vmem>>, vector<1x1x1x8x8xf32>
    %190 = vector.shape_cast %189 : vector<1x1x1x8x8xf32> to vector<8x8xf32>
    %cst_262 = arith.constant dense<0.000000e+00> : vector<8x4xf32>
    %191 = tpu.matmul %190, %16, %cst_262 {dimension_numbers = #tpu.dot_dimension_numbers<[1], [0], [0], [1], [0, 0, 1, 1], [], []>} : vector<8x8xf32>, vector<8x4xf32>, vector<8x4xf32> -> vector<8x4xf32>
    %192 = arith.addf %188, %191 : vector<8x4xf32>
    %c0_263 = arith.constant 0 : index
    %c0_264 = arith.constant 0 : index
    %c5_265 = arith.constant 5 : index
    %c2_266 = arith.constant 2 : index
    %c0_267 = arith.constant 0 : index
    %193 = vector.load %arg1[%c0_263, %c0_264, %c5_265, %c2_266, %c0_267] : memref<1x1x10x10x8xf32, #tpu.memory_space<vmem>>, vector<1x1x1x8x8xf32>
    %194 = vector.shape_cast %193 : vector<1x1x1x8x8xf32> to vector<8x8xf32>
    %cst_268 = arith.constant dense<0.000000e+00> : vector<8x4xf32>
    %195 = tpu.matmul %194, %18, %cst_268 {dimension_numbers = #tpu.dot_dimension_numbers<[1], [0], [0], [1], [0, 0, 1, 1], [], []>} : vector<8x8xf32>, vector<8x4xf32>, vector<8x4xf32> -> vector<8x4xf32>
    %196 = arith.addf %192, %195 : vector<8x4xf32>
    %197 = vector.broadcast %0 : vector<1x4xf32> to vector<8x4xf32>
    %198 = arith.addf %196, %197 : vector<8x4xf32>
    %cst_269 = arith.constant 0.000000e+00 : f32
    %199 = vector.broadcast %cst_269 : f32 to vector<8x4xf32>
    %200 = arith.cmpf oge, %198, %199 : vector<8x4xf32>
    %cst_270 = arith.constant 2.000000e-01 : f32
    %201 = vector.broadcast %cst_270 : f32 to vector<8x4xf32>
    %202 = arith.mulf %201, %198 : vector<8x4xf32>
    %203 = arith.select %200, %198, %202 : vector<8x4xi1>, vector<8x4xf32>
    %c0_271 = arith.constant 0 : index
    %c3_272 = arith.constant 3 : index
    %c0_273 = arith.constant 0 : index
    %c0_274 = arith.constant 0 : index
    %204 = vector.load %arg4[%c0_271, %c3_272, %c0_273, %c0_274] : memref<1x8x8x4xf32, #tpu.memory_space<vmem>>, vector<1x1x8x4xf32>
    %205 = vector.shape_cast %204 : vector<1x1x8x4xf32> to vector<8x4xf32>
    %206 = vector.shape_cast %203 : vector<8x4xf32> to vector<1x1x8x4xf32>
    tpu.vector_store %arg4[%c0_271, %c3_272, %c0_273, %c0_274], %206 {strides = array<i32>} : memref<1x8x8x4xf32, #tpu.memory_space<vmem>>, vector<1x1x8x4xf32>,
    %cst_275 = arith.constant 0.000000e+00 : f32
    %207 = vector.broadcast %cst_275 : f32 to vector<8x4xf32>
    %c0_276 = arith.constant 0 : index
    %c0_277 = arith.constant 0 : index
    %c4_278 = arith.constant 4 : index
    %c0_279 = arith.constant 0 : index
    %c0_280 = arith.constant 0 : index
    %208 = vector.load %arg1[%c0_276, %c0_277, %c4_278, %c0_279, %c0_280] : memref<1x1x10x10x8xf32, #tpu.memory_space<vmem>>, vector<1x1x1x8x8xf32>
    %209 = vector.shape_cast %208 : vector<1x1x1x8x8xf32> to vector<8x8xf32>
    %cst_281 = arith.constant dense<0.000000e+00> : vector<8x4xf32>
    %210 = tpu.matmul %209, %2, %cst_281 {dimension_numbers = #tpu.dot_dimension_numbers<[1], [0], [0], [1], [0, 0, 1, 1], [], []>} : vector<8x8xf32>, vector<8x4xf32>, vector<8x4xf32> -> vector<8x4xf32>
    %211 = arith.addf %207, %210 : vector<8x4xf32>
    %c0_282 = arith.constant 0 : index
    %c0_283 = arith.constant 0 : index
    %c4_284 = arith.constant 4 : index
    %c1_285 = arith.constant 1 : index
    %c0_286 = arith.constant 0 : index
    %212 = vector.load %arg1[%c0_282, %c0_283, %c4_284, %c1_285, %c0_286] : memref<1x1x10x10x8xf32, #tpu.memory_space<vmem>>, vector<1x1x1x8x8xf32>
    %213 = vector.shape_cast %212 : vector<1x1x1x8x8xf32> to vector<8x8xf32>
    %cst_287 = arith.constant dense<0.000000e+00> : vector<8x4xf32>
    %214 = tpu.matmul %213, %4, %cst_287 {dimension_numbers = #tpu.dot_dimension_numbers<[1], [0], [0], [1], [0, 0, 1, 1], [], []>} : vector<8x8xf32>, vector<8x4xf32>, vector<8x4xf32> -> vector<8x4xf32>
    %215 = arith.addf %211, %214 : vector<8x4xf32>
    %c0_288 = arith.constant 0 : index
    %c0_289 = arith.constant 0 : index
    %c4_290 = arith.constant 4 : index
    %c2_291 = arith.constant 2 : index
    %c0_292 = arith.constant 0 : index
    %216 = vector.load %arg1[%c0_288, %c0_289, %c4_290, %c2_291, %c0_292] : memref<1x1x10x10x8xf32, #tpu.memory_space<vmem>>, vector<1x1x1x8x8xf32>
    %217 = vector.shape_cast %216 : vector<1x1x1x8x8xf32> to vector<8x8xf32>
    %cst_293 = arith.constant dense<0.000000e+00> : vector<8x4xf32>
    %218 = tpu.matmul %217, %6, %cst_293 {dimension_numbers = #tpu.dot_dimension_numbers<[1], [0], [0], [1], [0, 0, 1, 1], [], []>} : vector<8x8xf32>, vector<8x4xf32>, vector<8x4xf32> -> vector<8x4xf32>
    %219 = arith.addf %215, %218 : vector<8x4xf32>
    %c0_294 = arith.constant 0 : index
    %c0_295 = arith.constant 0 : index
    %c5_296 = arith.constant 5 : index
    %c0_297 = arith.constant 0 : index
    %c0_298 = arith.constant 0 : index
    %220 = vector.load %arg1[%c0_294, %c0_295, %c5_296, %c0_297, %c0_298] : memref<1x1x10x10x8xf32, #tpu.memory_space<vmem>>, vector<1x1x1x8x8xf32>
    %221 = vector.shape_cast %220 : vector<1x1x1x8x8xf32> to vector<8x8xf32>
    %cst_299 = arith.constant dense<0.000000e+00> : vector<8x4xf32>
    %222 = tpu.matmul %221, %8, %cst_299 {dimension_numbers = #tpu.dot_dimension_numbers<[1], [0], [0], [1], [0, 0, 1, 1], [], []>} : vector<8x8xf32>, vector<8x4xf32>, vector<8x4xf32> -> vector<8x4xf32>
    %223 = arith.addf %219, %222 : vector<8x4xf32>
    %c0_300 = arith.constant 0 : index
    %c0_301 = arith.constant 0 : index
    %c5_302 = arith.constant 5 : index
    %c1_303 = arith.constant 1 : index
    %c0_304 = arith.constant 0 : index
    %224 = vector.load %arg1[%c0_300, %c0_301, %c5_302, %c1_303, %c0_304] : memref<1x1x10x10x8xf32, #tpu.memory_space<vmem>>, vector<1x1x1x8x8xf32>
    %225 = vector.shape_cast %224 : vector<1x1x1x8x8xf32> to vector<8x8xf32>
    %cst_305 = arith.constant dense<0.000000e+00> : vector<8x4xf32>
    %226 = tpu.matmul %225, %10, %cst_305 {dimension_numbers = #tpu.dot_dimension_numbers<[1], [0], [0], [1], [0, 0, 1, 1], [], []>} : vector<8x8xf32>, vector<8x4xf32>, vector<8x4xf32> -> vector<8x4xf32>
    %227 = arith.addf %223, %226 : vector<8x4xf32>
    %c0_306 = arith.constant 0 : index
    %c0_307 = arith.constant 0 : index
    %c5_308 = arith.constant 5 : index
    %c2_309 = arith.constant 2 : index
    %c0_310 = arith.constant 0 : index
    %228 = vector.load %arg1[%c0_306, %c0_307, %c5_308, %c2_309, %c0_310] : memref<1x1x10x10x8xf32, #tpu.memory_space<vmem>>, vector<1x1x1x8x8xf32>
    %229 = vector.shape_cast %228 : vector<1x1x1x8x8xf32> to vector<8x8xf32>
    %cst_311 = arith.constant dense<0.000000e+00> : vector<8x4xf32>
    %230 = tpu.matmul %229, %12, %cst_311 {dimension_numbers = #tpu.dot_dimension_numbers<[1], [0], [0], [1], [0, 0, 1, 1], [], []>} : vector<8x8xf32>, vector<8x4xf32>, vector<8x4xf32> -> vector<8x4xf32>
    %231 = arith.addf %227, %230 : vector<8x4xf32>
    %c0_312 = arith.constant 0 : index
    %c0_313 = arith.constant 0 : index
    %c6 = arith.constant 6 : index
    %c0_314 = arith.constant 0 : index
    %c0_315 = arith.constant 0 : index
    %232 = vector.load %arg1[%c0_312, %c0_313, %c6, %c0_314, %c0_315] : memref<1x1x10x10x8xf32, #tpu.memory_space<vmem>>, vector<1x1x1x8x8xf32>
    %233 = vector.shape_cast %232 : vector<1x1x1x8x8xf32> to vector<8x8xf32>
    %cst_316 = arith.constant dense<0.000000e+00> : vector<8x4xf32>
    %234 = tpu.matmul %233, %14, %cst_316 {dimension_numbers = #tpu.dot_dimension_numbers<[1], [0], [0], [1], [0, 0, 1, 1], [], []>} : vector<8x8xf32>, vector<8x4xf32>, vector<8x4xf32> -> vector<8x4xf32>
    %235 = arith.addf %231, %234 : vector<8x4xf32>
    %c0_317 = arith.constant 0 : index
    %c0_318 = arith.constant 0 : index
    %c6_319 = arith.constant 6 : index
    %c1_320 = arith.constant 1 : index
    %c0_321 = arith.constant 0 : index
    %236 = vector.load %arg1[%c0_317, %c0_318, %c6_319, %c1_320, %c0_321] : memref<1x1x10x10x8xf32, #tpu.memory_space<vmem>>, vector<1x1x1x8x8xf32>
    %237 = vector.shape_cast %236 : vector<1x1x1x8x8xf32> to vector<8x8xf32>
    %cst_322 = arith.constant dense<0.000000e+00> : vector<8x4xf32>
    %238 = tpu.matmul %237, %16, %cst_322 {dimension_numbers = #tpu.dot_dimension_numbers<[1], [0], [0], [1], [0, 0, 1, 1], [], []>} : vector<8x8xf32>, vector<8x4xf32>, vector<8x4xf32> -> vector<8x4xf32>
    %239 = arith.addf %235, %238 : vector<8x4xf32>
    %c0_323 = arith.constant 0 : index
    %c0_324 = arith.constant 0 : index
    %c6_325 = arith.constant 6 : index
    %c2_326 = arith.constant 2 : index
    %c0_327 = arith.constant 0 : index
    %240 = vector.load %arg1[%c0_323, %c0_324, %c6_325, %c2_326, %c0_327] : memref<1x1x10x10x8xf32, #tpu.memory_space<vmem>>, vector<1x1x1x8x8xf32>
    %241 = vector.shape_cast %240 : vector<1x1x1x8x8xf32> to vector<8x8xf32>
    %cst_328 = arith.constant dense<0.000000e+00> : vector<8x4xf32>
    %242 = tpu.matmul %241, %18, %cst_328 {dimension_numbers = #tpu.dot_dimension_numbers<[1], [0], [0], [1], [0, 0, 1, 1], [], []>} : vector<8x8xf32>, vector<8x4xf32>, vector<8x4xf32> -> vector<8x4xf32>
    %243 = arith.addf %239, %242 : vector<8x4xf32>
    %244 = vector.broadcast %0 : vector<1x4xf32> to vector<8x4xf32>
    %245 = arith.addf %243, %244 : vector<8x4xf32>
    %cst_329 = arith.constant 0.000000e+00 : f32
    %246 = vector.broadcast %cst_329 : f32 to vector<8x4xf32>
    %247 = arith.cmpf oge, %245, %246 : vector<8x4xf32>
    %cst_330 = arith.constant 2.000000e-01 : f32
    %248 = vector.broadcast %cst_330 : f32 to vector<8x4xf32>
    %249 = arith.mulf %248, %245 : vector<8x4xf32>
    %250 = arith.select %247, %245, %249 : vector<8x4xi1>, vector<8x4xf32>
    %c0_331 = arith.constant 0 : index
    %c4_332 = arith.constant 4 : index
    %c0_333 = arith.constant 0 : index
    %c0_334 = arith.constant 0 : index
    %251 = vector.load %arg4[%c0_331, %c4_332, %c0_333, %c0_334] : memref<1x8x8x4xf32, #tpu.memory_space<vmem>>, vector<1x1x8x4xf32>
    %252 = vector.shape_cast %251 : vector<1x1x8x4xf32> to vector<8x4xf32>
    %253 = vector.shape_cast %250 : vector<8x4xf32> to vector<1x1x8x4xf32>
    tpu.vector_store %arg4[%c0_331, %c4_332, %c0_333, %c0_334], %253 {strides = array<i32>} : memref<1x8x8x4xf32, #tpu.memory_space<vmem>>, vector<1x1x8x4xf32>,
    %cst_335 = arith.constant 0.000000e+00 : f32
    %254 = vector.broadcast %cst_335 : f32 to vector<8x4xf32>
    %c0_336 = arith.constant 0 : index
    %c0_337 = arith.constant 0 : index
    %c5_338 = arith.constant 5 : index
    %c0_339 = arith.constant 0 : index
    %c0_340 = arith.constant 0 : index
    %255 = vector.load %arg1[%c0_336, %c0_337, %c5_338, %c0_339, %c0_340] : memref<1x1x10x10x8xf32, #tpu.memory_space<vmem>>, vector<1x1x1x8x8xf32>
    %256 = vector.shape_cast %255 : vector<1x1x1x8x8xf32> to vector<8x8xf32>
    %cst_341 = arith.constant dense<0.000000e+00> : vector<8x4xf32>
    %257 = tpu.matmul %256, %2, %cst_341 {dimension_numbers = #tpu.dot_dimension_numbers<[1], [0], [0], [1], [0, 0, 1, 1], [], []>} : vector<8x8xf32>, vector<8x4xf32>, vector<8x4xf32> -> vector<8x4xf32>
    %258 = arith.addf %254, %257 : vector<8x4xf32>
    %c0_342 = arith.constant 0 : index
    %c0_343 = arith.constant 0 : index
    %c5_344 = arith.constant 5 : index
    %c1_345 = arith.constant 1 : index
    %c0_346 = arith.constant 0 : index
    %259 = vector.load %arg1[%c0_342, %c0_343, %c5_344, %c1_345, %c0_346] : memref<1x1x10x10x8xf32, #tpu.memory_space<vmem>>, vector<1x1x1x8x8xf32>
    %260 = vector.shape_cast %259 : vector<1x1x1x8x8xf32> to vector<8x8xf32>
    %cst_347 = arith.constant dense<0.000000e+00> : vector<8x4xf32>
    %261 = tpu.matmul %260, %4, %cst_347 {dimension_numbers = #tpu.dot_dimension_numbers<[1], [0], [0], [1], [0, 0, 1, 1], [], []>} : vector<8x8xf32>, vector<8x4xf32>, vector<8x4xf32> -> vector<8x4xf32>
    %262 = arith.addf %258, %261 : vector<8x4xf32>
    %c0_348 = arith.constant 0 : index
    %c0_349 = arith.constant 0 : index
    %c5_350 = arith.constant 5 : index
    %c2_351 = arith.constant 2 : index
    %c0_352 = arith.constant 0 : index
    %263 = vector.load %arg1[%c0_348, %c0_349, %c5_350, %c2_351, %c0_352] : memref<1x1x10x10x8xf32, #tpu.memory_space<vmem>>, vector<1x1x1x8x8xf32>
    %264 = vector.shape_cast %263 : vector<1x1x1x8x8xf32> to vector<8x8xf32>
    %cst_353 = arith.constant dense<0.000000e+00> : vector<8x4xf32>
    %265 = tpu.matmul %264, %6, %cst_353 {dimension_numbers = #tpu.dot_dimension_numbers<[1], [0], [0], [1], [0, 0, 1, 1], [], []>} : vector<8x8xf32>, vector<8x4xf32>, vector<8x4xf32> -> vector<8x4xf32>
    %266 = arith.addf %262, %265 : vector<8x4xf32>
    %c0_354 = arith.constant 0 : index
    %c0_355 = arith.constant 0 : index
    %c6_356 = arith.constant 6 : index
    %c0_357 = arith.constant 0 : index
    %c0_358 = arith.constant 0 : index
    %267 = vector.load %arg1[%c0_354, %c0_355, %c6_356, %c0_357, %c0_358] : memref<1x1x10x10x8xf32, #tpu.memory_space<vmem>>, vector<1x1x1x8x8xf32>
    %268 = vector.shape_cast %267 : vector<1x1x1x8x8xf32> to vector<8x8xf32>
    %cst_359 = arith.constant dense<0.000000e+00> : vector<8x4xf32>
    %269 = tpu.matmul %268, %8, %cst_359 {dimension_numbers = #tpu.dot_dimension_numbers<[1], [0], [0], [1], [0, 0, 1, 1], [], []>} : vector<8x8xf32>, vector<8x4xf32>, vector<8x4xf32> -> vector<8x4xf32>
    %270 = arith.addf %266, %269 : vector<8x4xf32>
    %c0_360 = arith.constant 0 : index
    %c0_361 = arith.constant 0 : index
    %c6_362 = arith.constant 6 : index
    %c1_363 = arith.constant 1 : index
    %c0_364 = arith.constant 0 : index
    %271 = vector.load %arg1[%c0_360, %c0_361, %c6_362, %c1_363, %c0_364] : memref<1x1x10x10x8xf32, #tpu.memory_space<vmem>>, vector<1x1x1x8x8xf32>
    %272 = vector.shape_cast %271 : vector<1x1x1x8x8xf32> to vector<8x8xf32>
    %cst_365 = arith.constant dense<0.000000e+00> : vector<8x4xf32>
    %273 = tpu.matmul %272, %10, %cst_365 {dimension_numbers = #tpu.dot_dimension_numbers<[1], [0], [0], [1], [0, 0, 1, 1], [], []>} : vector<8x8xf32>, vector<8x4xf32>, vector<8x4xf32> -> vector<8x4xf32>
    %274 = arith.addf %270, %273 : vector<8x4xf32>
    %c0_366 = arith.constant 0 : index
    %c0_367 = arith.constant 0 : index
    %c6_368 = arith.constant 6 : index
    %c2_369 = arith.constant 2 : index
    %c0_370 = arith.constant 0 : index
    %275 = vector.load %arg1[%c0_366, %c0_367, %c6_368, %c2_369, %c0_370] : memref<1x1x10x10x8xf32, #tpu.memory_space<vmem>>, vector<1x1x1x8x8xf32>
    %276 = vector.shape_cast %275 : vector<1x1x1x8x8xf32> to vector<8x8xf32>
    %cst_371 = arith.constant dense<0.000000e+00> : vector<8x4xf32>
    %277 = tpu.matmul %276, %12, %cst_371 {dimension_numbers = #tpu.dot_dimension_numbers<[1], [0], [0], [1], [0, 0, 1, 1], [], []>} : vector<8x8xf32>, vector<8x4xf32>, vector<8x4xf32> -> vector<8x4xf32>
    %278 = arith.addf %274, %277 : vector<8x4xf32>
    %c0_372 = arith.constant 0 : index
    %c0_373 = arith.constant 0 : index
    %c7 = arith.constant 7 : index
    %c0_374 = arith.constant 0 : index
    %c0_375 = arith.constant 0 : index
    %279 = vector.load %arg1[%c0_372, %c0_373, %c7, %c0_374, %c0_375] : memref<1x1x10x10x8xf32, #tpu.memory_space<vmem>>, vector<1x1x1x8x8xf32>
    %280 = vector.shape_cast %279 : vector<1x1x1x8x8xf32> to vector<8x8xf32>
    %cst_376 = arith.constant dense<0.000000e+00> : vector<8x4xf32>
    %281 = tpu.matmul %280, %14, %cst_376 {dimension_numbers = #tpu.dot_dimension_numbers<[1], [0], [0], [1], [0, 0, 1, 1], [], []>} : vector<8x8xf32>, vector<8x4xf32>, vector<8x4xf32> -> vector<8x4xf32>
    %282 = arith.addf %278, %281 : vector<8x4xf32>
    %c0_377 = arith.constant 0 : index
    %c0_378 = arith.constant 0 : index
    %c7_379 = arith.constant 7 : index
    %c1_380 = arith.constant 1 : index
    %c0_381 = arith.constant 0 : index
    %283 = vector.load %arg1[%c0_377, %c0_378, %c7_379, %c1_380, %c0_381] : memref<1x1x10x10x8xf32, #tpu.memory_space<vmem>>, vector<1x1x1x8x8xf32>
    %284 = vector.shape_cast %283 : vector<1x1x1x8x8xf32> to vector<8x8xf32>
    %cst_382 = arith.constant dense<0.000000e+00> : vector<8x4xf32>
    %285 = tpu.matmul %284, %16, %cst_382 {dimension_numbers = #tpu.dot_dimension_numbers<[1], [0], [0], [1], [0, 0, 1, 1], [], []>} : vector<8x8xf32>, vector<8x4xf32>, vector<8x4xf32> -> vector<8x4xf32>
    %286 = arith.addf %282, %285 : vector<8x4xf32>
    %c0_383 = arith.constant 0 : index
    %c0_384 = arith.constant 0 : index
    %c7_385 = arith.constant 7 : index
    %c2_386 = arith.constant 2 : index
    %c0_387 = arith.constant 0 : index
    %287 = vector.load %arg1[%c0_383, %c0_384, %c7_385, %c2_386, %c0_387] : memref<1x1x10x10x8xf32, #tpu.memory_space<vmem>>, vector<1x1x1x8x8xf32>
    %288 = vector.shape_cast %287 : vector<1x1x1x8x8xf32> to vector<8x8xf32>
    %cst_388 = arith.constant dense<0.000000e+00> : vector<8x4xf32>
    %289 = tpu.matmul %288, %18, %cst_388 {dimension_numbers = #tpu.dot_dimension_numbers<[1], [0], [0], [1], [0, 0, 1, 1], [], []>} : vector<8x8xf32>, vector<8x4xf32>, vector<8x4xf32> -> vector<8x4xf32>
    %290 = arith.addf %286, %289 : vector<8x4xf32>
    %291 = vector.broadcast %0 : vector<1x4xf32> to vector<8x4xf32>
    %292 = arith.addf %290, %291 : vector<8x4xf32>
    %cst_389 = arith.constant 0.000000e+00 : f32
    %293 = vector.broadcast %cst_389 : f32 to vector<8x4xf32>
    %294 = arith.cmpf oge, %292, %293 : vector<8x4xf32>
    %cst_390 = arith.constant 2.000000e-01 : f32
    %295 = vector.broadcast %cst_390 : f32 to vector<8x4xf32>
    %296 = arith.mulf %295, %292 : vector<8x4xf32>
    %297 = arith.select %294, %292, %296 : vector<8x4xi1>, vector<8x4xf32>
    %c0_391 = arith.constant 0 : index
    %c5_392 = arith.constant 5 : index
    %c0_393 = arith.constant 0 : index
    %c0_394 = arith.constant 0 : index
    %298 = vector.load %arg4[%c0_391, %c5_392, %c0_393, %c0_394] : memref<1x8x8x4xf32, #tpu.memory_space<vmem>>, vector<1x1x8x4xf32>
    %299 = vector.shape_cast %298 : vector<1x1x8x4xf32> to vector<8x4xf32>
    %300 = vector.shape_cast %297 : vector<8x4xf32> to vector<1x1x8x4xf32>
    tpu.vector_store %arg4[%c0_391, %c5_392, %c0_393, %c0_394], %300 {strides = array<i32>} : memref<1x8x8x4xf32, #tpu.memory_space<vmem>>, vector<1x1x8x4xf32>,
    %cst_395 = arith.constant 0.000000e+00 : f32
    %301 = vector.broadcast %cst_395 : f32 to vector<8x4xf32>
    %c0_396 = arith.constant 0 : index
    %c0_397 = arith.constant 0 : index
    %c6_398 = arith.constant 6 : index
    %c0_399 = arith.constant 0 : index
    %c0_400 = arith.constant 0 : index
    %302 = vector.load %arg1[%c0_396, %c0_397, %c6_398, %c0_399, %c0_400] : memref<1x1x10x10x8xf32, #tpu.memory_space<vmem>>, vector<1x1x1x8x8xf32>
    %303 = vector.shape_cast %302 : vector<1x1x1x8x8xf32> to vector<8x8xf32>
    %cst_401 = arith.constant dense<0.000000e+00> : vector<8x4xf32>
    %304 = tpu.matmul %303, %2, %cst_401 {dimension_numbers = #tpu.dot_dimension_numbers<[1], [0], [0], [1], [0, 0, 1, 1], [], []>} : vector<8x8xf32>, vector<8x4xf32>, vector<8x4xf32> -> vector<8x4xf32>
    %305 = arith.addf %301, %304 : vector<8x4xf32>
    %c0_402 = arith.constant 0 : index
    %c0_403 = arith.constant 0 : index
    %c6_404 = arith.constant 6 : index
    %c1_405 = arith.constant 1 : index
    %c0_406 = arith.constant 0 : index
    %306 = vector.load %arg1[%c0_402, %c0_403, %c6_404, %c1_405, %c0_406] : memref<1x1x10x10x8xf32, #tpu.memory_space<vmem>>, vector<1x1x1x8x8xf32>
    %307 = vector.shape_cast %306 : vector<1x1x1x8x8xf32> to vector<8x8xf32>
    %cst_407 = arith.constant dense<0.000000e+00> : vector<8x4xf32>
    %308 = tpu.matmul %307, %4, %cst_407 {dimension_numbers = #tpu.dot_dimension_numbers<[1], [0], [0], [1], [0, 0, 1, 1], [], []>} : vector<8x8xf32>, vector<8x4xf32>, vector<8x4xf32> -> vector<8x4xf32>
    %309 = arith.addf %305, %308 : vector<8x4xf32>
    %c0_408 = arith.constant 0 : index
    %c0_409 = arith.constant 0 : index
    %c6_410 = arith.constant 6 : index
    %c2_411 = arith.constant 2 : index
    %c0_412 = arith.constant 0 : index
    %310 = vector.load %arg1[%c0_408, %c0_409, %c6_410, %c2_411, %c0_412] : memref<1x1x10x10x8xf32, #tpu.memory_space<vmem>>, vector<1x1x1x8x8xf32>
    %311 = vector.shape_cast %310 : vector<1x1x1x8x8xf32> to vector<8x8xf32>
    %cst_413 = arith.constant dense<0.000000e+00> : vector<8x4xf32>
    %312 = tpu.matmul %311, %6, %cst_413 {dimension_numbers = #tpu.dot_dimension_numbers<[1], [0], [0], [1], [0, 0, 1, 1], [], []>} : vector<8x8xf32>, vector<8x4xf32>, vector<8x4xf32> -> vector<8x4xf32>
    %313 = arith.addf %309, %312 : vector<8x4xf32>
    %c0_414 = arith.constant 0 : index
    %c0_415 = arith.constant 0 : index
    %c7_416 = arith.constant 7 : index
    %c0_417 = arith.constant 0 : index
    %c0_418 = arith.constant 0 : index
    %314 = vector.load %arg1[%c0_414, %c0_415, %c7_416, %c0_417, %c0_418] : memref<1x1x10x10x8xf32, #tpu.memory_space<vmem>>, vector<1x1x1x8x8xf32>
    %315 = vector.shape_cast %314 : vector<1x1x1x8x8xf32> to vector<8x8xf32>
    %cst_419 = arith.constant dense<0.000000e+00> : vector<8x4xf32>
    %316 = tpu.matmul %315, %8, %cst_419 {dimension_numbers = #tpu.dot_dimension_numbers<[1], [0], [0], [1], [0, 0, 1, 1], [], []>} : vector<8x8xf32>, vector<8x4xf32>, vector<8x4xf32> -> vector<8x4xf32>
    %317 = arith.addf %313, %316 : vector<8x4xf32>
    %c0_420 = arith.constant 0 : index
    %c0_421 = arith.constant 0 : index
    %c7_422 = arith.constant 7 : index
    %c1_423 = arith.constant 1 : index
    %c0_424 = arith.constant 0 : index
    %318 = vector.load %arg1[%c0_420, %c0_421, %c7_422, %c1_423, %c0_424] : memref<1x1x10x10x8xf32, #tpu.memory_space<vmem>>, vector<1x1x1x8x8xf32>
    %319 = vector.shape_cast %318 : vector<1x1x1x8x8xf32> to vector<8x8xf32>
    %cst_425 = arith.constant dense<0.000000e+00> : vector<8x4xf32>
    %320 = tpu.matmul %319, %10, %cst_425 {dimension_numbers = #tpu.dot_dimension_numbers<[1], [0], [0], [1], [0, 0, 1, 1], [], []>} : vector<8x8xf32>, vector<8x4xf32>, vector<8x4xf32> -> vector<8x4xf32>
    %321 = arith.addf %317, %320 : vector<8x4xf32>
    %c0_426 = arith.constant 0 : index
    %c0_427 = arith.constant 0 : index
    %c7_428 = arith.constant 7 : index
    %c2_429 = arith.constant 2 : index
    %c0_430 = arith.constant 0 : index
    %322 = vector.load %arg1[%c0_426, %c0_427, %c7_428, %c2_429, %c0_430] : memref<1x1x10x10x8xf32, #tpu.memory_space<vmem>>, vector<1x1x1x8x8xf32>
    %323 = vector.shape_cast %322 : vector<1x1x1x8x8xf32> to vector<8x8xf32>
    %cst_431 = arith.constant dense<0.000000e+00> : vector<8x4xf32>
    %324 = tpu.matmul %323, %12, %cst_431 {dimension_numbers = #tpu.dot_dimension_numbers<[1], [0], [0], [1], [0, 0, 1, 1], [], []>} : vector<8x8xf32>, vector<8x4xf32>, vector<8x4xf32> -> vector<8x4xf32>
    %325 = arith.addf %321, %324 : vector<8x4xf32>
    %c0_432 = arith.constant 0 : index
    %c0_433 = arith.constant 0 : index
    %c8 = arith.constant 8 : index
    %c0_434 = arith.constant 0 : index
    %c0_435 = arith.constant 0 : index
    %326 = vector.load %arg1[%c0_432, %c0_433, %c8, %c0_434, %c0_435] : memref<1x1x10x10x8xf32, #tpu.memory_space<vmem>>, vector<1x1x1x8x8xf32>
    %327 = vector.shape_cast %326 : vector<1x1x1x8x8xf32> to vector<8x8xf32>
    %cst_436 = arith.constant dense<0.000000e+00> : vector<8x4xf32>
    %328 = tpu.matmul %327, %14, %cst_436 {dimension_numbers = #tpu.dot_dimension_numbers<[1], [0], [0], [1], [0, 0, 1, 1], [], []>} : vector<8x8xf32>, vector<8x4xf32>, vector<8x4xf32> -> vector<8x4xf32>
    %329 = arith.addf %325, %328 : vector<8x4xf32>
    %c0_437 = arith.constant 0 : index
    %c0_438 = arith.constant 0 : index
    %c8_439 = arith.constant 8 : index
    %c1_440 = arith.constant 1 : index
    %c0_441 = arith.constant 0 : index
    %330 = vector.load %arg1[%c0_437, %c0_438, %c8_439, %c1_440, %c0_441] : memref<1x1x10x10x8xf32, #tpu.memory_space<vmem>>, vector<1x1x1x8x8xf32>
    %331 = vector.shape_cast %330 : vector<1x1x1x8x8xf32> to vector<8x8xf32>
    %cst_442 = arith.constant dense<0.000000e+00> : vector<8x4xf32>
    %332 = tpu.matmul %331, %16, %cst_442 {dimension_numbers = #tpu.dot_dimension_numbers<[1], [0], [0], [1], [0, 0, 1, 1], [], []>} : vector<8x8xf32>, vector<8x4xf32>, vector<8x4xf32> -> vector<8x4xf32>
    %333 = arith.addf %329, %332 : vector<8x4xf32>
    %c0_443 = arith.constant 0 : index
    %c0_444 = arith.constant 0 : index
    %c8_445 = arith.constant 8 : index
    %c2_446 = arith.constant 2 : index
    %c0_447 = arith.constant 0 : index
    %334 = vector.load %arg1[%c0_443, %c0_444, %c8_445, %c2_446, %c0_447] : memref<1x1x10x10x8xf32, #tpu.memory_space<vmem>>, vector<1x1x1x8x8xf32>
    %335 = vector.shape_cast %334 : vector<1x1x1x8x8xf32> to vector<8x8xf32>
    %cst_448 = arith.constant dense<0.000000e+00> : vector<8x4xf32>
    %336 = tpu.matmul %335, %18, %cst_448 {dimension_numbers = #tpu.dot_dimension_numbers<[1], [0], [0], [1], [0, 0, 1, 1], [], []>} : vector<8x8xf32>, vector<8x4xf32>, vector<8x4xf32> -> vector<8x4xf32>
    %337 = arith.addf %333, %336 : vector<8x4xf32>
    %338 = vector.broadcast %0 : vector<1x4xf32> to vector<8x4xf32>
    %339 = arith.addf %337, %338 : vector<8x4xf32>
    %cst_449 = arith.constant 0.000000e+00 : f32
    %340 = vector.broadcast %cst_449 : f32 to vector<8x4xf32>
    %341 = arith.cmpf oge, %339, %340 : vector<8x4xf32>
    %cst_450 = arith.constant 2.000000e-01 : f32
    %342 = vector.broadcast %cst_450 : f32 to vector<8x4xf32>
    %343 = arith.mulf %342, %339 : vector<8x4xf32>
    %344 = arith.select %341, %339, %343 : vector<8x4xi1>, vector<8x4xf32>
    %c0_451 = arith.constant 0 : index
    %c6_452 = arith.constant 6 : index
    %c0_453 = arith.constant 0 : index
    %c0_454 = arith.constant 0 : index
    %345 = vector.load %arg4[%c0_451, %c6_452, %c0_453, %c0_454] : memref<1x8x8x4xf32, #tpu.memory_space<vmem>>, vector<1x1x8x4xf32>
    %346 = vector.shape_cast %345 : vector<1x1x8x4xf32> to vector<8x4xf32>
    %347 = vector.shape_cast %344 : vector<8x4xf32> to vector<1x1x8x4xf32>
    tpu.vector_store %arg4[%c0_451, %c6_452, %c0_453, %c0_454], %347 {strides = array<i32>} : memref<1x8x8x4xf32, #tpu.memory_space<vmem>>, vector<1x1x8x4xf32>,
    %cst_455 = arith.constant 0.000000e+00 : f32
    %348 = vector.broadcast %cst_455 : f32 to vector<8x4xf32>
    %c0_456 = arith.constant 0 : index
    %c0_457 = arith.constant 0 : index
    %c7_458 = arith.constant 7 : index
    %c0_459 = arith.constant 0 : index
    %c0_460 = arith.constant 0 : index
    %349 = vector.load %arg1[%c0_456, %c0_457, %c7_458, %c0_459, %c0_460] : memref<1x1x10x10x8xf32, #tpu.memory_space<vmem>>, vector<1x1x1x8x8xf32>
    %350 = vector.shape_cast %349 : vector<1x1x1x8x8xf32> to vector<8x8xf32>
    %cst_461 = arith.constant dense<0.000000e+00> : vector<8x4xf32>
    %351 = tpu.matmul %350, %2, %cst_461 {dimension_numbers = #tpu.dot_dimension_numbers<[1], [0], [0], [1], [0, 0, 1, 1], [], []>} : vector<8x8xf32>, vector<8x4xf32>, vector<8x4xf32> -> vector<8x4xf32>
    %352 = arith.addf %348, %351 : vector<8x4xf32>
    %c0_462 = arith.constant 0 : index
    %c0_463 = arith.constant 0 : index
    %c7_464 = arith.constant 7 : index
    %c1_465 = arith.constant 1 : index
    %c0_466 = arith.constant 0 : index
    %353 = vector.load %arg1[%c0_462, %c0_463, %c7_464, %c1_465, %c0_466] : memref<1x1x10x10x8xf32, #tpu.memory_space<vmem>>, vector<1x1x1x8x8xf32>
    %354 = vector.shape_cast %353 : vector<1x1x1x8x8xf32> to vector<8x8xf32>
    %cst_467 = arith.constant dense<0.000000e+00> : vector<8x4xf32>
    %355 = tpu.matmul %354, %4, %cst_467 {dimension_numbers = #tpu.dot_dimension_numbers<[1], [0], [0], [1], [0, 0, 1, 1], [], []>} : vector<8x8xf32>, vector<8x4xf32>, vector<8x4xf32> -> vector<8x4xf32>
    %356 = arith.addf %352, %355 : vector<8x4xf32>
    %c0_468 = arith.constant 0 : index
    %c0_469 = arith.constant 0 : index
    %c7_470 = arith.constant 7 : index
    %c2_471 = arith.constant 2 : index
    %c0_472 = arith.constant 0 : index
    %357 = vector.load %arg1[%c0_468, %c0_469, %c7_470, %c2_471, %c0_472] : memref<1x1x10x10x8xf32, #tpu.memory_space<vmem>>, vector<1x1x1x8x8xf32>
    %358 = vector.shape_cast %357 : vector<1x1x1x8x8xf32> to vector<8x8xf32>
    %cst_473 = arith.constant dense<0.000000e+00> : vector<8x4xf32>
    %359 = tpu.matmul %358, %6, %cst_473 {dimension_numbers = #tpu.dot_dimension_numbers<[1], [0], [0], [1], [0, 0, 1, 1], [], []>} : vector<8x8xf32>, vector<8x4xf32>, vector<8x4xf32> -> vector<8x4xf32>
    %360 = arith.addf %356, %359 : vector<8x4xf32>
    %c0_474 = arith.constant 0 : index
    %c0_475 = arith.constant 0 : index
    %c8_476 = arith.constant 8 : index
    %c0_477 = arith.constant 0 : index
    %c0_478 = arith.constant 0 : index
    %361 = vector.load %arg1[%c0_474, %c0_475, %c8_476, %c0_477, %c0_478] : memref<1x1x10x10x8xf32, #tpu.memory_space<vmem>>, vector<1x1x1x8x8xf32>
    %362 = vector.shape_cast %361 : vector<1x1x1x8x8xf32> to vector<8x8xf32>
    %cst_479 = arith.constant dense<0.000000e+00> : vector<8x4xf32>
    %363 = tpu.matmul %362, %8, %cst_479 {dimension_numbers = #tpu.dot_dimension_numbers<[1], [0], [0], [1], [0, 0, 1, 1], [], []>} : vector<8x8xf32>, vector<8x4xf32>, vector<8x4xf32> -> vector<8x4xf32>
    %364 = arith.addf %360, %363 : vector<8x4xf32>
    %c0_480 = arith.constant 0 : index
    %c0_481 = arith.constant 0 : index
    %c8_482 = arith.constant 8 : index
    %c1_483 = arith.constant 1 : index
    %c0_484 = arith.constant 0 : index
    %365 = vector.load %arg1[%c0_480, %c0_481, %c8_482, %c1_483, %c0_484] : memref<1x1x10x10x8xf32, #tpu.memory_space<vmem>>, vector<1x1x1x8x8xf32>
    %366 = vector.shape_cast %365 : vector<1x1x1x8x8xf32> to vector<8x8xf32>
    %cst_485 = arith.constant dense<0.000000e+00> : vector<8x4xf32>
    %367 = tpu.matmul %366, %10, %cst_485 {dimension_numbers = #tpu.dot_dimension_numbers<[1], [0], [0], [1], [0, 0, 1, 1], [], []>} : vector<8x8xf32>, vector<8x4xf32>, vector<8x4xf32> -> vector<8x4xf32>
    %368 = arith.addf %364, %367 : vector<8x4xf32>
    %c0_486 = arith.constant 0 : index
    %c0_487 = arith.constant 0 : index
    %c8_488 = arith.constant 8 : index
    %c2_489 = arith.constant 2 : index
    %c0_490 = arith.constant 0 : index
    %369 = vector.load %arg1[%c0_486, %c0_487, %c8_488, %c2_489, %c0_490] : memref<1x1x10x10x8xf32, #tpu.memory_space<vmem>>, vector<1x1x1x8x8xf32>
    %370 = vector.shape_cast %369 : vector<1x1x1x8x8xf32> to vector<8x8xf32>
    %cst_491 = arith.constant dense<0.000000e+00> : vector<8x4xf32>
    %371 = tpu.matmul %370, %12, %cst_491 {dimension_numbers = #tpu.dot_dimension_numbers<[1], [0], [0], [1], [0, 0, 1, 1], [], []>} : vector<8x8xf32>, vector<8x4xf32>, vector<8x4xf32> -> vector<8x4xf32>
    %372 = arith.addf %368, %371 : vector<8x4xf32>
    %c0_492 = arith.constant 0 : index
    %c0_493 = arith.constant 0 : index
    %c9 = arith.constant 9 : index
    %c0_494 = arith.constant 0 : index
    %c0_495 = arith.constant 0 : index
    %373 = vector.load %arg1[%c0_492, %c0_493, %c9, %c0_494, %c0_495] : memref<1x1x10x10x8xf32, #tpu.memory_space<vmem>>, vector<1x1x1x8x8xf32>
    %374 = vector.shape_cast %373 : vector<1x1x1x8x8xf32> to vector<8x8xf32>
    %cst_496 = arith.constant dense<0.000000e+00> : vector<8x4xf32>
    %375 = tpu.matmul %374, %14, %cst_496 {dimension_numbers = #tpu.dot_dimension_numbers<[1], [0], [0], [1], [0, 0, 1, 1], [], []>} : vector<8x8xf32>, vector<8x4xf32>, vector<8x4xf32> -> vector<8x4xf32>
    %376 = arith.addf %372, %375 : vector<8x4xf32>
    %c0_497 = arith.constant 0 : index
    %c0_498 = arith.constant 0 : index
    %c9_499 = arith.constant 9 : index
    %c1_500 = arith.constant 1 : index
    %c0_501 = arith.constant 0 : index
    %377 = vector.load %arg1[%c0_497, %c0_498, %c9_499, %c1_500, %c0_501] : memref<1x1x10x10x8xf32, #tpu.memory_space<vmem>>, vector<1x1x1x8x8xf32>
    %378 = vector.shape_cast %377 : vector<1x1x1x8x8xf32> to vector<8x8xf32>
    %cst_502 = arith.constant dense<0.000000e+00> : vector<8x4xf32>
    %379 = tpu.matmul %378, %16, %cst_502 {dimension_numbers = #tpu.dot_dimension_numbers<[1], [0], [0], [1], [0, 0, 1, 1], [], []>} : vector<8x8xf32>, vector<8x4xf32>, vector<8x4xf32> -> vector<8x4xf32>
    %380 = arith.addf %376, %379 : vector<8x4xf32>
    %c0_503 = arith.constant 0 : index
    %c0_504 = arith.constant 0 : index
    %c9_505 = arith.constant 9 : index
    %c2_506 = arith.constant 2 : index
    %c0_507 = arith.constant 0 : index
    %381 = vector.load %arg1[%c0_503, %c0_504, %c9_505, %c2_506, %c0_507] : memref<1x1x10x10x8xf32, #tpu.memory_space<vmem>>, vector<1x1x1x8x8xf32>
    %382 = vector.shape_cast %381 : vector<1x1x1x8x8xf32> to vector<8x8xf32>
    %cst_508 = arith.constant dense<0.000000e+00> : vector<8x4xf32>
    %383 = tpu.matmul %382, %18, %cst_508 {dimension_numbers = #tpu.dot_dimension_numbers<[1], [0], [0], [1], [0, 0, 1, 1], [], []>} : vector<8x8xf32>, vector<8x4xf32>, vector<8x4xf32> -> vector<8x4xf32>
    %384 = arith.addf %380, %383 : vector<8x4xf32>
    %385 = vector.broadcast %0 : vector<1x4xf32> to vector<8x4xf32>
    %386 = arith.addf %384, %385 : vector<8x4xf32>
    %cst_509 = arith.constant 0.000000e+00 : f32
    %387 = vector.broadcast %cst_509 : f32 to vector<8x4xf32>
    %388 = arith.cmpf oge, %386, %387 : vector<8x4xf32>
    %cst_510 = arith.constant 2.000000e-01 : f32
    %389 = vector.broadcast %cst_510 : f32 to vector<8x4xf32>
    %390 = arith.mulf %389, %386 : vector<8x4xf32>
    %391 = arith.select %388, %386, %390 : vector<8x4xi1>, vector<8x4xf32>
    %c0_511 = arith.constant 0 : index
    %c7_512 = arith.constant 7 : index
    %c0_513 = arith.constant 0 : index
    %c0_514 = arith.constant 0 : index
    %392 = vector.load %arg4[%c0_511, %c7_512, %c0_513, %c0_514] : memref<1x8x8x4xf32, #tpu.memory_space<vmem>>, vector<1x1x8x4xf32>
    %393 = vector.shape_cast %392 : vector<1x1x8x4xf32> to vector<8x4xf32>
    %394 = vector.shape_cast %391 : vector<8x4xf32> to vector<1x1x8x4xf32>
    tpu.vector_store %arg4[%c0_511, %c7_512, %c0_513, %c0_514], %394 {strides = array<i32>} : memref<1x8x8x4xf32, #tpu.memory_space<vmem>>, vector<1x1x8x4xf32>,
    return
  }
  func.func @transform_0(%arg0: i32) -> (i32, i32, i32, i32, i32) {
    %c0_i32 = arith.constant 0 : i32
    %c0_i32_0 = arith.constant 0 : i32
    %c0_i32_1 = arith.constant 0 : i32
    %c0_i32_2 = arith.constant 0 : i32
    %c0_i32_3 = arith.constant 0 : i32
    return %arg0, %c0_i32, %c0_i32_0, %c0_i32_1, %c0_i32_2 : i32, i32, i32, i32, i32
  }
  func.func @transform_1(%arg0: i32) -> (i32, i32, i32, i32) {
    %c0_i32 = arith.constant 0 : i32
    %c0_i32_0 = arith.constant 0 : i32
    %c0_i32_1 = arith.constant 0 : i32
    %c0_i32_2 = arith.constant 0 : i32
    %c0_i32_3 = arith.constant 0 : i32
    return %c0_i32, %c0_i32_0, %c0_i32_1, %c0_i32_2 : i32, i32, i32, i32
  }
  func.func @transform_2(%arg0: i32) -> (i32, i32) {
    %c0_i32 = arith.constant 0 : i32
    %c0_i32_0 = arith.constant 0 : i32
    %c0_i32_1 = arith.constant 0 : i32
    return %c0_i32, %c0_i32_0 : i32, i32
  }
  func.func @transform_3(%arg0: i32) -> (i32, i32, i32, i32) {
    %c0_i32 = arith.constant 0 : i32
    %c0_i32_0 = arith.constant 0 : i32
    %c0_i32_1 = arith.constant 0 : i32
    %c0_i32_2 = arith.constant 0 : i32
    return %arg0, %c0_i32, %c0_i32_0, %c0_i32_1 : i32, i32, i32, i32
  }
}

module attributes {stable_mosaic.version = 11 : i64} {
  func.func @_conv3x3_kernel(%arg0: i32, %arg1: memref<1x4x9x9x8xf32, #tpu.memory_space<vmem>>, %arg2: memref<3x3x8x4xf32, #tpu.memory_space<vmem>>, %arg3: memref<1x4xf32, #tpu.memory_space<vmem>>, %arg4: memref<1x8x8x4xf32, #tpu.memory_space<vmem>>) attributes {dimension_semantics = [#tpu.dimension_semantics<parallel>], iteration_bounds = array<i64: 2>, scalar_prefetch = 0 : i64, scratch_operands = 0 : i64, tpu.core_type = #tpu.core_type<tc>, window_params = [{transform_indices = @transform_0, window_bounds = array<i64: 1, 4, 9, 9, 8>}, {pipeline_mode = #tpu.pipeline_mode<synchronous>, transform_indices = @transform_1, window_bounds = array<i64: 3, 3, 8, 4>}, {pipeline_mode = #tpu.pipeline_mode<synchronous>, transform_indices = @transform_2, window_bounds = array<i64: 1, 4>}, {transform_indices = @transform_3, window_bounds = array<i64: 1, 8, 8, 4>}]} {
    %c0 = arith.constant 0 : index
    %c0_0 = arith.constant 0 : index
    %0 = vector.load %arg3[%c0, %c0_0] : memref<1x4xf32, #tpu.memory_space<vmem>>, vector<1x4xf32>
    %c0_1 = arith.constant 0 : index
    %c0_2 = arith.constant 0 : index
    %c0_3 = arith.constant 0 : index
    %c0_4 = arith.constant 0 : index
    %1 = vector.load %arg2[%c0_1, %c0_2, %c0_3, %c0_4] : memref<3x3x8x4xf32, #tpu.memory_space<vmem>>, vector<1x1x8x4xf32>
    %2 = vector.shape_cast %1 : vector<1x1x8x4xf32> to vector<8x4xf32>
    %c0_5 = arith.constant 0 : index
    %c1 = arith.constant 1 : index
    %c0_6 = arith.constant 0 : index
    %c0_7 = arith.constant 0 : index
    %3 = vector.load %arg2[%c0_5, %c1, %c0_6, %c0_7] : memref<3x3x8x4xf32, #tpu.memory_space<vmem>>, vector<1x1x8x4xf32>
    %4 = vector.shape_cast %3 : vector<1x1x8x4xf32> to vector<8x4xf32>
    %c0_8 = arith.constant 0 : index
    %c2 = arith.constant 2 : index
    %c0_9 = arith.constant 0 : index
    %c0_10 = arith.constant 0 : index
    %5 = vector.load %arg2[%c0_8, %c2, %c0_9, %c0_10] : memref<3x3x8x4xf32, #tpu.memory_space<vmem>>, vector<1x1x8x4xf32>
    %6 = vector.shape_cast %5 : vector<1x1x8x4xf32> to vector<8x4xf32>
    %c1_11 = arith.constant 1 : index
    %c0_12 = arith.constant 0 : index
    %c0_13 = arith.constant 0 : index
    %c0_14 = arith.constant 0 : index
    %7 = vector.load %arg2[%c1_11, %c0_12, %c0_13, %c0_14] : memref<3x3x8x4xf32, #tpu.memory_space<vmem>>, vector<1x1x8x4xf32>
    %8 = vector.shape_cast %7 : vector<1x1x8x4xf32> to vector<8x4xf32>
    %c1_15 = arith.constant 1 : index
    %c1_16 = arith.constant 1 : index
    %c0_17 = arith.constant 0 : index
    %c0_18 = arith.constant 0 : index
    %9 = vector.load %arg2[%c1_15, %c1_16, %c0_17, %c0_18] : memref<3x3x8x4xf32, #tpu.memory_space<vmem>>, vector<1x1x8x4xf32>
    %10 = vector.shape_cast %9 : vector<1x1x8x4xf32> to vector<8x4xf32>
    %c1_19 = arith.constant 1 : index
    %c2_20 = arith.constant 2 : index
    %c0_21 = arith.constant 0 : index
    %c0_22 = arith.constant 0 : index
    %11 = vector.load %arg2[%c1_19, %c2_20, %c0_21, %c0_22] : memref<3x3x8x4xf32, #tpu.memory_space<vmem>>, vector<1x1x8x4xf32>
    %12 = vector.shape_cast %11 : vector<1x1x8x4xf32> to vector<8x4xf32>
    %c2_23 = arith.constant 2 : index
    %c0_24 = arith.constant 0 : index
    %c0_25 = arith.constant 0 : index
    %c0_26 = arith.constant 0 : index
    %13 = vector.load %arg2[%c2_23, %c0_24, %c0_25, %c0_26] : memref<3x3x8x4xf32, #tpu.memory_space<vmem>>, vector<1x1x8x4xf32>
    %14 = vector.shape_cast %13 : vector<1x1x8x4xf32> to vector<8x4xf32>
    %c2_27 = arith.constant 2 : index
    %c1_28 = arith.constant 1 : index
    %c0_29 = arith.constant 0 : index
    %c0_30 = arith.constant 0 : index
    %15 = vector.load %arg2[%c2_27, %c1_28, %c0_29, %c0_30] : memref<3x3x8x4xf32, #tpu.memory_space<vmem>>, vector<1x1x8x4xf32>
    %16 = vector.shape_cast %15 : vector<1x1x8x4xf32> to vector<8x4xf32>
    %c2_31 = arith.constant 2 : index
    %c2_32 = arith.constant 2 : index
    %c0_33 = arith.constant 0 : index
    %c0_34 = arith.constant 0 : index
    %17 = vector.load %arg2[%c2_31, %c2_32, %c0_33, %c0_34] : memref<3x3x8x4xf32, #tpu.memory_space<vmem>>, vector<1x1x8x4xf32>
    %18 = vector.shape_cast %17 : vector<1x1x8x4xf32> to vector<8x4xf32>
    %cst = arith.constant 0.000000e+00 : f32
    %19 = vector.broadcast %cst : f32 to vector<8x4xf32>
    %c0_35 = arith.constant 0 : index
    %c0_36 = arith.constant 0 : index
    %c0_37 = arith.constant 0 : index
    %c0_38 = arith.constant 0 : index
    %c0_39 = arith.constant 0 : index
    %20 = vector.load %arg1[%c0_35, %c0_36, %c0_37, %c0_38, %c0_39] : memref<1x4x9x9x8xf32, #tpu.memory_space<vmem>>, vector<1x1x1x8x8xf32>
    %21 = vector.shape_cast %20 : vector<1x1x1x8x8xf32> to vector<8x8xf32>
    %cst_40 = arith.constant dense<0.000000e+00> : vector<8x4xf32>
    %22 = tpu.matmul %21, %2, %cst_40 {dimension_numbers = #tpu.dot_dimension_numbers<[1], [0], [0], [1], [0, 0, 1, 1], [], []>} : vector<8x8xf32>, vector<8x4xf32>, vector<8x4xf32> -> vector<8x4xf32>
    %23 = arith.addf %19, %22 : vector<8x4xf32>
    %c0_41 = arith.constant 0 : index
    %c1_42 = arith.constant 1 : index
    %c0_43 = arith.constant 0 : index
    %c0_44 = arith.constant 0 : index
    %c0_45 = arith.constant 0 : index
    %24 = vector.load %arg1[%c0_41, %c1_42, %c0_43, %c0_44, %c0_45] : memref<1x4x9x9x8xf32, #tpu.memory_space<vmem>>, vector<1x1x1x8x8xf32>
    %25 = vector.shape_cast %24 : vector<1x1x1x8x8xf32> to vector<8x8xf32>
    %cst_46 = arith.constant dense<0.000000e+00> : vector<8x4xf32>
    %26 = tpu.matmul %25, %4, %cst_46 {dimension_numbers = #tpu.dot_dimension_numbers<[1], [0], [0], [1], [0, 0, 1, 1], [], []>} : vector<8x8xf32>, vector<8x4xf32>, vector<8x4xf32> -> vector<8x4xf32>
    %27 = arith.addf %23, %26 : vector<8x4xf32>
    %c0_47 = arith.constant 0 : index
    %c0_48 = arith.constant 0 : index
    %c0_49 = arith.constant 0 : index
    %c1_50 = arith.constant 1 : index
    %c0_51 = arith.constant 0 : index
    %28 = vector.load %arg1[%c0_47, %c0_48, %c0_49, %c1_50, %c0_51] : memref<1x4x9x9x8xf32, #tpu.memory_space<vmem>>, vector<1x1x1x8x8xf32>
    %29 = vector.shape_cast %28 : vector<1x1x1x8x8xf32> to vector<8x8xf32>
    %cst_52 = arith.constant dense<0.000000e+00> : vector<8x4xf32>
    %30 = tpu.matmul %29, %6, %cst_52 {dimension_numbers = #tpu.dot_dimension_numbers<[1], [0], [0], [1], [0, 0, 1, 1], [], []>} : vector<8x8xf32>, vector<8x4xf32>, vector<8x4xf32> -> vector<8x4xf32>
    %31 = arith.addf %27, %30 : vector<8x4xf32>
    %c0_53 = arith.constant 0 : index
    %c2_54 = arith.constant 2 : index
    %c0_55 = arith.constant 0 : index
    %c0_56 = arith.constant 0 : index
    %c0_57 = arith.constant 0 : index
    %32 = vector.load %arg1[%c0_53, %c2_54, %c0_55, %c0_56, %c0_57] : memref<1x4x9x9x8xf32, #tpu.memory_space<vmem>>, vector<1x1x1x8x8xf32>
    %33 = vector.shape_cast %32 : vector<1x1x1x8x8xf32> to vector<8x8xf32>
    %cst_58 = arith.constant dense<0.000000e+00> : vector<8x4xf32>
    %34 = tpu.matmul %33, %8, %cst_58 {dimension_numbers = #tpu.dot_dimension_numbers<[1], [0], [0], [1], [0, 0, 1, 1], [], []>} : vector<8x8xf32>, vector<8x4xf32>, vector<8x4xf32> -> vector<8x4xf32>
    %35 = arith.addf %31, %34 : vector<8x4xf32>
    %c0_59 = arith.constant 0 : index
    %c3 = arith.constant 3 : index
    %c0_60 = arith.constant 0 : index
    %c0_61 = arith.constant 0 : index
    %c0_62 = arith.constant 0 : index
    %36 = vector.load %arg1[%c0_59, %c3, %c0_60, %c0_61, %c0_62] : memref<1x4x9x9x8xf32, #tpu.memory_space<vmem>>, vector<1x1x1x8x8xf32>
    %37 = vector.shape_cast %36 : vector<1x1x1x8x8xf32> to vector<8x8xf32>
    %cst_63 = arith.constant dense<0.000000e+00> : vector<8x4xf32>
    %38 = tpu.matmul %37, %10, %cst_63 {dimension_numbers = #tpu.dot_dimension_numbers<[1], [0], [0], [1], [0, 0, 1, 1], [], []>} : vector<8x8xf32>, vector<8x4xf32>, vector<8x4xf32> -> vector<8x4xf32>
    %39 = arith.addf %35, %38 : vector<8x4xf32>
    %c0_64 = arith.constant 0 : index
    %c2_65 = arith.constant 2 : index
    %c0_66 = arith.constant 0 : index
    %c1_67 = arith.constant 1 : index
    %c0_68 = arith.constant 0 : index
    %40 = vector.load %arg1[%c0_64, %c2_65, %c0_66, %c1_67, %c0_68] : memref<1x4x9x9x8xf32, #tpu.memory_space<vmem>>, vector<1x1x1x8x8xf32>
    %41 = vector.shape_cast %40 : vector<1x1x1x8x8xf32> to vector<8x8xf32>
    %cst_69 = arith.constant dense<0.000000e+00> : vector<8x4xf32>
    %42 = tpu.matmul %41, %12, %cst_69 {dimension_numbers = #tpu.dot_dimension_numbers<[1], [0], [0], [1], [0, 0, 1, 1], [], []>} : vector<8x8xf32>, vector<8x4xf32>, vector<8x4xf32> -> vector<8x4xf32>
    %43 = arith.addf %39, %42 : vector<8x4xf32>
    %c0_70 = arith.constant 0 : index
    %c0_71 = arith.constant 0 : index
    %c1_72 = arith.constant 1 : index
    %c0_73 = arith.constant 0 : index
    %c0_74 = arith.constant 0 : index
    %44 = vector.load %arg1[%c0_70, %c0_71, %c1_72, %c0_73, %c0_74] : memref<1x4x9x9x8xf32, #tpu.memory_space<vmem>>, vector<1x1x1x8x8xf32>
    %45 = vector.shape_cast %44 : vector<1x1x1x8x8xf32> to vector<8x8xf32>
    %cst_75 = arith.constant dense<0.000000e+00> : vector<8x4xf32>
    %46 = tpu.matmul %45, %14, %cst_75 {dimension_numbers = #tpu.dot_dimension_numbers<[1], [0], [0], [1], [0, 0, 1, 1], [], []>} : vector<8x8xf32>, vector<8x4xf32>, vector<8x4xf32> -> vector<8x4xf32>
    %47 = arith.addf %43, %46 : vector<8x4xf32>
    %c0_76 = arith.constant 0 : index
    %c1_77 = arith.constant 1 : index
    %c1_78 = arith.constant 1 : index
    %c0_79 = arith.constant 0 : index
    %c0_80 = arith.constant 0 : index
    %48 = vector.load %arg1[%c0_76, %c1_77, %c1_78, %c0_79, %c0_80] : memref<1x4x9x9x8xf32, #tpu.memory_space<vmem>>, vector<1x1x1x8x8xf32>
    %49 = vector.shape_cast %48 : vector<1x1x1x8x8xf32> to vector<8x8xf32>
    %cst_81 = arith.constant dense<0.000000e+00> : vector<8x4xf32>
    %50 = tpu.matmul %49, %16, %cst_81 {dimension_numbers = #tpu.dot_dimension_numbers<[1], [0], [0], [1], [0, 0, 1, 1], [], []>} : vector<8x8xf32>, vector<8x4xf32>, vector<8x4xf32> -> vector<8x4xf32>
    %51 = arith.addf %47, %50 : vector<8x4xf32>
    %c0_82 = arith.constant 0 : index
    %c0_83 = arith.constant 0 : index
    %c1_84 = arith.constant 1 : index
    %c1_85 = arith.constant 1 : index
    %c0_86 = arith.constant 0 : index
    %52 = vector.load %arg1[%c0_82, %c0_83, %c1_84, %c1_85, %c0_86] : memref<1x4x9x9x8xf32, #tpu.memory_space<vmem>>, vector<1x1x1x8x8xf32>
    %53 = vector.shape_cast %52 : vector<1x1x1x8x8xf32> to vector<8x8xf32>
    %cst_87 = arith.constant dense<0.000000e+00> : vector<8x4xf32>
    %54 = tpu.matmul %53, %18, %cst_87 {dimension_numbers = #tpu.dot_dimension_numbers<[1], [0], [0], [1], [0, 0, 1, 1], [], []>} : vector<8x8xf32>, vector<8x4xf32>, vector<8x4xf32> -> vector<8x4xf32>
    %55 = arith.addf %51, %54 : vector<8x4xf32>
    %56 = vector.broadcast %0 : vector<1x4xf32> to vector<8x4xf32>
    %57 = arith.addf %55, %56 : vector<8x4xf32>
    %cst_88 = arith.constant 0.000000e+00 : f32
    %58 = vector.broadcast %cst_88 : f32 to vector<8x4xf32>
    %59 = arith.cmpf oge, %57, %58 : vector<8x4xf32>
    %cst_89 = arith.constant 2.000000e-01 : f32
    %60 = vector.broadcast %cst_89 : f32 to vector<8x4xf32>
    %61 = arith.mulf %60, %57 : vector<8x4xf32>
    %62 = arith.select %59, %57, %61 : vector<8x4xi1>, vector<8x4xf32>
    %c0_90 = arith.constant 0 : index
    %c0_91 = arith.constant 0 : index
    %c0_92 = arith.constant 0 : index
    %c0_93 = arith.constant 0 : index
    %63 = vector.load %arg4[%c0_90, %c0_91, %c0_92, %c0_93] : memref<1x8x8x4xf32, #tpu.memory_space<vmem>>, vector<1x1x8x4xf32>
    %64 = vector.shape_cast %63 : vector<1x1x8x4xf32> to vector<8x4xf32>
    %65 = vector.shape_cast %62 : vector<8x4xf32> to vector<1x1x8x4xf32>
    tpu.vector_store %arg4[%c0_90, %c0_91, %c0_92, %c0_93], %65 {strides = array<i32>} : memref<1x8x8x4xf32, #tpu.memory_space<vmem>>, vector<1x1x8x4xf32>,
    %cst_94 = arith.constant 0.000000e+00 : f32
    %66 = vector.broadcast %cst_94 : f32 to vector<8x4xf32>
    %c0_95 = arith.constant 0 : index
    %c0_96 = arith.constant 0 : index
    %c1_97 = arith.constant 1 : index
    %c0_98 = arith.constant 0 : index
    %c0_99 = arith.constant 0 : index
    %67 = vector.load %arg1[%c0_95, %c0_96, %c1_97, %c0_98, %c0_99] : memref<1x4x9x9x8xf32, #tpu.memory_space<vmem>>, vector<1x1x1x8x8xf32>
    %68 = vector.shape_cast %67 : vector<1x1x1x8x8xf32> to vector<8x8xf32>
    %cst_100 = arith.constant dense<0.000000e+00> : vector<8x4xf32>
    %69 = tpu.matmul %68, %2, %cst_100 {dimension_numbers = #tpu.dot_dimension_numbers<[1], [0], [0], [1], [0, 0, 1, 1], [], []>} : vector<8x8xf32>, vector<8x4xf32>, vector<8x4xf32> -> vector<8x4xf32>
    %70 = arith.addf %66, %69 : vector<8x4xf32>
    %c0_101 = arith.constant 0 : index
    %c1_102 = arith.constant 1 : index
    %c1_103 = arith.constant 1 : index
    %c0_104 = arith.constant 0 : index
    %c0_105 = arith.constant 0 : index
    %71 = vector.load %arg1[%c0_101, %c1_102, %c1_103, %c0_104, %c0_105] : memref<1x4x9x9x8xf32, #tpu.memory_space<vmem>>, vector<1x1x1x8x8xf32>
    %72 = vector.shape_cast %71 : vector<1x1x1x8x8xf32> to vector<8x8xf32>
    %cst_106 = arith.constant dense<0.000000e+00> : vector<8x4xf32>
    %73 = tpu.matmul %72, %4, %cst_106 {dimension_numbers = #tpu.dot_dimension_numbers<[1], [0], [0], [1], [0, 0, 1, 1], [], []>} : vector<8x8xf32>, vector<8x4xf32>, vector<8x4xf32> -> vector<8x4xf32>
    %74 = arith.addf %70, %73 : vector<8x4xf32>
    %c0_107 = arith.constant 0 : index
    %c0_108 = arith.constant 0 : index
    %c1_109 = arith.constant 1 : index
    %c1_110 = arith.constant 1 : index
    %c0_111 = arith.constant 0 : index
    %75 = vector.load %arg1[%c0_107, %c0_108, %c1_109, %c1_110, %c0_111] : memref<1x4x9x9x8xf32, #tpu.memory_space<vmem>>, vector<1x1x1x8x8xf32>
    %76 = vector.shape_cast %75 : vector<1x1x1x8x8xf32> to vector<8x8xf32>
    %cst_112 = arith.constant dense<0.000000e+00> : vector<8x4xf32>
    %77 = tpu.matmul %76, %6, %cst_112 {dimension_numbers = #tpu.dot_dimension_numbers<[1], [0], [0], [1], [0, 0, 1, 1], [], []>} : vector<8x8xf32>, vector<8x4xf32>, vector<8x4xf32> -> vector<8x4xf32>
    %78 = arith.addf %74, %77 : vector<8x4xf32>
    %c0_113 = arith.constant 0 : index
    %c2_114 = arith.constant 2 : index
    %c1_115 = arith.constant 1 : index
    %c0_116 = arith.constant 0 : index
    %c0_117 = arith.constant 0 : index
    %79 = vector.load %arg1[%c0_113, %c2_114, %c1_115, %c0_116, %c0_117] : memref<1x4x9x9x8xf32, #tpu.memory_space<vmem>>, vector<1x1x1x8x8xf32>
    %80 = vector.shape_cast %79 : vector<1x1x1x8x8xf32> to vector<8x8xf32>
    %cst_118 = arith.constant dense<0.000000e+00> : vector<8x4xf32>
    %81 = tpu.matmul %80, %8, %cst_118 {dimension_numbers = #tpu.dot_dimension_numbers<[1], [0], [0], [1], [0, 0, 1, 1], [], []>} : vector<8x8xf32>, vector<8x4xf32>, vector<8x4xf32> -> vector<8x4xf32>
    %82 = arith.addf %78, %81 : vector<8x4xf32>
    %c0_119 = arith.constant 0 : index
    %c3_120 = arith.constant 3 : index
    %c1_121 = arith.constant 1 : index
    %c0_122 = arith.constant 0 : index
    %c0_123 = arith.constant 0 : index
    %83 = vector.load %arg1[%c0_119, %c3_120, %c1_121, %c0_122, %c0_123] : memref<1x4x9x9x8xf32, #tpu.memory_space<vmem>>, vector<1x1x1x8x8xf32>
    %84 = vector.shape_cast %83 : vector<1x1x1x8x8xf32> to vector<8x8xf32>
    %cst_124 = arith.constant dense<0.000000e+00> : vector<8x4xf32>
    %85 = tpu.matmul %84, %10, %cst_124 {dimension_numbers = #tpu.dot_dimension_numbers<[1], [0], [0], [1], [0, 0, 1, 1], [], []>} : vector<8x8xf32>, vector<8x4xf32>, vector<8x4xf32> -> vector<8x4xf32>
    %86 = arith.addf %82, %85 : vector<8x4xf32>
    %c0_125 = arith.constant 0 : index
    %c2_126 = arith.constant 2 : index
    %c1_127 = arith.constant 1 : index
    %c1_128 = arith.constant 1 : index
    %c0_129 = arith.constant 0 : index
    %87 = vector.load %arg1[%c0_125, %c2_126, %c1_127, %c1_128, %c0_129] : memref<1x4x9x9x8xf32, #tpu.memory_space<vmem>>, vector<1x1x1x8x8xf32>
    %88 = vector.shape_cast %87 : vector<1x1x1x8x8xf32> to vector<8x8xf32>
    %cst_130 = arith.constant dense<0.000000e+00> : vector<8x4xf32>
    %89 = tpu.matmul %88, %12, %cst_130 {dimension_numbers = #tpu.dot_dimension_numbers<[1], [0], [0], [1], [0, 0, 1, 1], [], []>} : vector<8x8xf32>, vector<8x4xf32>, vector<8x4xf32> -> vector<8x4xf32>
    %90 = arith.addf %86, %89 : vector<8x4xf32>
    %c0_131 = arith.constant 0 : index
    %c0_132 = arith.constant 0 : index
    %c2_133 = arith.constant 2 : index
    %c0_134 = arith.constant 0 : index
    %c0_135 = arith.constant 0 : index
    %91 = vector.load %arg1[%c0_131, %c0_132, %c2_133, %c0_134, %c0_135] : memref<1x4x9x9x8xf32, #tpu.memory_space<vmem>>, vector<1x1x1x8x8xf32>
    %92 = vector.shape_cast %91 : vector<1x1x1x8x8xf32> to vector<8x8xf32>
    %cst_136 = arith.constant dense<0.000000e+00> : vector<8x4xf32>
    %93 = tpu.matmul %92, %14, %cst_136 {dimension_numbers = #tpu.dot_dimension_numbers<[1], [0], [0], [1], [0, 0, 1, 1], [], []>} : vector<8x8xf32>, vector<8x4xf32>, vector<8x4xf32> -> vector<8x4xf32>
    %94 = arith.addf %90, %93 : vector<8x4xf32>
    %c0_137 = arith.constant 0 : index
    %c1_138 = arith.constant 1 : index
    %c2_139 = arith.constant 2 : index
    %c0_140 = arith.constant 0 : index
    %c0_141 = arith.constant 0 : index
    %95 = vector.load %arg1[%c0_137, %c1_138, %c2_139, %c0_140, %c0_141] : memref<1x4x9x9x8xf32, #tpu.memory_space<vmem>>, vector<1x1x1x8x8xf32>
    %96 = vector.shape_cast %95 : vector<1x1x1x8x8xf32> to vector<8x8xf32>
    %cst_142 = arith.constant dense<0.000000e+00> : vector<8x4xf32>
    %97 = tpu.matmul %96, %16, %cst_142 {dimension_numbers = #tpu.dot_dimension_numbers<[1], [0], [0], [1], [0, 0, 1, 1], [], []>} : vector<8x8xf32>, vector<8x4xf32>, vector<8x4xf32> -> vector<8x4xf32>
    %98 = arith.addf %94, %97 : vector<8x4xf32>
    %c0_143 = arith.constant 0 : index
    %c0_144 = arith.constant 0 : index
    %c2_145 = arith.constant 2 : index
    %c1_146 = arith.constant 1 : index
    %c0_147 = arith.constant 0 : index
    %99 = vector.load %arg1[%c0_143, %c0_144, %c2_145, %c1_146, %c0_147] : memref<1x4x9x9x8xf32, #tpu.memory_space<vmem>>, vector<1x1x1x8x8xf32>
    %100 = vector.shape_cast %99 : vector<1x1x1x8x8xf32> to vector<8x8xf32>
    %cst_148 = arith.constant dense<0.000000e+00> : vector<8x4xf32>
    %101 = tpu.matmul %100, %18, %cst_148 {dimension_numbers = #tpu.dot_dimension_numbers<[1], [0], [0], [1], [0, 0, 1, 1], [], []>} : vector<8x8xf32>, vector<8x4xf32>, vector<8x4xf32> -> vector<8x4xf32>
    %102 = arith.addf %98, %101 : vector<8x4xf32>
    %103 = vector.broadcast %0 : vector<1x4xf32> to vector<8x4xf32>
    %104 = arith.addf %102, %103 : vector<8x4xf32>
    %cst_149 = arith.constant 0.000000e+00 : f32
    %105 = vector.broadcast %cst_149 : f32 to vector<8x4xf32>
    %106 = arith.cmpf oge, %104, %105 : vector<8x4xf32>
    %cst_150 = arith.constant 2.000000e-01 : f32
    %107 = vector.broadcast %cst_150 : f32 to vector<8x4xf32>
    %108 = arith.mulf %107, %104 : vector<8x4xf32>
    %109 = arith.select %106, %104, %108 : vector<8x4xi1>, vector<8x4xf32>
    %c0_151 = arith.constant 0 : index
    %c1_152 = arith.constant 1 : index
    %c0_153 = arith.constant 0 : index
    %c0_154 = arith.constant 0 : index
    %110 = vector.load %arg4[%c0_151, %c1_152, %c0_153, %c0_154] : memref<1x8x8x4xf32, #tpu.memory_space<vmem>>, vector<1x1x8x4xf32>
    %111 = vector.shape_cast %110 : vector<1x1x8x4xf32> to vector<8x4xf32>
    %112 = vector.shape_cast %109 : vector<8x4xf32> to vector<1x1x8x4xf32>
    tpu.vector_store %arg4[%c0_151, %c1_152, %c0_153, %c0_154], %112 {strides = array<i32>} : memref<1x8x8x4xf32, #tpu.memory_space<vmem>>, vector<1x1x8x4xf32>,
    %cst_155 = arith.constant 0.000000e+00 : f32
    %113 = vector.broadcast %cst_155 : f32 to vector<8x4xf32>
    %c0_156 = arith.constant 0 : index
    %c0_157 = arith.constant 0 : index
    %c2_158 = arith.constant 2 : index
    %c0_159 = arith.constant 0 : index
    %c0_160 = arith.constant 0 : index
    %114 = vector.load %arg1[%c0_156, %c0_157, %c2_158, %c0_159, %c0_160] : memref<1x4x9x9x8xf32, #tpu.memory_space<vmem>>, vector<1x1x1x8x8xf32>
    %115 = vector.shape_cast %114 : vector<1x1x1x8x8xf32> to vector<8x8xf32>
    %cst_161 = arith.constant dense<0.000000e+00> : vector<8x4xf32>
    %116 = tpu.matmul %115, %2, %cst_161 {dimension_numbers = #tpu.dot_dimension_numbers<[1], [0], [0], [1], [0, 0, 1, 1], [], []>} : vector<8x8xf32>, vector<8x4xf32>, vector<8x4xf32> -> vector<8x4xf32>
    %117 = arith.addf %113, %116 : vector<8x4xf32>
    %c0_162 = arith.constant 0 : index
    %c1_163 = arith.constant 1 : index
    %c2_164 = arith.constant 2 : index
    %c0_165 = arith.constant 0 : index
    %c0_166 = arith.constant 0 : index
    %118 = vector.load %arg1[%c0_162, %c1_163, %c2_164, %c0_165, %c0_166] : memref<1x4x9x9x8xf32, #tpu.memory_space<vmem>>, vector<1x1x1x8x8xf32>
    %119 = vector.shape_cast %118 : vector<1x1x1x8x8xf32> to vector<8x8xf32>
    %cst_167 = arith.constant dense<0.000000e+00> : vector<8x4xf32>
    %120 = tpu.matmul %119, %4, %cst_167 {dimension_numbers = #tpu.dot_dimension_numbers<[1], [0], [0], [1], [0, 0, 1, 1], [], []>} : vector<8x8xf32>, vector<8x4xf32>, vector<8x4xf32> -> vector<8x4xf32>
    %121 = arith.addf %117, %120 : vector<8x4xf32>
    %c0_168 = arith.constant 0 : index
    %c0_169 = arith.constant 0 : index
    %c2_170 = arith.constant 2 : index
    %c1_171 = arith.constant 1 : index
    %c0_172 = arith.constant 0 : index
    %122 = vector.load %arg1[%c0_168, %c0_169, %c2_170, %c1_171, %c0_172] : memref<1x4x9x9x8xf32, #tpu.memory_space<vmem>>, vector<1x1x1x8x8xf32>
    %123 = vector.shape_cast %122 : vector<1x1x1x8x8xf32> to vector<8x8xf32>
    %cst_173 = arith.constant dense<0.000000e+00> : vector<8x4xf32>
    %124 = tpu.matmul %123, %6, %cst_173 {dimension_numbers = #tpu.dot_dimension_numbers<[1], [0], [0], [1], [0, 0, 1, 1], [], []>} : vector<8x8xf32>, vector<8x4xf32>, vector<8x4xf32> -> vector<8x4xf32>
    %125 = arith.addf %121, %124 : vector<8x4xf32>
    %c0_174 = arith.constant 0 : index
    %c2_175 = arith.constant 2 : index
    %c2_176 = arith.constant 2 : index
    %c0_177 = arith.constant 0 : index
    %c0_178 = arith.constant 0 : index
    %126 = vector.load %arg1[%c0_174, %c2_175, %c2_176, %c0_177, %c0_178] : memref<1x4x9x9x8xf32, #tpu.memory_space<vmem>>, vector<1x1x1x8x8xf32>
    %127 = vector.shape_cast %126 : vector<1x1x1x8x8xf32> to vector<8x8xf32>
    %cst_179 = arith.constant dense<0.000000e+00> : vector<8x4xf32>
    %128 = tpu.matmul %127, %8, %cst_179 {dimension_numbers = #tpu.dot_dimension_numbers<[1], [0], [0], [1], [0, 0, 1, 1], [], []>} : vector<8x8xf32>, vector<8x4xf32>, vector<8x4xf32> -> vector<8x4xf32>
    %129 = arith.addf %125, %128 : vector<8x4xf32>
    %c0_180 = arith.constant 0 : index
    %c3_181 = arith.constant 3 : index
    %c2_182 = arith.constant 2 : index
    %c0_183 = arith.constant 0 : index
    %c0_184 = arith.constant 0 : index
    %130 = vector.load %arg1[%c0_180, %c3_181, %c2_182, %c0_183, %c0_184] : memref<1x4x9x9x8xf32, #tpu.memory_space<vmem>>, vector<1x1x1x8x8xf32>
    %131 = vector.shape_cast %130 : vector<1x1x1x8x8xf32> to vector<8x8xf32>
    %cst_185 = arith.constant dense<0.000000e+00> : vector<8x4xf32>
    %132 = tpu.matmul %131, %10, %cst_185 {dimension_numbers = #tpu.dot_dimension_numbers<[1], [0], [0], [1], [0, 0, 1, 1], [], []>} : vector<8x8xf32>, vector<8x4xf32>, vector<8x4xf32> -> vector<8x4xf32>
    %133 = arith.addf %129, %132 : vector<8x4xf32>
    %c0_186 = arith.constant 0 : index
    %c2_187 = arith.constant 2 : index
    %c2_188 = arith.constant 2 : index
    %c1_189 = arith.constant 1 : index
    %c0_190 = arith.constant 0 : index
    %134 = vector.load %arg1[%c0_186, %c2_187, %c2_188, %c1_189, %c0_190] : memref<1x4x9x9x8xf32, #tpu.memory_space<vmem>>, vector<1x1x1x8x8xf32>
    %135 = vector.shape_cast %134 : vector<1x1x1x8x8xf32> to vector<8x8xf32>
    %cst_191 = arith.constant dense<0.000000e+00> : vector<8x4xf32>
    %136 = tpu.matmul %135, %12, %cst_191 {dimension_numbers = #tpu.dot_dimension_numbers<[1], [0], [0], [1], [0, 0, 1, 1], [], []>} : vector<8x8xf32>, vector<8x4xf32>, vector<8x4xf32> -> vector<8x4xf32>
    %137 = arith.addf %133, %136 : vector<8x4xf32>
    %c0_192 = arith.constant 0 : index
    %c0_193 = arith.constant 0 : index
    %c3_194 = arith.constant 3 : index
    %c0_195 = arith.constant 0 : index
    %c0_196 = arith.constant 0 : index
    %138 = vector.load %arg1[%c0_192, %c0_193, %c3_194, %c0_195, %c0_196] : memref<1x4x9x9x8xf32, #tpu.memory_space<vmem>>, vector<1x1x1x8x8xf32>
    %139 = vector.shape_cast %138 : vector<1x1x1x8x8xf32> to vector<8x8xf32>
    %cst_197 = arith.constant dense<0.000000e+00> : vector<8x4xf32>
    %140 = tpu.matmul %139, %14, %cst_197 {dimension_numbers = #tpu.dot_dimension_numbers<[1], [0], [0], [1], [0, 0, 1, 1], [], []>} : vector<8x8xf32>, vector<8x4xf32>, vector<8x4xf32> -> vector<8x4xf32>
    %141 = arith.addf %137, %140 : vector<8x4xf32>
    %c0_198 = arith.constant 0 : index
    %c1_199 = arith.constant 1 : index
    %c3_200 = arith.constant 3 : index
    %c0_201 = arith.constant 0 : index
    %c0_202 = arith.constant 0 : index
    %142 = vector.load %arg1[%c0_198, %c1_199, %c3_200, %c0_201, %c0_202] : memref<1x4x9x9x8xf32, #tpu.memory_space<vmem>>, vector<1x1x1x8x8xf32>
    %143 = vector.shape_cast %142 : vector<1x1x1x8x8xf32> to vector<8x8xf32>
    %cst_203 = arith.constant dense<0.000000e+00> : vector<8x4xf32>
    %144 = tpu.matmul %143, %16, %cst_203 {dimension_numbers = #tpu.dot_dimension_numbers<[1], [0], [0], [1], [0, 0, 1, 1], [], []>} : vector<8x8xf32>, vector<8x4xf32>, vector<8x4xf32> -> vector<8x4xf32>
    %145 = arith.addf %141, %144 : vector<8x4xf32>
    %c0_204 = arith.constant 0 : index
    %c0_205 = arith.constant 0 : index
    %c3_206 = arith.constant 3 : index
    %c1_207 = arith.constant 1 : index
    %c0_208 = arith.constant 0 : index
    %146 = vector.load %arg1[%c0_204, %c0_205, %c3_206, %c1_207, %c0_208] : memref<1x4x9x9x8xf32, #tpu.memory_space<vmem>>, vector<1x1x1x8x8xf32>
    %147 = vector.shape_cast %146 : vector<1x1x1x8x8xf32> to vector<8x8xf32>
    %cst_209 = arith.constant dense<0.000000e+00> : vector<8x4xf32>
    %148 = tpu.matmul %147, %18, %cst_209 {dimension_numbers = #tpu.dot_dimension_numbers<[1], [0], [0], [1], [0, 0, 1, 1], [], []>} : vector<8x8xf32>, vector<8x4xf32>, vector<8x4xf32> -> vector<8x4xf32>
    %149 = arith.addf %145, %148 : vector<8x4xf32>
    %150 = vector.broadcast %0 : vector<1x4xf32> to vector<8x4xf32>
    %151 = arith.addf %149, %150 : vector<8x4xf32>
    %cst_210 = arith.constant 0.000000e+00 : f32
    %152 = vector.broadcast %cst_210 : f32 to vector<8x4xf32>
    %153 = arith.cmpf oge, %151, %152 : vector<8x4xf32>
    %cst_211 = arith.constant 2.000000e-01 : f32
    %154 = vector.broadcast %cst_211 : f32 to vector<8x4xf32>
    %155 = arith.mulf %154, %151 : vector<8x4xf32>
    %156 = arith.select %153, %151, %155 : vector<8x4xi1>, vector<8x4xf32>
    %c0_212 = arith.constant 0 : index
    %c2_213 = arith.constant 2 : index
    %c0_214 = arith.constant 0 : index
    %c0_215 = arith.constant 0 : index
    %157 = vector.load %arg4[%c0_212, %c2_213, %c0_214, %c0_215] : memref<1x8x8x4xf32, #tpu.memory_space<vmem>>, vector<1x1x8x4xf32>
    %158 = vector.shape_cast %157 : vector<1x1x8x4xf32> to vector<8x4xf32>
    %159 = vector.shape_cast %156 : vector<8x4xf32> to vector<1x1x8x4xf32>
    tpu.vector_store %arg4[%c0_212, %c2_213, %c0_214, %c0_215], %159 {strides = array<i32>} : memref<1x8x8x4xf32, #tpu.memory_space<vmem>>, vector<1x1x8x4xf32>,
    %cst_216 = arith.constant 0.000000e+00 : f32
    %160 = vector.broadcast %cst_216 : f32 to vector<8x4xf32>
    %c0_217 = arith.constant 0 : index
    %c0_218 = arith.constant 0 : index
    %c3_219 = arith.constant 3 : index
    %c0_220 = arith.constant 0 : index
    %c0_221 = arith.constant 0 : index
    %161 = vector.load %arg1[%c0_217, %c0_218, %c3_219, %c0_220, %c0_221] : memref<1x4x9x9x8xf32, #tpu.memory_space<vmem>>, vector<1x1x1x8x8xf32>
    %162 = vector.shape_cast %161 : vector<1x1x1x8x8xf32> to vector<8x8xf32>
    %cst_222 = arith.constant dense<0.000000e+00> : vector<8x4xf32>
    %163 = tpu.matmul %162, %2, %cst_222 {dimension_numbers = #tpu.dot_dimension_numbers<[1], [0], [0], [1], [0, 0, 1, 1], [], []>} : vector<8x8xf32>, vector<8x4xf32>, vector<8x4xf32> -> vector<8x4xf32>
    %164 = arith.addf %160, %163 : vector<8x4xf32>
    %c0_223 = arith.constant 0 : index
    %c1_224 = arith.constant 1 : index
    %c3_225 = arith.constant 3 : index
    %c0_226 = arith.constant 0 : index
    %c0_227 = arith.constant 0 : index
    %165 = vector.load %arg1[%c0_223, %c1_224, %c3_225, %c0_226, %c0_227] : memref<1x4x9x9x8xf32, #tpu.memory_space<vmem>>, vector<1x1x1x8x8xf32>
    %166 = vector.shape_cast %165 : vector<1x1x1x8x8xf32> to vector<8x8xf32>
    %cst_228 = arith.constant dense<0.000000e+00> : vector<8x4xf32>
    %167 = tpu.matmul %166, %4, %cst_228 {dimension_numbers = #tpu.dot_dimension_numbers<[1], [0], [0], [1], [0, 0, 1, 1], [], []>} : vector<8x8xf32>, vector<8x4xf32>, vector<8x4xf32> -> vector<8x4xf32>
    %168 = arith.addf %164, %167 : vector<8x4xf32>
    %c0_229 = arith.constant 0 : index
    %c0_230 = arith.constant 0 : index
    %c3_231 = arith.constant 3 : index
    %c1_232 = arith.constant 1 : index
    %c0_233 = arith.constant 0 : index
    %169 = vector.load %arg1[%c0_229, %c0_230, %c3_231, %c1_232, %c0_233] : memref<1x4x9x9x8xf32, #tpu.memory_space<vmem>>, vector<1x1x1x8x8xf32>
    %170 = vector.shape_cast %169 : vector<1x1x1x8x8xf32> to vector<8x8xf32>
    %cst_234 = arith.constant dense<0.000000e+00> : vector<8x4xf32>
    %171 = tpu.matmul %170, %6, %cst_234 {dimension_numbers = #tpu.dot_dimension_numbers<[1], [0], [0], [1], [0, 0, 1, 1], [], []>} : vector<8x8xf32>, vector<8x4xf32>, vector<8x4xf32> -> vector<8x4xf32>
    %172 = arith.addf %168, %171 : vector<8x4xf32>
    %c0_235 = arith.constant 0 : index
    %c2_236 = arith.constant 2 : index
    %c3_237 = arith.constant 3 : index
    %c0_238 = arith.constant 0 : index
    %c0_239 = arith.constant 0 : index
    %173 = vector.load %arg1[%c0_235, %c2_236, %c3_237, %c0_238, %c0_239] : memref<1x4x9x9x8xf32, #tpu.memory_space<vmem>>, vector<1x1x1x8x8xf32>
    %174 = vector.shape_cast %173 : vector<1x1x1x8x8xf32> to vector<8x8xf32>
    %cst_240 = arith.constant dense<0.000000e+00> : vector<8x4xf32>
    %175 = tpu.matmul %174, %8, %cst_240 {dimension_numbers = #tpu.dot_dimension_numbers<[1], [0], [0], [1], [0, 0, 1, 1], [], []>} : vector<8x8xf32>, vector<8x4xf32>, vector<8x4xf32> -> vector<8x4xf32>
    %176 = arith.addf %172, %175 : vector<8x4xf32>
    %c0_241 = arith.constant 0 : index
    %c3_242 = arith.constant 3 : index
    %c3_243 = arith.constant 3 : index
    %c0_244 = arith.constant 0 : index
    %c0_245 = arith.constant 0 : index
    %177 = vector.load %arg1[%c0_241, %c3_242, %c3_243, %c0_244, %c0_245] : memref<1x4x9x9x8xf32, #tpu.memory_space<vmem>>, vector<1x1x1x8x8xf32>
    %178 = vector.shape_cast %177 : vector<1x1x1x8x8xf32> to vector<8x8xf32>
    %cst_246 = arith.constant dense<0.000000e+00> : vector<8x4xf32>
    %179 = tpu.matmul %178, %10, %cst_246 {dimension_numbers = #tpu.dot_dimension_numbers<[1], [0], [0], [1], [0, 0, 1, 1], [], []>} : vector<8x8xf32>, vector<8x4xf32>, vector<8x4xf32> -> vector<8x4xf32>
    %180 = arith.addf %176, %179 : vector<8x4xf32>
    %c0_247 = arith.constant 0 : index
    %c2_248 = arith.constant 2 : index
    %c3_249 = arith.constant 3 : index
    %c1_250 = arith.constant 1 : index
    %c0_251 = arith.constant 0 : index
    %181 = vector.load %arg1[%c0_247, %c2_248, %c3_249, %c1_250, %c0_251] : memref<1x4x9x9x8xf32, #tpu.memory_space<vmem>>, vector<1x1x1x8x8xf32>
    %182 = vector.shape_cast %181 : vector<1x1x1x8x8xf32> to vector<8x8xf32>
    %cst_252 = arith.constant dense<0.000000e+00> : vector<8x4xf32>
    %183 = tpu.matmul %182, %12, %cst_252 {dimension_numbers = #tpu.dot_dimension_numbers<[1], [0], [0], [1], [0, 0, 1, 1], [], []>} : vector<8x8xf32>, vector<8x4xf32>, vector<8x4xf32> -> vector<8x4xf32>
    %184 = arith.addf %180, %183 : vector<8x4xf32>
    %c0_253 = arith.constant 0 : index
    %c0_254 = arith.constant 0 : index
    %c4 = arith.constant 4 : index
    %c0_255 = arith.constant 0 : index
    %c0_256 = arith.constant 0 : index
    %185 = vector.load %arg1[%c0_253, %c0_254, %c4, %c0_255, %c0_256] : memref<1x4x9x9x8xf32, #tpu.memory_space<vmem>>, vector<1x1x1x8x8xf32>
    %186 = vector.shape_cast %185 : vector<1x1x1x8x8xf32> to vector<8x8xf32>
    %cst_257 = arith.constant dense<0.000000e+00> : vector<8x4xf32>
    %187 = tpu.matmul %186, %14, %cst_257 {dimension_numbers = #tpu.dot_dimension_numbers<[1], [0], [0], [1], [0, 0, 1, 1], [], []>} : vector<8x8xf32>, vector<8x4xf32>, vector<8x4xf32> -> vector<8x4xf32>
    %188 = arith.addf %184, %187 : vector<8x4xf32>
    %c0_258 = arith.constant 0 : index
    %c1_259 = arith.constant 1 : index
    %c4_260 = arith.constant 4 : index
    %c0_261 = arith.constant 0 : index
    %c0_262 = arith.constant 0 : index
    %189 = vector.load %arg1[%c0_258, %c1_259, %c4_260, %c0_261, %c0_262] : memref<1x4x9x9x8xf32, #tpu.memory_space<vmem>>, vector<1x1x1x8x8xf32>
    %190 = vector.shape_cast %189 : vector<1x1x1x8x8xf32> to vector<8x8xf32>
    %cst_263 = arith.constant dense<0.000000e+00> : vector<8x4xf32>
    %191 = tpu.matmul %190, %16, %cst_263 {dimension_numbers = #tpu.dot_dimension_numbers<[1], [0], [0], [1], [0, 0, 1, 1], [], []>} : vector<8x8xf32>, vector<8x4xf32>, vector<8x4xf32> -> vector<8x4xf32>
    %192 = arith.addf %188, %191 : vector<8x4xf32>
    %c0_264 = arith.constant 0 : index
    %c0_265 = arith.constant 0 : index
    %c4_266 = arith.constant 4 : index
    %c1_267 = arith.constant 1 : index
    %c0_268 = arith.constant 0 : index
    %193 = vector.load %arg1[%c0_264, %c0_265, %c4_266, %c1_267, %c0_268] : memref<1x4x9x9x8xf32, #tpu.memory_space<vmem>>, vector<1x1x1x8x8xf32>
    %194 = vector.shape_cast %193 : vector<1x1x1x8x8xf32> to vector<8x8xf32>
    %cst_269 = arith.constant dense<0.000000e+00> : vector<8x4xf32>
    %195 = tpu.matmul %194, %18, %cst_269 {dimension_numbers = #tpu.dot_dimension_numbers<[1], [0], [0], [1], [0, 0, 1, 1], [], []>} : vector<8x8xf32>, vector<8x4xf32>, vector<8x4xf32> -> vector<8x4xf32>
    %196 = arith.addf %192, %195 : vector<8x4xf32>
    %197 = vector.broadcast %0 : vector<1x4xf32> to vector<8x4xf32>
    %198 = arith.addf %196, %197 : vector<8x4xf32>
    %cst_270 = arith.constant 0.000000e+00 : f32
    %199 = vector.broadcast %cst_270 : f32 to vector<8x4xf32>
    %200 = arith.cmpf oge, %198, %199 : vector<8x4xf32>
    %cst_271 = arith.constant 2.000000e-01 : f32
    %201 = vector.broadcast %cst_271 : f32 to vector<8x4xf32>
    %202 = arith.mulf %201, %198 : vector<8x4xf32>
    %203 = arith.select %200, %198, %202 : vector<8x4xi1>, vector<8x4xf32>
    %c0_272 = arith.constant 0 : index
    %c3_273 = arith.constant 3 : index
    %c0_274 = arith.constant 0 : index
    %c0_275 = arith.constant 0 : index
    %204 = vector.load %arg4[%c0_272, %c3_273, %c0_274, %c0_275] : memref<1x8x8x4xf32, #tpu.memory_space<vmem>>, vector<1x1x8x4xf32>
    %205 = vector.shape_cast %204 : vector<1x1x8x4xf32> to vector<8x4xf32>
    %206 = vector.shape_cast %203 : vector<8x4xf32> to vector<1x1x8x4xf32>
    tpu.vector_store %arg4[%c0_272, %c3_273, %c0_274, %c0_275], %206 {strides = array<i32>} : memref<1x8x8x4xf32, #tpu.memory_space<vmem>>, vector<1x1x8x4xf32>,
    %cst_276 = arith.constant 0.000000e+00 : f32
    %207 = vector.broadcast %cst_276 : f32 to vector<8x4xf32>
    %c0_277 = arith.constant 0 : index
    %c0_278 = arith.constant 0 : index
    %c4_279 = arith.constant 4 : index
    %c0_280 = arith.constant 0 : index
    %c0_281 = arith.constant 0 : index
    %208 = vector.load %arg1[%c0_277, %c0_278, %c4_279, %c0_280, %c0_281] : memref<1x4x9x9x8xf32, #tpu.memory_space<vmem>>, vector<1x1x1x8x8xf32>
    %209 = vector.shape_cast %208 : vector<1x1x1x8x8xf32> to vector<8x8xf32>
    %cst_282 = arith.constant dense<0.000000e+00> : vector<8x4xf32>
    %210 = tpu.matmul %209, %2, %cst_282 {dimension_numbers = #tpu.dot_dimension_numbers<[1], [0], [0], [1], [0, 0, 1, 1], [], []>} : vector<8x8xf32>, vector<8x4xf32>, vector<8x4xf32> -> vector<8x4xf32>
    %211 = arith.addf %207, %210 : vector<8x4xf32>
    %c0_283 = arith.constant 0 : index
    %c1_284 = arith.constant 1 : index
    %c4_285 = arith.constant 4 : index
    %c0_286 = arith.constant 0 : index
    %c0_287 = arith.constant 0 : index
    %212 = vector.load %arg1[%c0_283, %c1_284, %c4_285, %c0_286, %c0_287] : memref<1x4x9x9x8xf32, #tpu.memory_space<vmem>>, vector<1x1x1x8x8xf32>
    %213 = vector.shape_cast %212 : vector<1x1x1x8x8xf32> to vector<8x8xf32>
    %cst_288 = arith.constant dense<0.000000e+00> : vector<8x4xf32>
    %214 = tpu.matmul %213, %4, %cst_288 {dimension_numbers = #tpu.dot_dimension_numbers<[1], [0], [0], [1], [0, 0, 1, 1], [], []>} : vector<8x8xf32>, vector<8x4xf32>, vector<8x4xf32> -> vector<8x4xf32>
    %215 = arith.addf %211, %214 : vector<8x4xf32>
    %c0_289 = arith.constant 0 : index
    %c0_290 = arith.constant 0 : index
    %c4_291 = arith.constant 4 : index
    %c1_292 = arith.constant 1 : index
    %c0_293 = arith.constant 0 : index
    %216 = vector.load %arg1[%c0_289, %c0_290, %c4_291, %c1_292, %c0_293] : memref<1x4x9x9x8xf32, #tpu.memory_space<vmem>>, vector<1x1x1x8x8xf32>
    %217 = vector.shape_cast %216 : vector<1x1x1x8x8xf32> to vector<8x8xf32>
    %cst_294 = arith.constant dense<0.000000e+00> : vector<8x4xf32>
    %218 = tpu.matmul %217, %6, %cst_294 {dimension_numbers = #tpu.dot_dimension_numbers<[1], [0], [0], [1], [0, 0, 1, 1], [], []>} : vector<8x8xf32>, vector<8x4xf32>, vector<8x4xf32> -> vector<8x4xf32>
    %219 = arith.addf %215, %218 : vector<8x4xf32>
    %c0_295 = arith.constant 0 : index
    %c2_296 = arith.constant 2 : index
    %c4_297 = arith.constant 4 : index
    %c0_298 = arith.constant 0 : index
    %c0_299 = arith.constant 0 : index
    %220 = vector.load %arg1[%c0_295, %c2_296, %c4_297, %c0_298, %c0_299] : memref<1x4x9x9x8xf32, #tpu.memory_space<vmem>>, vector<1x1x1x8x8xf32>
    %221 = vector.shape_cast %220 : vector<1x1x1x8x8xf32> to vector<8x8xf32>
    %cst_300 = arith.constant dense<0.000000e+00> : vector<8x4xf32>
    %222 = tpu.matmul %221, %8, %cst_300 {dimension_numbers = #tpu.dot_dimension_numbers<[1], [0], [0], [1], [0, 0, 1, 1], [], []>} : vector<8x8xf32>, vector<8x4xf32>, vector<8x4xf32> -> vector<8x4xf32>
    %223 = arith.addf %219, %222 : vector<8x4xf32>
    %c0_301 = arith.constant 0 : index
    %c3_302 = arith.constant 3 : index
    %c4_303 = arith.constant 4 : index
    %c0_304 = arith.constant 0 : index
    %c0_305 = arith.constant 0 : index
    %224 = vector.load %arg1[%c0_301, %c3_302, %c4_303, %c0_304, %c0_305] : memref<1x4x9x9x8xf32, #tpu.memory_space<vmem>>, vector<1x1x1x8x8xf32>
    %225 = vector.shape_cast %224 : vector<1x1x1x8x8xf32> to vector<8x8xf32>
    %cst_306 = arith.constant dense<0.000000e+00> : vector<8x4xf32>
    %226 = tpu.matmul %225, %10, %cst_306 {dimension_numbers = #tpu.dot_dimension_numbers<[1], [0], [0], [1], [0, 0, 1, 1], [], []>} : vector<8x8xf32>, vector<8x4xf32>, vector<8x4xf32> -> vector<8x4xf32>
    %227 = arith.addf %223, %226 : vector<8x4xf32>
    %c0_307 = arith.constant 0 : index
    %c2_308 = arith.constant 2 : index
    %c4_309 = arith.constant 4 : index
    %c1_310 = arith.constant 1 : index
    %c0_311 = arith.constant 0 : index
    %228 = vector.load %arg1[%c0_307, %c2_308, %c4_309, %c1_310, %c0_311] : memref<1x4x9x9x8xf32, #tpu.memory_space<vmem>>, vector<1x1x1x8x8xf32>
    %229 = vector.shape_cast %228 : vector<1x1x1x8x8xf32> to vector<8x8xf32>
    %cst_312 = arith.constant dense<0.000000e+00> : vector<8x4xf32>
    %230 = tpu.matmul %229, %12, %cst_312 {dimension_numbers = #tpu.dot_dimension_numbers<[1], [0], [0], [1], [0, 0, 1, 1], [], []>} : vector<8x8xf32>, vector<8x4xf32>, vector<8x4xf32> -> vector<8x4xf32>
    %231 = arith.addf %227, %230 : vector<8x4xf32>
    %c0_313 = arith.constant 0 : index
    %c0_314 = arith.constant 0 : index
    %c5 = arith.constant 5 : index
    %c0_315 = arith.constant 0 : index
    %c0_316 = arith.constant 0 : index
    %232 = vector.load %arg1[%c0_313, %c0_314, %c5, %c0_315, %c0_316] : memref<1x4x9x9x8xf32, #tpu.memory_space<vmem>>, vector<1x1x1x8x8xf32>
    %233 = vector.shape_cast %232 : vector<1x1x1x8x8xf32> to vector<8x8xf32>
    %cst_317 = arith.constant dense<0.000000e+00> : vector<8x4xf32>
    %234 = tpu.matmul %233, %14, %cst_317 {dimension_numbers = #tpu.dot_dimension_numbers<[1], [0], [0], [1], [0, 0, 1, 1], [], []>} : vector<8x8xf32>, vector<8x4xf32>, vector<8x4xf32> -> vector<8x4xf32>
    %235 = arith.addf %231, %234 : vector<8x4xf32>
    %c0_318 = arith.constant 0 : index
    %c1_319 = arith.constant 1 : index
    %c5_320 = arith.constant 5 : index
    %c0_321 = arith.constant 0 : index
    %c0_322 = arith.constant 0 : index
    %236 = vector.load %arg1[%c0_318, %c1_319, %c5_320, %c0_321, %c0_322] : memref<1x4x9x9x8xf32, #tpu.memory_space<vmem>>, vector<1x1x1x8x8xf32>
    %237 = vector.shape_cast %236 : vector<1x1x1x8x8xf32> to vector<8x8xf32>
    %cst_323 = arith.constant dense<0.000000e+00> : vector<8x4xf32>
    %238 = tpu.matmul %237, %16, %cst_323 {dimension_numbers = #tpu.dot_dimension_numbers<[1], [0], [0], [1], [0, 0, 1, 1], [], []>} : vector<8x8xf32>, vector<8x4xf32>, vector<8x4xf32> -> vector<8x4xf32>
    %239 = arith.addf %235, %238 : vector<8x4xf32>
    %c0_324 = arith.constant 0 : index
    %c0_325 = arith.constant 0 : index
    %c5_326 = arith.constant 5 : index
    %c1_327 = arith.constant 1 : index
    %c0_328 = arith.constant 0 : index
    %240 = vector.load %arg1[%c0_324, %c0_325, %c5_326, %c1_327, %c0_328] : memref<1x4x9x9x8xf32, #tpu.memory_space<vmem>>, vector<1x1x1x8x8xf32>
    %241 = vector.shape_cast %240 : vector<1x1x1x8x8xf32> to vector<8x8xf32>
    %cst_329 = arith.constant dense<0.000000e+00> : vector<8x4xf32>
    %242 = tpu.matmul %241, %18, %cst_329 {dimension_numbers = #tpu.dot_dimension_numbers<[1], [0], [0], [1], [0, 0, 1, 1], [], []>} : vector<8x8xf32>, vector<8x4xf32>, vector<8x4xf32> -> vector<8x4xf32>
    %243 = arith.addf %239, %242 : vector<8x4xf32>
    %244 = vector.broadcast %0 : vector<1x4xf32> to vector<8x4xf32>
    %245 = arith.addf %243, %244 : vector<8x4xf32>
    %cst_330 = arith.constant 0.000000e+00 : f32
    %246 = vector.broadcast %cst_330 : f32 to vector<8x4xf32>
    %247 = arith.cmpf oge, %245, %246 : vector<8x4xf32>
    %cst_331 = arith.constant 2.000000e-01 : f32
    %248 = vector.broadcast %cst_331 : f32 to vector<8x4xf32>
    %249 = arith.mulf %248, %245 : vector<8x4xf32>
    %250 = arith.select %247, %245, %249 : vector<8x4xi1>, vector<8x4xf32>
    %c0_332 = arith.constant 0 : index
    %c4_333 = arith.constant 4 : index
    %c0_334 = arith.constant 0 : index
    %c0_335 = arith.constant 0 : index
    %251 = vector.load %arg4[%c0_332, %c4_333, %c0_334, %c0_335] : memref<1x8x8x4xf32, #tpu.memory_space<vmem>>, vector<1x1x8x4xf32>
    %252 = vector.shape_cast %251 : vector<1x1x8x4xf32> to vector<8x4xf32>
    %253 = vector.shape_cast %250 : vector<8x4xf32> to vector<1x1x8x4xf32>
    tpu.vector_store %arg4[%c0_332, %c4_333, %c0_334, %c0_335], %253 {strides = array<i32>} : memref<1x8x8x4xf32, #tpu.memory_space<vmem>>, vector<1x1x8x4xf32>,
    %cst_336 = arith.constant 0.000000e+00 : f32
    %254 = vector.broadcast %cst_336 : f32 to vector<8x4xf32>
    %c0_337 = arith.constant 0 : index
    %c0_338 = arith.constant 0 : index
    %c5_339 = arith.constant 5 : index
    %c0_340 = arith.constant 0 : index
    %c0_341 = arith.constant 0 : index
    %255 = vector.load %arg1[%c0_337, %c0_338, %c5_339, %c0_340, %c0_341] : memref<1x4x9x9x8xf32, #tpu.memory_space<vmem>>, vector<1x1x1x8x8xf32>
    %256 = vector.shape_cast %255 : vector<1x1x1x8x8xf32> to vector<8x8xf32>
    %cst_342 = arith.constant dense<0.000000e+00> : vector<8x4xf32>
    %257 = tpu.matmul %256, %2, %cst_342 {dimension_numbers = #tpu.dot_dimension_numbers<[1], [0], [0], [1], [0, 0, 1, 1], [], []>} : vector<8x8xf32>, vector<8x4xf32>, vector<8x4xf32> -> vector<8x4xf32>
    %258 = arith.addf %254, %257 : vector<8x4xf32>
    %c0_343 = arith.constant 0 : index
    %c1_344 = arith.constant 1 : index
    %c5_345 = arith.constant 5 : index
    %c0_346 = arith.constant 0 : index
    %c0_347 = arith.constant 0 : index
    %259 = vector.load %arg1[%c0_343, %c1_344, %c5_345, %c0_346, %c0_347] : memref<1x4x9x9x8xf32, #tpu.memory_space<vmem>>, vector<1x1x1x8x8xf32>
    %260 = vector.shape_cast %259 : vector<1x1x1x8x8xf32> to vector<8x8xf32>
    %cst_348 = arith.constant dense<0.000000e+00> : vector<8x4xf32>
    %261 = tpu.matmul %260, %4, %cst_348 {dimension_numbers = #tpu.dot_dimension_numbers<[1], [0], [0], [1], [0, 0, 1, 1], [], []>} : vector<8x8xf32>, vector<8x4xf32>, vector<8x4xf32> -> vector<8x4xf32>
    %262 = arith.addf %258, %261 : vector<8x4xf32>
    %c0_349 = arith.constant 0 : index
    %c0_350 = arith.constant 0 : index
    %c5_351 = arith.constant 5 : index
    %c1_352 = arith.constant 1 : index
    %c0_353 = arith.constant 0 : index
    %263 = vector.load %arg1[%c0_349, %c0_350, %c5_351, %c1_352, %c0_353] : memref<1x4x9x9x8xf32, #tpu.memory_space<vmem>>, vector<1x1x1x8x8xf32>
    %264 = vector.shape_cast %263 : vector<1x1x1x8x8xf32> to vector<8x8xf32>
    %cst_354 = arith.constant dense<0.000000e+00> : vector<8x4xf32>
    %265 = tpu.matmul %264, %6, %cst_354 {dimension_numbers = #tpu.dot_dimension_numbers<[1], [0], [0], [1], [0, 0, 1, 1], [], []>} : vector<8x8xf32>, vector<8x4xf32>, vector<8x4xf32> -> vector<8x4xf32>
    %266 = arith.addf %262, %265 : vector<8x4xf32>
    %c0_355 = arith.constant 0 : index
    %c2_356 = arith.constant 2 : index
    %c5_357 = arith.constant 5 : index
    %c0_358 = arith.constant 0 : index
    %c0_359 = arith.constant 0 : index
    %267 = vector.load %arg1[%c0_355, %c2_356, %c5_357, %c0_358, %c0_359] : memref<1x4x9x9x8xf32, #tpu.memory_space<vmem>>, vector<1x1x1x8x8xf32>
    %268 = vector.shape_cast %267 : vector<1x1x1x8x8xf32> to vector<8x8xf32>
    %cst_360 = arith.constant dense<0.000000e+00> : vector<8x4xf32>
    %269 = tpu.matmul %268, %8, %cst_360 {dimension_numbers = #tpu.dot_dimension_numbers<[1], [0], [0], [1], [0, 0, 1, 1], [], []>} : vector<8x8xf32>, vector<8x4xf32>, vector<8x4xf32> -> vector<8x4xf32>
    %270 = arith.addf %266, %269 : vector<8x4xf32>
    %c0_361 = arith.constant 0 : index
    %c3_362 = arith.constant 3 : index
    %c5_363 = arith.constant 5 : index
    %c0_364 = arith.constant 0 : index
    %c0_365 = arith.constant 0 : index
    %271 = vector.load %arg1[%c0_361, %c3_362, %c5_363, %c0_364, %c0_365] : memref<1x4x9x9x8xf32, #tpu.memory_space<vmem>>, vector<1x1x1x8x8xf32>
    %272 = vector.shape_cast %271 : vector<1x1x1x8x8xf32> to vector<8x8xf32>
    %cst_366 = arith.constant dense<0.000000e+00> : vector<8x4xf32>
    %273 = tpu.matmul %272, %10, %cst_366 {dimension_numbers = #tpu.dot_dimension_numbers<[1], [0], [0], [1], [0, 0, 1, 1], [], []>} : vector<8x8xf32>, vector<8x4xf32>, vector<8x4xf32> -> vector<8x4xf32>
    %274 = arith.addf %270, %273 : vector<8x4xf32>
    %c0_367 = arith.constant 0 : index
    %c2_368 = arith.constant 2 : index
    %c5_369 = arith.constant 5 : index
    %c1_370 = arith.constant 1 : index
    %c0_371 = arith.constant 0 : index
    %275 = vector.load %arg1[%c0_367, %c2_368, %c5_369, %c1_370, %c0_371] : memref<1x4x9x9x8xf32, #tpu.memory_space<vmem>>, vector<1x1x1x8x8xf32>
    %276 = vector.shape_cast %275 : vector<1x1x1x8x8xf32> to vector<8x8xf32>
    %cst_372 = arith.constant dense<0.000000e+00> : vector<8x4xf32>
    %277 = tpu.matmul %276, %12, %cst_372 {dimension_numbers = #tpu.dot_dimension_numbers<[1], [0], [0], [1], [0, 0, 1, 1], [], []>} : vector<8x8xf32>, vector<8x4xf32>, vector<8x4xf32> -> vector<8x4xf32>
    %278 = arith.addf %274, %277 : vector<8x4xf32>
    %c0_373 = arith.constant 0 : index
    %c0_374 = arith.constant 0 : index
    %c6 = arith.constant 6 : index
    %c0_375 = arith.constant 0 : index
    %c0_376 = arith.constant 0 : index
    %279 = vector.load %arg1[%c0_373, %c0_374, %c6, %c0_375, %c0_376] : memref<1x4x9x9x8xf32, #tpu.memory_space<vmem>>, vector<1x1x1x8x8xf32>
    %280 = vector.shape_cast %279 : vector<1x1x1x8x8xf32> to vector<8x8xf32>
    %cst_377 = arith.constant dense<0.000000e+00> : vector<8x4xf32>
    %281 = tpu.matmul %280, %14, %cst_377 {dimension_numbers = #tpu.dot_dimension_numbers<[1], [0], [0], [1], [0, 0, 1, 1], [], []>} : vector<8x8xf32>, vector<8x4xf32>, vector<8x4xf32> -> vector<8x4xf32>
    %282 = arith.addf %278, %281 : vector<8x4xf32>
    %c0_378 = arith.constant 0 : index
    %c1_379 = arith.constant 1 : index
    %c6_380 = arith.constant 6 : index
    %c0_381 = arith.constant 0 : index
    %c0_382 = arith.constant 0 : index
    %283 = vector.load %arg1[%c0_378, %c1_379, %c6_380, %c0_381, %c0_382] : memref<1x4x9x9x8xf32, #tpu.memory_space<vmem>>, vector<1x1x1x8x8xf32>
    %284 = vector.shape_cast %283 : vector<1x1x1x8x8xf32> to vector<8x8xf32>
    %cst_383 = arith.constant dense<0.000000e+00> : vector<8x4xf32>
    %285 = tpu.matmul %284, %16, %cst_383 {dimension_numbers = #tpu.dot_dimension_numbers<[1], [0], [0], [1], [0, 0, 1, 1], [], []>} : vector<8x8xf32>, vector<8x4xf32>, vector<8x4xf32> -> vector<8x4xf32>
    %286 = arith.addf %282, %285 : vector<8x4xf32>
    %c0_384 = arith.constant 0 : index
    %c0_385 = arith.constant 0 : index
    %c6_386 = arith.constant 6 : index
    %c1_387 = arith.constant 1 : index
    %c0_388 = arith.constant 0 : index
    %287 = vector.load %arg1[%c0_384, %c0_385, %c6_386, %c1_387, %c0_388] : memref<1x4x9x9x8xf32, #tpu.memory_space<vmem>>, vector<1x1x1x8x8xf32>
    %288 = vector.shape_cast %287 : vector<1x1x1x8x8xf32> to vector<8x8xf32>
    %cst_389 = arith.constant dense<0.000000e+00> : vector<8x4xf32>
    %289 = tpu.matmul %288, %18, %cst_389 {dimension_numbers = #tpu.dot_dimension_numbers<[1], [0], [0], [1], [0, 0, 1, 1], [], []>} : vector<8x8xf32>, vector<8x4xf32>, vector<8x4xf32> -> vector<8x4xf32>
    %290 = arith.addf %286, %289 : vector<8x4xf32>
    %291 = vector.broadcast %0 : vector<1x4xf32> to vector<8x4xf32>
    %292 = arith.addf %290, %291 : vector<8x4xf32>
    %cst_390 = arith.constant 0.000000e+00 : f32
    %293 = vector.broadcast %cst_390 : f32 to vector<8x4xf32>
    %294 = arith.cmpf oge, %292, %293 : vector<8x4xf32>
    %cst_391 = arith.constant 2.000000e-01 : f32
    %295 = vector.broadcast %cst_391 : f32 to vector<8x4xf32>
    %296 = arith.mulf %295, %292 : vector<8x4xf32>
    %297 = arith.select %294, %292, %296 : vector<8x4xi1>, vector<8x4xf32>
    %c0_392 = arith.constant 0 : index
    %c5_393 = arith.constant 5 : index
    %c0_394 = arith.constant 0 : index
    %c0_395 = arith.constant 0 : index
    %298 = vector.load %arg4[%c0_392, %c5_393, %c0_394, %c0_395] : memref<1x8x8x4xf32, #tpu.memory_space<vmem>>, vector<1x1x8x4xf32>
    %299 = vector.shape_cast %298 : vector<1x1x8x4xf32> to vector<8x4xf32>
    %300 = vector.shape_cast %297 : vector<8x4xf32> to vector<1x1x8x4xf32>
    tpu.vector_store %arg4[%c0_392, %c5_393, %c0_394, %c0_395], %300 {strides = array<i32>} : memref<1x8x8x4xf32, #tpu.memory_space<vmem>>, vector<1x1x8x4xf32>,
    %cst_396 = arith.constant 0.000000e+00 : f32
    %301 = vector.broadcast %cst_396 : f32 to vector<8x4xf32>
    %c0_397 = arith.constant 0 : index
    %c0_398 = arith.constant 0 : index
    %c6_399 = arith.constant 6 : index
    %c0_400 = arith.constant 0 : index
    %c0_401 = arith.constant 0 : index
    %302 = vector.load %arg1[%c0_397, %c0_398, %c6_399, %c0_400, %c0_401] : memref<1x4x9x9x8xf32, #tpu.memory_space<vmem>>, vector<1x1x1x8x8xf32>
    %303 = vector.shape_cast %302 : vector<1x1x1x8x8xf32> to vector<8x8xf32>
    %cst_402 = arith.constant dense<0.000000e+00> : vector<8x4xf32>
    %304 = tpu.matmul %303, %2, %cst_402 {dimension_numbers = #tpu.dot_dimension_numbers<[1], [0], [0], [1], [0, 0, 1, 1], [], []>} : vector<8x8xf32>, vector<8x4xf32>, vector<8x4xf32> -> vector<8x4xf32>
    %305 = arith.addf %301, %304 : vector<8x4xf32>
    %c0_403 = arith.constant 0 : index
    %c1_404 = arith.constant 1 : index
    %c6_405 = arith.constant 6 : index
    %c0_406 = arith.constant 0 : index
    %c0_407 = arith.constant 0 : index
    %306 = vector.load %arg1[%c0_403, %c1_404, %c6_405, %c0_406, %c0_407] : memref<1x4x9x9x8xf32, #tpu.memory_space<vmem>>, vector<1x1x1x8x8xf32>
    %307 = vector.shape_cast %306 : vector<1x1x1x8x8xf32> to vector<8x8xf32>
    %cst_408 = arith.constant dense<0.000000e+00> : vector<8x4xf32>
    %308 = tpu.matmul %307, %4, %cst_408 {dimension_numbers = #tpu.dot_dimension_numbers<[1], [0], [0], [1], [0, 0, 1, 1], [], []>} : vector<8x8xf32>, vector<8x4xf32>, vector<8x4xf32> -> vector<8x4xf32>
    %309 = arith.addf %305, %308 : vector<8x4xf32>
    %c0_409 = arith.constant 0 : index
    %c0_410 = arith.constant 0 : index
    %c6_411 = arith.constant 6 : index
    %c1_412 = arith.constant 1 : index
    %c0_413 = arith.constant 0 : index
    %310 = vector.load %arg1[%c0_409, %c0_410, %c6_411, %c1_412, %c0_413] : memref<1x4x9x9x8xf32, #tpu.memory_space<vmem>>, vector<1x1x1x8x8xf32>
    %311 = vector.shape_cast %310 : vector<1x1x1x8x8xf32> to vector<8x8xf32>
    %cst_414 = arith.constant dense<0.000000e+00> : vector<8x4xf32>
    %312 = tpu.matmul %311, %6, %cst_414 {dimension_numbers = #tpu.dot_dimension_numbers<[1], [0], [0], [1], [0, 0, 1, 1], [], []>} : vector<8x8xf32>, vector<8x4xf32>, vector<8x4xf32> -> vector<8x4xf32>
    %313 = arith.addf %309, %312 : vector<8x4xf32>
    %c0_415 = arith.constant 0 : index
    %c2_416 = arith.constant 2 : index
    %c6_417 = arith.constant 6 : index
    %c0_418 = arith.constant 0 : index
    %c0_419 = arith.constant 0 : index
    %314 = vector.load %arg1[%c0_415, %c2_416, %c6_417, %c0_418, %c0_419] : memref<1x4x9x9x8xf32, #tpu.memory_space<vmem>>, vector<1x1x1x8x8xf32>
    %315 = vector.shape_cast %314 : vector<1x1x1x8x8xf32> to vector<8x8xf32>
    %cst_420 = arith.constant dense<0.000000e+00> : vector<8x4xf32>
    %316 = tpu.matmul %315, %8, %cst_420 {dimension_numbers = #tpu.dot_dimension_numbers<[1], [0], [0], [1], [0, 0, 1, 1], [], []>} : vector<8x8xf32>, vector<8x4xf32>, vector<8x4xf32> -> vector<8x4xf32>
    %317 = arith.addf %313, %316 : vector<8x4xf32>
    %c0_421 = arith.constant 0 : index
    %c3_422 = arith.constant 3 : index
    %c6_423 = arith.constant 6 : index
    %c0_424 = arith.constant 0 : index
    %c0_425 = arith.constant 0 : index
    %318 = vector.load %arg1[%c0_421, %c3_422, %c6_423, %c0_424, %c0_425] : memref<1x4x9x9x8xf32, #tpu.memory_space<vmem>>, vector<1x1x1x8x8xf32>
    %319 = vector.shape_cast %318 : vector<1x1x1x8x8xf32> to vector<8x8xf32>
    %cst_426 = arith.constant dense<0.000000e+00> : vector<8x4xf32>
    %320 = tpu.matmul %319, %10, %cst_426 {dimension_numbers = #tpu.dot_dimension_numbers<[1], [0], [0], [1], [0, 0, 1, 1], [], []>} : vector<8x8xf32>, vector<8x4xf32>, vector<8x4xf32> -> vector<8x4xf32>
    %321 = arith.addf %317, %320 : vector<8x4xf32>
    %c0_427 = arith.constant 0 : index
    %c2_428 = arith.constant 2 : index
    %c6_429 = arith.constant 6 : index
    %c1_430 = arith.constant 1 : index
    %c0_431 = arith.constant 0 : index
    %322 = vector.load %arg1[%c0_427, %c2_428, %c6_429, %c1_430, %c0_431] : memref<1x4x9x9x8xf32, #tpu.memory_space<vmem>>, vector<1x1x1x8x8xf32>
    %323 = vector.shape_cast %322 : vector<1x1x1x8x8xf32> to vector<8x8xf32>
    %cst_432 = arith.constant dense<0.000000e+00> : vector<8x4xf32>
    %324 = tpu.matmul %323, %12, %cst_432 {dimension_numbers = #tpu.dot_dimension_numbers<[1], [0], [0], [1], [0, 0, 1, 1], [], []>} : vector<8x8xf32>, vector<8x4xf32>, vector<8x4xf32> -> vector<8x4xf32>
    %325 = arith.addf %321, %324 : vector<8x4xf32>
    %c0_433 = arith.constant 0 : index
    %c0_434 = arith.constant 0 : index
    %c7 = arith.constant 7 : index
    %c0_435 = arith.constant 0 : index
    %c0_436 = arith.constant 0 : index
    %326 = vector.load %arg1[%c0_433, %c0_434, %c7, %c0_435, %c0_436] : memref<1x4x9x9x8xf32, #tpu.memory_space<vmem>>, vector<1x1x1x8x8xf32>
    %327 = vector.shape_cast %326 : vector<1x1x1x8x8xf32> to vector<8x8xf32>
    %cst_437 = arith.constant dense<0.000000e+00> : vector<8x4xf32>
    %328 = tpu.matmul %327, %14, %cst_437 {dimension_numbers = #tpu.dot_dimension_numbers<[1], [0], [0], [1], [0, 0, 1, 1], [], []>} : vector<8x8xf32>, vector<8x4xf32>, vector<8x4xf32> -> vector<8x4xf32>
    %329 = arith.addf %325, %328 : vector<8x4xf32>
    %c0_438 = arith.constant 0 : index
    %c1_439 = arith.constant 1 : index
    %c7_440 = arith.constant 7 : index
    %c0_441 = arith.constant 0 : index
    %c0_442 = arith.constant 0 : index
    %330 = vector.load %arg1[%c0_438, %c1_439, %c7_440, %c0_441, %c0_442] : memref<1x4x9x9x8xf32, #tpu.memory_space<vmem>>, vector<1x1x1x8x8xf32>
    %331 = vector.shape_cast %330 : vector<1x1x1x8x8xf32> to vector<8x8xf32>
    %cst_443 = arith.constant dense<0.000000e+00> : vector<8x4xf32>
    %332 = tpu.matmul %331, %16, %cst_443 {dimension_numbers = #tpu.dot_dimension_numbers<[1], [0], [0], [1], [0, 0, 1, 1], [], []>} : vector<8x8xf32>, vector<8x4xf32>, vector<8x4xf32> -> vector<8x4xf32>
    %333 = arith.addf %329, %332 : vector<8x4xf32>
    %c0_444 = arith.constant 0 : index
    %c0_445 = arith.constant 0 : index
    %c7_446 = arith.constant 7 : index
    %c1_447 = arith.constant 1 : index
    %c0_448 = arith.constant 0 : index
    %334 = vector.load %arg1[%c0_444, %c0_445, %c7_446, %c1_447, %c0_448] : memref<1x4x9x9x8xf32, #tpu.memory_space<vmem>>, vector<1x1x1x8x8xf32>
    %335 = vector.shape_cast %334 : vector<1x1x1x8x8xf32> to vector<8x8xf32>
    %cst_449 = arith.constant dense<0.000000e+00> : vector<8x4xf32>
    %336 = tpu.matmul %335, %18, %cst_449 {dimension_numbers = #tpu.dot_dimension_numbers<[1], [0], [0], [1], [0, 0, 1, 1], [], []>} : vector<8x8xf32>, vector<8x4xf32>, vector<8x4xf32> -> vector<8x4xf32>
    %337 = arith.addf %333, %336 : vector<8x4xf32>
    %338 = vector.broadcast %0 : vector<1x4xf32> to vector<8x4xf32>
    %339 = arith.addf %337, %338 : vector<8x4xf32>
    %cst_450 = arith.constant 0.000000e+00 : f32
    %340 = vector.broadcast %cst_450 : f32 to vector<8x4xf32>
    %341 = arith.cmpf oge, %339, %340 : vector<8x4xf32>
    %cst_451 = arith.constant 2.000000e-01 : f32
    %342 = vector.broadcast %cst_451 : f32 to vector<8x4xf32>
    %343 = arith.mulf %342, %339 : vector<8x4xf32>
    %344 = arith.select %341, %339, %343 : vector<8x4xi1>, vector<8x4xf32>
    %c0_452 = arith.constant 0 : index
    %c6_453 = arith.constant 6 : index
    %c0_454 = arith.constant 0 : index
    %c0_455 = arith.constant 0 : index
    %345 = vector.load %arg4[%c0_452, %c6_453, %c0_454, %c0_455] : memref<1x8x8x4xf32, #tpu.memory_space<vmem>>, vector<1x1x8x4xf32>
    %346 = vector.shape_cast %345 : vector<1x1x8x4xf32> to vector<8x4xf32>
    %347 = vector.shape_cast %344 : vector<8x4xf32> to vector<1x1x8x4xf32>
    tpu.vector_store %arg4[%c0_452, %c6_453, %c0_454, %c0_455], %347 {strides = array<i32>} : memref<1x8x8x4xf32, #tpu.memory_space<vmem>>, vector<1x1x8x4xf32>,
    %cst_456 = arith.constant 0.000000e+00 : f32
    %348 = vector.broadcast %cst_456 : f32 to vector<8x4xf32>
    %c0_457 = arith.constant 0 : index
    %c0_458 = arith.constant 0 : index
    %c7_459 = arith.constant 7 : index
    %c0_460 = arith.constant 0 : index
    %c0_461 = arith.constant 0 : index
    %349 = vector.load %arg1[%c0_457, %c0_458, %c7_459, %c0_460, %c0_461] : memref<1x4x9x9x8xf32, #tpu.memory_space<vmem>>, vector<1x1x1x8x8xf32>
    %350 = vector.shape_cast %349 : vector<1x1x1x8x8xf32> to vector<8x8xf32>
    %cst_462 = arith.constant dense<0.000000e+00> : vector<8x4xf32>
    %351 = tpu.matmul %350, %2, %cst_462 {dimension_numbers = #tpu.dot_dimension_numbers<[1], [0], [0], [1], [0, 0, 1, 1], [], []>} : vector<8x8xf32>, vector<8x4xf32>, vector<8x4xf32> -> vector<8x4xf32>
    %352 = arith.addf %348, %351 : vector<8x4xf32>
    %c0_463 = arith.constant 0 : index
    %c1_464 = arith.constant 1 : index
    %c7_465 = arith.constant 7 : index
    %c0_466 = arith.constant 0 : index
    %c0_467 = arith.constant 0 : index
    %353 = vector.load %arg1[%c0_463, %c1_464, %c7_465, %c0_466, %c0_467] : memref<1x4x9x9x8xf32, #tpu.memory_space<vmem>>, vector<1x1x1x8x8xf32>
    %354 = vector.shape_cast %353 : vector<1x1x1x8x8xf32> to vector<8x8xf32>
    %cst_468 = arith.constant dense<0.000000e+00> : vector<8x4xf32>
    %355 = tpu.matmul %354, %4, %cst_468 {dimension_numbers = #tpu.dot_dimension_numbers<[1], [0], [0], [1], [0, 0, 1, 1], [], []>} : vector<8x8xf32>, vector<8x4xf32>, vector<8x4xf32> -> vector<8x4xf32>
    %356 = arith.addf %352, %355 : vector<8x4xf32>
    %c0_469 = arith.constant 0 : index
    %c0_470 = arith.constant 0 : index
    %c7_471 = arith.constant 7 : index
    %c1_472 = arith.constant 1 : index
    %c0_473 = arith.constant 0 : index
    %357 = vector.load %arg1[%c0_469, %c0_470, %c7_471, %c1_472, %c0_473] : memref<1x4x9x9x8xf32, #tpu.memory_space<vmem>>, vector<1x1x1x8x8xf32>
    %358 = vector.shape_cast %357 : vector<1x1x1x8x8xf32> to vector<8x8xf32>
    %cst_474 = arith.constant dense<0.000000e+00> : vector<8x4xf32>
    %359 = tpu.matmul %358, %6, %cst_474 {dimension_numbers = #tpu.dot_dimension_numbers<[1], [0], [0], [1], [0, 0, 1, 1], [], []>} : vector<8x8xf32>, vector<8x4xf32>, vector<8x4xf32> -> vector<8x4xf32>
    %360 = arith.addf %356, %359 : vector<8x4xf32>
    %c0_475 = arith.constant 0 : index
    %c2_476 = arith.constant 2 : index
    %c7_477 = arith.constant 7 : index
    %c0_478 = arith.constant 0 : index
    %c0_479 = arith.constant 0 : index
    %361 = vector.load %arg1[%c0_475, %c2_476, %c7_477, %c0_478, %c0_479] : memref<1x4x9x9x8xf32, #tpu.memory_space<vmem>>, vector<1x1x1x8x8xf32>
    %362 = vector.shape_cast %361 : vector<1x1x1x8x8xf32> to vector<8x8xf32>
    %cst_480 = arith.constant dense<0.000000e+00> : vector<8x4xf32>
    %363 = tpu.matmul %362, %8, %cst_480 {dimension_numbers = #tpu.dot_dimension_numbers<[1], [0], [0], [1], [0, 0, 1, 1], [], []>} : vector<8x8xf32>, vector<8x4xf32>, vector<8x4xf32> -> vector<8x4xf32>
    %364 = arith.addf %360, %363 : vector<8x4xf32>
    %c0_481 = arith.constant 0 : index
    %c3_482 = arith.constant 3 : index
    %c7_483 = arith.constant 7 : index
    %c0_484 = arith.constant 0 : index
    %c0_485 = arith.constant 0 : index
    %365 = vector.load %arg1[%c0_481, %c3_482, %c7_483, %c0_484, %c0_485] : memref<1x4x9x9x8xf32, #tpu.memory_space<vmem>>, vector<1x1x1x8x8xf32>
    %366 = vector.shape_cast %365 : vector<1x1x1x8x8xf32> to vector<8x8xf32>
    %cst_486 = arith.constant dense<0.000000e+00> : vector<8x4xf32>
    %367 = tpu.matmul %366, %10, %cst_486 {dimension_numbers = #tpu.dot_dimension_numbers<[1], [0], [0], [1], [0, 0, 1, 1], [], []>} : vector<8x8xf32>, vector<8x4xf32>, vector<8x4xf32> -> vector<8x4xf32>
    %368 = arith.addf %364, %367 : vector<8x4xf32>
    %c0_487 = arith.constant 0 : index
    %c2_488 = arith.constant 2 : index
    %c7_489 = arith.constant 7 : index
    %c1_490 = arith.constant 1 : index
    %c0_491 = arith.constant 0 : index
    %369 = vector.load %arg1[%c0_487, %c2_488, %c7_489, %c1_490, %c0_491] : memref<1x4x9x9x8xf32, #tpu.memory_space<vmem>>, vector<1x1x1x8x8xf32>
    %370 = vector.shape_cast %369 : vector<1x1x1x8x8xf32> to vector<8x8xf32>
    %cst_492 = arith.constant dense<0.000000e+00> : vector<8x4xf32>
    %371 = tpu.matmul %370, %12, %cst_492 {dimension_numbers = #tpu.dot_dimension_numbers<[1], [0], [0], [1], [0, 0, 1, 1], [], []>} : vector<8x8xf32>, vector<8x4xf32>, vector<8x4xf32> -> vector<8x4xf32>
    %372 = arith.addf %368, %371 : vector<8x4xf32>
    %c0_493 = arith.constant 0 : index
    %c0_494 = arith.constant 0 : index
    %c8 = arith.constant 8 : index
    %c0_495 = arith.constant 0 : index
    %c0_496 = arith.constant 0 : index
    %373 = vector.load %arg1[%c0_493, %c0_494, %c8, %c0_495, %c0_496] : memref<1x4x9x9x8xf32, #tpu.memory_space<vmem>>, vector<1x1x1x8x8xf32>
    %374 = vector.shape_cast %373 : vector<1x1x1x8x8xf32> to vector<8x8xf32>
    %cst_497 = arith.constant dense<0.000000e+00> : vector<8x4xf32>
    %375 = tpu.matmul %374, %14, %cst_497 {dimension_numbers = #tpu.dot_dimension_numbers<[1], [0], [0], [1], [0, 0, 1, 1], [], []>} : vector<8x8xf32>, vector<8x4xf32>, vector<8x4xf32> -> vector<8x4xf32>
    %376 = arith.addf %372, %375 : vector<8x4xf32>
    %c0_498 = arith.constant 0 : index
    %c1_499 = arith.constant 1 : index
    %c8_500 = arith.constant 8 : index
    %c0_501 = arith.constant 0 : index
    %c0_502 = arith.constant 0 : index
    %377 = vector.load %arg1[%c0_498, %c1_499, %c8_500, %c0_501, %c0_502] : memref<1x4x9x9x8xf32, #tpu.memory_space<vmem>>, vector<1x1x1x8x8xf32>
    %378 = vector.shape_cast %377 : vector<1x1x1x8x8xf32> to vector<8x8xf32>
    %cst_503 = arith.constant dense<0.000000e+00> : vector<8x4xf32>
    %379 = tpu.matmul %378, %16, %cst_503 {dimension_numbers = #tpu.dot_dimension_numbers<[1], [0], [0], [1], [0, 0, 1, 1], [], []>} : vector<8x8xf32>, vector<8x4xf32>, vector<8x4xf32> -> vector<8x4xf32>
    %380 = arith.addf %376, %379 : vector<8x4xf32>
    %c0_504 = arith.constant 0 : index
    %c0_505 = arith.constant 0 : index
    %c8_506 = arith.constant 8 : index
    %c1_507 = arith.constant 1 : index
    %c0_508 = arith.constant 0 : index
    %381 = vector.load %arg1[%c0_504, %c0_505, %c8_506, %c1_507, %c0_508] : memref<1x4x9x9x8xf32, #tpu.memory_space<vmem>>, vector<1x1x1x8x8xf32>
    %382 = vector.shape_cast %381 : vector<1x1x1x8x8xf32> to vector<8x8xf32>
    %cst_509 = arith.constant dense<0.000000e+00> : vector<8x4xf32>
    %383 = tpu.matmul %382, %18, %cst_509 {dimension_numbers = #tpu.dot_dimension_numbers<[1], [0], [0], [1], [0, 0, 1, 1], [], []>} : vector<8x8xf32>, vector<8x4xf32>, vector<8x4xf32> -> vector<8x4xf32>
    %384 = arith.addf %380, %383 : vector<8x4xf32>
    %385 = vector.broadcast %0 : vector<1x4xf32> to vector<8x4xf32>
    %386 = arith.addf %384, %385 : vector<8x4xf32>
    %cst_510 = arith.constant 0.000000e+00 : f32
    %387 = vector.broadcast %cst_510 : f32 to vector<8x4xf32>
    %388 = arith.cmpf oge, %386, %387 : vector<8x4xf32>
    %cst_511 = arith.constant 2.000000e-01 : f32
    %389 = vector.broadcast %cst_511 : f32 to vector<8x4xf32>
    %390 = arith.mulf %389, %386 : vector<8x4xf32>
    %391 = arith.select %388, %386, %390 : vector<8x4xi1>, vector<8x4xf32>
    %c0_512 = arith.constant 0 : index
    %c7_513 = arith.constant 7 : index
    %c0_514 = arith.constant 0 : index
    %c0_515 = arith.constant 0 : index
    %392 = vector.load %arg4[%c0_512, %c7_513, %c0_514, %c0_515] : memref<1x8x8x4xf32, #tpu.memory_space<vmem>>, vector<1x1x8x4xf32>
    %393 = vector.shape_cast %392 : vector<1x1x8x4xf32> to vector<8x4xf32>
    %394 = vector.shape_cast %391 : vector<8x4xf32> to vector<1x1x8x4xf32>
    tpu.vector_store %arg4[%c0_512, %c7_513, %c0_514, %c0_515], %394 {strides = array<i32>} : memref<1x8x8x4xf32, #tpu.memory_space<vmem>>, vector<1x1x8x4xf32>,
    return
  }
  func.func @transform_0(%arg0: i32) -> (i32, i32, i32, i32, i32) {
    %c0_i32 = arith.constant 0 : i32
    %c0_i32_0 = arith.constant 0 : i32
    %c0_i32_1 = arith.constant 0 : i32
    %c0_i32_2 = arith.constant 0 : i32
    %c0_i32_3 = arith.constant 0 : i32
    return %arg0, %c0_i32, %c0_i32_0, %c0_i32_1, %c0_i32_2 : i32, i32, i32, i32, i32
  }
  func.func @transform_1(%arg0: i32) -> (i32, i32, i32, i32) {
    %c0_i32 = arith.constant 0 : i32
    %c0_i32_0 = arith.constant 0 : i32
    %c0_i32_1 = arith.constant 0 : i32
    %c0_i32_2 = arith.constant 0 : i32
    %c0_i32_3 = arith.constant 0 : i32
    return %c0_i32, %c0_i32_0, %c0_i32_1, %c0_i32_2 : i32, i32, i32, i32
  }
  func.func @transform_2(%arg0: i32) -> (i32, i32) {
    %c0_i32 = arith.constant 0 : i32
    %c0_i32_0 = arith.constant 0 : i32
    %c0_i32_1 = arith.constant 0 : i32
    return %c0_i32, %c0_i32_0 : i32, i32
  }
  func.func @transform_3(%arg0: i32) -> (i32, i32, i32, i32) {
    %c0_i32 = arith.constant 0 : i32
    %c0_i32_0 = arith.constant 0 : i32
    %c0_i32_1 = arith.constant 0 : i32
    %c0_i32_2 = arith.constant 0 : i32
    return %arg0, %c0_i32, %c0_i32_0, %c0_i32_1 : i32, i32, i32, i32
  }
}

module attributes {stable_mosaic.version = 11 : i64} {
  func.func @_conv3x3_kernel(%arg0: i32, %arg1: memref<1x1x6x6x8xf32, #tpu.memory_space<vmem>>, %arg2: memref<3x3x8x8xf32, #tpu.memory_space<vmem>>, %arg3: memref<1x8xf32, #tpu.memory_space<vmem>>, %arg4: memref<1x4x4x8xf32, #tpu.memory_space<vmem>>) attributes {dimension_semantics = [#tpu.dimension_semantics<parallel>], iteration_bounds = array<i64: 2>, scalar_prefetch = 0 : i64, scratch_operands = 0 : i64, tpu.core_type = #tpu.core_type<tc>, window_params = [{transform_indices = @transform_0, window_bounds = array<i64: 1, 1, 6, 6, 8>}, {pipeline_mode = #tpu.pipeline_mode<synchronous>, transform_indices = @transform_1, window_bounds = array<i64: 3, 3, 8, 8>}, {pipeline_mode = #tpu.pipeline_mode<synchronous>, transform_indices = @transform_2, window_bounds = array<i64: 1, 8>}, {transform_indices = @transform_3, window_bounds = array<i64: 1, 4, 4, 8>}]} {
    %c0 = arith.constant 0 : index
    %c0_0 = arith.constant 0 : index
    %0 = vector.load %arg3[%c0, %c0_0] : memref<1x8xf32, #tpu.memory_space<vmem>>, vector<1x8xf32>
    %c0_1 = arith.constant 0 : index
    %c0_2 = arith.constant 0 : index
    %c0_3 = arith.constant 0 : index
    %c0_4 = arith.constant 0 : index
    %1 = vector.load %arg2[%c0_1, %c0_2, %c0_3, %c0_4] : memref<3x3x8x8xf32, #tpu.memory_space<vmem>>, vector<1x1x8x8xf32>
    %2 = vector.shape_cast %1 : vector<1x1x8x8xf32> to vector<8x8xf32>
    %c0_5 = arith.constant 0 : index
    %c1 = arith.constant 1 : index
    %c0_6 = arith.constant 0 : index
    %c0_7 = arith.constant 0 : index
    %3 = vector.load %arg2[%c0_5, %c1, %c0_6, %c0_7] : memref<3x3x8x8xf32, #tpu.memory_space<vmem>>, vector<1x1x8x8xf32>
    %4 = vector.shape_cast %3 : vector<1x1x8x8xf32> to vector<8x8xf32>
    %c0_8 = arith.constant 0 : index
    %c2 = arith.constant 2 : index
    %c0_9 = arith.constant 0 : index
    %c0_10 = arith.constant 0 : index
    %5 = vector.load %arg2[%c0_8, %c2, %c0_9, %c0_10] : memref<3x3x8x8xf32, #tpu.memory_space<vmem>>, vector<1x1x8x8xf32>
    %6 = vector.shape_cast %5 : vector<1x1x8x8xf32> to vector<8x8xf32>
    %c1_11 = arith.constant 1 : index
    %c0_12 = arith.constant 0 : index
    %c0_13 = arith.constant 0 : index
    %c0_14 = arith.constant 0 : index
    %7 = vector.load %arg2[%c1_11, %c0_12, %c0_13, %c0_14] : memref<3x3x8x8xf32, #tpu.memory_space<vmem>>, vector<1x1x8x8xf32>
    %8 = vector.shape_cast %7 : vector<1x1x8x8xf32> to vector<8x8xf32>
    %c1_15 = arith.constant 1 : index
    %c1_16 = arith.constant 1 : index
    %c0_17 = arith.constant 0 : index
    %c0_18 = arith.constant 0 : index
    %9 = vector.load %arg2[%c1_15, %c1_16, %c0_17, %c0_18] : memref<3x3x8x8xf32, #tpu.memory_space<vmem>>, vector<1x1x8x8xf32>
    %10 = vector.shape_cast %9 : vector<1x1x8x8xf32> to vector<8x8xf32>
    %c1_19 = arith.constant 1 : index
    %c2_20 = arith.constant 2 : index
    %c0_21 = arith.constant 0 : index
    %c0_22 = arith.constant 0 : index
    %11 = vector.load %arg2[%c1_19, %c2_20, %c0_21, %c0_22] : memref<3x3x8x8xf32, #tpu.memory_space<vmem>>, vector<1x1x8x8xf32>
    %12 = vector.shape_cast %11 : vector<1x1x8x8xf32> to vector<8x8xf32>
    %c2_23 = arith.constant 2 : index
    %c0_24 = arith.constant 0 : index
    %c0_25 = arith.constant 0 : index
    %c0_26 = arith.constant 0 : index
    %13 = vector.load %arg2[%c2_23, %c0_24, %c0_25, %c0_26] : memref<3x3x8x8xf32, #tpu.memory_space<vmem>>, vector<1x1x8x8xf32>
    %14 = vector.shape_cast %13 : vector<1x1x8x8xf32> to vector<8x8xf32>
    %c2_27 = arith.constant 2 : index
    %c1_28 = arith.constant 1 : index
    %c0_29 = arith.constant 0 : index
    %c0_30 = arith.constant 0 : index
    %15 = vector.load %arg2[%c2_27, %c1_28, %c0_29, %c0_30] : memref<3x3x8x8xf32, #tpu.memory_space<vmem>>, vector<1x1x8x8xf32>
    %16 = vector.shape_cast %15 : vector<1x1x8x8xf32> to vector<8x8xf32>
    %c2_31 = arith.constant 2 : index
    %c2_32 = arith.constant 2 : index
    %c0_33 = arith.constant 0 : index
    %c0_34 = arith.constant 0 : index
    %17 = vector.load %arg2[%c2_31, %c2_32, %c0_33, %c0_34] : memref<3x3x8x8xf32, #tpu.memory_space<vmem>>, vector<1x1x8x8xf32>
    %18 = vector.shape_cast %17 : vector<1x1x8x8xf32> to vector<8x8xf32>
    %cst = arith.constant 0.000000e+00 : f32
    %19 = vector.broadcast %cst : f32 to vector<4x8xf32>
    %c0_35 = arith.constant 0 : index
    %c0_36 = arith.constant 0 : index
    %c0_37 = arith.constant 0 : index
    %c0_38 = arith.constant 0 : index
    %c0_39 = arith.constant 0 : index
    %20 = vector.load %arg1[%c0_35, %c0_36, %c0_37, %c0_38, %c0_39] : memref<1x1x6x6x8xf32, #tpu.memory_space<vmem>>, vector<1x1x1x4x8xf32>
    %21 = vector.shape_cast %20 : vector<1x1x1x4x8xf32> to vector<4x8xf32>
    %cst_40 = arith.constant dense<0.000000e+00> : vector<4x8xf32>
    %22 = tpu.matmul %21, %2, %cst_40 {dimension_numbers = #tpu.dot_dimension_numbers<[1], [0], [0], [1], [0, 0, 1, 1], [], []>} : vector<4x8xf32>, vector<8x8xf32>, vector<4x8xf32> -> vector<4x8xf32>
    %23 = arith.addf %19, %22 : vector<4x8xf32>
    %c0_41 = arith.constant 0 : index
    %c0_42 = arith.constant 0 : index
    %c0_43 = arith.constant 0 : index
    %c1_44 = arith.constant 1 : index
    %c0_45 = arith.constant 0 : index
    %24 = vector.load %arg1[%c0_41, %c0_42, %c0_43, %c1_44, %c0_45] : memref<1x1x6x6x8xf32, #tpu.memory_space<vmem>>, vector<1x1x1x4x8xf32>
    %25 = vector.shape_cast %24 : vector<1x1x1x4x8xf32> to vector<4x8xf32>
    %cst_46 = arith.constant dense<0.000000e+00> : vector<4x8xf32>
    %26 = tpu.matmul %25, %4, %cst_46 {dimension_numbers = #tpu.dot_dimension_numbers<[1], [0], [0], [1], [0, 0, 1, 1], [], []>} : vector<4x8xf32>, vector<8x8xf32>, vector<4x8xf32> -> vector<4x8xf32>
    %27 = arith.addf %23, %26 : vector<4x8xf32>
    %c0_47 = arith.constant 0 : index
    %c0_48 = arith.constant 0 : index
    %c0_49 = arith.constant 0 : index
    %c2_50 = arith.constant 2 : index
    %c0_51 = arith.constant 0 : index
    %28 = vector.load %arg1[%c0_47, %c0_48, %c0_49, %c2_50, %c0_51] : memref<1x1x6x6x8xf32, #tpu.memory_space<vmem>>, vector<1x1x1x4x8xf32>
    %29 = vector.shape_cast %28 : vector<1x1x1x4x8xf32> to vector<4x8xf32>
    %cst_52 = arith.constant dense<0.000000e+00> : vector<4x8xf32>
    %30 = tpu.matmul %29, %6, %cst_52 {dimension_numbers = #tpu.dot_dimension_numbers<[1], [0], [0], [1], [0, 0, 1, 1], [], []>} : vector<4x8xf32>, vector<8x8xf32>, vector<4x8xf32> -> vector<4x8xf32>
    %31 = arith.addf %27, %30 : vector<4x8xf32>
    %c0_53 = arith.constant 0 : index
    %c0_54 = arith.constant 0 : index
    %c1_55 = arith.constant 1 : index
    %c0_56 = arith.constant 0 : index
    %c0_57 = arith.constant 0 : index
    %32 = vector.load %arg1[%c0_53, %c0_54, %c1_55, %c0_56, %c0_57] : memref<1x1x6x6x8xf32, #tpu.memory_space<vmem>>, vector<1x1x1x4x8xf32>
    %33 = vector.shape_cast %32 : vector<1x1x1x4x8xf32> to vector<4x8xf32>
    %cst_58 = arith.constant dense<0.000000e+00> : vector<4x8xf32>
    %34 = tpu.matmul %33, %8, %cst_58 {dimension_numbers = #tpu.dot_dimension_numbers<[1], [0], [0], [1], [0, 0, 1, 1], [], []>} : vector<4x8xf32>, vector<8x8xf32>, vector<4x8xf32> -> vector<4x8xf32>
    %35 = arith.addf %31, %34 : vector<4x8xf32>
    %c0_59 = arith.constant 0 : index
    %c0_60 = arith.constant 0 : index
    %c1_61 = arith.constant 1 : index
    %c1_62 = arith.constant 1 : index
    %c0_63 = arith.constant 0 : index
    %36 = vector.load %arg1[%c0_59, %c0_60, %c1_61, %c1_62, %c0_63] : memref<1x1x6x6x8xf32, #tpu.memory_space<vmem>>, vector<1x1x1x4x8xf32>
    %37 = vector.shape_cast %36 : vector<1x1x1x4x8xf32> to vector<4x8xf32>
    %cst_64 = arith.constant dense<0.000000e+00> : vector<4x8xf32>
    %38 = tpu.matmul %37, %10, %cst_64 {dimension_numbers = #tpu.dot_dimension_numbers<[1], [0], [0], [1], [0, 0, 1, 1], [], []>} : vector<4x8xf32>, vector<8x8xf32>, vector<4x8xf32> -> vector<4x8xf32>
    %39 = arith.addf %35, %38 : vector<4x8xf32>
    %c0_65 = arith.constant 0 : index
    %c0_66 = arith.constant 0 : index
    %c1_67 = arith.constant 1 : index
    %c2_68 = arith.constant 2 : index
    %c0_69 = arith.constant 0 : index
    %40 = vector.load %arg1[%c0_65, %c0_66, %c1_67, %c2_68, %c0_69] : memref<1x1x6x6x8xf32, #tpu.memory_space<vmem>>, vector<1x1x1x4x8xf32>
    %41 = vector.shape_cast %40 : vector<1x1x1x4x8xf32> to vector<4x8xf32>
    %cst_70 = arith.constant dense<0.000000e+00> : vector<4x8xf32>
    %42 = tpu.matmul %41, %12, %cst_70 {dimension_numbers = #tpu.dot_dimension_numbers<[1], [0], [0], [1], [0, 0, 1, 1], [], []>} : vector<4x8xf32>, vector<8x8xf32>, vector<4x8xf32> -> vector<4x8xf32>
    %43 = arith.addf %39, %42 : vector<4x8xf32>
    %c0_71 = arith.constant 0 : index
    %c0_72 = arith.constant 0 : index
    %c2_73 = arith.constant 2 : index
    %c0_74 = arith.constant 0 : index
    %c0_75 = arith.constant 0 : index
    %44 = vector.load %arg1[%c0_71, %c0_72, %c2_73, %c0_74, %c0_75] : memref<1x1x6x6x8xf32, #tpu.memory_space<vmem>>, vector<1x1x1x4x8xf32>
    %45 = vector.shape_cast %44 : vector<1x1x1x4x8xf32> to vector<4x8xf32>
    %cst_76 = arith.constant dense<0.000000e+00> : vector<4x8xf32>
    %46 = tpu.matmul %45, %14, %cst_76 {dimension_numbers = #tpu.dot_dimension_numbers<[1], [0], [0], [1], [0, 0, 1, 1], [], []>} : vector<4x8xf32>, vector<8x8xf32>, vector<4x8xf32> -> vector<4x8xf32>
    %47 = arith.addf %43, %46 : vector<4x8xf32>
    %c0_77 = arith.constant 0 : index
    %c0_78 = arith.constant 0 : index
    %c2_79 = arith.constant 2 : index
    %c1_80 = arith.constant 1 : index
    %c0_81 = arith.constant 0 : index
    %48 = vector.load %arg1[%c0_77, %c0_78, %c2_79, %c1_80, %c0_81] : memref<1x1x6x6x8xf32, #tpu.memory_space<vmem>>, vector<1x1x1x4x8xf32>
    %49 = vector.shape_cast %48 : vector<1x1x1x4x8xf32> to vector<4x8xf32>
    %cst_82 = arith.constant dense<0.000000e+00> : vector<4x8xf32>
    %50 = tpu.matmul %49, %16, %cst_82 {dimension_numbers = #tpu.dot_dimension_numbers<[1], [0], [0], [1], [0, 0, 1, 1], [], []>} : vector<4x8xf32>, vector<8x8xf32>, vector<4x8xf32> -> vector<4x8xf32>
    %51 = arith.addf %47, %50 : vector<4x8xf32>
    %c0_83 = arith.constant 0 : index
    %c0_84 = arith.constant 0 : index
    %c2_85 = arith.constant 2 : index
    %c2_86 = arith.constant 2 : index
    %c0_87 = arith.constant 0 : index
    %52 = vector.load %arg1[%c0_83, %c0_84, %c2_85, %c2_86, %c0_87] : memref<1x1x6x6x8xf32, #tpu.memory_space<vmem>>, vector<1x1x1x4x8xf32>
    %53 = vector.shape_cast %52 : vector<1x1x1x4x8xf32> to vector<4x8xf32>
    %cst_88 = arith.constant dense<0.000000e+00> : vector<4x8xf32>
    %54 = tpu.matmul %53, %18, %cst_88 {dimension_numbers = #tpu.dot_dimension_numbers<[1], [0], [0], [1], [0, 0, 1, 1], [], []>} : vector<4x8xf32>, vector<8x8xf32>, vector<4x8xf32> -> vector<4x8xf32>
    %55 = arith.addf %51, %54 : vector<4x8xf32>
    %56 = vector.broadcast %0 : vector<1x8xf32> to vector<4x8xf32>
    %57 = arith.addf %55, %56 : vector<4x8xf32>
    %cst_89 = arith.constant 0.000000e+00 : f32
    %58 = vector.broadcast %cst_89 : f32 to vector<4x8xf32>
    %59 = arith.cmpf oge, %57, %58 : vector<4x8xf32>
    %cst_90 = arith.constant 2.000000e-01 : f32
    %60 = vector.broadcast %cst_90 : f32 to vector<4x8xf32>
    %61 = arith.mulf %60, %57 : vector<4x8xf32>
    %62 = arith.select %59, %57, %61 : vector<4x8xi1>, vector<4x8xf32>
    %c0_91 = arith.constant 0 : index
    %c0_92 = arith.constant 0 : index
    %c0_93 = arith.constant 0 : index
    %c0_94 = arith.constant 0 : index
    %63 = vector.load %arg4[%c0_91, %c0_92, %c0_93, %c0_94] : memref<1x4x4x8xf32, #tpu.memory_space<vmem>>, vector<1x1x4x8xf32>
    %64 = vector.shape_cast %63 : vector<1x1x4x8xf32> to vector<4x8xf32>
    %65 = vector.shape_cast %62 : vector<4x8xf32> to vector<1x1x4x8xf32>
    tpu.vector_store %arg4[%c0_91, %c0_92, %c0_93, %c0_94], %65 {strides = array<i32>} : memref<1x4x4x8xf32, #tpu.memory_space<vmem>>, vector<1x1x4x8xf32>,
    %cst_95 = arith.constant 0.000000e+00 : f32
    %66 = vector.broadcast %cst_95 : f32 to vector<4x8xf32>
    %c0_96 = arith.constant 0 : index
    %c0_97 = arith.constant 0 : index
    %c1_98 = arith.constant 1 : index
    %c0_99 = arith.constant 0 : index
    %c0_100 = arith.constant 0 : index
    %67 = vector.load %arg1[%c0_96, %c0_97, %c1_98, %c0_99, %c0_100] : memref<1x1x6x6x8xf32, #tpu.memory_space<vmem>>, vector<1x1x1x4x8xf32>
    %68 = vector.shape_cast %67 : vector<1x1x1x4x8xf32> to vector<4x8xf32>
    %cst_101 = arith.constant dense<0.000000e+00> : vector<4x8xf32>
    %69 = tpu.matmul %68, %2, %cst_101 {dimension_numbers = #tpu.dot_dimension_numbers<[1], [0], [0], [1], [0, 0, 1, 1], [], []>} : vector<4x8xf32>, vector<8x8xf32>, vector<4x8xf32> -> vector<4x8xf32>
    %70 = arith.addf %66, %69 : vector<4x8xf32>
    %c0_102 = arith.constant 0 : index
    %c0_103 = arith.constant 0 : index
    %c1_104 = arith.constant 1 : index
    %c1_105 = arith.constant 1 : index
    %c0_106 = arith.constant 0 : index
    %71 = vector.load %arg1[%c0_102, %c0_103, %c1_104, %c1_105, %c0_106] : memref<1x1x6x6x8xf32, #tpu.memory_space<vmem>>, vector<1x1x1x4x8xf32>
    %72 = vector.shape_cast %71 : vector<1x1x1x4x8xf32> to vector<4x8xf32>
    %cst_107 = arith.constant dense<0.000000e+00> : vector<4x8xf32>
    %73 = tpu.matmul %72, %4, %cst_107 {dimension_numbers = #tpu.dot_dimension_numbers<[1], [0], [0], [1], [0, 0, 1, 1], [], []>} : vector<4x8xf32>, vector<8x8xf32>, vector<4x8xf32> -> vector<4x8xf32>
    %74 = arith.addf %70, %73 : vector<4x8xf32>
    %c0_108 = arith.constant 0 : index
    %c0_109 = arith.constant 0 : index
    %c1_110 = arith.constant 1 : index
    %c2_111 = arith.constant 2 : index
    %c0_112 = arith.constant 0 : index
    %75 = vector.load %arg1[%c0_108, %c0_109, %c1_110, %c2_111, %c0_112] : memref<1x1x6x6x8xf32, #tpu.memory_space<vmem>>, vector<1x1x1x4x8xf32>
    %76 = vector.shape_cast %75 : vector<1x1x1x4x8xf32> to vector<4x8xf32>
    %cst_113 = arith.constant dense<0.000000e+00> : vector<4x8xf32>
    %77 = tpu.matmul %76, %6, %cst_113 {dimension_numbers = #tpu.dot_dimension_numbers<[1], [0], [0], [1], [0, 0, 1, 1], [], []>} : vector<4x8xf32>, vector<8x8xf32>, vector<4x8xf32> -> vector<4x8xf32>
    %78 = arith.addf %74, %77 : vector<4x8xf32>
    %c0_114 = arith.constant 0 : index
    %c0_115 = arith.constant 0 : index
    %c2_116 = arith.constant 2 : index
    %c0_117 = arith.constant 0 : index
    %c0_118 = arith.constant 0 : index
    %79 = vector.load %arg1[%c0_114, %c0_115, %c2_116, %c0_117, %c0_118] : memref<1x1x6x6x8xf32, #tpu.memory_space<vmem>>, vector<1x1x1x4x8xf32>
    %80 = vector.shape_cast %79 : vector<1x1x1x4x8xf32> to vector<4x8xf32>
    %cst_119 = arith.constant dense<0.000000e+00> : vector<4x8xf32>
    %81 = tpu.matmul %80, %8, %cst_119 {dimension_numbers = #tpu.dot_dimension_numbers<[1], [0], [0], [1], [0, 0, 1, 1], [], []>} : vector<4x8xf32>, vector<8x8xf32>, vector<4x8xf32> -> vector<4x8xf32>
    %82 = arith.addf %78, %81 : vector<4x8xf32>
    %c0_120 = arith.constant 0 : index
    %c0_121 = arith.constant 0 : index
    %c2_122 = arith.constant 2 : index
    %c1_123 = arith.constant 1 : index
    %c0_124 = arith.constant 0 : index
    %83 = vector.load %arg1[%c0_120, %c0_121, %c2_122, %c1_123, %c0_124] : memref<1x1x6x6x8xf32, #tpu.memory_space<vmem>>, vector<1x1x1x4x8xf32>
    %84 = vector.shape_cast %83 : vector<1x1x1x4x8xf32> to vector<4x8xf32>
    %cst_125 = arith.constant dense<0.000000e+00> : vector<4x8xf32>
    %85 = tpu.matmul %84, %10, %cst_125 {dimension_numbers = #tpu.dot_dimension_numbers<[1], [0], [0], [1], [0, 0, 1, 1], [], []>} : vector<4x8xf32>, vector<8x8xf32>, vector<4x8xf32> -> vector<4x8xf32>
    %86 = arith.addf %82, %85 : vector<4x8xf32>
    %c0_126 = arith.constant 0 : index
    %c0_127 = arith.constant 0 : index
    %c2_128 = arith.constant 2 : index
    %c2_129 = arith.constant 2 : index
    %c0_130 = arith.constant 0 : index
    %87 = vector.load %arg1[%c0_126, %c0_127, %c2_128, %c2_129, %c0_130] : memref<1x1x6x6x8xf32, #tpu.memory_space<vmem>>, vector<1x1x1x4x8xf32>
    %88 = vector.shape_cast %87 : vector<1x1x1x4x8xf32> to vector<4x8xf32>
    %cst_131 = arith.constant dense<0.000000e+00> : vector<4x8xf32>
    %89 = tpu.matmul %88, %12, %cst_131 {dimension_numbers = #tpu.dot_dimension_numbers<[1], [0], [0], [1], [0, 0, 1, 1], [], []>} : vector<4x8xf32>, vector<8x8xf32>, vector<4x8xf32> -> vector<4x8xf32>
    %90 = arith.addf %86, %89 : vector<4x8xf32>
    %c0_132 = arith.constant 0 : index
    %c0_133 = arith.constant 0 : index
    %c3 = arith.constant 3 : index
    %c0_134 = arith.constant 0 : index
    %c0_135 = arith.constant 0 : index
    %91 = vector.load %arg1[%c0_132, %c0_133, %c3, %c0_134, %c0_135] : memref<1x1x6x6x8xf32, #tpu.memory_space<vmem>>, vector<1x1x1x4x8xf32>
    %92 = vector.shape_cast %91 : vector<1x1x1x4x8xf32> to vector<4x8xf32>
    %cst_136 = arith.constant dense<0.000000e+00> : vector<4x8xf32>
    %93 = tpu.matmul %92, %14, %cst_136 {dimension_numbers = #tpu.dot_dimension_numbers<[1], [0], [0], [1], [0, 0, 1, 1], [], []>} : vector<4x8xf32>, vector<8x8xf32>, vector<4x8xf32> -> vector<4x8xf32>
    %94 = arith.addf %90, %93 : vector<4x8xf32>
    %c0_137 = arith.constant 0 : index
    %c0_138 = arith.constant 0 : index
    %c3_139 = arith.constant 3 : index
    %c1_140 = arith.constant 1 : index
    %c0_141 = arith.constant 0 : index
    %95 = vector.load %arg1[%c0_137, %c0_138, %c3_139, %c1_140, %c0_141] : memref<1x1x6x6x8xf32, #tpu.memory_space<vmem>>, vector<1x1x1x4x8xf32>
    %96 = vector.shape_cast %95 : vector<1x1x1x4x8xf32> to vector<4x8xf32>
    %cst_142 = arith.constant dense<0.000000e+00> : vector<4x8xf32>
    %97 = tpu.matmul %96, %16, %cst_142 {dimension_numbers = #tpu.dot_dimension_numbers<[1], [0], [0], [1], [0, 0, 1, 1], [], []>} : vector<4x8xf32>, vector<8x8xf32>, vector<4x8xf32> -> vector<4x8xf32>
    %98 = arith.addf %94, %97 : vector<4x8xf32>
    %c0_143 = arith.constant 0 : index
    %c0_144 = arith.constant 0 : index
    %c3_145 = arith.constant 3 : index
    %c2_146 = arith.constant 2 : index
    %c0_147 = arith.constant 0 : index
    %99 = vector.load %arg1[%c0_143, %c0_144, %c3_145, %c2_146, %c0_147] : memref<1x1x6x6x8xf32, #tpu.memory_space<vmem>>, vector<1x1x1x4x8xf32>
    %100 = vector.shape_cast %99 : vector<1x1x1x4x8xf32> to vector<4x8xf32>
    %cst_148 = arith.constant dense<0.000000e+00> : vector<4x8xf32>
    %101 = tpu.matmul %100, %18, %cst_148 {dimension_numbers = #tpu.dot_dimension_numbers<[1], [0], [0], [1], [0, 0, 1, 1], [], []>} : vector<4x8xf32>, vector<8x8xf32>, vector<4x8xf32> -> vector<4x8xf32>
    %102 = arith.addf %98, %101 : vector<4x8xf32>
    %103 = vector.broadcast %0 : vector<1x8xf32> to vector<4x8xf32>
    %104 = arith.addf %102, %103 : vector<4x8xf32>
    %cst_149 = arith.constant 0.000000e+00 : f32
    %105 = vector.broadcast %cst_149 : f32 to vector<4x8xf32>
    %106 = arith.cmpf oge, %104, %105 : vector<4x8xf32>
    %cst_150 = arith.constant 2.000000e-01 : f32
    %107 = vector.broadcast %cst_150 : f32 to vector<4x8xf32>
    %108 = arith.mulf %107, %104 : vector<4x8xf32>
    %109 = arith.select %106, %104, %108 : vector<4x8xi1>, vector<4x8xf32>
    %c0_151 = arith.constant 0 : index
    %c1_152 = arith.constant 1 : index
    %c0_153 = arith.constant 0 : index
    %c0_154 = arith.constant 0 : index
    %110 = vector.load %arg4[%c0_151, %c1_152, %c0_153, %c0_154] : memref<1x4x4x8xf32, #tpu.memory_space<vmem>>, vector<1x1x4x8xf32>
    %111 = vector.shape_cast %110 : vector<1x1x4x8xf32> to vector<4x8xf32>
    %112 = vector.shape_cast %109 : vector<4x8xf32> to vector<1x1x4x8xf32>
    tpu.vector_store %arg4[%c0_151, %c1_152, %c0_153, %c0_154], %112 {strides = array<i32>} : memref<1x4x4x8xf32, #tpu.memory_space<vmem>>, vector<1x1x4x8xf32>,
    %cst_155 = arith.constant 0.000000e+00 : f32
    %113 = vector.broadcast %cst_155 : f32 to vector<4x8xf32>
    %c0_156 = arith.constant 0 : index
    %c0_157 = arith.constant 0 : index
    %c2_158 = arith.constant 2 : index
    %c0_159 = arith.constant 0 : index
    %c0_160 = arith.constant 0 : index
    %114 = vector.load %arg1[%c0_156, %c0_157, %c2_158, %c0_159, %c0_160] : memref<1x1x6x6x8xf32, #tpu.memory_space<vmem>>, vector<1x1x1x4x8xf32>
    %115 = vector.shape_cast %114 : vector<1x1x1x4x8xf32> to vector<4x8xf32>
    %cst_161 = arith.constant dense<0.000000e+00> : vector<4x8xf32>
    %116 = tpu.matmul %115, %2, %cst_161 {dimension_numbers = #tpu.dot_dimension_numbers<[1], [0], [0], [1], [0, 0, 1, 1], [], []>} : vector<4x8xf32>, vector<8x8xf32>, vector<4x8xf32> -> vector<4x8xf32>
    %117 = arith.addf %113, %116 : vector<4x8xf32>
    %c0_162 = arith.constant 0 : index
    %c0_163 = arith.constant 0 : index
    %c2_164 = arith.constant 2 : index
    %c1_165 = arith.constant 1 : index
    %c0_166 = arith.constant 0 : index
    %118 = vector.load %arg1[%c0_162, %c0_163, %c2_164, %c1_165, %c0_166] : memref<1x1x6x6x8xf32, #tpu.memory_space<vmem>>, vector<1x1x1x4x8xf32>
    %119 = vector.shape_cast %118 : vector<1x1x1x4x8xf32> to vector<4x8xf32>
    %cst_167 = arith.constant dense<0.000000e+00> : vector<4x8xf32>
    %120 = tpu.matmul %119, %4, %cst_167 {dimension_numbers = #tpu.dot_dimension_numbers<[1], [0], [0], [1], [0, 0, 1, 1], [], []>} : vector<4x8xf32>, vector<8x8xf32>, vector<4x8xf32> -> vector<4x8xf32>
    %121 = arith.addf %117, %120 : vector<4x8xf32>
    %c0_168 = arith.constant 0 : index
    %c0_169 = arith.constant 0 : index
    %c2_170 = arith.constant 2 : index
    %c2_171 = arith.constant 2 : index
    %c0_172 = arith.constant 0 : index
    %122 = vector.load %arg1[%c0_168, %c0_169, %c2_170, %c2_171, %c0_172] : memref<1x1x6x6x8xf32, #tpu.memory_space<vmem>>, vector<1x1x1x4x8xf32>
    %123 = vector.shape_cast %122 : vector<1x1x1x4x8xf32> to vector<4x8xf32>
    %cst_173 = arith.constant dense<0.000000e+00> : vector<4x8xf32>
    %124 = tpu.matmul %123, %6, %cst_173 {dimension_numbers = #tpu.dot_dimension_numbers<[1], [0], [0], [1], [0, 0, 1, 1], [], []>} : vector<4x8xf32>, vector<8x8xf32>, vector<4x8xf32> -> vector<4x8xf32>
    %125 = arith.addf %121, %124 : vector<4x8xf32>
    %c0_174 = arith.constant 0 : index
    %c0_175 = arith.constant 0 : index
    %c3_176 = arith.constant 3 : index
    %c0_177 = arith.constant 0 : index
    %c0_178 = arith.constant 0 : index
    %126 = vector.load %arg1[%c0_174, %c0_175, %c3_176, %c0_177, %c0_178] : memref<1x1x6x6x8xf32, #tpu.memory_space<vmem>>, vector<1x1x1x4x8xf32>
    %127 = vector.shape_cast %126 : vector<1x1x1x4x8xf32> to vector<4x8xf32>
    %cst_179 = arith.constant dense<0.000000e+00> : vector<4x8xf32>
    %128 = tpu.matmul %127, %8, %cst_179 {dimension_numbers = #tpu.dot_dimension_numbers<[1], [0], [0], [1], [0, 0, 1, 1], [], []>} : vector<4x8xf32>, vector<8x8xf32>, vector<4x8xf32> -> vector<4x8xf32>
    %129 = arith.addf %125, %128 : vector<4x8xf32>
    %c0_180 = arith.constant 0 : index
    %c0_181 = arith.constant 0 : index
    %c3_182 = arith.constant 3 : index
    %c1_183 = arith.constant 1 : index
    %c0_184 = arith.constant 0 : index
    %130 = vector.load %arg1[%c0_180, %c0_181, %c3_182, %c1_183, %c0_184] : memref<1x1x6x6x8xf32, #tpu.memory_space<vmem>>, vector<1x1x1x4x8xf32>
    %131 = vector.shape_cast %130 : vector<1x1x1x4x8xf32> to vector<4x8xf32>
    %cst_185 = arith.constant dense<0.000000e+00> : vector<4x8xf32>
    %132 = tpu.matmul %131, %10, %cst_185 {dimension_numbers = #tpu.dot_dimension_numbers<[1], [0], [0], [1], [0, 0, 1, 1], [], []>} : vector<4x8xf32>, vector<8x8xf32>, vector<4x8xf32> -> vector<4x8xf32>
    %133 = arith.addf %129, %132 : vector<4x8xf32>
    %c0_186 = arith.constant 0 : index
    %c0_187 = arith.constant 0 : index
    %c3_188 = arith.constant 3 : index
    %c2_189 = arith.constant 2 : index
    %c0_190 = arith.constant 0 : index
    %134 = vector.load %arg1[%c0_186, %c0_187, %c3_188, %c2_189, %c0_190] : memref<1x1x6x6x8xf32, #tpu.memory_space<vmem>>, vector<1x1x1x4x8xf32>
    %135 = vector.shape_cast %134 : vector<1x1x1x4x8xf32> to vector<4x8xf32>
    %cst_191 = arith.constant dense<0.000000e+00> : vector<4x8xf32>
    %136 = tpu.matmul %135, %12, %cst_191 {dimension_numbers = #tpu.dot_dimension_numbers<[1], [0], [0], [1], [0, 0, 1, 1], [], []>} : vector<4x8xf32>, vector<8x8xf32>, vector<4x8xf32> -> vector<4x8xf32>
    %137 = arith.addf %133, %136 : vector<4x8xf32>
    %c0_192 = arith.constant 0 : index
    %c0_193 = arith.constant 0 : index
    %c4 = arith.constant 4 : index
    %c0_194 = arith.constant 0 : index
    %c0_195 = arith.constant 0 : index
    %138 = vector.load %arg1[%c0_192, %c0_193, %c4, %c0_194, %c0_195] : memref<1x1x6x6x8xf32, #tpu.memory_space<vmem>>, vector<1x1x1x4x8xf32>
    %139 = vector.shape_cast %138 : vector<1x1x1x4x8xf32> to vector<4x8xf32>
    %cst_196 = arith.constant dense<0.000000e+00> : vector<4x8xf32>
    %140 = tpu.matmul %139, %14, %cst_196 {dimension_numbers = #tpu.dot_dimension_numbers<[1], [0], [0], [1], [0, 0, 1, 1], [], []>} : vector<4x8xf32>, vector<8x8xf32>, vector<4x8xf32> -> vector<4x8xf32>
    %141 = arith.addf %137, %140 : vector<4x8xf32>
    %c0_197 = arith.constant 0 : index
    %c0_198 = arith.constant 0 : index
    %c4_199 = arith.constant 4 : index
    %c1_200 = arith.constant 1 : index
    %c0_201 = arith.constant 0 : index
    %142 = vector.load %arg1[%c0_197, %c0_198, %c4_199, %c1_200, %c0_201] : memref<1x1x6x6x8xf32, #tpu.memory_space<vmem>>, vector<1x1x1x4x8xf32>
    %143 = vector.shape_cast %142 : vector<1x1x1x4x8xf32> to vector<4x8xf32>
    %cst_202 = arith.constant dense<0.000000e+00> : vector<4x8xf32>
    %144 = tpu.matmul %143, %16, %cst_202 {dimension_numbers = #tpu.dot_dimension_numbers<[1], [0], [0], [1], [0, 0, 1, 1], [], []>} : vector<4x8xf32>, vector<8x8xf32>, vector<4x8xf32> -> vector<4x8xf32>
    %145 = arith.addf %141, %144 : vector<4x8xf32>
    %c0_203 = arith.constant 0 : index
    %c0_204 = arith.constant 0 : index
    %c4_205 = arith.constant 4 : index
    %c2_206 = arith.constant 2 : index
    %c0_207 = arith.constant 0 : index
    %146 = vector.load %arg1[%c0_203, %c0_204, %c4_205, %c2_206, %c0_207] : memref<1x1x6x6x8xf32, #tpu.memory_space<vmem>>, vector<1x1x1x4x8xf32>
    %147 = vector.shape_cast %146 : vector<1x1x1x4x8xf32> to vector<4x8xf32>
    %cst_208 = arith.constant dense<0.000000e+00> : vector<4x8xf32>
    %148 = tpu.matmul %147, %18, %cst_208 {dimension_numbers = #tpu.dot_dimension_numbers<[1], [0], [0], [1], [0, 0, 1, 1], [], []>} : vector<4x8xf32>, vector<8x8xf32>, vector<4x8xf32> -> vector<4x8xf32>
    %149 = arith.addf %145, %148 : vector<4x8xf32>
    %150 = vector.broadcast %0 : vector<1x8xf32> to vector<4x8xf32>
    %151 = arith.addf %149, %150 : vector<4x8xf32>
    %cst_209 = arith.constant 0.000000e+00 : f32
    %152 = vector.broadcast %cst_209 : f32 to vector<4x8xf32>
    %153 = arith.cmpf oge, %151, %152 : vector<4x8xf32>
    %cst_210 = arith.constant 2.000000e-01 : f32
    %154 = vector.broadcast %cst_210 : f32 to vector<4x8xf32>
    %155 = arith.mulf %154, %151 : vector<4x8xf32>
    %156 = arith.select %153, %151, %155 : vector<4x8xi1>, vector<4x8xf32>
    %c0_211 = arith.constant 0 : index
    %c2_212 = arith.constant 2 : index
    %c0_213 = arith.constant 0 : index
    %c0_214 = arith.constant 0 : index
    %157 = vector.load %arg4[%c0_211, %c2_212, %c0_213, %c0_214] : memref<1x4x4x8xf32, #tpu.memory_space<vmem>>, vector<1x1x4x8xf32>
    %158 = vector.shape_cast %157 : vector<1x1x4x8xf32> to vector<4x8xf32>
    %159 = vector.shape_cast %156 : vector<4x8xf32> to vector<1x1x4x8xf32>
    tpu.vector_store %arg4[%c0_211, %c2_212, %c0_213, %c0_214], %159 {strides = array<i32>} : memref<1x4x4x8xf32, #tpu.memory_space<vmem>>, vector<1x1x4x8xf32>,
    %cst_215 = arith.constant 0.000000e+00 : f32
    %160 = vector.broadcast %cst_215 : f32 to vector<4x8xf32>
    %c0_216 = arith.constant 0 : index
    %c0_217 = arith.constant 0 : index
    %c3_218 = arith.constant 3 : index
    %c0_219 = arith.constant 0 : index
    %c0_220 = arith.constant 0 : index
    %161 = vector.load %arg1[%c0_216, %c0_217, %c3_218, %c0_219, %c0_220] : memref<1x1x6x6x8xf32, #tpu.memory_space<vmem>>, vector<1x1x1x4x8xf32>
    %162 = vector.shape_cast %161 : vector<1x1x1x4x8xf32> to vector<4x8xf32>
    %cst_221 = arith.constant dense<0.000000e+00> : vector<4x8xf32>
    %163 = tpu.matmul %162, %2, %cst_221 {dimension_numbers = #tpu.dot_dimension_numbers<[1], [0], [0], [1], [0, 0, 1, 1], [], []>} : vector<4x8xf32>, vector<8x8xf32>, vector<4x8xf32> -> vector<4x8xf32>
    %164 = arith.addf %160, %163 : vector<4x8xf32>
    %c0_222 = arith.constant 0 : index
    %c0_223 = arith.constant 0 : index
    %c3_224 = arith.constant 3 : index
    %c1_225 = arith.constant 1 : index
    %c0_226 = arith.constant 0 : index
    %165 = vector.load %arg1[%c0_222, %c0_223, %c3_224, %c1_225, %c0_226] : memref<1x1x6x6x8xf32, #tpu.memory_space<vmem>>, vector<1x1x1x4x8xf32>
    %166 = vector.shape_cast %165 : vector<1x1x1x4x8xf32> to vector<4x8xf32>
    %cst_227 = arith.constant dense<0.000000e+00> : vector<4x8xf32>
    %167 = tpu.matmul %166, %4, %cst_227 {dimension_numbers = #tpu.dot_dimension_numbers<[1], [0], [0], [1], [0, 0, 1, 1], [], []>} : vector<4x8xf32>, vector<8x8xf32>, vector<4x8xf32> -> vector<4x8xf32>
    %168 = arith.addf %164, %167 : vector<4x8xf32>
    %c0_228 = arith.constant 0 : index
    %c0_229 = arith.constant 0 : index
    %c3_230 = arith.constant 3 : index
    %c2_231 = arith.constant 2 : index
    %c0_232 = arith.constant 0 : index
    %169 = vector.load %arg1[%c0_228, %c0_229, %c3_230, %c2_231, %c0_232] : memref<1x1x6x6x8xf32, #tpu.memory_space<vmem>>, vector<1x1x1x4x8xf32>
    %170 = vector.shape_cast %169 : vector<1x1x1x4x8xf32> to vector<4x8xf32>
    %cst_233 = arith.constant dense<0.000000e+00> : vector<4x8xf32>
    %171 = tpu.matmul %170, %6, %cst_233 {dimension_numbers = #tpu.dot_dimension_numbers<[1], [0], [0], [1], [0, 0, 1, 1], [], []>} : vector<4x8xf32>, vector<8x8xf32>, vector<4x8xf32> -> vector<4x8xf32>
    %172 = arith.addf %168, %171 : vector<4x8xf32>
    %c0_234 = arith.constant 0 : index
    %c0_235 = arith.constant 0 : index
    %c4_236 = arith.constant 4 : index
    %c0_237 = arith.constant 0 : index
    %c0_238 = arith.constant 0 : index
    %173 = vector.load %arg1[%c0_234, %c0_235, %c4_236, %c0_237, %c0_238] : memref<1x1x6x6x8xf32, #tpu.memory_space<vmem>>, vector<1x1x1x4x8xf32>
    %174 = vector.shape_cast %173 : vector<1x1x1x4x8xf32> to vector<4x8xf32>
    %cst_239 = arith.constant dense<0.000000e+00> : vector<4x8xf32>
    %175 = tpu.matmul %174, %8, %cst_239 {dimension_numbers = #tpu.dot_dimension_numbers<[1], [0], [0], [1], [0, 0, 1, 1], [], []>} : vector<4x8xf32>, vector<8x8xf32>, vector<4x8xf32> -> vector<4x8xf32>
    %176 = arith.addf %172, %175 : vector<4x8xf32>
    %c0_240 = arith.constant 0 : index
    %c0_241 = arith.constant 0 : index
    %c4_242 = arith.constant 4 : index
    %c1_243 = arith.constant 1 : index
    %c0_244 = arith.constant 0 : index
    %177 = vector.load %arg1[%c0_240, %c0_241, %c4_242, %c1_243, %c0_244] : memref<1x1x6x6x8xf32, #tpu.memory_space<vmem>>, vector<1x1x1x4x8xf32>
    %178 = vector.shape_cast %177 : vector<1x1x1x4x8xf32> to vector<4x8xf32>
    %cst_245 = arith.constant dense<0.000000e+00> : vector<4x8xf32>
    %179 = tpu.matmul %178, %10, %cst_245 {dimension_numbers = #tpu.dot_dimension_numbers<[1], [0], [0], [1], [0, 0, 1, 1], [], []>} : vector<4x8xf32>, vector<8x8xf32>, vector<4x8xf32> -> vector<4x8xf32>
    %180 = arith.addf %176, %179 : vector<4x8xf32>
    %c0_246 = arith.constant 0 : index
    %c0_247 = arith.constant 0 : index
    %c4_248 = arith.constant 4 : index
    %c2_249 = arith.constant 2 : index
    %c0_250 = arith.constant 0 : index
    %181 = vector.load %arg1[%c0_246, %c0_247, %c4_248, %c2_249, %c0_250] : memref<1x1x6x6x8xf32, #tpu.memory_space<vmem>>, vector<1x1x1x4x8xf32>
    %182 = vector.shape_cast %181 : vector<1x1x1x4x8xf32> to vector<4x8xf32>
    %cst_251 = arith.constant dense<0.000000e+00> : vector<4x8xf32>
    %183 = tpu.matmul %182, %12, %cst_251 {dimension_numbers = #tpu.dot_dimension_numbers<[1], [0], [0], [1], [0, 0, 1, 1], [], []>} : vector<4x8xf32>, vector<8x8xf32>, vector<4x8xf32> -> vector<4x8xf32>
    %184 = arith.addf %180, %183 : vector<4x8xf32>
    %c0_252 = arith.constant 0 : index
    %c0_253 = arith.constant 0 : index
    %c5 = arith.constant 5 : index
    %c0_254 = arith.constant 0 : index
    %c0_255 = arith.constant 0 : index
    %185 = vector.load %arg1[%c0_252, %c0_253, %c5, %c0_254, %c0_255] : memref<1x1x6x6x8xf32, #tpu.memory_space<vmem>>, vector<1x1x1x4x8xf32>
    %186 = vector.shape_cast %185 : vector<1x1x1x4x8xf32> to vector<4x8xf32>
    %cst_256 = arith.constant dense<0.000000e+00> : vector<4x8xf32>
    %187 = tpu.matmul %186, %14, %cst_256 {dimension_numbers = #tpu.dot_dimension_numbers<[1], [0], [0], [1], [0, 0, 1, 1], [], []>} : vector<4x8xf32>, vector<8x8xf32>, vector<4x8xf32> -> vector<4x8xf32>
    %188 = arith.addf %184, %187 : vector<4x8xf32>
    %c0_257 = arith.constant 0 : index
    %c0_258 = arith.constant 0 : index
    %c5_259 = arith.constant 5 : index
    %c1_260 = arith.constant 1 : index
    %c0_261 = arith.constant 0 : index
    %189 = vector.load %arg1[%c0_257, %c0_258, %c5_259, %c1_260, %c0_261] : memref<1x1x6x6x8xf32, #tpu.memory_space<vmem>>, vector<1x1x1x4x8xf32>
    %190 = vector.shape_cast %189 : vector<1x1x1x4x8xf32> to vector<4x8xf32>
    %cst_262 = arith.constant dense<0.000000e+00> : vector<4x8xf32>
    %191 = tpu.matmul %190, %16, %cst_262 {dimension_numbers = #tpu.dot_dimension_numbers<[1], [0], [0], [1], [0, 0, 1, 1], [], []>} : vector<4x8xf32>, vector<8x8xf32>, vector<4x8xf32> -> vector<4x8xf32>
    %192 = arith.addf %188, %191 : vector<4x8xf32>
    %c0_263 = arith.constant 0 : index
    %c0_264 = arith.constant 0 : index
    %c5_265 = arith.constant 5 : index
    %c2_266 = arith.constant 2 : index
    %c0_267 = arith.constant 0 : index
    %193 = vector.load %arg1[%c0_263, %c0_264, %c5_265, %c2_266, %c0_267] : memref<1x1x6x6x8xf32, #tpu.memory_space<vmem>>, vector<1x1x1x4x8xf32>
    %194 = vector.shape_cast %193 : vector<1x1x1x4x8xf32> to vector<4x8xf32>
    %cst_268 = arith.constant dense<0.000000e+00> : vector<4x8xf32>
    %195 = tpu.matmul %194, %18, %cst_268 {dimension_numbers = #tpu.dot_dimension_numbers<[1], [0], [0], [1], [0, 0, 1, 1], [], []>} : vector<4x8xf32>, vector<8x8xf32>, vector<4x8xf32> -> vector<4x8xf32>
    %196 = arith.addf %192, %195 : vector<4x8xf32>
    %197 = vector.broadcast %0 : vector<1x8xf32> to vector<4x8xf32>
    %198 = arith.addf %196, %197 : vector<4x8xf32>
    %cst_269 = arith.constant 0.000000e+00 : f32
    %199 = vector.broadcast %cst_269 : f32 to vector<4x8xf32>
    %200 = arith.cmpf oge, %198, %199 : vector<4x8xf32>
    %cst_270 = arith.constant 2.000000e-01 : f32
    %201 = vector.broadcast %cst_270 : f32 to vector<4x8xf32>
    %202 = arith.mulf %201, %198 : vector<4x8xf32>
    %203 = arith.select %200, %198, %202 : vector<4x8xi1>, vector<4x8xf32>
    %c0_271 = arith.constant 0 : index
    %c3_272 = arith.constant 3 : index
    %c0_273 = arith.constant 0 : index
    %c0_274 = arith.constant 0 : index
    %204 = vector.load %arg4[%c0_271, %c3_272, %c0_273, %c0_274] : memref<1x4x4x8xf32, #tpu.memory_space<vmem>>, vector<1x1x4x8xf32>
    %205 = vector.shape_cast %204 : vector<1x1x4x8xf32> to vector<4x8xf32>
    %206 = vector.shape_cast %203 : vector<4x8xf32> to vector<1x1x4x8xf32>
    tpu.vector_store %arg4[%c0_271, %c3_272, %c0_273, %c0_274], %206 {strides = array<i32>} : memref<1x4x4x8xf32, #tpu.memory_space<vmem>>, vector<1x1x4x8xf32>,
    return
  }
  func.func @transform_0(%arg0: i32) -> (i32, i32, i32, i32, i32) {
    %c0_i32 = arith.constant 0 : i32
    %c0_i32_0 = arith.constant 0 : i32
    %c0_i32_1 = arith.constant 0 : i32
    %c0_i32_2 = arith.constant 0 : i32
    %c0_i32_3 = arith.constant 0 : i32
    return %arg0, %c0_i32, %c0_i32_0, %c0_i32_1, %c0_i32_2 : i32, i32, i32, i32, i32
  }
  func.func @transform_1(%arg0: i32) -> (i32, i32, i32, i32) {
    %c0_i32 = arith.constant 0 : i32
    %c0_i32_0 = arith.constant 0 : i32
    %c0_i32_1 = arith.constant 0 : i32
    %c0_i32_2 = arith.constant 0 : i32
    %c0_i32_3 = arith.constant 0 : i32
    return %c0_i32, %c0_i32_0, %c0_i32_1, %c0_i32_2 : i32, i32, i32, i32
  }
  func.func @transform_2(%arg0: i32) -> (i32, i32) {
    %c0_i32 = arith.constant 0 : i32
    %c0_i32_0 = arith.constant 0 : i32
    %c0_i32_1 = arith.constant 0 : i32
    return %c0_i32, %c0_i32_0 : i32, i32
  }
  func.func @transform_3(%arg0: i32) -> (i32, i32, i32, i32) {
    %c0_i32 = arith.constant 0 : i32
    %c0_i32_0 = arith.constant 0 : i32
    %c0_i32_1 = arith.constant 0 : i32
    %c0_i32_2 = arith.constant 0 : i32
    return %arg0, %c0_i32, %c0_i32_0, %c0_i32_1 : i32, i32, i32, i32
  }
}

module attributes {stable_mosaic.version = 11 : i64} {
  func.func @_conv3x3_kernel(%arg0: i32, %arg1: memref<1x4x5x5x8xf32, #tpu.memory_space<vmem>>, %arg2: memref<3x3x8x8xf32, #tpu.memory_space<vmem>>, %arg3: memref<1x8xf32, #tpu.memory_space<vmem>>, %arg4: memref<1x4x4x8xf32, #tpu.memory_space<vmem>>) attributes {dimension_semantics = [#tpu.dimension_semantics<parallel>], iteration_bounds = array<i64: 2>, scalar_prefetch = 0 : i64, scratch_operands = 0 : i64, tpu.core_type = #tpu.core_type<tc>, window_params = [{transform_indices = @transform_0, window_bounds = array<i64: 1, 4, 5, 5, 8>}, {pipeline_mode = #tpu.pipeline_mode<synchronous>, transform_indices = @transform_1, window_bounds = array<i64: 3, 3, 8, 8>}, {pipeline_mode = #tpu.pipeline_mode<synchronous>, transform_indices = @transform_2, window_bounds = array<i64: 1, 8>}, {transform_indices = @transform_3, window_bounds = array<i64: 1, 4, 4, 8>}]} {
    %c0 = arith.constant 0 : index
    %c0_0 = arith.constant 0 : index
    %0 = vector.load %arg3[%c0, %c0_0] : memref<1x8xf32, #tpu.memory_space<vmem>>, vector<1x8xf32>
    %c0_1 = arith.constant 0 : index
    %c0_2 = arith.constant 0 : index
    %c0_3 = arith.constant 0 : index
    %c0_4 = arith.constant 0 : index
    %1 = vector.load %arg2[%c0_1, %c0_2, %c0_3, %c0_4] : memref<3x3x8x8xf32, #tpu.memory_space<vmem>>, vector<1x1x8x8xf32>
    %2 = vector.shape_cast %1 : vector<1x1x8x8xf32> to vector<8x8xf32>
    %c0_5 = arith.constant 0 : index
    %c1 = arith.constant 1 : index
    %c0_6 = arith.constant 0 : index
    %c0_7 = arith.constant 0 : index
    %3 = vector.load %arg2[%c0_5, %c1, %c0_6, %c0_7] : memref<3x3x8x8xf32, #tpu.memory_space<vmem>>, vector<1x1x8x8xf32>
    %4 = vector.shape_cast %3 : vector<1x1x8x8xf32> to vector<8x8xf32>
    %c0_8 = arith.constant 0 : index
    %c2 = arith.constant 2 : index
    %c0_9 = arith.constant 0 : index
    %c0_10 = arith.constant 0 : index
    %5 = vector.load %arg2[%c0_8, %c2, %c0_9, %c0_10] : memref<3x3x8x8xf32, #tpu.memory_space<vmem>>, vector<1x1x8x8xf32>
    %6 = vector.shape_cast %5 : vector<1x1x8x8xf32> to vector<8x8xf32>
    %c1_11 = arith.constant 1 : index
    %c0_12 = arith.constant 0 : index
    %c0_13 = arith.constant 0 : index
    %c0_14 = arith.constant 0 : index
    %7 = vector.load %arg2[%c1_11, %c0_12, %c0_13, %c0_14] : memref<3x3x8x8xf32, #tpu.memory_space<vmem>>, vector<1x1x8x8xf32>
    %8 = vector.shape_cast %7 : vector<1x1x8x8xf32> to vector<8x8xf32>
    %c1_15 = arith.constant 1 : index
    %c1_16 = arith.constant 1 : index
    %c0_17 = arith.constant 0 : index
    %c0_18 = arith.constant 0 : index
    %9 = vector.load %arg2[%c1_15, %c1_16, %c0_17, %c0_18] : memref<3x3x8x8xf32, #tpu.memory_space<vmem>>, vector<1x1x8x8xf32>
    %10 = vector.shape_cast %9 : vector<1x1x8x8xf32> to vector<8x8xf32>
    %c1_19 = arith.constant 1 : index
    %c2_20 = arith.constant 2 : index
    %c0_21 = arith.constant 0 : index
    %c0_22 = arith.constant 0 : index
    %11 = vector.load %arg2[%c1_19, %c2_20, %c0_21, %c0_22] : memref<3x3x8x8xf32, #tpu.memory_space<vmem>>, vector<1x1x8x8xf32>
    %12 = vector.shape_cast %11 : vector<1x1x8x8xf32> to vector<8x8xf32>
    %c2_23 = arith.constant 2 : index
    %c0_24 = arith.constant 0 : index
    %c0_25 = arith.constant 0 : index
    %c0_26 = arith.constant 0 : index
    %13 = vector.load %arg2[%c2_23, %c0_24, %c0_25, %c0_26] : memref<3x3x8x8xf32, #tpu.memory_space<vmem>>, vector<1x1x8x8xf32>
    %14 = vector.shape_cast %13 : vector<1x1x8x8xf32> to vector<8x8xf32>
    %c2_27 = arith.constant 2 : index
    %c1_28 = arith.constant 1 : index
    %c0_29 = arith.constant 0 : index
    %c0_30 = arith.constant 0 : index
    %15 = vector.load %arg2[%c2_27, %c1_28, %c0_29, %c0_30] : memref<3x3x8x8xf32, #tpu.memory_space<vmem>>, vector<1x1x8x8xf32>
    %16 = vector.shape_cast %15 : vector<1x1x8x8xf32> to vector<8x8xf32>
    %c2_31 = arith.constant 2 : index
    %c2_32 = arith.constant 2 : index
    %c0_33 = arith.constant 0 : index
    %c0_34 = arith.constant 0 : index
    %17 = vector.load %arg2[%c2_31, %c2_32, %c0_33, %c0_34] : memref<3x3x8x8xf32, #tpu.memory_space<vmem>>, vector<1x1x8x8xf32>
    %18 = vector.shape_cast %17 : vector<1x1x8x8xf32> to vector<8x8xf32>
    %cst = arith.constant 0.000000e+00 : f32
    %19 = vector.broadcast %cst : f32 to vector<4x8xf32>
    %c0_35 = arith.constant 0 : index
    %c0_36 = arith.constant 0 : index
    %c0_37 = arith.constant 0 : index
    %c0_38 = arith.constant 0 : index
    %c0_39 = arith.constant 0 : index
    %20 = vector.load %arg1[%c0_35, %c0_36, %c0_37, %c0_38, %c0_39] : memref<1x4x5x5x8xf32, #tpu.memory_space<vmem>>, vector<1x1x1x4x8xf32>
    %21 = vector.shape_cast %20 : vector<1x1x1x4x8xf32> to vector<4x8xf32>
    %cst_40 = arith.constant dense<0.000000e+00> : vector<4x8xf32>
    %22 = tpu.matmul %21, %2, %cst_40 {dimension_numbers = #tpu.dot_dimension_numbers<[1], [0], [0], [1], [0, 0, 1, 1], [], []>} : vector<4x8xf32>, vector<8x8xf32>, vector<4x8xf32> -> vector<4x8xf32>
    %23 = arith.addf %19, %22 : vector<4x8xf32>
    %c0_41 = arith.constant 0 : index
    %c1_42 = arith.constant 1 : index
    %c0_43 = arith.constant 0 : index
    %c0_44 = arith.constant 0 : index
    %c0_45 = arith.constant 0 : index
    %24 = vector.load %arg1[%c0_41, %c1_42, %c0_43, %c0_44, %c0_45] : memref<1x4x5x5x8xf32, #tpu.memory_space<vmem>>, vector<1x1x1x4x8xf32>
    %25 = vector.shape_cast %24 : vector<1x1x1x4x8xf32> to vector<4x8xf32>
    %cst_46 = arith.constant dense<0.000000e+00> : vector<4x8xf32>
    %26 = tpu.matmul %25, %4, %cst_46 {dimension_numbers = #tpu.dot_dimension_numbers<[1], [0], [0], [1], [0, 0, 1, 1], [], []>} : vector<4x8xf32>, vector<8x8xf32>, vector<4x8xf32> -> vector<4x8xf32>
    %27 = arith.addf %23, %26 : vector<4x8xf32>
    %c0_47 = arith.constant 0 : index
    %c0_48 = arith.constant 0 : index
    %c0_49 = arith.constant 0 : index
    %c1_50 = arith.constant 1 : index
    %c0_51 = arith.constant 0 : index
    %28 = vector.load %arg1[%c0_47, %c0_48, %c0_49, %c1_50, %c0_51] : memref<1x4x5x5x8xf32, #tpu.memory_space<vmem>>, vector<1x1x1x4x8xf32>
    %29 = vector.shape_cast %28 : vector<1x1x1x4x8xf32> to vector<4x8xf32>
    %cst_52 = arith.constant dense<0.000000e+00> : vector<4x8xf32>
    %30 = tpu.matmul %29, %6, %cst_52 {dimension_numbers = #tpu.dot_dimension_numbers<[1], [0], [0], [1], [0, 0, 1, 1], [], []>} : vector<4x8xf32>, vector<8x8xf32>, vector<4x8xf32> -> vector<4x8xf32>
    %31 = arith.addf %27, %30 : vector<4x8xf32>
    %c0_53 = arith.constant 0 : index
    %c2_54 = arith.constant 2 : index
    %c0_55 = arith.constant 0 : index
    %c0_56 = arith.constant 0 : index
    %c0_57 = arith.constant 0 : index
    %32 = vector.load %arg1[%c0_53, %c2_54, %c0_55, %c0_56, %c0_57] : memref<1x4x5x5x8xf32, #tpu.memory_space<vmem>>, vector<1x1x1x4x8xf32>
    %33 = vector.shape_cast %32 : vector<1x1x1x4x8xf32> to vector<4x8xf32>
    %cst_58 = arith.constant dense<0.000000e+00> : vector<4x8xf32>
    %34 = tpu.matmul %33, %8, %cst_58 {dimension_numbers = #tpu.dot_dimension_numbers<[1], [0], [0], [1], [0, 0, 1, 1], [], []>} : vector<4x8xf32>, vector<8x8xf32>, vector<4x8xf32> -> vector<4x8xf32>
    %35 = arith.addf %31, %34 : vector<4x8xf32>
    %c0_59 = arith.constant 0 : index
    %c3 = arith.constant 3 : index
    %c0_60 = arith.constant 0 : index
    %c0_61 = arith.constant 0 : index
    %c0_62 = arith.constant 0 : index
    %36 = vector.load %arg1[%c0_59, %c3, %c0_60, %c0_61, %c0_62] : memref<1x4x5x5x8xf32, #tpu.memory_space<vmem>>, vector<1x1x1x4x8xf32>
    %37 = vector.shape_cast %36 : vector<1x1x1x4x8xf32> to vector<4x8xf32>
    %cst_63 = arith.constant dense<0.000000e+00> : vector<4x8xf32>
    %38 = tpu.matmul %37, %10, %cst_63 {dimension_numbers = #tpu.dot_dimension_numbers<[1], [0], [0], [1], [0, 0, 1, 1], [], []>} : vector<4x8xf32>, vector<8x8xf32>, vector<4x8xf32> -> vector<4x8xf32>
    %39 = arith.addf %35, %38 : vector<4x8xf32>
    %c0_64 = arith.constant 0 : index
    %c2_65 = arith.constant 2 : index
    %c0_66 = arith.constant 0 : index
    %c1_67 = arith.constant 1 : index
    %c0_68 = arith.constant 0 : index
    %40 = vector.load %arg1[%c0_64, %c2_65, %c0_66, %c1_67, %c0_68] : memref<1x4x5x5x8xf32, #tpu.memory_space<vmem>>, vector<1x1x1x4x8xf32>
    %41 = vector.shape_cast %40 : vector<1x1x1x4x8xf32> to vector<4x8xf32>
    %cst_69 = arith.constant dense<0.000000e+00> : vector<4x8xf32>
    %42 = tpu.matmul %41, %12, %cst_69 {dimension_numbers = #tpu.dot_dimension_numbers<[1], [0], [0], [1], [0, 0, 1, 1], [], []>} : vector<4x8xf32>, vector<8x8xf32>, vector<4x8xf32> -> vector<4x8xf32>
    %43 = arith.addf %39, %42 : vector<4x8xf32>
    %c0_70 = arith.constant 0 : index
    %c0_71 = arith.constant 0 : index
    %c1_72 = arith.constant 1 : index
    %c0_73 = arith.constant 0 : index
    %c0_74 = arith.constant 0 : index
    %44 = vector.load %arg1[%c0_70, %c0_71, %c1_72, %c0_73, %c0_74] : memref<1x4x5x5x8xf32, #tpu.memory_space<vmem>>, vector<1x1x1x4x8xf32>
    %45 = vector.shape_cast %44 : vector<1x1x1x4x8xf32> to vector<4x8xf32>
    %cst_75 = arith.constant dense<0.000000e+00> : vector<4x8xf32>
    %46 = tpu.matmul %45, %14, %cst_75 {dimension_numbers = #tpu.dot_dimension_numbers<[1], [0], [0], [1], [0, 0, 1, 1], [], []>} : vector<4x8xf32>, vector<8x8xf32>, vector<4x8xf32> -> vector<4x8xf32>
    %47 = arith.addf %43, %46 : vector<4x8xf32>
    %c0_76 = arith.constant 0 : index
    %c1_77 = arith.constant 1 : index
    %c1_78 = arith.constant 1 : index
    %c0_79 = arith.constant 0 : index
    %c0_80 = arith.constant 0 : index
    %48 = vector.load %arg1[%c0_76, %c1_77, %c1_78, %c0_79, %c0_80] : memref<1x4x5x5x8xf32, #tpu.memory_space<vmem>>, vector<1x1x1x4x8xf32>
    %49 = vector.shape_cast %48 : vector<1x1x1x4x8xf32> to vector<4x8xf32>
    %cst_81 = arith.constant dense<0.000000e+00> : vector<4x8xf32>
    %50 = tpu.matmul %49, %16, %cst_81 {dimension_numbers = #tpu.dot_dimension_numbers<[1], [0], [0], [1], [0, 0, 1, 1], [], []>} : vector<4x8xf32>, vector<8x8xf32>, vector<4x8xf32> -> vector<4x8xf32>
    %51 = arith.addf %47, %50 : vector<4x8xf32>
    %c0_82 = arith.constant 0 : index
    %c0_83 = arith.constant 0 : index
    %c1_84 = arith.constant 1 : index
    %c1_85 = arith.constant 1 : index
    %c0_86 = arith.constant 0 : index
    %52 = vector.load %arg1[%c0_82, %c0_83, %c1_84, %c1_85, %c0_86] : memref<1x4x5x5x8xf32, #tpu.memory_space<vmem>>, vector<1x1x1x4x8xf32>
    %53 = vector.shape_cast %52 : vector<1x1x1x4x8xf32> to vector<4x8xf32>
    %cst_87 = arith.constant dense<0.000000e+00> : vector<4x8xf32>
    %54 = tpu.matmul %53, %18, %cst_87 {dimension_numbers = #tpu.dot_dimension_numbers<[1], [0], [0], [1], [0, 0, 1, 1], [], []>} : vector<4x8xf32>, vector<8x8xf32>, vector<4x8xf32> -> vector<4x8xf32>
    %55 = arith.addf %51, %54 : vector<4x8xf32>
    %56 = vector.broadcast %0 : vector<1x8xf32> to vector<4x8xf32>
    %57 = arith.addf %55, %56 : vector<4x8xf32>
    %cst_88 = arith.constant 0.000000e+00 : f32
    %58 = vector.broadcast %cst_88 : f32 to vector<4x8xf32>
    %59 = arith.cmpf oge, %57, %58 : vector<4x8xf32>
    %cst_89 = arith.constant 2.000000e-01 : f32
    %60 = vector.broadcast %cst_89 : f32 to vector<4x8xf32>
    %61 = arith.mulf %60, %57 : vector<4x8xf32>
    %62 = arith.select %59, %57, %61 : vector<4x8xi1>, vector<4x8xf32>
    %c0_90 = arith.constant 0 : index
    %c0_91 = arith.constant 0 : index
    %c0_92 = arith.constant 0 : index
    %c0_93 = arith.constant 0 : index
    %63 = vector.load %arg4[%c0_90, %c0_91, %c0_92, %c0_93] : memref<1x4x4x8xf32, #tpu.memory_space<vmem>>, vector<1x1x4x8xf32>
    %64 = vector.shape_cast %63 : vector<1x1x4x8xf32> to vector<4x8xf32>
    %65 = vector.shape_cast %62 : vector<4x8xf32> to vector<1x1x4x8xf32>
    tpu.vector_store %arg4[%c0_90, %c0_91, %c0_92, %c0_93], %65 {strides = array<i32>} : memref<1x4x4x8xf32, #tpu.memory_space<vmem>>, vector<1x1x4x8xf32>,
    %cst_94 = arith.constant 0.000000e+00 : f32
    %66 = vector.broadcast %cst_94 : f32 to vector<4x8xf32>
    %c0_95 = arith.constant 0 : index
    %c0_96 = arith.constant 0 : index
    %c1_97 = arith.constant 1 : index
    %c0_98 = arith.constant 0 : index
    %c0_99 = arith.constant 0 : index
    %67 = vector.load %arg1[%c0_95, %c0_96, %c1_97, %c0_98, %c0_99] : memref<1x4x5x5x8xf32, #tpu.memory_space<vmem>>, vector<1x1x1x4x8xf32>
    %68 = vector.shape_cast %67 : vector<1x1x1x4x8xf32> to vector<4x8xf32>
    %cst_100 = arith.constant dense<0.000000e+00> : vector<4x8xf32>
    %69 = tpu.matmul %68, %2, %cst_100 {dimension_numbers = #tpu.dot_dimension_numbers<[1], [0], [0], [1], [0, 0, 1, 1], [], []>} : vector<4x8xf32>, vector<8x8xf32>, vector<4x8xf32> -> vector<4x8xf32>
    %70 = arith.addf %66, %69 : vector<4x8xf32>
    %c0_101 = arith.constant 0 : index
    %c1_102 = arith.constant 1 : index
    %c1_103 = arith.constant 1 : index
    %c0_104 = arith.constant 0 : index
    %c0_105 = arith.constant 0 : index
    %71 = vector.load %arg1[%c0_101, %c1_102, %c1_103, %c0_104, %c0_105] : memref<1x4x5x5x8xf32, #tpu.memory_space<vmem>>, vector<1x1x1x4x8xf32>
    %72 = vector.shape_cast %71 : vector<1x1x1x4x8xf32> to vector<4x8xf32>
    %cst_106 = arith.constant dense<0.000000e+00> : vector<4x8xf32>
    %73 = tpu.matmul %72, %4, %cst_106 {dimension_numbers = #tpu.dot_dimension_numbers<[1], [0], [0], [1], [0, 0, 1, 1], [], []>} : vector<4x8xf32>, vector<8x8xf32>, vector<4x8xf32> -> vector<4x8xf32>
    %74 = arith.addf %70, %73 : vector<4x8xf32>
    %c0_107 = arith.constant 0 : index
    %c0_108 = arith.constant 0 : index
    %c1_109 = arith.constant 1 : index
    %c1_110 = arith.constant 1 : index
    %c0_111 = arith.constant 0 : index
    %75 = vector.load %arg1[%c0_107, %c0_108, %c1_109, %c1_110, %c0_111] : memref<1x4x5x5x8xf32, #tpu.memory_space<vmem>>, vector<1x1x1x4x8xf32>
    %76 = vector.shape_cast %75 : vector<1x1x1x4x8xf32> to vector<4x8xf32>
    %cst_112 = arith.constant dense<0.000000e+00> : vector<4x8xf32>
    %77 = tpu.matmul %76, %6, %cst_112 {dimension_numbers = #tpu.dot_dimension_numbers<[1], [0], [0], [1], [0, 0, 1, 1], [], []>} : vector<4x8xf32>, vector<8x8xf32>, vector<4x8xf32> -> vector<4x8xf32>
    %78 = arith.addf %74, %77 : vector<4x8xf32>
    %c0_113 = arith.constant 0 : index
    %c2_114 = arith.constant 2 : index
    %c1_115 = arith.constant 1 : index
    %c0_116 = arith.constant 0 : index
    %c0_117 = arith.constant 0 : index
    %79 = vector.load %arg1[%c0_113, %c2_114, %c1_115, %c0_116, %c0_117] : memref<1x4x5x5x8xf32, #tpu.memory_space<vmem>>, vector<1x1x1x4x8xf32>
    %80 = vector.shape_cast %79 : vector<1x1x1x4x8xf32> to vector<4x8xf32>
    %cst_118 = arith.constant dense<0.000000e+00> : vector<4x8xf32>
    %81 = tpu.matmul %80, %8, %cst_118 {dimension_numbers = #tpu.dot_dimension_numbers<[1], [0], [0], [1], [0, 0, 1, 1], [], []>} : vector<4x8xf32>, vector<8x8xf32>, vector<4x8xf32> -> vector<4x8xf32>
    %82 = arith.addf %78, %81 : vector<4x8xf32>
    %c0_119 = arith.constant 0 : index
    %c3_120 = arith.constant 3 : index
    %c1_121 = arith.constant 1 : index
    %c0_122 = arith.constant 0 : index
    %c0_123 = arith.constant 0 : index
    %83 = vector.load %arg1[%c0_119, %c3_120, %c1_121, %c0_122, %c0_123] : memref<1x4x5x5x8xf32, #tpu.memory_space<vmem>>, vector<1x1x1x4x8xf32>
    %84 = vector.shape_cast %83 : vector<1x1x1x4x8xf32> to vector<4x8xf32>
    %cst_124 = arith.constant dense<0.000000e+00> : vector<4x8xf32>
    %85 = tpu.matmul %84, %10, %cst_124 {dimension_numbers = #tpu.dot_dimension_numbers<[1], [0], [0], [1], [0, 0, 1, 1], [], []>} : vector<4x8xf32>, vector<8x8xf32>, vector<4x8xf32> -> vector<4x8xf32>
    %86 = arith.addf %82, %85 : vector<4x8xf32>
    %c0_125 = arith.constant 0 : index
    %c2_126 = arith.constant 2 : index
    %c1_127 = arith.constant 1 : index
    %c1_128 = arith.constant 1 : index
    %c0_129 = arith.constant 0 : index
    %87 = vector.load %arg1[%c0_125, %c2_126, %c1_127, %c1_128, %c0_129] : memref<1x4x5x5x8xf32, #tpu.memory_space<vmem>>, vector<1x1x1x4x8xf32>
    %88 = vector.shape_cast %87 : vector<1x1x1x4x8xf32> to vector<4x8xf32>
    %cst_130 = arith.constant dense<0.000000e+00> : vector<4x8xf32>
    %89 = tpu.matmul %88, %12, %cst_130 {dimension_numbers = #tpu.dot_dimension_numbers<[1], [0], [0], [1], [0, 0, 1, 1], [], []>} : vector<4x8xf32>, vector<8x8xf32>, vector<4x8xf32> -> vector<4x8xf32>
    %90 = arith.addf %86, %89 : vector<4x8xf32>
    %c0_131 = arith.constant 0 : index
    %c0_132 = arith.constant 0 : index
    %c2_133 = arith.constant 2 : index
    %c0_134 = arith.constant 0 : index
    %c0_135 = arith.constant 0 : index
    %91 = vector.load %arg1[%c0_131, %c0_132, %c2_133, %c0_134, %c0_135] : memref<1x4x5x5x8xf32, #tpu.memory_space<vmem>>, vector<1x1x1x4x8xf32>
    %92 = vector.shape_cast %91 : vector<1x1x1x4x8xf32> to vector<4x8xf32>
    %cst_136 = arith.constant dense<0.000000e+00> : vector<4x8xf32>
    %93 = tpu.matmul %92, %14, %cst_136 {dimension_numbers = #tpu.dot_dimension_numbers<[1], [0], [0], [1], [0, 0, 1, 1], [], []>} : vector<4x8xf32>, vector<8x8xf32>, vector<4x8xf32> -> vector<4x8xf32>
    %94 = arith.addf %90, %93 : vector<4x8xf32>
    %c0_137 = arith.constant 0 : index
    %c1_138 = arith.constant 1 : index
    %c2_139 = arith.constant 2 : index
    %c0_140 = arith.constant 0 : index
    %c0_141 = arith.constant 0 : index
    %95 = vector.load %arg1[%c0_137, %c1_138, %c2_139, %c0_140, %c0_141] : memref<1x4x5x5x8xf32, #tpu.memory_space<vmem>>, vector<1x1x1x4x8xf32>
    %96 = vector.shape_cast %95 : vector<1x1x1x4x8xf32> to vector<4x8xf32>
    %cst_142 = arith.constant dense<0.000000e+00> : vector<4x8xf32>
    %97 = tpu.matmul %96, %16, %cst_142 {dimension_numbers = #tpu.dot_dimension_numbers<[1], [0], [0], [1], [0, 0, 1, 1], [], []>} : vector<4x8xf32>, vector<8x8xf32>, vector<4x8xf32> -> vector<4x8xf32>
    %98 = arith.addf %94, %97 : vector<4x8xf32>
    %c0_143 = arith.constant 0 : index
    %c0_144 = arith.constant 0 : index
    %c2_145 = arith.constant 2 : index
    %c1_146 = arith.constant 1 : index
    %c0_147 = arith.constant 0 : index
    %99 = vector.load %arg1[%c0_143, %c0_144, %c2_145, %c1_146, %c0_147] : memref<1x4x5x5x8xf32, #tpu.memory_space<vmem>>, vector<1x1x1x4x8xf32>
    %100 = vector.shape_cast %99 : vector<1x1x1x4x8xf32> to vector<4x8xf32>
    %cst_148 = arith.constant dense<0.000000e+00> : vector<4x8xf32>
    %101 = tpu.matmul %100, %18, %cst_148 {dimension_numbers = #tpu.dot_dimension_numbers<[1], [0], [0], [1], [0, 0, 1, 1], [], []>} : vector<4x8xf32>, vector<8x8xf32>, vector<4x8xf32> -> vector<4x8xf32>
    %102 = arith.addf %98, %101 : vector<4x8xf32>
    %103 = vector.broadcast %0 : vector<1x8xf32> to vector<4x8xf32>
    %104 = arith.addf %102, %103 : vector<4x8xf32>
    %cst_149 = arith.constant 0.000000e+00 : f32
    %105 = vector.broadcast %cst_149 : f32 to vector<4x8xf32>
    %106 = arith.cmpf oge, %104, %105 : vector<4x8xf32>
    %cst_150 = arith.constant 2.000000e-01 : f32
    %107 = vector.broadcast %cst_150 : f32 to vector<4x8xf32>
    %108 = arith.mulf %107, %104 : vector<4x8xf32>
    %109 = arith.select %106, %104, %108 : vector<4x8xi1>, vector<4x8xf32>
    %c0_151 = arith.constant 0 : index
    %c1_152 = arith.constant 1 : index
    %c0_153 = arith.constant 0 : index
    %c0_154 = arith.constant 0 : index
    %110 = vector.load %arg4[%c0_151, %c1_152, %c0_153, %c0_154] : memref<1x4x4x8xf32, #tpu.memory_space<vmem>>, vector<1x1x4x8xf32>
    %111 = vector.shape_cast %110 : vector<1x1x4x8xf32> to vector<4x8xf32>
    %112 = vector.shape_cast %109 : vector<4x8xf32> to vector<1x1x4x8xf32>
    tpu.vector_store %arg4[%c0_151, %c1_152, %c0_153, %c0_154], %112 {strides = array<i32>} : memref<1x4x4x8xf32, #tpu.memory_space<vmem>>, vector<1x1x4x8xf32>,
    %cst_155 = arith.constant 0.000000e+00 : f32
    %113 = vector.broadcast %cst_155 : f32 to vector<4x8xf32>
    %c0_156 = arith.constant 0 : index
    %c0_157 = arith.constant 0 : index
    %c2_158 = arith.constant 2 : index
    %c0_159 = arith.constant 0 : index
    %c0_160 = arith.constant 0 : index
    %114 = vector.load %arg1[%c0_156, %c0_157, %c2_158, %c0_159, %c0_160] : memref<1x4x5x5x8xf32, #tpu.memory_space<vmem>>, vector<1x1x1x4x8xf32>
    %115 = vector.shape_cast %114 : vector<1x1x1x4x8xf32> to vector<4x8xf32>
    %cst_161 = arith.constant dense<0.000000e+00> : vector<4x8xf32>
    %116 = tpu.matmul %115, %2, %cst_161 {dimension_numbers = #tpu.dot_dimension_numbers<[1], [0], [0], [1], [0, 0, 1, 1], [], []>} : vector<4x8xf32>, vector<8x8xf32>, vector<4x8xf32> -> vector<4x8xf32>
    %117 = arith.addf %113, %116 : vector<4x8xf32>
    %c0_162 = arith.constant 0 : index
    %c1_163 = arith.constant 1 : index
    %c2_164 = arith.constant 2 : index
    %c0_165 = arith.constant 0 : index
    %c0_166 = arith.constant 0 : index
    %118 = vector.load %arg1[%c0_162, %c1_163, %c2_164, %c0_165, %c0_166] : memref<1x4x5x5x8xf32, #tpu.memory_space<vmem>>, vector<1x1x1x4x8xf32>
    %119 = vector.shape_cast %118 : vector<1x1x1x4x8xf32> to vector<4x8xf32>
    %cst_167 = arith.constant dense<0.000000e+00> : vector<4x8xf32>
    %120 = tpu.matmul %119, %4, %cst_167 {dimension_numbers = #tpu.dot_dimension_numbers<[1], [0], [0], [1], [0, 0, 1, 1], [], []>} : vector<4x8xf32>, vector<8x8xf32>, vector<4x8xf32> -> vector<4x8xf32>
    %121 = arith.addf %117, %120 : vector<4x8xf32>
    %c0_168 = arith.constant 0 : index
    %c0_169 = arith.constant 0 : index
    %c2_170 = arith.constant 2 : index
    %c1_171 = arith.constant 1 : index
    %c0_172 = arith.constant 0 : index
    %122 = vector.load %arg1[%c0_168, %c0_169, %c2_170, %c1_171, %c0_172] : memref<1x4x5x5x8xf32, #tpu.memory_space<vmem>>, vector<1x1x1x4x8xf32>
    %123 = vector.shape_cast %122 : vector<1x1x1x4x8xf32> to vector<4x8xf32>
    %cst_173 = arith.constant dense<0.000000e+00> : vector<4x8xf32>
    %124 = tpu.matmul %123, %6, %cst_173 {dimension_numbers = #tpu.dot_dimension_numbers<[1], [0], [0], [1], [0, 0, 1, 1], [], []>} : vector<4x8xf32>, vector<8x8xf32>, vector<4x8xf32> -> vector<4x8xf32>
    %125 = arith.addf %121, %124 : vector<4x8xf32>
    %c0_174 = arith.constant 0 : index
    %c2_175 = arith.constant 2 : index
    %c2_176 = arith.constant 2 : index
    %c0_177 = arith.constant 0 : index
    %c0_178 = arith.constant 0 : index
    %126 = vector.load %arg1[%c0_174, %c2_175, %c2_176, %c0_177, %c0_178] : memref<1x4x5x5x8xf32, #tpu.memory_space<vmem>>, vector<1x1x1x4x8xf32>
    %127 = vector.shape_cast %126 : vector<1x1x1x4x8xf32> to vector<4x8xf32>
    %cst_179 = arith.constant dense<0.000000e+00> : vector<4x8xf32>
    %128 = tpu.matmul %127, %8, %cst_179 {dimension_numbers = #tpu.dot_dimension_numbers<[1], [0], [0], [1], [0, 0, 1, 1], [], []>} : vector<4x8xf32>, vector<8x8xf32>, vector<4x8xf32> -> vector<4x8xf32>
    %129 = arith.addf %125, %128 : vector<4x8xf32>
    %c0_180 = arith.constant 0 : index
    %c3_181 = arith.constant 3 : index
    %c2_182 = arith.constant 2 : index
    %c0_183 = arith.constant 0 : index
    %c0_184 = arith.constant 0 : index
    %130 = vector.load %arg1[%c0_180, %c3_181, %c2_182, %c0_183, %c0_184] : memref<1x4x5x5x8xf32, #tpu.memory_space<vmem>>, vector<1x1x1x4x8xf32>
    %131 = vector.shape_cast %130 : vector<1x1x1x4x8xf32> to vector<4x8xf32>
    %cst_185 = arith.constant dense<0.000000e+00> : vector<4x8xf32>
    %132 = tpu.matmul %131, %10, %cst_185 {dimension_numbers = #tpu.dot_dimension_numbers<[1], [0], [0], [1], [0, 0, 1, 1], [], []>} : vector<4x8xf32>, vector<8x8xf32>, vector<4x8xf32> -> vector<4x8xf32>
    %133 = arith.addf %129, %132 : vector<4x8xf32>
    %c0_186 = arith.constant 0 : index
    %c2_187 = arith.constant 2 : index
    %c2_188 = arith.constant 2 : index
    %c1_189 = arith.constant 1 : index
    %c0_190 = arith.constant 0 : index
    %134 = vector.load %arg1[%c0_186, %c2_187, %c2_188, %c1_189, %c0_190] : memref<1x4x5x5x8xf32, #tpu.memory_space<vmem>>, vector<1x1x1x4x8xf32>
    %135 = vector.shape_cast %134 : vector<1x1x1x4x8xf32> to vector<4x8xf32>
    %cst_191 = arith.constant dense<0.000000e+00> : vector<4x8xf32>
    %136 = tpu.matmul %135, %12, %cst_191 {dimension_numbers = #tpu.dot_dimension_numbers<[1], [0], [0], [1], [0, 0, 1, 1], [], []>} : vector<4x8xf32>, vector<8x8xf32>, vector<4x8xf32> -> vector<4x8xf32>
    %137 = arith.addf %133, %136 : vector<4x8xf32>
    %c0_192 = arith.constant 0 : index
    %c0_193 = arith.constant 0 : index
    %c3_194 = arith.constant 3 : index
    %c0_195 = arith.constant 0 : index
    %c0_196 = arith.constant 0 : index
    %138 = vector.load %arg1[%c0_192, %c0_193, %c3_194, %c0_195, %c0_196] : memref<1x4x5x5x8xf32, #tpu.memory_space<vmem>>, vector<1x1x1x4x8xf32>
    %139 = vector.shape_cast %138 : vector<1x1x1x4x8xf32> to vector<4x8xf32>
    %cst_197 = arith.constant dense<0.000000e+00> : vector<4x8xf32>
    %140 = tpu.matmul %139, %14, %cst_197 {dimension_numbers = #tpu.dot_dimension_numbers<[1], [0], [0], [1], [0, 0, 1, 1], [], []>} : vector<4x8xf32>, vector<8x8xf32>, vector<4x8xf32> -> vector<4x8xf32>
    %141 = arith.addf %137, %140 : vector<4x8xf32>
    %c0_198 = arith.constant 0 : index
    %c1_199 = arith.constant 1 : index
    %c3_200 = arith.constant 3 : index
    %c0_201 = arith.constant 0 : index
    %c0_202 = arith.constant 0 : index
    %142 = vector.load %arg1[%c0_198, %c1_199, %c3_200, %c0_201, %c0_202] : memref<1x4x5x5x8xf32, #tpu.memory_space<vmem>>, vector<1x1x1x4x8xf32>
    %143 = vector.shape_cast %142 : vector<1x1x1x4x8xf32> to vector<4x8xf32>
    %cst_203 = arith.constant dense<0.000000e+00> : vector<4x8xf32>
    %144 = tpu.matmul %143, %16, %cst_203 {dimension_numbers = #tpu.dot_dimension_numbers<[1], [0], [0], [1], [0, 0, 1, 1], [], []>} : vector<4x8xf32>, vector<8x8xf32>, vector<4x8xf32> -> vector<4x8xf32>
    %145 = arith.addf %141, %144 : vector<4x8xf32>
    %c0_204 = arith.constant 0 : index
    %c0_205 = arith.constant 0 : index
    %c3_206 = arith.constant 3 : index
    %c1_207 = arith.constant 1 : index
    %c0_208 = arith.constant 0 : index
    %146 = vector.load %arg1[%c0_204, %c0_205, %c3_206, %c1_207, %c0_208] : memref<1x4x5x5x8xf32, #tpu.memory_space<vmem>>, vector<1x1x1x4x8xf32>
    %147 = vector.shape_cast %146 : vector<1x1x1x4x8xf32> to vector<4x8xf32>
    %cst_209 = arith.constant dense<0.000000e+00> : vector<4x8xf32>
    %148 = tpu.matmul %147, %18, %cst_209 {dimension_numbers = #tpu.dot_dimension_numbers<[1], [0], [0], [1], [0, 0, 1, 1], [], []>} : vector<4x8xf32>, vector<8x8xf32>, vector<4x8xf32> -> vector<4x8xf32>
    %149 = arith.addf %145, %148 : vector<4x8xf32>
    %150 = vector.broadcast %0 : vector<1x8xf32> to vector<4x8xf32>
    %151 = arith.addf %149, %150 : vector<4x8xf32>
    %cst_210 = arith.constant 0.000000e+00 : f32
    %152 = vector.broadcast %cst_210 : f32 to vector<4x8xf32>
    %153 = arith.cmpf oge, %151, %152 : vector<4x8xf32>
    %cst_211 = arith.constant 2.000000e-01 : f32
    %154 = vector.broadcast %cst_211 : f32 to vector<4x8xf32>
    %155 = arith.mulf %154, %151 : vector<4x8xf32>
    %156 = arith.select %153, %151, %155 : vector<4x8xi1>, vector<4x8xf32>
    %c0_212 = arith.constant 0 : index
    %c2_213 = arith.constant 2 : index
    %c0_214 = arith.constant 0 : index
    %c0_215 = arith.constant 0 : index
    %157 = vector.load %arg4[%c0_212, %c2_213, %c0_214, %c0_215] : memref<1x4x4x8xf32, #tpu.memory_space<vmem>>, vector<1x1x4x8xf32>
    %158 = vector.shape_cast %157 : vector<1x1x4x8xf32> to vector<4x8xf32>
    %159 = vector.shape_cast %156 : vector<4x8xf32> to vector<1x1x4x8xf32>
    tpu.vector_store %arg4[%c0_212, %c2_213, %c0_214, %c0_215], %159 {strides = array<i32>} : memref<1x4x4x8xf32, #tpu.memory_space<vmem>>, vector<1x1x4x8xf32>,
    %cst_216 = arith.constant 0.000000e+00 : f32
    %160 = vector.broadcast %cst_216 : f32 to vector<4x8xf32>
    %c0_217 = arith.constant 0 : index
    %c0_218 = arith.constant 0 : index
    %c3_219 = arith.constant 3 : index
    %c0_220 = arith.constant 0 : index
    %c0_221 = arith.constant 0 : index
    %161 = vector.load %arg1[%c0_217, %c0_218, %c3_219, %c0_220, %c0_221] : memref<1x4x5x5x8xf32, #tpu.memory_space<vmem>>, vector<1x1x1x4x8xf32>
    %162 = vector.shape_cast %161 : vector<1x1x1x4x8xf32> to vector<4x8xf32>
    %cst_222 = arith.constant dense<0.000000e+00> : vector<4x8xf32>
    %163 = tpu.matmul %162, %2, %cst_222 {dimension_numbers = #tpu.dot_dimension_numbers<[1], [0], [0], [1], [0, 0, 1, 1], [], []>} : vector<4x8xf32>, vector<8x8xf32>, vector<4x8xf32> -> vector<4x8xf32>
    %164 = arith.addf %160, %163 : vector<4x8xf32>
    %c0_223 = arith.constant 0 : index
    %c1_224 = arith.constant 1 : index
    %c3_225 = arith.constant 3 : index
    %c0_226 = arith.constant 0 : index
    %c0_227 = arith.constant 0 : index
    %165 = vector.load %arg1[%c0_223, %c1_224, %c3_225, %c0_226, %c0_227] : memref<1x4x5x5x8xf32, #tpu.memory_space<vmem>>, vector<1x1x1x4x8xf32>
    %166 = vector.shape_cast %165 : vector<1x1x1x4x8xf32> to vector<4x8xf32>
    %cst_228 = arith.constant dense<0.000000e+00> : vector<4x8xf32>
    %167 = tpu.matmul %166, %4, %cst_228 {dimension_numbers = #tpu.dot_dimension_numbers<[1], [0], [0], [1], [0, 0, 1, 1], [], []>} : vector<4x8xf32>, vector<8x8xf32>, vector<4x8xf32> -> vector<4x8xf32>
    %168 = arith.addf %164, %167 : vector<4x8xf32>
    %c0_229 = arith.constant 0 : index
    %c0_230 = arith.constant 0 : index
    %c3_231 = arith.constant 3 : index
    %c1_232 = arith.constant 1 : index
    %c0_233 = arith.constant 0 : index
    %169 = vector.load %arg1[%c0_229, %c0_230, %c3_231, %c1_232, %c0_233] : memref<1x4x5x5x8xf32, #tpu.memory_space<vmem>>, vector<1x1x1x4x8xf32>
    %170 = vector.shape_cast %169 : vector<1x1x1x4x8xf32> to vector<4x8xf32>
    %cst_234 = arith.constant dense<0.000000e+00> : vector<4x8xf32>
    %171 = tpu.matmul %170, %6, %cst_234 {dimension_numbers = #tpu.dot_dimension_numbers<[1], [0], [0], [1], [0, 0, 1, 1], [], []>} : vector<4x8xf32>, vector<8x8xf32>, vector<4x8xf32> -> vector<4x8xf32>
    %172 = arith.addf %168, %171 : vector<4x8xf32>
    %c0_235 = arith.constant 0 : index
    %c2_236 = arith.constant 2 : index
    %c3_237 = arith.constant 3 : index
    %c0_238 = arith.constant 0 : index
    %c0_239 = arith.constant 0 : index
    %173 = vector.load %arg1[%c0_235, %c2_236, %c3_237, %c0_238, %c0_239] : memref<1x4x5x5x8xf32, #tpu.memory_space<vmem>>, vector<1x1x1x4x8xf32>
    %174 = vector.shape_cast %173 : vector<1x1x1x4x8xf32> to vector<4x8xf32>
    %cst_240 = arith.constant dense<0.000000e+00> : vector<4x8xf32>
    %175 = tpu.matmul %174, %8, %cst_240 {dimension_numbers = #tpu.dot_dimension_numbers<[1], [0], [0], [1], [0, 0, 1, 1], [], []>} : vector<4x8xf32>, vector<8x8xf32>, vector<4x8xf32> -> vector<4x8xf32>
    %176 = arith.addf %172, %175 : vector<4x8xf32>
    %c0_241 = arith.constant 0 : index
    %c3_242 = arith.constant 3 : index
    %c3_243 = arith.constant 3 : index
    %c0_244 = arith.constant 0 : index
    %c0_245 = arith.constant 0 : index
    %177 = vector.load %arg1[%c0_241, %c3_242, %c3_243, %c0_244, %c0_245] : memref<1x4x5x5x8xf32, #tpu.memory_space<vmem>>, vector<1x1x1x4x8xf32>
    %178 = vector.shape_cast %177 : vector<1x1x1x4x8xf32> to vector<4x8xf32>
    %cst_246 = arith.constant dense<0.000000e+00> : vector<4x8xf32>
    %179 = tpu.matmul %178, %10, %cst_246 {dimension_numbers = #tpu.dot_dimension_numbers<[1], [0], [0], [1], [0, 0, 1, 1], [], []>} : vector<4x8xf32>, vector<8x8xf32>, vector<4x8xf32> -> vector<4x8xf32>
    %180 = arith.addf %176, %179 : vector<4x8xf32>
    %c0_247 = arith.constant 0 : index
    %c2_248 = arith.constant 2 : index
    %c3_249 = arith.constant 3 : index
    %c1_250 = arith.constant 1 : index
    %c0_251 = arith.constant 0 : index
    %181 = vector.load %arg1[%c0_247, %c2_248, %c3_249, %c1_250, %c0_251] : memref<1x4x5x5x8xf32, #tpu.memory_space<vmem>>, vector<1x1x1x4x8xf32>
    %182 = vector.shape_cast %181 : vector<1x1x1x4x8xf32> to vector<4x8xf32>
    %cst_252 = arith.constant dense<0.000000e+00> : vector<4x8xf32>
    %183 = tpu.matmul %182, %12, %cst_252 {dimension_numbers = #tpu.dot_dimension_numbers<[1], [0], [0], [1], [0, 0, 1, 1], [], []>} : vector<4x8xf32>, vector<8x8xf32>, vector<4x8xf32> -> vector<4x8xf32>
    %184 = arith.addf %180, %183 : vector<4x8xf32>
    %c0_253 = arith.constant 0 : index
    %c0_254 = arith.constant 0 : index
    %c4 = arith.constant 4 : index
    %c0_255 = arith.constant 0 : index
    %c0_256 = arith.constant 0 : index
    %185 = vector.load %arg1[%c0_253, %c0_254, %c4, %c0_255, %c0_256] : memref<1x4x5x5x8xf32, #tpu.memory_space<vmem>>, vector<1x1x1x4x8xf32>
    %186 = vector.shape_cast %185 : vector<1x1x1x4x8xf32> to vector<4x8xf32>
    %cst_257 = arith.constant dense<0.000000e+00> : vector<4x8xf32>
    %187 = tpu.matmul %186, %14, %cst_257 {dimension_numbers = #tpu.dot_dimension_numbers<[1], [0], [0], [1], [0, 0, 1, 1], [], []>} : vector<4x8xf32>, vector<8x8xf32>, vector<4x8xf32> -> vector<4x8xf32>
    %188 = arith.addf %184, %187 : vector<4x8xf32>
    %c0_258 = arith.constant 0 : index
    %c1_259 = arith.constant 1 : index
    %c4_260 = arith.constant 4 : index
    %c0_261 = arith.constant 0 : index
    %c0_262 = arith.constant 0 : index
    %189 = vector.load %arg1[%c0_258, %c1_259, %c4_260, %c0_261, %c0_262] : memref<1x4x5x5x8xf32, #tpu.memory_space<vmem>>, vector<1x1x1x4x8xf32>
    %190 = vector.shape_cast %189 : vector<1x1x1x4x8xf32> to vector<4x8xf32>
    %cst_263 = arith.constant dense<0.000000e+00> : vector<4x8xf32>
    %191 = tpu.matmul %190, %16, %cst_263 {dimension_numbers = #tpu.dot_dimension_numbers<[1], [0], [0], [1], [0, 0, 1, 1], [], []>} : vector<4x8xf32>, vector<8x8xf32>, vector<4x8xf32> -> vector<4x8xf32>
    %192 = arith.addf %188, %191 : vector<4x8xf32>
    %c0_264 = arith.constant 0 : index
    %c0_265 = arith.constant 0 : index
    %c4_266 = arith.constant 4 : index
    %c1_267 = arith.constant 1 : index
    %c0_268 = arith.constant 0 : index
    %193 = vector.load %arg1[%c0_264, %c0_265, %c4_266, %c1_267, %c0_268] : memref<1x4x5x5x8xf32, #tpu.memory_space<vmem>>, vector<1x1x1x4x8xf32>
    %194 = vector.shape_cast %193 : vector<1x1x1x4x8xf32> to vector<4x8xf32>
    %cst_269 = arith.constant dense<0.000000e+00> : vector<4x8xf32>
    %195 = tpu.matmul %194, %18, %cst_269 {dimension_numbers = #tpu.dot_dimension_numbers<[1], [0], [0], [1], [0, 0, 1, 1], [], []>} : vector<4x8xf32>, vector<8x8xf32>, vector<4x8xf32> -> vector<4x8xf32>
    %196 = arith.addf %192, %195 : vector<4x8xf32>
    %197 = vector.broadcast %0 : vector<1x8xf32> to vector<4x8xf32>
    %198 = arith.addf %196, %197 : vector<4x8xf32>
    %cst_270 = arith.constant 0.000000e+00 : f32
    %199 = vector.broadcast %cst_270 : f32 to vector<4x8xf32>
    %200 = arith.cmpf oge, %198, %199 : vector<4x8xf32>
    %cst_271 = arith.constant 2.000000e-01 : f32
    %201 = vector.broadcast %cst_271 : f32 to vector<4x8xf32>
    %202 = arith.mulf %201, %198 : vector<4x8xf32>
    %203 = arith.select %200, %198, %202 : vector<4x8xi1>, vector<4x8xf32>
    %c0_272 = arith.constant 0 : index
    %c3_273 = arith.constant 3 : index
    %c0_274 = arith.constant 0 : index
    %c0_275 = arith.constant 0 : index
    %204 = vector.load %arg4[%c0_272, %c3_273, %c0_274, %c0_275] : memref<1x4x4x8xf32, #tpu.memory_space<vmem>>, vector<1x1x4x8xf32>
    %205 = vector.shape_cast %204 : vector<1x1x4x8xf32> to vector<4x8xf32>
    %206 = vector.shape_cast %203 : vector<4x8xf32> to vector<1x1x4x8xf32>
    tpu.vector_store %arg4[%c0_272, %c3_273, %c0_274, %c0_275], %206 {strides = array<i32>} : memref<1x4x4x8xf32, #tpu.memory_space<vmem>>, vector<1x1x4x8xf32>,
    return
  }
  func.func @transform_0(%arg0: i32) -> (i32, i32, i32, i32, i32) {
    %c0_i32 = arith.constant 0 : i32
    %c0_i32_0 = arith.constant 0 : i32
    %c0_i32_1 = arith.constant 0 : i32
    %c0_i32_2 = arith.constant 0 : i32
    %c0_i32_3 = arith.constant 0 : i32
    return %arg0, %c0_i32, %c0_i32_0, %c0_i32_1, %c0_i32_2 : i32, i32, i32, i32, i32
  }
  func.func @transform_1(%arg0: i32) -> (i32, i32, i32, i32) {
    %c0_i32 = arith.constant 0 : i32
    %c0_i32_0 = arith.constant 0 : i32
    %c0_i32_1 = arith.constant 0 : i32
    %c0_i32_2 = arith.constant 0 : i32
    %c0_i32_3 = arith.constant 0 : i32
    return %c0_i32, %c0_i32_0, %c0_i32_1, %c0_i32_2 : i32, i32, i32, i32
  }
  func.func @transform_2(%arg0: i32) -> (i32, i32) {
    %c0_i32 = arith.constant 0 : i32
    %c0_i32_0 = arith.constant 0 : i32
    %c0_i32_1 = arith.constant 0 : i32
    return %c0_i32, %c0_i32_0 : i32, i32
  }
  func.func @transform_3(%arg0: i32) -> (i32, i32, i32, i32) {
    %c0_i32 = arith.constant 0 : i32
    %c0_i32_0 = arith.constant 0 : i32
    %c0_i32_1 = arith.constant 0 : i32
    %c0_i32_2 = arith.constant 0 : i32
    return %arg0, %c0_i32, %c0_i32_0, %c0_i32_1 : i32, i32, i32, i32
  }
}

module attributes {stable_mosaic.version = 11 : i64} {
  func.func @_conv3x3_kernel(%arg0: i32, %arg1: memref<1x4x3x3x8xf32, #tpu.memory_space<vmem>>, %arg2: memref<3x3x8x16xf32, #tpu.memory_space<vmem>>, %arg3: memref<1x16xf32, #tpu.memory_space<vmem>>, %arg4: memref<1x2x2x16xf32, #tpu.memory_space<vmem>>) attributes {dimension_semantics = [#tpu.dimension_semantics<parallel>], iteration_bounds = array<i64: 2>, scalar_prefetch = 0 : i64, scratch_operands = 0 : i64, tpu.core_type = #tpu.core_type<tc>, window_params = [{transform_indices = @transform_0, window_bounds = array<i64: 1, 4, 3, 3, 8>}, {pipeline_mode = #tpu.pipeline_mode<synchronous>, transform_indices = @transform_1, window_bounds = array<i64: 3, 3, 8, 16>}, {pipeline_mode = #tpu.pipeline_mode<synchronous>, transform_indices = @transform_2, window_bounds = array<i64: 1, 16>}, {transform_indices = @transform_3, window_bounds = array<i64: 1, 2, 2, 16>}]} {
    %c0 = arith.constant 0 : index
    %c0_0 = arith.constant 0 : index
    %0 = vector.load %arg3[%c0, %c0_0] : memref<1x16xf32, #tpu.memory_space<vmem>>, vector<1x16xf32>
    %c0_1 = arith.constant 0 : index
    %c0_2 = arith.constant 0 : index
    %c0_3 = arith.constant 0 : index
    %c0_4 = arith.constant 0 : index
    %1 = vector.load %arg2[%c0_1, %c0_2, %c0_3, %c0_4] : memref<3x3x8x16xf32, #tpu.memory_space<vmem>>, vector<1x1x8x16xf32>
    %2 = vector.shape_cast %1 : vector<1x1x8x16xf32> to vector<8x16xf32>
    %c0_5 = arith.constant 0 : index
    %c1 = arith.constant 1 : index
    %c0_6 = arith.constant 0 : index
    %c0_7 = arith.constant 0 : index
    %3 = vector.load %arg2[%c0_5, %c1, %c0_6, %c0_7] : memref<3x3x8x16xf32, #tpu.memory_space<vmem>>, vector<1x1x8x16xf32>
    %4 = vector.shape_cast %3 : vector<1x1x8x16xf32> to vector<8x16xf32>
    %c0_8 = arith.constant 0 : index
    %c2 = arith.constant 2 : index
    %c0_9 = arith.constant 0 : index
    %c0_10 = arith.constant 0 : index
    %5 = vector.load %arg2[%c0_8, %c2, %c0_9, %c0_10] : memref<3x3x8x16xf32, #tpu.memory_space<vmem>>, vector<1x1x8x16xf32>
    %6 = vector.shape_cast %5 : vector<1x1x8x16xf32> to vector<8x16xf32>
    %c1_11 = arith.constant 1 : index
    %c0_12 = arith.constant 0 : index
    %c0_13 = arith.constant 0 : index
    %c0_14 = arith.constant 0 : index
    %7 = vector.load %arg2[%c1_11, %c0_12, %c0_13, %c0_14] : memref<3x3x8x16xf32, #tpu.memory_space<vmem>>, vector<1x1x8x16xf32>
    %8 = vector.shape_cast %7 : vector<1x1x8x16xf32> to vector<8x16xf32>
    %c1_15 = arith.constant 1 : index
    %c1_16 = arith.constant 1 : index
    %c0_17 = arith.constant 0 : index
    %c0_18 = arith.constant 0 : index
    %9 = vector.load %arg2[%c1_15, %c1_16, %c0_17, %c0_18] : memref<3x3x8x16xf32, #tpu.memory_space<vmem>>, vector<1x1x8x16xf32>
    %10 = vector.shape_cast %9 : vector<1x1x8x16xf32> to vector<8x16xf32>
    %c1_19 = arith.constant 1 : index
    %c2_20 = arith.constant 2 : index
    %c0_21 = arith.constant 0 : index
    %c0_22 = arith.constant 0 : index
    %11 = vector.load %arg2[%c1_19, %c2_20, %c0_21, %c0_22] : memref<3x3x8x16xf32, #tpu.memory_space<vmem>>, vector<1x1x8x16xf32>
    %12 = vector.shape_cast %11 : vector<1x1x8x16xf32> to vector<8x16xf32>
    %c2_23 = arith.constant 2 : index
    %c0_24 = arith.constant 0 : index
    %c0_25 = arith.constant 0 : index
    %c0_26 = arith.constant 0 : index
    %13 = vector.load %arg2[%c2_23, %c0_24, %c0_25, %c0_26] : memref<3x3x8x16xf32, #tpu.memory_space<vmem>>, vector<1x1x8x16xf32>
    %14 = vector.shape_cast %13 : vector<1x1x8x16xf32> to vector<8x16xf32>
    %c2_27 = arith.constant 2 : index
    %c1_28 = arith.constant 1 : index
    %c0_29 = arith.constant 0 : index
    %c0_30 = arith.constant 0 : index
    %15 = vector.load %arg2[%c2_27, %c1_28, %c0_29, %c0_30] : memref<3x3x8x16xf32, #tpu.memory_space<vmem>>, vector<1x1x8x16xf32>
    %16 = vector.shape_cast %15 : vector<1x1x8x16xf32> to vector<8x16xf32>
    %c2_31 = arith.constant 2 : index
    %c2_32 = arith.constant 2 : index
    %c0_33 = arith.constant 0 : index
    %c0_34 = arith.constant 0 : index
    %17 = vector.load %arg2[%c2_31, %c2_32, %c0_33, %c0_34] : memref<3x3x8x16xf32, #tpu.memory_space<vmem>>, vector<1x1x8x16xf32>
    %18 = vector.shape_cast %17 : vector<1x1x8x16xf32> to vector<8x16xf32>
    %cst = arith.constant 0.000000e+00 : f32
    %19 = vector.broadcast %cst : f32 to vector<2x16xf32>
    %c0_35 = arith.constant 0 : index
    %c0_36 = arith.constant 0 : index
    %c0_37 = arith.constant 0 : index
    %c0_38 = arith.constant 0 : index
    %c0_39 = arith.constant 0 : index
    %20 = vector.load %arg1[%c0_35, %c0_36, %c0_37, %c0_38, %c0_39] : memref<1x4x3x3x8xf32, #tpu.memory_space<vmem>>, vector<1x1x1x2x8xf32>
    %21 = vector.shape_cast %20 : vector<1x1x1x2x8xf32> to vector<2x8xf32>
    %cst_40 = arith.constant dense<0.000000e+00> : vector<2x16xf32>
    %22 = tpu.matmul %21, %2, %cst_40 {dimension_numbers = #tpu.dot_dimension_numbers<[1], [0], [0], [1], [0, 0, 1, 1], [], []>} : vector<2x8xf32>, vector<8x16xf32>, vector<2x16xf32> -> vector<2x16xf32>
    %23 = arith.addf %19, %22 : vector<2x16xf32>
    %c0_41 = arith.constant 0 : index
    %c1_42 = arith.constant 1 : index
    %c0_43 = arith.constant 0 : index
    %c0_44 = arith.constant 0 : index
    %c0_45 = arith.constant 0 : index
    %24 = vector.load %arg1[%c0_41, %c1_42, %c0_43, %c0_44, %c0_45] : memref<1x4x3x3x8xf32, #tpu.memory_space<vmem>>, vector<1x1x1x2x8xf32>
    %25 = vector.shape_cast %24 : vector<1x1x1x2x8xf32> to vector<2x8xf32>
    %cst_46 = arith.constant dense<0.000000e+00> : vector<2x16xf32>
    %26 = tpu.matmul %25, %4, %cst_46 {dimension_numbers = #tpu.dot_dimension_numbers<[1], [0], [0], [1], [0, 0, 1, 1], [], []>} : vector<2x8xf32>, vector<8x16xf32>, vector<2x16xf32> -> vector<2x16xf32>
    %27 = arith.addf %23, %26 : vector<2x16xf32>
    %c0_47 = arith.constant 0 : index
    %c0_48 = arith.constant 0 : index
    %c0_49 = arith.constant 0 : index
    %c1_50 = arith.constant 1 : index
    %c0_51 = arith.constant 0 : index
    %28 = vector.load %arg1[%c0_47, %c0_48, %c0_49, %c1_50, %c0_51] : memref<1x4x3x3x8xf32, #tpu.memory_space<vmem>>, vector<1x1x1x2x8xf32>
    %29 = vector.shape_cast %28 : vector<1x1x1x2x8xf32> to vector<2x8xf32>
    %cst_52 = arith.constant dense<0.000000e+00> : vector<2x16xf32>
    %30 = tpu.matmul %29, %6, %cst_52 {dimension_numbers = #tpu.dot_dimension_numbers<[1], [0], [0], [1], [0, 0, 1, 1], [], []>} : vector<2x8xf32>, vector<8x16xf32>, vector<2x16xf32> -> vector<2x16xf32>
    %31 = arith.addf %27, %30 : vector<2x16xf32>
    %c0_53 = arith.constant 0 : index
    %c2_54 = arith.constant 2 : index
    %c0_55 = arith.constant 0 : index
    %c0_56 = arith.constant 0 : index
    %c0_57 = arith.constant 0 : index
    %32 = vector.load %arg1[%c0_53, %c2_54, %c0_55, %c0_56, %c0_57] : memref<1x4x3x3x8xf32, #tpu.memory_space<vmem>>, vector<1x1x1x2x8xf32>
    %33 = vector.shape_cast %32 : vector<1x1x1x2x8xf32> to vector<2x8xf32>
    %cst_58 = arith.constant dense<0.000000e+00> : vector<2x16xf32>
    %34 = tpu.matmul %33, %8, %cst_58 {dimension_numbers = #tpu.dot_dimension_numbers<[1], [0], [0], [1], [0, 0, 1, 1], [], []>} : vector<2x8xf32>, vector<8x16xf32>, vector<2x16xf32> -> vector<2x16xf32>
    %35 = arith.addf %31, %34 : vector<2x16xf32>
    %c0_59 = arith.constant 0 : index
    %c3 = arith.constant 3 : index
    %c0_60 = arith.constant 0 : index
    %c0_61 = arith.constant 0 : index
    %c0_62 = arith.constant 0 : index
    %36 = vector.load %arg1[%c0_59, %c3, %c0_60, %c0_61, %c0_62] : memref<1x4x3x3x8xf32, #tpu.memory_space<vmem>>, vector<1x1x1x2x8xf32>
    %37 = vector.shape_cast %36 : vector<1x1x1x2x8xf32> to vector<2x8xf32>
    %cst_63 = arith.constant dense<0.000000e+00> : vector<2x16xf32>
    %38 = tpu.matmul %37, %10, %cst_63 {dimension_numbers = #tpu.dot_dimension_numbers<[1], [0], [0], [1], [0, 0, 1, 1], [], []>} : vector<2x8xf32>, vector<8x16xf32>, vector<2x16xf32> -> vector<2x16xf32>
    %39 = arith.addf %35, %38 : vector<2x16xf32>
    %c0_64 = arith.constant 0 : index
    %c2_65 = arith.constant 2 : index
    %c0_66 = arith.constant 0 : index
    %c1_67 = arith.constant 1 : index
    %c0_68 = arith.constant 0 : index
    %40 = vector.load %arg1[%c0_64, %c2_65, %c0_66, %c1_67, %c0_68] : memref<1x4x3x3x8xf32, #tpu.memory_space<vmem>>, vector<1x1x1x2x8xf32>
    %41 = vector.shape_cast %40 : vector<1x1x1x2x8xf32> to vector<2x8xf32>
    %cst_69 = arith.constant dense<0.000000e+00> : vector<2x16xf32>
    %42 = tpu.matmul %41, %12, %cst_69 {dimension_numbers = #tpu.dot_dimension_numbers<[1], [0], [0], [1], [0, 0, 1, 1], [], []>} : vector<2x8xf32>, vector<8x16xf32>, vector<2x16xf32> -> vector<2x16xf32>
    %43 = arith.addf %39, %42 : vector<2x16xf32>
    %c0_70 = arith.constant 0 : index
    %c0_71 = arith.constant 0 : index
    %c1_72 = arith.constant 1 : index
    %c0_73 = arith.constant 0 : index
    %c0_74 = arith.constant 0 : index
    %44 = vector.load %arg1[%c0_70, %c0_71, %c1_72, %c0_73, %c0_74] : memref<1x4x3x3x8xf32, #tpu.memory_space<vmem>>, vector<1x1x1x2x8xf32>
    %45 = vector.shape_cast %44 : vector<1x1x1x2x8xf32> to vector<2x8xf32>
    %cst_75 = arith.constant dense<0.000000e+00> : vector<2x16xf32>
    %46 = tpu.matmul %45, %14, %cst_75 {dimension_numbers = #tpu.dot_dimension_numbers<[1], [0], [0], [1], [0, 0, 1, 1], [], []>} : vector<2x8xf32>, vector<8x16xf32>, vector<2x16xf32> -> vector<2x16xf32>
    %47 = arith.addf %43, %46 : vector<2x16xf32>
    %c0_76 = arith.constant 0 : index
    %c1_77 = arith.constant 1 : index
    %c1_78 = arith.constant 1 : index
    %c0_79 = arith.constant 0 : index
    %c0_80 = arith.constant 0 : index
    %48 = vector.load %arg1[%c0_76, %c1_77, %c1_78, %c0_79, %c0_80] : memref<1x4x3x3x8xf32, #tpu.memory_space<vmem>>, vector<1x1x1x2x8xf32>
    %49 = vector.shape_cast %48 : vector<1x1x1x2x8xf32> to vector<2x8xf32>
    %cst_81 = arith.constant dense<0.000000e+00> : vector<2x16xf32>
    %50 = tpu.matmul %49, %16, %cst_81 {dimension_numbers = #tpu.dot_dimension_numbers<[1], [0], [0], [1], [0, 0, 1, 1], [], []>} : vector<2x8xf32>, vector<8x16xf32>, vector<2x16xf32> -> vector<2x16xf32>
    %51 = arith.addf %47, %50 : vector<2x16xf32>
    %c0_82 = arith.constant 0 : index
    %c0_83 = arith.constant 0 : index
    %c1_84 = arith.constant 1 : index
    %c1_85 = arith.constant 1 : index
    %c0_86 = arith.constant 0 : index
    %52 = vector.load %arg1[%c0_82, %c0_83, %c1_84, %c1_85, %c0_86] : memref<1x4x3x3x8xf32, #tpu.memory_space<vmem>>, vector<1x1x1x2x8xf32>
    %53 = vector.shape_cast %52 : vector<1x1x1x2x8xf32> to vector<2x8xf32>
    %cst_87 = arith.constant dense<0.000000e+00> : vector<2x16xf32>
    %54 = tpu.matmul %53, %18, %cst_87 {dimension_numbers = #tpu.dot_dimension_numbers<[1], [0], [0], [1], [0, 0, 1, 1], [], []>} : vector<2x8xf32>, vector<8x16xf32>, vector<2x16xf32> -> vector<2x16xf32>
    %55 = arith.addf %51, %54 : vector<2x16xf32>
    %56 = vector.broadcast %0 : vector<1x16xf32> to vector<2x16xf32>
    %57 = arith.addf %55, %56 : vector<2x16xf32>
    %cst_88 = arith.constant 0.000000e+00 : f32
    %58 = vector.broadcast %cst_88 : f32 to vector<2x16xf32>
    %59 = arith.cmpf oge, %57, %58 : vector<2x16xf32>
    %cst_89 = arith.constant 2.000000e-01 : f32
    %60 = vector.broadcast %cst_89 : f32 to vector<2x16xf32>
    %61 = arith.mulf %60, %57 : vector<2x16xf32>
    %62 = arith.select %59, %57, %61 : vector<2x16xi1>, vector<2x16xf32>
    %c0_90 = arith.constant 0 : index
    %c0_91 = arith.constant 0 : index
    %c0_92 = arith.constant 0 : index
    %c0_93 = arith.constant 0 : index
    %63 = vector.load %arg4[%c0_90, %c0_91, %c0_92, %c0_93] : memref<1x2x2x16xf32, #tpu.memory_space<vmem>>, vector<1x1x2x16xf32>
    %64 = vector.shape_cast %63 : vector<1x1x2x16xf32> to vector<2x16xf32>
    %65 = vector.shape_cast %62 : vector<2x16xf32> to vector<1x1x2x16xf32>
    tpu.vector_store %arg4[%c0_90, %c0_91, %c0_92, %c0_93], %65 {strides = array<i32>} : memref<1x2x2x16xf32, #tpu.memory_space<vmem>>, vector<1x1x2x16xf32>,
    %cst_94 = arith.constant 0.000000e+00 : f32
    %66 = vector.broadcast %cst_94 : f32 to vector<2x16xf32>
    %c0_95 = arith.constant 0 : index
    %c0_96 = arith.constant 0 : index
    %c1_97 = arith.constant 1 : index
    %c0_98 = arith.constant 0 : index
    %c0_99 = arith.constant 0 : index
    %67 = vector.load %arg1[%c0_95, %c0_96, %c1_97, %c0_98, %c0_99] : memref<1x4x3x3x8xf32, #tpu.memory_space<vmem>>, vector<1x1x1x2x8xf32>
    %68 = vector.shape_cast %67 : vector<1x1x1x2x8xf32> to vector<2x8xf32>
    %cst_100 = arith.constant dense<0.000000e+00> : vector<2x16xf32>
    %69 = tpu.matmul %68, %2, %cst_100 {dimension_numbers = #tpu.dot_dimension_numbers<[1], [0], [0], [1], [0, 0, 1, 1], [], []>} : vector<2x8xf32>, vector<8x16xf32>, vector<2x16xf32> -> vector<2x16xf32>
    %70 = arith.addf %66, %69 : vector<2x16xf32>
    %c0_101 = arith.constant 0 : index
    %c1_102 = arith.constant 1 : index
    %c1_103 = arith.constant 1 : index
    %c0_104 = arith.constant 0 : index
    %c0_105 = arith.constant 0 : index
    %71 = vector.load %arg1[%c0_101, %c1_102, %c1_103, %c0_104, %c0_105] : memref<1x4x3x3x8xf32, #tpu.memory_space<vmem>>, vector<1x1x1x2x8xf32>
    %72 = vector.shape_cast %71 : vector<1x1x1x2x8xf32> to vector<2x8xf32>
    %cst_106 = arith.constant dense<0.000000e+00> : vector<2x16xf32>
    %73 = tpu.matmul %72, %4, %cst_106 {dimension_numbers = #tpu.dot_dimension_numbers<[1], [0], [0], [1], [0, 0, 1, 1], [], []>} : vector<2x8xf32>, vector<8x16xf32>, vector<2x16xf32> -> vector<2x16xf32>
    %74 = arith.addf %70, %73 : vector<2x16xf32>
    %c0_107 = arith.constant 0 : index
    %c0_108 = arith.constant 0 : index
    %c1_109 = arith.constant 1 : index
    %c1_110 = arith.constant 1 : index
    %c0_111 = arith.constant 0 : index
    %75 = vector.load %arg1[%c0_107, %c0_108, %c1_109, %c1_110, %c0_111] : memref<1x4x3x3x8xf32, #tpu.memory_space<vmem>>, vector<1x1x1x2x8xf32>
    %76 = vector.shape_cast %75 : vector<1x1x1x2x8xf32> to vector<2x8xf32>
    %cst_112 = arith.constant dense<0.000000e+00> : vector<2x16xf32>
    %77 = tpu.matmul %76, %6, %cst_112 {dimension_numbers = #tpu.dot_dimension_numbers<[1], [0], [0], [1], [0, 0, 1, 1], [], []>} : vector<2x8xf32>, vector<8x16xf32>, vector<2x16xf32> -> vector<2x16xf32>
    %78 = arith.addf %74, %77 : vector<2x16xf32>
    %c0_113 = arith.constant 0 : index
    %c2_114 = arith.constant 2 : index
    %c1_115 = arith.constant 1 : index
    %c0_116 = arith.constant 0 : index
    %c0_117 = arith.constant 0 : index
    %79 = vector.load %arg1[%c0_113, %c2_114, %c1_115, %c0_116, %c0_117] : memref<1x4x3x3x8xf32, #tpu.memory_space<vmem>>, vector<1x1x1x2x8xf32>
    %80 = vector.shape_cast %79 : vector<1x1x1x2x8xf32> to vector<2x8xf32>
    %cst_118 = arith.constant dense<0.000000e+00> : vector<2x16xf32>
    %81 = tpu.matmul %80, %8, %cst_118 {dimension_numbers = #tpu.dot_dimension_numbers<[1], [0], [0], [1], [0, 0, 1, 1], [], []>} : vector<2x8xf32>, vector<8x16xf32>, vector<2x16xf32> -> vector<2x16xf32>
    %82 = arith.addf %78, %81 : vector<2x16xf32>
    %c0_119 = arith.constant 0 : index
    %c3_120 = arith.constant 3 : index
    %c1_121 = arith.constant 1 : index
    %c0_122 = arith.constant 0 : index
    %c0_123 = arith.constant 0 : index
    %83 = vector.load %arg1[%c0_119, %c3_120, %c1_121, %c0_122, %c0_123] : memref<1x4x3x3x8xf32, #tpu.memory_space<vmem>>, vector<1x1x1x2x8xf32>
    %84 = vector.shape_cast %83 : vector<1x1x1x2x8xf32> to vector<2x8xf32>
    %cst_124 = arith.constant dense<0.000000e+00> : vector<2x16xf32>
    %85 = tpu.matmul %84, %10, %cst_124 {dimension_numbers = #tpu.dot_dimension_numbers<[1], [0], [0], [1], [0, 0, 1, 1], [], []>} : vector<2x8xf32>, vector<8x16xf32>, vector<2x16xf32> -> vector<2x16xf32>
    %86 = arith.addf %82, %85 : vector<2x16xf32>
    %c0_125 = arith.constant 0 : index
    %c2_126 = arith.constant 2 : index
    %c1_127 = arith.constant 1 : index
    %c1_128 = arith.constant 1 : index
    %c0_129 = arith.constant 0 : index
    %87 = vector.load %arg1[%c0_125, %c2_126, %c1_127, %c1_128, %c0_129] : memref<1x4x3x3x8xf32, #tpu.memory_space<vmem>>, vector<1x1x1x2x8xf32>
    %88 = vector.shape_cast %87 : vector<1x1x1x2x8xf32> to vector<2x8xf32>
    %cst_130 = arith.constant dense<0.000000e+00> : vector<2x16xf32>
    %89 = tpu.matmul %88, %12, %cst_130 {dimension_numbers = #tpu.dot_dimension_numbers<[1], [0], [0], [1], [0, 0, 1, 1], [], []>} : vector<2x8xf32>, vector<8x16xf32>, vector<2x16xf32> -> vector<2x16xf32>
    %90 = arith.addf %86, %89 : vector<2x16xf32>
    %c0_131 = arith.constant 0 : index
    %c0_132 = arith.constant 0 : index
    %c2_133 = arith.constant 2 : index
    %c0_134 = arith.constant 0 : index
    %c0_135 = arith.constant 0 : index
    %91 = vector.load %arg1[%c0_131, %c0_132, %c2_133, %c0_134, %c0_135] : memref<1x4x3x3x8xf32, #tpu.memory_space<vmem>>, vector<1x1x1x2x8xf32>
    %92 = vector.shape_cast %91 : vector<1x1x1x2x8xf32> to vector<2x8xf32>
    %cst_136 = arith.constant dense<0.000000e+00> : vector<2x16xf32>
    %93 = tpu.matmul %92, %14, %cst_136 {dimension_numbers = #tpu.dot_dimension_numbers<[1], [0], [0], [1], [0, 0, 1, 1], [], []>} : vector<2x8xf32>, vector<8x16xf32>, vector<2x16xf32> -> vector<2x16xf32>
    %94 = arith.addf %90, %93 : vector<2x16xf32>
    %c0_137 = arith.constant 0 : index
    %c1_138 = arith.constant 1 : index
    %c2_139 = arith.constant 2 : index
    %c0_140 = arith.constant 0 : index
    %c0_141 = arith.constant 0 : index
    %95 = vector.load %arg1[%c0_137, %c1_138, %c2_139, %c0_140, %c0_141] : memref<1x4x3x3x8xf32, #tpu.memory_space<vmem>>, vector<1x1x1x2x8xf32>
    %96 = vector.shape_cast %95 : vector<1x1x1x2x8xf32> to vector<2x8xf32>
    %cst_142 = arith.constant dense<0.000000e+00> : vector<2x16xf32>
    %97 = tpu.matmul %96, %16, %cst_142 {dimension_numbers = #tpu.dot_dimension_numbers<[1], [0], [0], [1], [0, 0, 1, 1], [], []>} : vector<2x8xf32>, vector<8x16xf32>, vector<2x16xf32> -> vector<2x16xf32>
    %98 = arith.addf %94, %97 : vector<2x16xf32>
    %c0_143 = arith.constant 0 : index
    %c0_144 = arith.constant 0 : index
    %c2_145 = arith.constant 2 : index
    %c1_146 = arith.constant 1 : index
    %c0_147 = arith.constant 0 : index
    %99 = vector.load %arg1[%c0_143, %c0_144, %c2_145, %c1_146, %c0_147] : memref<1x4x3x3x8xf32, #tpu.memory_space<vmem>>, vector<1x1x1x2x8xf32>
    %100 = vector.shape_cast %99 : vector<1x1x1x2x8xf32> to vector<2x8xf32>
    %cst_148 = arith.constant dense<0.000000e+00> : vector<2x16xf32>
    %101 = tpu.matmul %100, %18, %cst_148 {dimension_numbers = #tpu.dot_dimension_numbers<[1], [0], [0], [1], [0, 0, 1, 1], [], []>} : vector<2x8xf32>, vector<8x16xf32>, vector<2x16xf32> -> vector<2x16xf32>
    %102 = arith.addf %98, %101 : vector<2x16xf32>
    %103 = vector.broadcast %0 : vector<1x16xf32> to vector<2x16xf32>
    %104 = arith.addf %102, %103 : vector<2x16xf32>
    %cst_149 = arith.constant 0.000000e+00 : f32
    %105 = vector.broadcast %cst_149 : f32 to vector<2x16xf32>
    %106 = arith.cmpf oge, %104, %105 : vector<2x16xf32>
    %cst_150 = arith.constant 2.000000e-01 : f32
    %107 = vector.broadcast %cst_150 : f32 to vector<2x16xf32>
    %108 = arith.mulf %107, %104 : vector<2x16xf32>
    %109 = arith.select %106, %104, %108 : vector<2x16xi1>, vector<2x16xf32>
    %c0_151 = arith.constant 0 : index
    %c1_152 = arith.constant 1 : index
    %c0_153 = arith.constant 0 : index
    %c0_154 = arith.constant 0 : index
    %110 = vector.load %arg4[%c0_151, %c1_152, %c0_153, %c0_154] : memref<1x2x2x16xf32, #tpu.memory_space<vmem>>, vector<1x1x2x16xf32>
    %111 = vector.shape_cast %110 : vector<1x1x2x16xf32> to vector<2x16xf32>
    %112 = vector.shape_cast %109 : vector<2x16xf32> to vector<1x1x2x16xf32>
    tpu.vector_store %arg4[%c0_151, %c1_152, %c0_153, %c0_154], %112 {strides = array<i32>} : memref<1x2x2x16xf32, #tpu.memory_space<vmem>>, vector<1x1x2x16xf32>,
    return
  }
  func.func @transform_0(%arg0: i32) -> (i32, i32, i32, i32, i32) {
    %c0_i32 = arith.constant 0 : i32
    %c0_i32_0 = arith.constant 0 : i32
    %c0_i32_1 = arith.constant 0 : i32
    %c0_i32_2 = arith.constant 0 : i32
    %c0_i32_3 = arith.constant 0 : i32
    return %arg0, %c0_i32, %c0_i32_0, %c0_i32_1, %c0_i32_2 : i32, i32, i32, i32, i32
  }
  func.func @transform_1(%arg0: i32) -> (i32, i32, i32, i32) {
    %c0_i32 = arith.constant 0 : i32
    %c0_i32_0 = arith.constant 0 : i32
    %c0_i32_1 = arith.constant 0 : i32
    %c0_i32_2 = arith.constant 0 : i32
    %c0_i32_3 = arith.constant 0 : i32
    return %c0_i32, %c0_i32_0, %c0_i32_1, %c0_i32_2 : i32, i32, i32, i32
  }
  func.func @transform_2(%arg0: i32) -> (i32, i32) {
    %c0_i32 = arith.constant 0 : i32
    %c0_i32_0 = arith.constant 0 : i32
    %c0_i32_1 = arith.constant 0 : i32
    return %c0_i32, %c0_i32_0 : i32, i32
  }
  func.func @transform_3(%arg0: i32) -> (i32, i32, i32, i32) {
    %c0_i32 = arith.constant 0 : i32
    %c0_i32_0 = arith.constant 0 : i32
    %c0_i32_1 = arith.constant 0 : i32
    %c0_i32_2 = arith.constant 0 : i32
    return %arg0, %c0_i32, %c0_i32_0, %c0_i32_1 : i32, i32, i32, i32
  }
}

module attributes {stable_mosaic.version = 11 : i64} {
  func.func @_gemm_bias_act_kernel(%arg0: i32, %arg1: i32, %arg2: i32, %arg3: memref<8x64xf32, #tpu.memory_space<vmem>>, %arg4: memref<64x64xf32, #tpu.memory_space<vmem>>, %arg5: memref<1x64xf32, #tpu.memory_space<vmem>>, %arg6: memref<8x64xf32, #tpu.memory_space<vmem>>, %arg7: memref<8x64xf32, #tpu.memory_space<vmem>>) attributes {dimension_semantics = [#tpu.dimension_semantics<parallel>, #tpu.dimension_semantics<parallel>, #tpu.dimension_semantics<arbitrary>], iteration_bounds = array<i64: 1, 1, 1>, scalar_prefetch = 0 : i64, scratch_operands = 1 : i64, tpu.core_type = #tpu.core_type<tc>, window_params = [{transform_indices = @transform_0, window_bounds = array<i64: 8, 64>}, {transform_indices = @transform_1, window_bounds = array<i64: 64, 64>}, {transform_indices = @transform_2, window_bounds = array<i64: 1, 64>}, {transform_indices = @transform_3, window_bounds = array<i64: 8, 64>}]} {
    %c0_i32 = arith.constant 0 : i32
    %0 = arith.cmpi eq, %arg2, %c0_i32 : i32
    %1 = arith.extui %0 : i1 to i32
    %c0_i32_0 = arith.constant 0 : i32
    %2 = arith.cmpi ne, %1, %c0_i32_0 : i32
    scf.if %2 {
      %cst_10 = arith.constant 0.000000e+00 : f32
      %12 = vector.broadcast %cst_10 : f32 to vector<8x64xf32>
      %c0_11 = arith.constant 0 : index
      %c0_12 = arith.constant 0 : index
      %13 = vector.load %arg7[%c0_11, %c0_12] : memref<8x64xf32, #tpu.memory_space<vmem>>, vector<8x64xf32>
      tpu.vector_store %arg7[%c0_11, %c0_12], %12 {strides = array<i32>} : memref<8x64xf32, #tpu.memory_space<vmem>>, vector<8x64xf32>,
    } else {
    }
    %c0 = arith.constant 0 : index
    %c0_1 = arith.constant 0 : index
    %3 = vector.load %arg7[%c0, %c0_1] : memref<8x64xf32, #tpu.memory_space<vmem>>, vector<8x64xf32>
    %c0_2 = arith.constant 0 : index
    %c0_3 = arith.constant 0 : index
    %4 = vector.load %arg3[%c0_2, %c0_3] : memref<8x64xf32, #tpu.memory_space<vmem>>, vector<8x64xf32>
    %c0_4 = arith.constant 0 : index
    %c0_5 = arith.constant 0 : index
    %5 = vector.load %arg4[%c0_4, %c0_5] : memref<64x64xf32, #tpu.memory_space<vmem>>, vector<64x64xf32>
    %cst = arith.constant dense<0.000000e+00> : vector<8x64xf32>
    %6 = tpu.matmul %4, %5, %cst {dimension_numbers = #tpu.dot_dimension_numbers<[1], [0], [0], [1], [0, 0, 1, 1], [], []>} : vector<8x64xf32>, vector<64x64xf32>, vector<8x64xf32> -> vector<8x64xf32>
    %7 = arith.addf %3, %6 : vector<8x64xf32>
    %c0_6 = arith.constant 0 : index
    %c0_7 = arith.constant 0 : index
    %8 = vector.load %arg7[%c0_6, %c0_7] : memref<8x64xf32, #tpu.memory_space<vmem>>, vector<8x64xf32>
    tpu.vector_store %arg7[%c0_6, %c0_7], %7 {strides = array<i32>} : memref<8x64xf32, #tpu.memory_space<vmem>>, vector<8x64xf32>,
    %c0_i32_8 = arith.constant 0 : i32
    %9 = arith.cmpi eq, %arg2, %c0_i32_8 : i32
    %10 = arith.extui %9 : i1 to i32
    %c0_i32_9 = arith.constant 0 : i32
    %11 = arith.cmpi ne, %10, %c0_i32_9 : i32
    scf.if %11 {
      %c0_10 = arith.constant 0 : index
      %c0_11 = arith.constant 0 : index
      %12 = vector.load %arg7[%c0_10, %c0_11] : memref<8x64xf32, #tpu.memory_space<vmem>>, vector<8x64xf32>
      %c0_12 = arith.constant 0 : index
      %c0_13 = arith.constant 0 : index
      %13 = vector.load %arg5[%c0_12, %c0_13] : memref<1x64xf32, #tpu.memory_space<vmem>>, vector<1x64xf32>
      %14 = vector.broadcast %13 : vector<1x64xf32> to vector<8x64xf32>
      %15 = arith.addf %12, %14 : vector<8x64xf32>
      %cst_14 = arith.constant 0.000000e+00 : f32
      %16 = vector.broadcast %cst_14 : f32 to vector<8x64xf32>
      %17 = arith.cmpf oge, %15, %16 : vector<8x64xf32>
      %cst_15 = arith.constant 2.000000e-01 : f32
      %18 = vector.broadcast %cst_15 : f32 to vector<8x64xf32>
      %19 = arith.mulf %18, %15 : vector<8x64xf32>
      %20 = arith.select %17, %15, %19 : vector<8x64xi1>, vector<8x64xf32>
      %c0_16 = arith.constant 0 : index
      %c0_17 = arith.constant 0 : index
      %21 = vector.load %arg6[%c0_16, %c0_17] : memref<8x64xf32, #tpu.memory_space<vmem>>, vector<8x64xf32>
      tpu.vector_store %arg6[%c0_16, %c0_17], %20 {strides = array<i32>} : memref<8x64xf32, #tpu.memory_space<vmem>>, vector<8x64xf32>,
    } else {
    }
    return
  }
  func.func @transform_0(%arg0: i32, %arg1: i32, %arg2: i32) -> (i32, i32) {
    %c0_i32 = arith.constant 0 : i32
    return %arg0, %arg2 : i32, i32
  }
  func.func @transform_1(%arg0: i32, %arg1: i32, %arg2: i32) -> (i32, i32) {
    %c0_i32 = arith.constant 0 : i32
    return %arg2, %arg1 : i32, i32
  }
  func.func @transform_2(%arg0: i32, %arg1: i32, %arg2: i32) -> (i32, i32) {
    %c0_i32 = arith.constant 0 : i32
    %c0_i32_0 = arith.constant 0 : i32
    return %c0_i32, %arg1 : i32, i32
  }
  func.func @transform_3(%arg0: i32, %arg1: i32, %arg2: i32) -> (i32, i32) {
    %c0_i32 = arith.constant 0 : i32
    return %arg0, %arg1 : i32, i32
  }
}

module attributes {stable_mosaic.version = 11 : i64} {
  func.func @_gemm_bias_act_kernel(%arg0: i32, %arg1: i32, %arg2: i32, %arg3: memref<8x64xf32, #tpu.memory_space<vmem>>, %arg4: memref<64x32xf32, #tpu.memory_space<vmem>>, %arg5: memref<1x32xf32, #tpu.memory_space<vmem>>, %arg6: memref<8x32xf32, #tpu.memory_space<vmem>>, %arg7: memref<8x32xf32, #tpu.memory_space<vmem>>) attributes {dimension_semantics = [#tpu.dimension_semantics<parallel>, #tpu.dimension_semantics<parallel>, #tpu.dimension_semantics<arbitrary>], iteration_bounds = array<i64: 1, 1, 1>, scalar_prefetch = 0 : i64, scratch_operands = 1 : i64, tpu.core_type = #tpu.core_type<tc>, window_params = [{transform_indices = @transform_0, window_bounds = array<i64: 8, 64>}, {transform_indices = @transform_1, window_bounds = array<i64: 64, 32>}, {transform_indices = @transform_2, window_bounds = array<i64: 1, 32>}, {transform_indices = @transform_3, window_bounds = array<i64: 8, 32>}]} {
    %c0_i32 = arith.constant 0 : i32
    %0 = arith.cmpi eq, %arg2, %c0_i32 : i32
    %1 = arith.extui %0 : i1 to i32
    %c0_i32_0 = arith.constant 0 : i32
    %2 = arith.cmpi ne, %1, %c0_i32_0 : i32
    scf.if %2 {
      %cst_10 = arith.constant 0.000000e+00 : f32
      %12 = vector.broadcast %cst_10 : f32 to vector<8x32xf32>
      %c0_11 = arith.constant 0 : index
      %c0_12 = arith.constant 0 : index
      %13 = vector.load %arg7[%c0_11, %c0_12] : memref<8x32xf32, #tpu.memory_space<vmem>>, vector<8x32xf32>
      tpu.vector_store %arg7[%c0_11, %c0_12], %12 {strides = array<i32>} : memref<8x32xf32, #tpu.memory_space<vmem>>, vector<8x32xf32>,
    } else {
    }
    %c0 = arith.constant 0 : index
    %c0_1 = arith.constant 0 : index
    %3 = vector.load %arg7[%c0, %c0_1] : memref<8x32xf32, #tpu.memory_space<vmem>>, vector<8x32xf32>
    %c0_2 = arith.constant 0 : index
    %c0_3 = arith.constant 0 : index
    %4 = vector.load %arg3[%c0_2, %c0_3] : memref<8x64xf32, #tpu.memory_space<vmem>>, vector<8x64xf32>
    %c0_4 = arith.constant 0 : index
    %c0_5 = arith.constant 0 : index
    %5 = vector.load %arg4[%c0_4, %c0_5] : memref<64x32xf32, #tpu.memory_space<vmem>>, vector<64x32xf32>
    %cst = arith.constant dense<0.000000e+00> : vector<8x32xf32>
    %6 = tpu.matmul %4, %5, %cst {dimension_numbers = #tpu.dot_dimension_numbers<[1], [0], [0], [1], [0, 0, 1, 1], [], []>} : vector<8x64xf32>, vector<64x32xf32>, vector<8x32xf32> -> vector<8x32xf32>
    %7 = arith.addf %3, %6 : vector<8x32xf32>
    %c0_6 = arith.constant 0 : index
    %c0_7 = arith.constant 0 : index
    %8 = vector.load %arg7[%c0_6, %c0_7] : memref<8x32xf32, #tpu.memory_space<vmem>>, vector<8x32xf32>
    tpu.vector_store %arg7[%c0_6, %c0_7], %7 {strides = array<i32>} : memref<8x32xf32, #tpu.memory_space<vmem>>, vector<8x32xf32>,
    %c0_i32_8 = arith.constant 0 : i32
    %9 = arith.cmpi eq, %arg2, %c0_i32_8 : i32
    %10 = arith.extui %9 : i1 to i32
    %c0_i32_9 = arith.constant 0 : i32
    %11 = arith.cmpi ne, %10, %c0_i32_9 : i32
    scf.if %11 {
      %c0_10 = arith.constant 0 : index
      %c0_11 = arith.constant 0 : index
      %12 = vector.load %arg7[%c0_10, %c0_11] : memref<8x32xf32, #tpu.memory_space<vmem>>, vector<8x32xf32>
      %c0_12 = arith.constant 0 : index
      %c0_13 = arith.constant 0 : index
      %13 = vector.load %arg5[%c0_12, %c0_13] : memref<1x32xf32, #tpu.memory_space<vmem>>, vector<1x32xf32>
      %14 = vector.broadcast %13 : vector<1x32xf32> to vector<8x32xf32>
      %15 = arith.addf %12, %14 : vector<8x32xf32>
      %c0_14 = arith.constant 0 : index
      %c0_15 = arith.constant 0 : index
      %16 = vector.load %arg6[%c0_14, %c0_15] : memref<8x32xf32, #tpu.memory_space<vmem>>, vector<8x32xf32>
      tpu.vector_store %arg6[%c0_14, %c0_15], %15 {strides = array<i32>} : memref<8x32xf32, #tpu.memory_space<vmem>>, vector<8x32xf32>,
    } else {
    }
    return
  }
  func.func @transform_0(%arg0: i32, %arg1: i32, %arg2: i32) -> (i32, i32) {
    %c0_i32 = arith.constant 0 : i32
    return %arg0, %arg2 : i32, i32
  }
  func.func @transform_1(%arg0: i32, %arg1: i32, %arg2: i32) -> (i32, i32) {
    %c0_i32 = arith.constant 0 : i32
    return %arg2, %arg1 : i32, i32
  }
  func.func @transform_2(%arg0: i32, %arg1: i32, %arg2: i32) -> (i32, i32) {
    %c0_i32 = arith.constant 0 : i32
    %c0_i32_0 = arith.constant 0 : i32
    return %c0_i32, %arg1 : i32, i32
  }
  func.func @transform_3(%arg0: i32, %arg1: i32, %arg2: i32) -> (i32, i32) {
    %c0_i32 = arith.constant 0 : i32
    return %arg0, %arg1 : i32, i32
  }
}

</mosaic_0001>

<bundles_post_ra>
// kernel: pallas_forward.10
= control target key start
LH: loop header
LB: loop body
LE: loop exit
PB: predicated region body
PF: predicated region fallthrough
CT: control target
= control target key end

     0   :  { %s3357_s12 = smov 0   ;;  %s3660_s0 = inlined_call_operand.vmem [shape: f32[2,1,6,6,8], index: 0, kind: input, shape index: {}]   ;;  %s3661_s1 = inlined_call_operand.vmem [shape: f32[3,3,8,8], index: 1, kind: input, shape index: {}]   ;;  %s3662_s2 = inlined_call_operand.vmem [shape: f32[1,8], index: 2, kind: input, shape index: {}]   ;;  %s3663_s3 = inlined_call_operand.vmem [shape: f32[2,4,4,8], index: 3, kind: output, shape index: {}]  }
   0x1 LB: > { %s2972_s13 = sadd.s32 4294967295, %s3333_s12   ;;  %p2976_p0 = scmp.ge.s32.totalorder %s3333_s12, 1  ;;  %s3333_s12 = sphi %s3357_s12, %s13_s12  }
   0x2   : > { %p137_p1 = scmp.lt.s32.totalorder %s3333_s12, 3 }
   0x4   : > { %p138_p2 = pnand %p2976_p0, %p137_p1 }
   0x5   : > { %v3368_v0 = vld [vmem:[%s3661_s1 + $0x8] sm:$0xff] (!%p138_p2)  ;;  %v3373_v1 = vld [vmem:[%s3661_s1] sm:$0xff] (!%p138_p2)  ;;  %p161_p3 = scmp.lt.s32.totalorder (!%p138_p2), %s2972_s13, 1  ;;  %v3335_v2 = vmov (!%p138_p2), 0.0   ;;  %vm3336_vm0 = vmmov (!%p138_p2), 0   ;;  %vm191_vm1 = vcmask (!%p138_p2), 64512  }
   0x6   : > { %141 = sbr.rel (%p138_p2) target bundleno = 308 (0x134), region = 32  ;;  %3136 = vmatprep.subr.mxu0 (!%p138_p2), %v3335_v2  ;;  %3141 = vmatprep.subr.mxu1 (!%p138_p2), %v3335_v2  ;;  %v3396_v3 = vld [vmem:[%s3661_s1 + $0x10] sm:$0xff] (!%p138_p2)  ;;  %v3401_v4 = vld [vmem:[%s3661_s1 + $0x18] sm:$0xff] (!%p138_p2)  ;;  %v3418_v9 = vld [vmem:[%s3661_s1 + $0x20] sm:$0xff] (!%p138_p2)  ;;  %vm875_vm3 = vcmask (!%p138_p2), 60416  }
   0x7   : > { %3137 = vmatpush3.msra.mxu0 (!%p138_p2), %v3368_v0  ;;  %3138 = vmatprep.mubr.msk.f32.mxu0 (!%p138_p2), %vm3336_vm0, %v3335_v2  ;;  %v3423_v10 = vld [vmem:[%s3661_s1 + $0x28] sm:$0xff] (!%p138_p2)  ;;  %v3440_v13 = vld [vmem:[%s3661_s1 + $0x30] sm:$0xff] (!%p138_p2)  ;;  %v3445_v14 = vld [vmem:[%s3661_s1 + $0x38] sm:$0xff] (!%p138_p2) }
   0x8   : > { %3142 = vmatpush3.msra.mxu1 (!%p138_p2), %v3373_v1  ;;  %3143 = vmatprep.mubr.msk.f32.mxu1 (!%p138_p2), %vm3336_vm0, %v3335_v2  ;;  %v3462_v17 = vld [vmem:[%s3661_s1 + $0x40] sm:$0xff] (!%p138_p2) }
   0x9   : > { %3146 = vmatprep.subr.mxu0 (!%p138_p2), %v3335_v2  ;;  %3151 = vmatprep.subr.mxu1 (!%p138_p2), %v3335_v2 }
   0xd   : > { %s3665_s13 = smov (!%p161_p3, %s2972_s13), 1 }
   0xe   : > { %s3316_s18 = smul.u32 48, %s3665_s13  ;;  %s3063_s11 = sshll.u32 %s3665_s13, 4 }
   0xf   : > { %s3644_s16 = scalar_lea.vmem %s3663_s3, %s3063_s11 }
  0x10   : > { %s3391_s21 = scalar_lea.vmem %s3660_s0, %s3316_s18 }
  0x11   : > { %v190_v5 = vld [vmem:[%s3391_s21 + $0x1] sm:$0xf]  ;;  %v2991_v8 = vld [vmem:[%s3391_s21 + $0x8] sm:$0xf]  ;;  %v2997_v15 = vld [vmem:[%s3391_s21 + $0x10] sm:$0xf] }
  0x12   : > { %v189_v6 = vld [vmem:[%s3391_s21] sm:$0xf]  ;;  %3139 = vmatmul.mubr.msk.f32.vlgmr.msra.gmra.mrb[0].mxu0 %vm191_vm1, %v190_v5  ;;  %v2993_v11 = vld [vmem:[%s3391_s21 + $0x9] sm:$0xf]  ;;  %v2999_v16 = vld [vmem:[%s3391_s21 + $0x11] sm:$0xf] }
  0x13   : > { %3144 = vmatmul.mubr.msk.f32.vlgmr.msra.gmra.mrb[0].mxu1 %vm191_vm1, %v189_v6  ;;  %3147 = vmatpush3.msra.mxu0 %v3396_v3  ;;  %v338_v7 = vld [vmem:[%s3391_s21 + $0x2] sm:$0xf]  ;;  %v2995_v12 = vld [vmem:[%s3391_s21 + $0xa] sm:$0xf]  ;;  %v3001_v18 = vld [vmem:[%s3391_s21 + $0x12] sm:$0xf] }
  0x14   : > { %3152 = vmatpush3.msra.mxu1 %v3401_v4  ;;  %3148 = vmatprep.mubr.msk.f32.mxu0 %vm3336_vm0, %v3335_v2  ;;  %v3005_v19 = vld [vmem:[%s3391_s21 + $0x9] sm:$0xf]  ;;  %v3010_v22 = vld [vmem:[%s3391_s21 + $0x10] sm:$0xf]  ;;  %v3016_v25 = vld [vmem:[%s3391_s21 + $0x18] sm:$0xf] }
  0x15   : > { %3153 = vmatprep.mubr.msk.f32.mxu1 %vm3336_vm0, %v3335_v2  ;;  %3156 = vmatprep.subr.mxu0 %v3335_v2  ;;  %v3004_v20 = vld [vmem:[%s3391_s21 + $0x8] sm:$0xf]  ;;  %v3012_v23 = vld [vmem:[%s3391_s21 + $0x11] sm:$0xf]  ;;  %v3018_v26 = vld [vmem:[%s3391_s21 + $0x19] sm:$0xf] }
  0x16   : > { %3161 = vmatprep.subr.mxu1 %v3335_v2  ;;  %3149 = vmatmul.mubr.msk.f32.vlgmr.msra.gmra.mrb[2].mxu0 %vm191_vm1, %v338_v7  ;;  %v3008_v21 = vld [vmem:[%s3391_s21 + $0xa] sm:$0xf]  ;;  %v3014_v24 = vld [vmem:[%s3391_s21 + $0x12] sm:$0xf]  ;;  %v3020_v27 = vld [vmem:[%s3391_s21 + $0x1a] sm:$0xf] }
  0x17   : > { %3154 = vmatmul.mubr.msk.f32.vlgmr.msra.gmra.mrb[2].mxu1 %vm191_vm1, %v2991_v8  ;;  %3157 = vmatpush3.msra.mxu0 %v3418_v9  ;;  %v3024_v28 = vld [vmem:[%s3391_s21 + $0x11] sm:$0xf]  ;;  %v3029_v31 = vld [vmem:[%s3391_s21 + $0x18] sm:$0xf]  ;;  %v3035_v34 = vld [vmem:[%s3391_s21 + $0x20] sm:$0xf] }
  0x18   : > { %3162 = vmatpush3.msra.mxu1 %v3423_v10  ;;  %3158 = vmatprep.mubr.msk.f32.mxu0 %vm3336_vm0, %v3335_v2  ;;  %v3023_v29 = vld [vmem:[%s3391_s21 + $0x10] sm:$0xf]  ;;  %v3031_v32 = vld [vmem:[%s3391_s21 + $0x19] sm:$0xf]  ;;  %v3037_v35 = vld [vmem:[%s3391_s21 + $0x21] sm:$0xf] }
  0x19   : > { %3163 = vmatprep.mubr.msk.f32.mxu1 %vm3336_vm0, %v3335_v2  ;;  %3166 = vmatprep.subr.mxu0 %v3335_v2  ;;  %v3027_v30 = vld [vmem:[%s3391_s21 + $0x12] sm:$0xf]  ;;  %v3033_v33 = vld [vmem:[%s3391_s21 + $0x1a] sm:$0xf]  ;;  %v3039_v36 = vld [vmem:[%s3391_s21 + $0x22] sm:$0xf] }
  0x1a   : > { %3171 = vmatprep.subr.mxu1 %v3335_v2  ;;  %3159 = vmatmul.mubr.msk.f32.vlgmr.msra.gmra.mrb[4].mxu0 %vm191_vm1, %v2993_v11  ;;  %v3043_v37 = vld [vmem:[%s3391_s21 + $0x19] sm:$0xf]  ;;  %v3048_v40 = vld [vmem:[%s3391_s21 + $0x20] sm:$0xf]  ;;  %v3054_v43 = vld [vmem:[%s3391_s21 + $0x28] sm:$0xf] }
  0x1b   : > { %3164 = vmatmul.mubr.msk.f32.vlgmr.msra.gmra.mrb[4].mxu1 %vm191_vm1, %v2995_v12  ;;  %3167 = vmatpush3.msra.mxu0 %v3440_v13  ;;  %v3042_v38 = vld [vmem:[%s3391_s21 + $0x18] sm:$0xf]  ;;  %v3050_v41 = vld [vmem:[%s3391_s21 + $0x21] sm:$0xf]  ;;  %v3056_v44 = vld [vmem:[%s3391_s21 + $0x29] sm:$0xf] }
  0x1c   : > { %3172 = vmatpush3.msra.mxu1 %v3445_v14  ;;  %3168 = vmatprep.mubr.msk.f32.mxu0 %vm3336_vm0, %v3335_v2  ;;  %v3046_v39 = vld [vmem:[%s3391_s21 + $0x1a] sm:$0xf]  ;;  %v3052_v42 = vld [vmem:[%s3391_s21 + $0x22] sm:$0xf]  ;;  %v3058_v45 = vld [vmem:[%s3391_s21 + $0x2a] sm:$0xf] }
  0x1d   : > { %3173 = vmatprep.mubr.msk.f32.mxu1 %vm3336_vm0, %v3335_v2  ;;  %3176 = vmatprep.subr.mxu0 %v3335_v2  ;;  %v3637_v5 = vld [vmem:[%s3662_s2] ss:$0 sm:$0xff] }
  0x1e   : > { %3181 = vmatprep.subr.mxu1 %v3335_v2  ;;  %3169 = vmatmul.mubr.msk.f32.vlgmr.msra.gmra.mrb[6].mxu0 %vm191_vm1, %v2997_v15 }
  0x1f   : > { %3174 = vmatmul.mubr.msk.f32.vlgmr.msra.gmra.mrb[6].mxu1 %vm191_vm1, %v2999_v16  ;;  %3177 = vmatpush3.msra.mxu0 %v3462_v17 }
  0x20   : > { %3182 = vmatpush3.msra.mxu1 %v3368_v0  ;;  %3178 = vmatprep.mubr.msk.f32.mxu0 %vm3336_vm0, %v3335_v2 }
  0x21   : > { %3183 = vmatprep.mubr.msk.f32.mxu1 %vm3336_vm0, %v3335_v2  ;;  %3186 = vmatprep.subr.mxu0 %v3335_v2 }
  0x22   : > { %3191 = vmatprep.subr.mxu1 %v3335_v2  ;;  %3179 = vmatmul.mubr.msk.f32.vlgmr.msra.gmra.mrb[8].mxu0 %vm191_vm1, %v3001_v18 }
  0x23   : > { %3184 = vmatmul.mubr.msk.f32.vlgmr.msra.gmra.mrb[8].mxu1 %vm191_vm1, %v3005_v19  ;;  %3187 = vmatpush3.msra.mxu0 %v3373_v1 }
  0x24   : > { %3192 = vmatpush3.msra.mxu1 %v3396_v3  ;;  %3188 = vmatprep.mubr.msk.f32.mxu0 %vm3336_vm0, %v3335_v2 }
  0x25   : > { %3193 = vmatprep.mubr.msk.f32.mxu1 %vm3336_vm0, %v3335_v2  ;;  %3196 = vmatprep.subr.mxu0 %v3335_v2 }
  0x26   : > { %3201 = vmatprep.subr.mxu1 %v3335_v2  ;;  %3189 = vmatmul.mubr.msk.f32.vlgmr.msra.gmra.mrb[10].mxu0 %vm191_vm1, %v3004_v20 }
  0x27   : > { %3194 = vmatmul.mubr.msk.f32.vlgmr.msra.gmra.mrb[10].mxu1 %vm191_vm1, %v3008_v21  ;;  %3197 = vmatpush3.msra.mxu0 %v3401_v4 }
  0x28   : > { %3202 = vmatpush3.msra.mxu1 %v3418_v9  ;;  %3198 = vmatprep.mubr.msk.f32.mxu0 %vm3336_vm0, %v3335_v2 }
  0x29   : > { %3203 = vmatprep.mubr.msk.f32.mxu1 %vm3336_vm0, %v3335_v2  ;;  %3206 = vmatprep.subr.mxu0 %v3335_v2 }
  0x2a   : > { %3211 = vmatprep.subr.mxu1 %v3335_v2  ;;  %3199 = vmatmul.mubr.msk.f32.vlgmr.msra.gmra.mrb[12].mxu0 %vm191_vm1, %v3010_v22 }
  0x2b   : > { %3204 = vmatmul.mubr.msk.f32.vlgmr.msra.gmra.mrb[12].mxu1 %vm191_vm1, %v3012_v23  ;;  %3207 = vmatpush3.msra.mxu0 %v3423_v10 }
  0x2c   : > { %3212 = vmatpush3.msra.mxu1 %v3440_v13  ;;  %3208 = vmatprep.mubr.msk.f32.mxu0 %vm3336_vm0, %v3335_v2 }
  0x2d   : > { %3213 = vmatprep.mubr.msk.f32.mxu1 %vm3336_vm0, %v3335_v2  ;;  %3216 = vmatprep.subr.mxu0 %v3335_v2 }
  0x2e   : > { %3221 = vmatprep.subr.mxu1 %v3335_v2  ;;  %3209 = vmatmul.mubr.msk.f32.vlgmr.msra.gmra.mrb[14].mxu0 %vm191_vm1, %v3014_v24 }
  0x2f   : > { %3214 = vmatmul.mubr.msk.f32.vlgmr.msra.gmra.mrb[14].mxu1 %vm191_vm1, %v3016_v25  ;;  %3217 = vmatpush3.msra.mxu0 %v3445_v14 }
  0x30   : > { %3222 = vmatpush3.msra.mxu1 %v3462_v17  ;;  %3218 = vmatprep.mubr.msk.f32.mxu0 %vm3336_vm0, %v3335_v2 }
  0x31   : > { %3223 = vmatprep.mubr.msk.f32.mxu1 %vm3336_vm0, %v3335_v2  ;;  %3226 = vmatprep.subr.mxu0 %v3335_v2 }
  0x32   : > { %3231 = vmatprep.subr.mxu1 %v3335_v2  ;;  %3219 = vmatmul.mubr.msk.f32.vlgmr.msra.gmra.mrb[16].mxu0 %vm191_vm1, %v3018_v26 }
  0x33   : > { %3224 = vmatmul.mubr.msk.f32.vlgmr.msra.gmra.mrb[16].mxu1 %vm191_vm1, %v3020_v27  ;;  %3227 = vmatpush3.msra.mxu0 %v3368_v0 }
  0x34   : > { %3232 = vmatpush3.msra.mxu1 %v3373_v1  ;;  %3228 = vmatprep.mubr.msk.f32.mxu0 %vm3336_vm0, %v3335_v2 }
  0x35   : > { %3233 = vmatprep.mubr.msk.f32.mxu1 %vm3336_vm0, %v3335_v2  ;;  %3236 = vmatprep.subr.mxu0 %v3335_v2 }
  0x36   : > { %3241 = vmatprep.subr.mxu1 %v3335_v2  ;;  %3229 = vmatmul.mubr.msk.f32.vlgmr.msra.gmra.mrb[18].mxu0 %vm191_vm1, %v3024_v28 }
  0x37   : > { %3234 = vmatmul.mubr.msk.f32.vlgmr.msra.gmra.mrb[18].mxu1 %vm191_vm1, %v3023_v29  ;;  %3237 = vmatpush3.msra.mxu0 %v3396_v3 }
  0x38   : > { %3242 = vmatpush3.msra.mxu1 %v3401_v4  ;;  %3238 = vmatprep.mubr.msk.f32.mxu0 %vm3336_vm0, %v3335_v2 }
  0x39   : > { %3246 = vmatprep.subr.mxu0 %v3335_v2  ;;  %3243 = vmatprep.mubr.msk.f32.mxu1 %vm3336_vm0, %v3335_v2 }
  0x3a   : > { %3251 = vmatprep.subr.mxu1 %v3335_v2  ;;  %3239 = vmatmul.mubr.msk.f32.vlgmr.msra.gmra.mrb[20].mxu0 %vm191_vm1, %v3027_v30 }
  0x3b   : > { %3244 = vmatmul.mubr.msk.f32.vlgmr.msra.gmra.mrb[20].mxu1 %vm191_vm1, %v3029_v31  ;;  %3247 = vmatpush3.msra.mxu0 %v3418_v9 }
  0x3c   : > { %3252 = vmatpush3.msra.mxu1 %v3423_v10  ;;  %3248 = vmatprep.mubr.msk.f32.mxu0 %vm3336_vm0, %v3335_v2 }
  0x3d   : > { %3256 = vmatprep.subr.mxu0 %v3335_v2  ;;  %3253 = vmatprep.mubr.msk.f32.mxu1 %vm3336_vm0, %v3335_v2 }
  0x3e   : > { %3261 = vmatprep.subr.mxu1 %v3335_v2  ;;  %3249 = vmatmul.mubr.msk.f32.vlgmr.msra.gmra.mrb[22].mxu0 %vm191_vm1, %v3031_v32 }
  0x3f   : > { %3254 = vmatmul.mubr.msk.f32.vlgmr.msra.gmra.mrb[22].mxu1 %vm191_vm1, %v3033_v33  ;;  %3257 = vmatpush3.msra.mxu0 %v3440_v13 }
  0x40   : > { %3262 = vmatpush3.msra.mxu1 %v3445_v14  ;;  %3258 = vmatprep.mubr.msk.f32.mxu0 %vm3336_vm0, %v3335_v2 }
  0x41   : > { %3266 = vmatprep.subr.mxu0 %v3335_v2  ;;  %3263 = vmatprep.mubr.msk.f32.mxu1 %vm3336_vm0, %v3335_v2 }
  0x42   : > { %3271 = vmatprep.subr.mxu1 %v3335_v2  ;;  %3259 = vmatmul.mubr.msk.f32.vlgmr.msra.gmra.mrb[24].mxu0 %vm191_vm1, %v3035_v34 }
  0x43   : > { %3264 = vmatmul.mubr.msk.f32.vlgmr.msra.gmra.mrb[24].mxu1 %vm191_vm1, %v3037_v35  ;;  %3267 = vmatpush3.msra.mxu0 %v3462_v17 }
  0x44   : > { %3272 = vmatpush3.msra.mxu1 %v3368_v0  ;;  %3268 = vmatprep.mubr.msk.f32.mxu0 %vm3336_vm0, %v3335_v2 }
  0x45   : > { %3276 = vmatprep.subr.mxu0 %v3335_v2  ;;  %3273 = vmatprep.mubr.msk.f32.mxu1 %vm3336_vm0, %v3335_v2 }
  0x46   : > { %3281 = vmatprep.subr.mxu1 %v3335_v2  ;;  %3269 = vmatmul.mubr.msk.f32.vlgmr.msra.gmra.mrb[26].mxu0 %vm191_vm1, %v3039_v36 }
  0x47   : > { %3274 = vmatmul.mubr.msk.f32.vlgmr.msra.gmra.mrb[26].mxu1 %vm191_vm1, %v3043_v37  ;;  %3277 = vmatpush3.msra.mxu0 %v3373_v1 }
  0x48   : > { %3282 = vmatpush3.msra.mxu1 %v3396_v3  ;;  %3278 = vmatprep.mubr.msk.f32.mxu0 %vm3336_vm0, %v3335_v2 }
  0x49   : > { %3286 = vmatprep.subr.mxu0 %v3335_v2  ;;  %3283 = vmatprep.mubr.msk.f32.mxu1 %vm3336_vm0, %v3335_v2 }
  0x4a   : > { %3291 = vmatprep.subr.mxu1 %v3335_v2  ;;  %3279 = vmatmul.mubr.msk.f32.vlgmr.msra.gmra.mrb[28].mxu0 %vm191_vm1, %v3042_v38 }
  0x4b   : > { %3284 = vmatmul.mubr.msk.f32.vlgmr.msra.gmra.mrb[28].mxu1 %vm191_vm1, %v3046_v39  ;;  %3287 = vmatpush3.msra.mxu0 %v3401_v4 }
  0x4c   : > { %3292 = vmatpush3.msra.mxu1 %v3418_v9  ;;  %3288 = vmatprep.mubr.msk.f32.mxu0 %vm3336_vm0, %v3335_v2 }
  0x4d   : > { %3296 = vmatprep.subr.mxu0 %v3335_v2  ;;  %3293 = vmatprep.mubr.msk.f32.mxu1 %vm3336_vm0, %v3335_v2 }
  0x4e   : > { %3301 = vmatprep.subr.mxu1 %v3335_v2  ;;  %3289 = vmatmul.mubr.msk.f32.vlgmr.msra.gmra.mrb[30].mxu0 %vm191_vm1, %v3048_v40 }
  0x4f   : > { %3294 = vmatmul.mubr.msk.f32.vlgmr.msra.gmra.mrb[30].mxu1 %vm191_vm1, %v3050_v41  ;;  %3297 = vmatpush3.msra.mxu0 %v3423_v10 }
  0x50   : > { %3302 = vmatpush3.msra.mxu1 %v3440_v13  ;;  %3298 = vmatprep.mubr.msk.f32.mxu0 %vm3336_vm0, %v3335_v2 }
  0x51   : > { %3306 = vmatprep.subr.mxu0 %v3335_v2  ;;  %3303 = vmatprep.mubr.msk.f32.mxu1 %vm3336_vm0, %v3335_v2 }
  0x52   : > { %3311 = vmatprep.subr.mxu1 %v3335_v2  ;;  %3299 = vmatmul.mubr.msk.f32.vlgmr.msra.gmra.mrb[32].mxu0 %vm191_vm1, %v3052_v42 }
  0x53   : > { %3304 = vmatmul.mubr.msk.f32.vlgmr.msra.gmra.mrb[32].mxu1 %vm191_vm1, %v3054_v43  ;;  %3307 = vmatpush3.msra.mxu0 %v3445_v14 }
  0x54   : > { %3312 = vmatpush3.msra.mxu1 %v3462_v17  ;;  %3308 = vmatprep.mubr.msk.f32.mxu0 %vm3336_vm0, %v3335_v2 }
  0x55   : > { %3313 = vmatprep.mubr.msk.f32.mxu1 %vm3336_vm0, %v3335_v2 }
  0x56   : > { %3309 = vmatmul.mubr.msk.f32.vlgmr.msra.gmra.mrb[34].mxu0 %vm191_vm1, %v3056_v44 }
  0x57   : > { %3314 = vmatmul.mubr.msk.f32.vlgmr.msra.gmra.mrb[34].mxu1 %vm191_vm1, %v3058_v45 }
  0xe5   : > { %v261_v46 = vpop.f32.mrb[0].mxu0 }
  0xe6   : > { %v334_v47 = vpop.f32.mrb[0].mxu1  ;;  %v3140_v49 = vpop.f32.mrb[1].mxu0 }
  0xe7   : > { %v335_v48 = vadd.f32 %v334_v47, %v261_v46  ;;  %v3145_v50 = vpop.f32.mrb[1].mxu1 }
  0xe9   : > { %v408_v51 = vpop.f32.mrb[2].mxu0 }
  0xea   : > { %v484_v52 = vpop.f32.mrb[2].mxu1  ;;  %v412_v53 = vadd.f32 %v408_v51, %v335_v48  ;;  %v3150_v54 = vpop.f32.mrb[3].mxu0 }
  0xeb   : > { %v3155_v55 = vpop.f32.mrb[3].mxu1 }
  0xec   : > { %v488_v56 = vadd.f32 %v484_v52, %v412_v53 }
  0xed   : > { %v559_v57 = vpop.f32.mrb[4].mxu0 }
  0xee   : > { %v634_v58 = vpop.f32.mrb[4].mxu1  ;;  %v563_v59 = vadd.f32 %v559_v57, %v488_v56  ;;  %v3160_v60 = vpop.f32.mrb[5].mxu0 }
  0xef   : > { %v3165_v61 = vpop.f32.mrb[5].mxu1 }
  0xf0   : > { %v638_v62 = vadd.f32 %v634_v58, %v563_v59 }
  0xf1   : > { %v710_v63 = vpop.f32.mrb[6].mxu0 }
  0xf2   : > { %v785_v0 = vpop.f32.mrb[6].mxu1  ;;  %v714_v1 = vadd.f32 %v710_v63, %v638_v62  ;;  %v3170_v2 = vpop.f32.mrb[7].mxu0 }
  0xf3   : > { %v3175_v3 = vpop.f32.mrb[7].mxu1 }
  0xf4   : > { %v789_v4 = vadd.f32 %v785_v0, %v714_v1 }
  0xf5   : > { %v860_v6 = vpop.f32.mrb[8].mxu0 }
  0xf6   : > { %v948_v7 = vpop.f32.mrb[8].mxu1  ;;  %v864_v8 = vadd.f32 %v860_v6, %v789_v4  ;;  %v3180_v9 = vpop.f32.mrb[9].mxu0 }
  0xf7   : > { %v3185_v10 = vpop.f32.mrb[9].mxu1 }
  0xf8   : > { %v871_v11 = vadd.f32 %v3637_v5, %v864_v8 }
  0xf9   : > { %v1021_v12 = vpop.f32.mrb[10].mxu0 }
  0xfa   : > { %v1095_v13 = vpop.f32.mrb[10].mxu1  ;;  %vm872_vm2 = vcmp.ge.f32.partialorder %v871_v11, 0.0  ;;  %v873_v14 = vmul.f32 0.2, %v871_v11  ;;  %v1022_v15 = vadd.f32 %v1021_v12, %v948_v7  ;;  %v3190_v16 = vpop.f32.mrb[11].mxu0 }
  0xfb   : > { %v3195_v17 = vpop.f32.mrb[11].mxu1 }
  0xfc   : > { %v874_v18 = vsel %vm872_vm2, %v871_v11, %v873_v14  ;;  %v1099_v19 = vadd.f32 %v1095_v13, %v1022_v15 }
  0xfd   : > { %876 = vst.msk [vmem:[%s3644_s16] sm:$0xf] %vm875_vm3, %v874_v18  ;;  %v1170_v20 = vpop.f32.mrb[12].mxu0 }
  0xfe   : > { %v1245_v21 = vpop.f32.mrb[12].mxu1  ;;  %v1174_v22 = vadd.f32 %v1170_v20, %v1099_v19  ;;  %v3200_v23 = vpop.f32.mrb[13].mxu0 }
  0xff   : > { %v3205_v24 = vpop.f32.mrb[13].mxu1 }
 0x100   : > { %v1249_v25 = vadd.f32 %v1245_v21, %v1174_v22 }
 0x101   : > { %v1320_v26 = vpop.f32.mrb[14].mxu0 }
 0x102   : > { %v1396_v27 = vpop.f32.mrb[14].mxu1  ;;  %v1324_v28 = vadd.f32 %v1320_v26, %v1249_v25  ;;  %v3210_v29 = vpop.f32.mrb[15].mxu0 }
 0x103   : > { %v3215_v30 = vpop.f32.mrb[15].mxu1 }
 0x104   : > { %v1400_v31 = vadd.f32 %v1396_v27, %v1324_v28 }
 0x105   : > { %v1471_v32 = vpop.f32.mrb[16].mxu0 }
 0x106   : > { %v1546_v33 = vpop.f32.mrb[16].mxu1  ;;  %v1475_v34 = vadd.f32 %v1471_v32, %v1400_v31  ;;  %v3220_v35 = vpop.f32.mrb[17].mxu0 }
 0x107   : > { %v3225_v36 = vpop.f32.mrb[17].mxu1 }
 0x108   : > { %v1550_v37 = vadd.f32 %v1546_v33, %v1475_v34 }
 0x109   : > { %v1628_v38 = vpop.f32.mrb[18].mxu0 }
 0x10a   : > { %v1701_v39 = vpop.f32.mrb[18].mxu1  ;;  %v1551_v40 = vadd.f32 %v3637_v5, %v1550_v37  ;;  %v3230_v42 = vpop.f32.mrb[19].mxu0 }
 0x10b   : > { %v1702_v41 = vadd.f32 %v1701_v39, %v1628_v38  ;;  %v3235_v43 = vpop.f32.mrb[19].mxu1 }
 0x10c   : > { %vm1552_vm4 = vcmp.ge.f32.partialorder %v1551_v40, 0.0  ;;  %v1553_v44 = vmul.f32 0.2, %v1551_v40 }
 0x10d   : > { %v1775_v45 = vpop.f32.mrb[20].mxu0 }
 0x10e   : > { %v1850_v46 = vpop.f32.mrb[20].mxu1  ;;  %v1554_v47 = vsel %vm1552_vm4, %v1551_v40, %v1553_v44  ;;  %v1779_v48 = vadd.f32 %v1775_v45, %v1702_v41  ;;  %v3240_v49 = vpop.f32.mrb[21].mxu0 }
 0x10f   : > { %v3245_v50 = vpop.f32.mrb[21].mxu1  ;;  %3022 = vst.msk [vmem:[%s3644_s16 + $0x4] sm:$0xf] %vm875_vm3, %v1554_v47 }
 0x110   : > { %v1854_v51 = vadd.f32 %v1850_v46, %v1779_v48 }
 0x111   : > { %v1925_v52 = vpop.f32.mrb[22].mxu0 }
 0x112   : > { %v2000_v53 = vpop.f32.mrb[22].mxu1  ;;  %v1929_v54 = vadd.f32 %v1925_v52, %v1854_v51  ;;  %v3250_v55 = vpop.f32.mrb[23].mxu0 }
 0x113   : > { %v3255_v56 = vpop.f32.mrb[23].mxu1 }
 0x114   : > { %v2004_v57 = vadd.f32 %v2000_v53, %v1929_v54 }
 0x115   : > { %v2076_v58 = vpop.f32.mrb[24].mxu0 }
 0x116   : > { %v2151_v59 = vpop.f32.mrb[24].mxu1  ;;  %v2080_v60 = vadd.f32 %v2076_v58, %v2004_v57  ;;  %v3260_v61 = vpop.f32.mrb[25].mxu0 }
 0x117   : > { %v3265_v62 = vpop.f32.mrb[25].mxu1 }
 0x118   : > { %v2155_v63 = vadd.f32 %v2151_v59, %v2080_v60 }
 0x119   : > { %v2226_v0 = vpop.f32.mrb[26].mxu0 }
 0x11a   : > { %v2308_v1 = vpop.f32.mrb[26].mxu1  ;;  %v2230_v2 = vadd.f32 %v2226_v0, %v2155_v63  ;;  %v3270_v3 = vpop.f32.mrb[27].mxu0 }
 0x11b   : > { %v3275_v4 = vpop.f32.mrb[27].mxu1 }
 0x11c   : > { %v2231_v6 = vadd.f32 %v3637_v5, %v2230_v2 }
 0x11d   : > { %v2381_v7 = vpop.f32.mrb[28].mxu0 }
 0x11e   : > { %v2455_v8 = vpop.f32.mrb[28].mxu1  ;;  %vm2232_vm5 = vcmp.ge.f32.partialorder %v2231_v6, 0.0  ;;  %v2233_v9 = vmul.f32 0.2, %v2231_v6  ;;  %v2382_v10 = vadd.f32 %v2381_v7, %v2308_v1  ;;  %v3280_v11 = vpop.f32.mrb[29].mxu0 }
 0x11f   : > { %v3285_v12 = vpop.f32.mrb[29].mxu1 }
 0x120   : > { %v2234_v13 = vsel %vm2232_vm5, %v2231_v6, %v2233_v9  ;;  %v2459_v14 = vadd.f32 %v2455_v8, %v2382_v10 }
 0x121   : > { %3041 = vst.msk [vmem:[%s3644_s16 + $0x8] sm:$0xf] %vm875_vm3, %v2234_v13  ;;  %v2530_v15 = vpop.f32.mrb[30].mxu0 }
 0x122   : > { %v2605_v16 = vpop.f32.mrb[30].mxu1  ;;  %v2534_v17 = vadd.f32 %v2530_v15, %v2459_v14  ;;  %v3290_v18 = vpop.f32.mrb[31].mxu0 }
 0x123   : > { %v3295_v19 = vpop.f32.mrb[31].mxu1 }
 0x124   : > { %v2609_v20 = vadd.f32 %v2605_v16, %v2534_v17 }
 0x125   : > { %v2680_v21 = vpop.f32.mrb[32].mxu0 }
 0x126   : > { %v2756_v22 = vpop.f32.mrb[32].mxu1  ;;  %v2684_v23 = vadd.f32 %v2680_v21, %v2609_v20  ;;  %v3300_v24 = vpop.f32.mrb[33].mxu0 }
 0x127   : > { %v3305_v25 = vpop.f32.mrb[33].mxu1 }
 0x128   : > { %v2760_v26 = vadd.f32 %v2756_v22, %v2684_v23 }
 0x129   : > { %v2831_v27 = vpop.f32.mrb[34].mxu0 }
 0x12a   : > { %v2906_v28 = vpop.f32.mrb[34].mxu1  ;;  %v2835_v29 = vadd.f32 %v2831_v27, %v2760_v26  ;;  %v3310_v30 = vpop.f32.mrb[35].mxu0 }
 0x12b   : > { %v3315_v31 = vpop.f32.mrb[35].mxu1 }
 0x12c   : > { %v2910_v32 = vadd.f32 %v2906_v28, %v2835_v29 }
 0x12e   : > { %v2911_v33 = vadd.f32 %v3637_v5, %v2910_v32 }
 0x130   : > { %vm2912_vm6 = vcmp.ge.f32.partialorder %v2911_v33, 0.0  ;;  %v2913_v34 = vmul.f32 0.2, %v2911_v33 }
 0x132   : > { %v2914_v35 = vsel %vm2912_vm6, %v2911_v33, %v2913_v34 }
 0x133   : > { %3060 = vst.msk [vmem:[%s3644_s16 + $0xc] sm:$0xf] %vm875_vm3, %v2914_v35 }
 0x134 PF: > { %s13_s12 = sadd.s32 1, %s3333_s12  }
 0x135   : > { %p10_p4 = scmp.ge.s32.totalorder %s13_s12, 4  }
 0x137   :  { %12 = sbr.rel (!%p10_p4) target bundleno = 1 (0x1), region = 78 }

// kernel: pallas_forward.9
= control target key start
LH: loop header
LB: loop body
LE: loop exit
PB: predicated region body
PF: predicated region fallthrough
CT: control target
= control target key end

     0   :  { %s3370_s12 = smov 0   ;;  %s3673_s0 = inlined_call_operand.vmem [shape: f32[2,4,5,5,8], index: 0, kind: input, shape index: {}]   ;;  %s3674_s1 = inlined_call_operand.vmem [shape: f32[3,3,8,8], index: 1, kind: input, shape index: {}]   ;;  %s3675_s2 = inlined_call_operand.vmem [shape: f32[1,8], index: 2, kind: input, shape index: {}]   ;;  %s3676_s3 = inlined_call_operand.vmem [shape: f32[2,4,4,8], index: 3, kind: output, shape index: {}]  }
   0x1 LB: > { %s2984_s13 = sadd.s32 4294967295, %s3346_s12   ;;  %p2988_p0 = scmp.ge.s32.totalorder %s3346_s12, 1  ;;  %s3346_s12 = sphi %s3370_s12, %s13_s12  }
   0x2   : > { %p137_p1 = scmp.lt.s32.totalorder %s3346_s12, 3 }
   0x4   : > { %p138_p2 = pnand %p2988_p0, %p137_p1 }
   0x5   : > { %v3381_v0 = vld [vmem:[%s3674_s1 + $0x8] sm:$0xff] (!%p138_p2)  ;;  %v3386_v1 = vld [vmem:[%s3674_s1] sm:$0xff] (!%p138_p2)  ;;  %p161_p3 = scmp.lt.s32.totalorder (!%p138_p2), %s2984_s13, 1  ;;  %v3348_v2 = vmov (!%p138_p2), 0.0   ;;  %vm3349_vm0 = vmmov (!%p138_p2), 0   ;;  %vm192_vm1 = vcmask (!%p138_p2), 64512  }
   0x6   : > { %141 = sbr.rel (%p138_p2) target bundleno = 308 (0x134), region = 32  ;;  %3149 = vmatprep.subr.mxu0 (!%p138_p2), %v3348_v2  ;;  %3154 = vmatprep.subr.mxu1 (!%p138_p2), %v3348_v2  ;;  %v3409_v3 = vld [vmem:[%s3674_s1 + $0x10] sm:$0xff] (!%p138_p2)  ;;  %v3414_v4 = vld [vmem:[%s3674_s1 + $0x18] sm:$0xff] (!%p138_p2)  ;;  %v3431_v9 = vld [vmem:[%s3674_s1 + $0x20] sm:$0xff] (!%p138_p2)  ;;  %vm878_vm3 = vcmask (!%p138_p2), 60416  }
   0x7   : > { %3150 = vmatpush3.msra.mxu0 (!%p138_p2), %v3381_v0  ;;  %3151 = vmatprep.mubr.msk.f32.mxu0 (!%p138_p2), %vm3349_vm0, %v3348_v2  ;;  %v3436_v10 = vld [vmem:[%s3674_s1 + $0x28] sm:$0xff] (!%p138_p2)  ;;  %v3453_v13 = vld [vmem:[%s3674_s1 + $0x30] sm:$0xff] (!%p138_p2)  ;;  %v3458_v14 = vld [vmem:[%s3674_s1 + $0x38] sm:$0xff] (!%p138_p2) }
   0x8   : > { %3155 = vmatpush3.msra.mxu1 (!%p138_p2), %v3386_v1  ;;  %3156 = vmatprep.mubr.msk.f32.mxu1 (!%p138_p2), %vm3349_vm0, %v3348_v2  ;;  %v3475_v17 = vld [vmem:[%s3674_s1 + $0x40] sm:$0xff] (!%p138_p2) }
   0x9   : > { %3159 = vmatprep.subr.mxu0 (!%p138_p2), %v3348_v2  ;;  %3164 = vmatprep.subr.mxu1 (!%p138_p2), %v3348_v2 }
   0xd   : > { %s3678_s13 = smov (!%p161_p3, %s2984_s13), 1 }
   0xe   : > { %s3329_s18 = smul.u32 160, %s3678_s13  ;;  %s3076_s11 = sshll.u32 %s3678_s13, 4 }
   0xf   : > { %s3657_s16 = scalar_lea.vmem %s3676_s3, %s3076_s11 }
  0x10   : > { %s3404_s21 = scalar_lea.vmem %s3673_s0, %s3329_s18 }
  0x11   : > { %v3000_v5 = vld [vmem:[%s3404_s21 + $0x28] sm:$0xf]  ;;  %v189_v6 = vld [vmem:[%s3404_s21] sm:$0xf]  ;;  %v3004_v8 = vld [vmem:[%s3404_s21 + $0x50] sm:$0xf] }
  0x12   : > { %3152 = vmatmul.mubr.msk.f32.vlgmr.msra.gmra.mrb[0].mxu0 %vm192_vm1, %v3000_v5  ;;  %3157 = vmatmul.mubr.msk.f32.vlgmr.msra.gmra.mrb[0].mxu1 %vm192_vm1, %v189_v6  ;;  %v339_v7 = vld [vmem:[%s3404_s21 + $0x1] sm:$0xf]  ;;  %v3006_v11 = vld [vmem:[%s3404_s21 + $0x78] sm:$0xf]  ;;  %v3008_v12 = vld [vmem:[%s3404_s21 + $0x51] sm:$0xf] }
  0x13   : > { %3160 = vmatpush3.msra.mxu0 %v3409_v3  ;;  %3165 = vmatpush3.msra.mxu1 %v3414_v4  ;;  %v3010_v15 = vld [vmem:[%s3404_s21 + $0x8] sm:$0xf]  ;;  %v3012_v16 = vld [vmem:[%s3404_s21 + $0x30] sm:$0xf]  ;;  %v3023_v22 = vld [vmem:[%s3404_s21 + $0x58] sm:$0xf] }
  0x14   : > { %3161 = vmatprep.mubr.msk.f32.mxu0 %vm3349_vm0, %v3348_v2  ;;  %3166 = vmatprep.mubr.msk.f32.mxu1 %vm3349_vm0, %v3348_v2  ;;  %v3014_v18 = vld [vmem:[%s3404_s21 + $0x9] sm:$0xf]  ;;  %v3018_v19 = vld [vmem:[%s3404_s21 + $0x30] sm:$0xf]  ;;  %v3025_v23 = vld [vmem:[%s3404_s21 + $0x80] sm:$0xf] }
  0x15   : > { %3169 = vmatprep.subr.mxu0 %v3348_v2  ;;  %3174 = vmatprep.subr.mxu1 %v3348_v2  ;;  %v3017_v20 = vld [vmem:[%s3404_s21 + $0x8] sm:$0xf]  ;;  %v3027_v24 = vld [vmem:[%s3404_s21 + $0x59] sm:$0xf]  ;;  %v3029_v25 = vld [vmem:[%s3404_s21 + $0x10] sm:$0xf] }
  0x16   : > { %3162 = vmatmul.mubr.msk.f32.vlgmr.msra.gmra.mrb[2].mxu0 %vm192_vm1, %v339_v7  ;;  %3167 = vmatmul.mubr.msk.f32.vlgmr.msra.gmra.mrb[2].mxu1 %vm192_vm1, %v3004_v8  ;;  %v3021_v21 = vld [vmem:[%s3404_s21 + $0x9] sm:$0xf]  ;;  %v3031_v26 = vld [vmem:[%s3404_s21 + $0x38] sm:$0xf]  ;;  %v3033_v27 = vld [vmem:[%s3404_s21 + $0x11] sm:$0xf] }
  0x17   : > { %3170 = vmatpush3.msra.mxu0 %v3431_v9  ;;  %3175 = vmatpush3.msra.mxu1 %v3436_v10  ;;  %v3037_v28 = vld [vmem:[%s3404_s21 + $0x38] sm:$0xf]  ;;  %v3036_v29 = vld [vmem:[%s3404_s21 + $0x10] sm:$0xf]  ;;  %v3042_v31 = vld [vmem:[%s3404_s21 + $0x60] sm:$0xf] }
  0x18   : > { %3171 = vmatprep.mubr.msk.f32.mxu0 %vm3349_vm0, %v3348_v2  ;;  %3176 = vmatprep.mubr.msk.f32.mxu1 %vm3349_vm0, %v3348_v2  ;;  %v3040_v30 = vld [vmem:[%s3404_s21 + $0x11] sm:$0xf]  ;;  %v3044_v32 = vld [vmem:[%s3404_s21 + $0x88] sm:$0xf]  ;;  %v3046_v33 = vld [vmem:[%s3404_s21 + $0x61] sm:$0xf] }
  0x19   : > { %3179 = vmatprep.subr.mxu0 %v3348_v2  ;;  %3184 = vmatprep.subr.mxu1 %v3348_v2  ;;  %v3048_v34 = vld [vmem:[%s3404_s21 + $0x18] sm:$0xf]  ;;  %v3050_v35 = vld [vmem:[%s3404_s21 + $0x40] sm:$0xf]  ;;  %v3061_v40 = vld [vmem:[%s3404_s21 + $0x68] sm:$0xf] }
  0x1a   : > { %3172 = vmatmul.mubr.msk.f32.vlgmr.msra.gmra.mrb[4].mxu0 %vm192_vm1, %v3006_v11  ;;  %3177 = vmatmul.mubr.msk.f32.vlgmr.msra.gmra.mrb[4].mxu1 %vm192_vm1, %v3008_v12  ;;  %v3052_v36 = vld [vmem:[%s3404_s21 + $0x19] sm:$0xf]  ;;  %v3056_v37 = vld [vmem:[%s3404_s21 + $0x40] sm:$0xf]  ;;  %v3063_v41 = vld [vmem:[%s3404_s21 + $0x90] sm:$0xf] }
  0x1b   : > { %3180 = vmatpush3.msra.mxu0 %v3453_v13  ;;  %3185 = vmatpush3.msra.mxu1 %v3458_v14  ;;  %v3055_v38 = vld [vmem:[%s3404_s21 + $0x18] sm:$0xf]  ;;  %v3065_v42 = vld [vmem:[%s3404_s21 + $0x69] sm:$0xf]  ;;  %v3067_v43 = vld [vmem:[%s3404_s21 + $0x20] sm:$0xf] }
  0x1c   : > { %3181 = vmatprep.mubr.msk.f32.mxu0 %vm3349_vm0, %v3348_v2  ;;  %3186 = vmatprep.mubr.msk.f32.mxu1 %vm3349_vm0, %v3348_v2  ;;  %v3059_v39 = vld [vmem:[%s3404_s21 + $0x19] sm:$0xf]  ;;  %v3069_v44 = vld [vmem:[%s3404_s21 + $0x48] sm:$0xf]  ;;  %v3071_v45 = vld [vmem:[%s3404_s21 + $0x21] sm:$0xf] }
  0x1d   : > { %3189 = vmatprep.subr.mxu0 %v3348_v2  ;;  %3194 = vmatprep.subr.mxu1 %v3348_v2  ;;  %v3650_v5 = vld [vmem:[%s3675_s2] ss:$0 sm:$0xff] }
  0x1e   : > { %3182 = vmatmul.mubr.msk.f32.vlgmr.msra.gmra.mrb[6].mxu0 %vm192_vm1, %v3010_v15  ;;  %3187 = vmatmul.mubr.msk.f32.vlgmr.msra.gmra.mrb[6].mxu1 %vm192_vm1, %v3012_v16 }
  0x1f   : > { %3190 = vmatpush3.msra.mxu0 %v3475_v17  ;;  %3195 = vmatpush3.msra.mxu1 %v3381_v0 }
  0x20   : > { %3191 = vmatprep.mubr.msk.f32.mxu0 %vm3349_vm0, %v3348_v2  ;;  %3196 = vmatprep.mubr.msk.f32.mxu1 %vm3349_vm0, %v3348_v2 }
  0x21   : > { %3199 = vmatprep.subr.mxu0 %v3348_v2  ;;  %3204 = vmatprep.subr.mxu1 %v3348_v2 }
  0x22   : > { %3192 = vmatmul.mubr.msk.f32.vlgmr.msra.gmra.mrb[8].mxu0 %vm192_vm1, %v3014_v18  ;;  %3197 = vmatmul.mubr.msk.f32.vlgmr.msra.gmra.mrb[8].mxu1 %vm192_vm1, %v3018_v19 }
  0x23   : > { %3200 = vmatpush3.msra.mxu0 %v3386_v1  ;;  %3205 = vmatpush3.msra.mxu1 %v3409_v3 }
  0x24   : > { %3201 = vmatprep.mubr.msk.f32.mxu0 %vm3349_vm0, %v3348_v2  ;;  %3206 = vmatprep.mubr.msk.f32.mxu1 %vm3349_vm0, %v3348_v2 }
  0x25   : > { %3209 = vmatprep.subr.mxu0 %v3348_v2  ;;  %3214 = vmatprep.subr.mxu1 %v3348_v2 }
  0x26   : > { %3202 = vmatmul.mubr.msk.f32.vlgmr.msra.gmra.mrb[10].mxu0 %vm192_vm1, %v3017_v20  ;;  %3207 = vmatmul.mubr.msk.f32.vlgmr.msra.gmra.mrb[10].mxu1 %vm192_vm1, %v3021_v21 }
  0x27   : > { %3210 = vmatpush3.msra.mxu0 %v3414_v4  ;;  %3215 = vmatpush3.msra.mxu1 %v3431_v9 }
  0x28   : > { %3211 = vmatprep.mubr.msk.f32.mxu0 %vm3349_vm0, %v3348_v2  ;;  %3216 = vmatprep.mubr.msk.f32.mxu1 %vm3349_vm0, %v3348_v2 }
  0x29   : > { %3219 = vmatprep.subr.mxu0 %v3348_v2  ;;  %3224 = vmatprep.subr.mxu1 %v3348_v2 }
  0x2a   : > { %3212 = vmatmul.mubr.msk.f32.vlgmr.msra.gmra.mrb[12].mxu0 %vm192_vm1, %v3023_v22  ;;  %3217 = vmatmul.mubr.msk.f32.vlgmr.msra.gmra.mrb[12].mxu1 %vm192_vm1, %v3025_v23 }
  0x2b   : > { %3220 = vmatpush3.msra.mxu0 %v3436_v10  ;;  %3225 = vmatpush3.msra.mxu1 %v3453_v13 }
  0x2c   : > { %3221 = vmatprep.mubr.msk.f32.mxu0 %vm3349_vm0, %v3348_v2  ;;  %3226 = vmatprep.mubr.msk.f32.mxu1 %vm3349_vm0, %v3348_v2 }
  0x2d   : > { %3229 = vmatprep.subr.mxu0 %v3348_v2  ;;  %3234 = vmatprep.subr.mxu1 %v3348_v2 }
  0x2e   : > { %3222 = vmatmul.mubr.msk.f32.vlgmr.msra.gmra.mrb[14].mxu0 %vm192_vm1, %v3027_v24  ;;  %3227 = vmatmul.mubr.msk.f32.vlgmr.msra.gmra.mrb[14].mxu1 %vm192_vm1, %v3029_v25 }
  0x2f   : > { %3230 = vmatpush3.msra.mxu0 %v3458_v14  ;;  %3235 = vmatpush3.msra.mxu1 %v3475_v17 }
  0x30   : > { %3231 = vmatprep.mubr.msk.f32.mxu0 %vm3349_vm0, %v3348_v2  ;;  %3236 = vmatprep.mubr.msk.f32.mxu1 %vm3349_vm0, %v3348_v2 }
  0x31   : > { %3239 = vmatprep.subr.mxu0 %v3348_v2  ;;  %3244 = vmatprep.subr.mxu1 %v3348_v2 }
  0x32   : > { %3232 = vmatmul.mubr.msk.f32.vlgmr.msra.gmra.mrb[16].mxu0 %vm192_vm1, %v3031_v26  ;;  %3237 = vmatmul.mubr.msk.f32.vlgmr.msra.gmra.mrb[16].mxu1 %vm192_vm1, %v3033_v27 }
  0x33   : > { %3240 = vmatpush3.msra.mxu0 %v3381_v0  ;;  %3245 = vmatpush3.msra.mxu1 %v3386_v1 }
  0x34   : > { %3241 = vmatprep.mubr.msk.f32.mxu0 %vm3349_vm0, %v3348_v2  ;;  %3246 = vmatprep.mubr.msk.f32.mxu1 %vm3349_vm0, %v3348_v2 }
  0x35   : > { %3249 = vmatprep.subr.mxu0 %v3348_v2  ;;  %3254 = vmatprep.subr.mxu1 %v3348_v2 }
  0x36   : > { %3242 = vmatmul.mubr.msk.f32.vlgmr.msra.gmra.mrb[18].mxu0 %vm192_vm1, %v3037_v28  ;;  %3247 = vmatmul.mubr.msk.f32.vlgmr.msra.gmra.mrb[18].mxu1 %vm192_vm1, %v3036_v29 }
  0x37   : > { %3250 = vmatpush3.msra.mxu0 %v3409_v3  ;;  %3255 = vmatpush3.msra.mxu1 %v3414_v4 }
  0x38   : > { %3251 = vmatprep.mubr.msk.f32.mxu0 %vm3349_vm0, %v3348_v2  ;;  %3259 = vmatprep.subr.mxu0 %v3348_v2 }
  0x39   : > { %3256 = vmatprep.mubr.msk.f32.mxu1 %vm3349_vm0, %v3348_v2  ;;  %3264 = vmatprep.subr.mxu1 %v3348_v2 }
  0x3a   : > { %3252 = vmatmul.mubr.msk.f32.vlgmr.msra.gmra.mrb[20].mxu0 %vm192_vm1, %v3040_v30  ;;  %3257 = vmatmul.mubr.msk.f32.vlgmr.msra.gmra.mrb[20].mxu1 %vm192_vm1, %v3042_v31 }
  0x3b   : > { %3260 = vmatpush3.msra.mxu0 %v3431_v9  ;;  %3265 = vmatpush3.msra.mxu1 %v3436_v10 }
  0x3c   : > { %3261 = vmatprep.mubr.msk.f32.mxu0 %vm3349_vm0, %v3348_v2  ;;  %3269 = vmatprep.subr.mxu0 %v3348_v2 }
  0x3d   : > { %3266 = vmatprep.mubr.msk.f32.mxu1 %vm3349_vm0, %v3348_v2  ;;  %3274 = vmatprep.subr.mxu1 %v3348_v2 }
  0x3e   : > { %3262 = vmatmul.mubr.msk.f32.vlgmr.msra.gmra.mrb[22].mxu0 %vm192_vm1, %v3044_v32  ;;  %3267 = vmatmul.mubr.msk.f32.vlgmr.msra.gmra.mrb[22].mxu1 %vm192_vm1, %v3046_v33 }
  0x3f   : > { %3270 = vmatpush3.msra.mxu0 %v3453_v13  ;;  %3275 = vmatpush3.msra.mxu1 %v3458_v14 }
  0x40   : > { %3271 = vmatprep.mubr.msk.f32.mxu0 %vm3349_vm0, %v3348_v2  ;;  %3279 = vmatprep.subr.mxu0 %v3348_v2 }
  0x41   : > { %3276 = vmatprep.mubr.msk.f32.mxu1 %vm3349_vm0, %v3348_v2  ;;  %3284 = vmatprep.subr.mxu1 %v3348_v2 }
  0x42   : > { %3272 = vmatmul.mubr.msk.f32.vlgmr.msra.gmra.mrb[24].mxu0 %vm192_vm1, %v3048_v34  ;;  %3277 = vmatmul.mubr.msk.f32.vlgmr.msra.gmra.mrb[24].mxu1 %vm192_vm1, %v3050_v35 }
  0x43   : > { %3280 = vmatpush3.msra.mxu0 %v3475_v17  ;;  %3285 = vmatpush3.msra.mxu1 %v3381_v0 }
  0x44   : > { %3281 = vmatprep.mubr.msk.f32.mxu0 %vm3349_vm0, %v3348_v2  ;;  %3289 = vmatprep.subr.mxu0 %v3348_v2 }
  0x45   : > { %3286 = vmatprep.mubr.msk.f32.mxu1 %vm3349_vm0, %v3348_v2  ;;  %3294 = vmatprep.subr.mxu1 %v3348_v2 }
  0x46   : > { %3282 = vmatmul.mubr.msk.f32.vlgmr.msra.gmra.mrb[26].mxu0 %vm192_vm1, %v3052_v36  ;;  %3287 = vmatmul.mubr.msk.f32.vlgmr.msra.gmra.mrb[26].mxu1 %vm192_vm1, %v3056_v37 }
  0x47   : > { %3290 = vmatpush3.msra.mxu0 %v3386_v1  ;;  %3295 = vmatpush3.msra.mxu1 %v3409_v3 }
  0x48   : > { %3291 = vmatprep.mubr.msk.f32.mxu0 %vm3349_vm0, %v3348_v2  ;;  %3299 = vmatprep.subr.mxu0 %v3348_v2 }
  0x49   : > { %3296 = vmatprep.mubr.msk.f32.mxu1 %vm3349_vm0, %v3348_v2  ;;  %3304 = vmatprep.subr.mxu1 %v3348_v2 }
  0x4a   : > { %3292 = vmatmul.mubr.msk.f32.vlgmr.msra.gmra.mrb[28].mxu0 %vm192_vm1, %v3055_v38  ;;  %3297 = vmatmul.mubr.msk.f32.vlgmr.msra.gmra.mrb[28].mxu1 %vm192_vm1, %v3059_v39 }
  0x4b   : > { %3300 = vmatpush3.msra.mxu0 %v3414_v4  ;;  %3305 = vmatpush3.msra.mxu1 %v3431_v9 }
  0x4c   : > { %3301 = vmatprep.mubr.msk.f32.mxu0 %vm3349_vm0, %v3348_v2  ;;  %3309 = vmatprep.subr.mxu0 %v3348_v2 }
  0x4d   : > { %3306 = vmatprep.mubr.msk.f32.mxu1 %vm3349_vm0, %v3348_v2  ;;  %3314 = vmatprep.subr.mxu1 %v3348_v2 }
  0x4e   : > { %3302 = vmatmul.mubr.msk.f32.vlgmr.msra.gmra.mrb[30].mxu0 %vm192_vm1, %v3061_v40  ;;  %3307 = vmatmul.mubr.msk.f32.vlgmr.msra.gmra.mrb[30].mxu1 %vm192_vm1, %v3063_v41 }
  0x4f   : > { %3310 = vmatpush3.msra.mxu0 %v3436_v10  ;;  %3315 = vmatpush3.msra.mxu1 %v3453_v13 }
  0x50   : > { %3311 = vmatprep.mubr.msk.f32.mxu0 %vm3349_vm0, %v3348_v2  ;;  %3319 = vmatprep.subr.mxu0 %v3348_v2 }
  0x51   : > { %3316 = vmatprep.mubr.msk.f32.mxu1 %vm3349_vm0, %v3348_v2  ;;  %3324 = vmatprep.subr.mxu1 %v3348_v2 }
  0x52   : > { %3312 = vmatmul.mubr.msk.f32.vlgmr.msra.gmra.mrb[32].mxu0 %vm192_vm1, %v3065_v42  ;;  %3317 = vmatmul.mubr.msk.f32.vlgmr.msra.gmra.mrb[32].mxu1 %vm192_vm1, %v3067_v43 }
  0x53   : > { %3320 = vmatpush3.msra.mxu0 %v3458_v14  ;;  %3325 = vmatpush3.msra.mxu1 %v3475_v17 }
  0x54   : > { %3321 = vmatprep.mubr.msk.f32.mxu0 %vm3349_vm0, %v3348_v2  ;;  %3326 = vmatprep.mubr.msk.f32.mxu1 %vm3349_vm0, %v3348_v2 }
  0x56   : > { %3322 = vmatmul.mubr.msk.f32.vlgmr.msra.gmra.mrb[34].mxu0 %vm192_vm1, %v3069_v44  ;;  %3327 = vmatmul.mubr.msk.f32.vlgmr.msra.gmra.mrb[34].mxu1 %vm192_vm1, %v3071_v45 }
  0xe5   : > { %v262_v46 = vpop.f32.mrb[0].mxu0  ;;  %v335_v47 = vpop.f32.mrb[0].mxu1 }
  0xe6   : > { %v336_v48 = vadd.f32 %v335_v47, %v262_v46  ;;  %v3153_v49 = vpop.f32.mrb[1].mxu0  ;;  %v3158_v50 = vpop.f32.mrb[1].mxu1 }
  0xe9   : > { %v409_v51 = vpop.f32.mrb[2].mxu0  ;;  %v485_v52 = vpop.f32.mrb[2].mxu1 }
  0xea   : > { %v413_v53 = vadd.f32 %v409_v51, %v336_v48  ;;  %v3163_v54 = vpop.f32.mrb[3].mxu0  ;;  %v3168_v55 = vpop.f32.mrb[3].mxu1 }
  0xec   : > { %v489_v56 = vadd.f32 %v485_v52, %v413_v53 }
  0xed   : > { %v561_v57 = vpop.f32.mrb[4].mxu0  ;;  %v636_v58 = vpop.f32.mrb[4].mxu1 }
  0xee   : > { %v565_v59 = vadd.f32 %v561_v57, %v489_v56  ;;  %v3173_v60 = vpop.f32.mrb[5].mxu0  ;;  %v3178_v61 = vpop.f32.mrb[5].mxu1 }
  0xf0   : > { %v640_v62 = vadd.f32 %v636_v58, %v565_v59 }
  0xf1   : > { %v712_v63 = vpop.f32.mrb[6].mxu0  ;;  %v788_v0 = vpop.f32.mrb[6].mxu1 }
  0xf2   : > { %v716_v1 = vadd.f32 %v712_v63, %v640_v62  ;;  %v3183_v2 = vpop.f32.mrb[7].mxu0  ;;  %v3188_v3 = vpop.f32.mrb[7].mxu1 }
  0xf4   : > { %v792_v4 = vadd.f32 %v788_v0, %v716_v1 }
  0xf5   : > { %v863_v6 = vpop.f32.mrb[8].mxu0  ;;  %v951_v7 = vpop.f32.mrb[8].mxu1 }
  0xf6   : > { %v867_v8 = vadd.f32 %v863_v6, %v792_v4  ;;  %v3193_v9 = vpop.f32.mrb[9].mxu0  ;;  %v3198_v10 = vpop.f32.mrb[9].mxu1 }
  0xf8   : > { %v874_v11 = vadd.f32 %v3650_v5, %v867_v8 }
  0xf9   : > { %v1024_v12 = vpop.f32.mrb[10].mxu0  ;;  %v1098_v13 = vpop.f32.mrb[10].mxu1 }
  0xfa   : > { %vm875_vm2 = vcmp.ge.f32.partialorder %v874_v11, 0.0  ;;  %v876_v14 = vmul.f32 0.2, %v874_v11  ;;  %v1025_v15 = vadd.f32 %v1024_v12, %v951_v7  ;;  %v3203_v16 = vpop.f32.mrb[11].mxu0  ;;  %v3208_v17 = vpop.f32.mrb[11].mxu1 }
  0xfc   : > { %v877_v18 = vsel %vm875_vm2, %v874_v11, %v876_v14  ;;  %v1102_v19 = vadd.f32 %v1098_v13, %v1025_v15 }
  0xfd   : > { %879 = vst.msk [vmem:[%s3657_s16] sm:$0xf] %vm878_vm3, %v877_v18  ;;  %v1174_v20 = vpop.f32.mrb[12].mxu0  ;;  %v1250_v21 = vpop.f32.mrb[12].mxu1 }
  0xfe   : > { %v1178_v22 = vadd.f32 %v1174_v20, %v1102_v19  ;;  %v3213_v23 = vpop.f32.mrb[13].mxu0  ;;  %v3218_v24 = vpop.f32.mrb[13].mxu1 }
 0x100   : > { %v1254_v25 = vadd.f32 %v1250_v21, %v1178_v22 }
 0x101   : > { %v1325_v26 = vpop.f32.mrb[14].mxu0  ;;  %v1401_v27 = vpop.f32.mrb[14].mxu1 }
 0x102   : > { %v1329_v28 = vadd.f32 %v1325_v26, %v1254_v25  ;;  %v3223_v29 = vpop.f32.mrb[15].mxu0  ;;  %v3228_v30 = vpop.f32.mrb[15].mxu1 }
 0x104   : > { %v1405_v31 = vadd.f32 %v1401_v27, %v1329_v28 }
 0x105   : > { %v1477_v32 = vpop.f32.mrb[16].mxu0  ;;  %v1552_v33 = vpop.f32.mrb[16].mxu1 }
 0x106   : > { %v1481_v34 = vadd.f32 %v1477_v32, %v1405_v31  ;;  %v3233_v35 = vpop.f32.mrb[17].mxu0  ;;  %v3238_v36 = vpop.f32.mrb[17].mxu1 }
 0x108   : > { %v1556_v37 = vadd.f32 %v1552_v33, %v1481_v34 }
 0x109   : > { %v1634_v38 = vpop.f32.mrb[18].mxu0  ;;  %v1707_v39 = vpop.f32.mrb[18].mxu1 }
 0x10a   : > { %v1557_v40 = vadd.f32 %v3650_v5, %v1556_v37  ;;  %v1708_v41 = vadd.f32 %v1707_v39, %v1634_v38  ;;  %v3243_v42 = vpop.f32.mrb[19].mxu0  ;;  %v3248_v43 = vpop.f32.mrb[19].mxu1 }
 0x10c   : > { %vm1558_vm4 = vcmp.ge.f32.partialorder %v1557_v40, 0.0  ;;  %v1559_v44 = vmul.f32 0.2, %v1557_v40 }
 0x10d   : > { %v1781_v45 = vpop.f32.mrb[20].mxu0  ;;  %v1857_v46 = vpop.f32.mrb[20].mxu1 }
 0x10e   : > { %v1560_v47 = vsel %vm1558_vm4, %v1557_v40, %v1559_v44  ;;  %v1785_v48 = vadd.f32 %v1781_v45, %v1708_v41  ;;  %v3253_v49 = vpop.f32.mrb[21].mxu0  ;;  %v3258_v50 = vpop.f32.mrb[21].mxu1 }
 0x10f   : > { %3035 = vst.msk [vmem:[%s3657_s16 + $0x4] sm:$0xf] %vm878_vm3, %v1560_v47 }
 0x110   : > { %v1861_v51 = vadd.f32 %v1857_v46, %v1785_v48 }
 0x111   : > { %v1933_v52 = vpop.f32.mrb[22].mxu0  ;;  %v2008_v53 = vpop.f32.mrb[22].mxu1 }
 0x112   : > { %v1937_v54 = vadd.f32 %v1933_v52, %v1861_v51  ;;  %v3263_v55 = vpop.f32.mrb[23].mxu0  ;;  %v3268_v56 = vpop.f32.mrb[23].mxu1 }
 0x114   : > { %v2012_v57 = vadd.f32 %v2008_v53, %v1937_v54 }
 0x115   : > { %v2084_v58 = vpop.f32.mrb[24].mxu0  ;;  %v2160_v59 = vpop.f32.mrb[24].mxu1 }
 0x116   : > { %v2088_v60 = vadd.f32 %v2084_v58, %v2012_v57  ;;  %v3273_v61 = vpop.f32.mrb[25].mxu0  ;;  %v3278_v62 = vpop.f32.mrb[25].mxu1 }
 0x118   : > { %v2164_v63 = vadd.f32 %v2160_v59, %v2088_v60 }
 0x119   : > { %v2235_v0 = vpop.f32.mrb[26].mxu0  ;;  %v2317_v1 = vpop.f32.mrb[26].mxu1 }
 0x11a   : > { %v2239_v2 = vadd.f32 %v2235_v0, %v2164_v63  ;;  %v3283_v3 = vpop.f32.mrb[27].mxu0  ;;  %v3288_v4 = vpop.f32.mrb[27].mxu1 }
 0x11c   : > { %v2240_v6 = vadd.f32 %v3650_v5, %v2239_v2 }
 0x11d   : > { %v2390_v7 = vpop.f32.mrb[28].mxu0  ;;  %v2464_v8 = vpop.f32.mrb[28].mxu1 }
 0x11e   : > { %vm2241_vm5 = vcmp.ge.f32.partialorder %v2240_v6, 0.0  ;;  %v2242_v9 = vmul.f32 0.2, %v2240_v6  ;;  %v2391_v10 = vadd.f32 %v2390_v7, %v2317_v1  ;;  %v3293_v11 = vpop.f32.mrb[29].mxu0  ;;  %v3298_v12 = vpop.f32.mrb[29].mxu1 }
 0x120   : > { %v2243_v13 = vsel %vm2241_vm5, %v2240_v6, %v2242_v9  ;;  %v2468_v14 = vadd.f32 %v2464_v8, %v2391_v10 }
 0x121   : > { %3054 = vst.msk [vmem:[%s3657_s16 + $0x8] sm:$0xf] %vm878_vm3, %v2243_v13  ;;  %v2540_v15 = vpop.f32.mrb[30].mxu0  ;;  %v2616_v16 = vpop.f32.mrb[30].mxu1 }
 0x122   : > { %v2544_v17 = vadd.f32 %v2540_v15, %v2468_v14  ;;  %v3303_v18 = vpop.f32.mrb[31].mxu0  ;;  %v3308_v19 = vpop.f32.mrb[31].mxu1 }
 0x124   : > { %v2620_v20 = vadd.f32 %v2616_v16, %v2544_v17 }
 0x125   : > { %v2691_v21 = vpop.f32.mrb[32].mxu0  ;;  %v2767_v22 = vpop.f32.mrb[32].mxu1 }
 0x126   : > { %v2695_v23 = vadd.f32 %v2691_v21, %v2620_v20  ;;  %v3313_v24 = vpop.f32.mrb[33].mxu0  ;;  %v3318_v25 = vpop.f32.mrb[33].mxu1 }
 0x128   : > { %v2771_v26 = vadd.f32 %v2767_v22, %v2695_v23 }
 0x129   : > { %v2843_v27 = vpop.f32.mrb[34].mxu0  ;;  %v2918_v28 = vpop.f32.mrb[34].mxu1 }
 0x12a   : > { %v2847_v29 = vadd.f32 %v2843_v27, %v2771_v26  ;;  %v3323_v30 = vpop.f32.mrb[35].mxu0  ;;  %v3328_v31 = vpop.f32.mrb[35].mxu1 }
 0x12c   : > { %v2922_v32 = vadd.f32 %v2918_v28, %v2847_v29 }
 0x12e   : > { %v2923_v33 = vadd.f32 %v3650_v5, %v2922_v32 }
 0x130   : > { %vm2924_vm6 = vcmp.ge.f32.partialorder %v2923_v33, 0.0  ;;  %v2925_v34 = vmul.f32 0.2, %v2923_v33 }
 0x132   : > { %v2926_v35 = vsel %vm2924_vm6, %v2923_v33, %v2925_v34 }
 0x133   : > { %3073 = vst.msk [vmem:[%s3657_s16 + $0xc] sm:$0xf] %vm878_vm3, %v2926_v35 }
 0x134 PF: > { %s13_s12 = sadd.s32 1, %s3346_s12  }
 0x135   : > { %p10_p4 = scmp.ge.s32.totalorder %s13_s12, 4  }
 0x137   :  { %12 = sbr.rel (!%p10_p4) target bundleno = 1 (0x1), region = 90 }

// kernel: pallas_forward.8
= control target key start
LH: loop header
LB: loop body
LE: loop exit
PB: predicated region body
PF: predicated region fallthrough
CT: control target
= control target key end

     0   :  { %s6405_s12 = smov 0   ;;  %s6909_s0 = inlined_call_operand.vmem [shape: f32[2,1,10,10,8], index: 0, kind: input, shape index: {}]   ;;  %s6910_s1 = inlined_call_operand.vmem [shape: f32[3,3,8,4], index: 1, kind: input, shape index: {}]   ;;  %s6911_s2 = inlined_call_operand.vmem [shape: f32[1,4], index: 2, kind: input, shape index: {}]   ;;  %s6912_s3 = inlined_call_operand.vmem [shape: f32[2,8,8,4], index: 3, kind: output, shape index: {}]  }
   0x1 LB: > { %s5692_s13 = sadd.s32 4294967295, %s6381_s12   ;;  %p5696_p0 = scmp.ge.s32.totalorder %s6381_s12, 1  ;;  %s6381_s12 = sphi %s6405_s12, %s13_s12  }
   0x2   : > { %p137_p1 = scmp.lt.s32.totalorder %s6381_s12, 3 }
   0x4   : > { %p138_p2 = pnand %p5696_p0, %p137_p1 }
   0x5   : > { %v6416_v0 = vld [vmem:[%s6910_s1 + $0x8] sm:$0xff] (!%p138_p2)  ;;  %v6421_v1 = vld [vmem:[%s6910_s1] sm:$0xff] (!%p138_p2)  ;;  %p161_p3 = scmp.lt.s32.totalorder (!%p138_p2), %s5692_s13, 1  ;;  %v6383_v2 = vmov (!%p138_p2), 0.0   ;;  %vm6384_vm0 = vmmov (!%p138_p2), 0   ;;  %vm191_vm1 = vcmask (!%p138_p2), 64512  }
   0x6   : > { %141 = sbr.rel (%p138_p2) target bundleno = 380 (0x17c), region = 32  ;;  %6004 = vmatprep.subr.mxu0 (!%p138_p2), %v6383_v2  ;;  %6009 = vmatprep.subr.mxu1 (!%p138_p2), %v6383_v2  ;;  %v6444_v3 = vld [vmem:[%s6910_s1 + $0x10] sm:$0xff] (!%p138_p2)  ;;  %v6449_v4 = vld [vmem:[%s6910_s1 + $0x18] sm:$0xff] (!%p138_p2)  ;;  %v6466_v9 = vld [vmem:[%s6910_s1 + $0x20] sm:$0xff] (!%p138_p2)  ;;  %vm875_vm3 = vcmask (!%p138_p2), 31744  }
   0x7   : > { %6005 = vmatpush3.msra.mxu0 (!%p138_p2), %v6416_v0  ;;  %6006 = vmatprep.mubr.msk.f32.mxu0 (!%p138_p2), %vm6384_vm0, %v6383_v2  ;;  %v6471_v10 = vld [vmem:[%s6910_s1 + $0x28] sm:$0xff] (!%p138_p2)  ;;  %v6488_v13 = vld [vmem:[%s6910_s1 + $0x30] sm:$0xff] (!%p138_p2)  ;;  %v6493_v14 = vld [vmem:[%s6910_s1 + $0x38] sm:$0xff] (!%p138_p2) }
   0x8   : > { %6010 = vmatpush3.msra.mxu1 (!%p138_p2), %v6421_v1  ;;  %6011 = vmatprep.mubr.msk.f32.mxu1 (!%p138_p2), %vm6384_vm0, %v6383_v2  ;;  %v6510_v17 = vld [vmem:[%s6910_s1 + $0x40] sm:$0xff] (!%p138_p2) }
   0x9   : > { %6014 = vmatprep.subr.mxu0 (!%p138_p2), %v6383_v2  ;;  %6019 = vmatprep.subr.mxu1 (!%p138_p2), %v6383_v2  ;;  %v6874_v63 = vld [vmem:[%s6911_s2] ss:$0 sm:$0xff] (!%p138_p2) }
   0xd   : > { %s6914_s13 = smov (!%p161_p3, %s5692_s13), 1 }
   0xe   : > { %s6364_s18 = smul.u32 160, %s6914_s13  ;;  %s5859_s11 = sshll.u32 %s6914_s13, 6 }
   0xf   : > { %s6881_s16 = scalar_lea.vmem %s6912_s3, %s5859_s11 }
  0x10   : > { %s6439_s21 = scalar_lea.vmem %s6909_s0, %s6364_s18 }
  0x11   : > { %v190_v5 = vld [vmem:[%s6439_s21 + $0x1] sm:$0xff]  ;;  %v5711_v8 = vld [vmem:[%s6439_s21 + $0x10] sm:$0xff] }
  0x12   : > { %v189_v6 = vld [vmem:[%s6439_s21] sm:$0xff]  ;;  %6007 = vmatmul.mubr.msk.f32.vlgmr.msra.gmra.mrb[0].mxu0 %vm191_vm1, %v190_v5  ;;  %v5713_v11 = vld [vmem:[%s6439_s21 + $0x11] sm:$0xff] }
  0x13   : > { %6012 = vmatmul.mubr.msk.f32.vlgmr.msra.gmra.mrb[0].mxu1 %vm191_vm1, %v189_v6  ;;  %6015 = vmatpush3.msra.mxu0 %v6444_v3  ;;  %v338_v7 = vld [vmem:[%s6439_s21 + $0x2] sm:$0xff]  ;;  %v5715_v12 = vld [vmem:[%s6439_s21 + $0x12] sm:$0xff] }
  0x14   : > { %6020 = vmatpush3.msra.mxu1 %v6449_v4  ;;  %6016 = vmatprep.mubr.msk.f32.mxu0 %vm6384_vm0, %v6383_v2  ;;  %v5717_v15 = vld [vmem:[%s6439_s21 + $0x20] sm:$0xff]  ;;  %v6550_v19 = vld [vmem:[%s6439_s21 + $0x30] sm:$0xff] }
  0x15   : > { %6021 = vmatprep.mubr.msk.f32.mxu1 %vm6384_vm0, %v6383_v2  ;;  %6024 = vmatprep.subr.mxu0 %v6383_v2  ;;  %v5719_v16 = vld [vmem:[%s6439_s21 + $0x21] sm:$0xff]  ;;  %v5738_v20 = vld [vmem:[%s6439_s21 + $0x31] sm:$0xff] }
  0x16   : > { %6029 = vmatprep.subr.mxu1 %v6383_v2  ;;  %6017 = vmatmul.mubr.msk.f32.vlgmr.msra.gmra.mrb[2].mxu0 %vm191_vm1, %v338_v7  ;;  %v5721_v18 = vld [vmem:[%s6439_s21 + $0x22] sm:$0xff]  ;;  %v5740_v21 = vld [vmem:[%s6439_s21 + $0x32] sm:$0xff] }
  0x17   : > { %6022 = vmatmul.mubr.msk.f32.vlgmr.msra.gmra.mrb[2].mxu1 %vm191_vm1, %v5711_v8  ;;  %6025 = vmatpush3.msra.mxu0 %v6466_v9  ;;  %v5755_v22 = vld [vmem:[%s6439_s21 + $0x40] sm:$0xff]  ;;  %v6651_v25 = vld [vmem:[%s6439_s21 + $0x50] sm:$0xff] }
  0x18   : > { %6030 = vmatpush3.msra.mxu1 %v6471_v10  ;;  %6026 = vmatprep.mubr.msk.f32.mxu0 %vm6384_vm0, %v6383_v2  ;;  %v5757_v23 = vld [vmem:[%s6439_s21 + $0x41] sm:$0xff]  ;;  %v5776_v26 = vld [vmem:[%s6439_s21 + $0x51] sm:$0xff] }
  0x19   : > { %6031 = vmatprep.mubr.msk.f32.mxu1 %vm6384_vm0, %v6383_v2  ;;  %6034 = vmatprep.subr.mxu0 %v6383_v2  ;;  %v5759_v24 = vld [vmem:[%s6439_s21 + $0x42] sm:$0xff]  ;;  %v5778_v27 = vld [vmem:[%s6439_s21 + $0x52] sm:$0xff] }
  0x1a   : > { %6039 = vmatprep.subr.mxu1 %v6383_v2  ;;  %6027 = vmatmul.mubr.msk.f32.vlgmr.msra.gmra.mrb[4].mxu0 %vm191_vm1, %v5713_v11  ;;  %v5793_v28 = vld [vmem:[%s6439_s21 + $0x60] sm:$0xff]  ;;  %v6752_v31 = vld [vmem:[%s6439_s21 + $0x70] sm:$0xff] }
  0x1b   : > { %6032 = vmatmul.mubr.msk.f32.vlgmr.msra.gmra.mrb[4].mxu1 %vm191_vm1, %v5715_v12  ;;  %6035 = vmatpush3.msra.mxu0 %v6488_v13  ;;  %v5795_v29 = vld [vmem:[%s6439_s21 + $0x61] sm:$0xff]  ;;  %v5814_v32 = vld [vmem:[%s6439_s21 + $0x71] sm:$0xff] }
  0x1c   : > { %6040 = vmatpush3.msra.mxu1 %v6493_v14  ;;  %6036 = vmatprep.mubr.msk.f32.mxu0 %vm6384_vm0, %v6383_v2  ;;  %v5797_v30 = vld [vmem:[%s6439_s21 + $0x62] sm:$0xff]  ;;  %v5816_v33 = vld [vmem:[%s6439_s21 + $0x72] sm:$0xff] }
  0x1d   : > { %6041 = vmatprep.mubr.msk.f32.mxu1 %vm6384_vm0, %v6383_v2  ;;  %6044 = vmatprep.subr.mxu0 %v6383_v2  ;;  %v5831_v34 = vld [vmem:[%s6439_s21 + $0x80] sm:$0xff]  ;;  %v5850_v37 = vld [vmem:[%s6439_s21 + $0x90] sm:$0xff] }
  0x1e   : > { %6049 = vmatprep.subr.mxu1 %v6383_v2  ;;  %6037 = vmatmul.mubr.msk.f32.vlgmr.msra.gmra.mrb[6].mxu0 %vm191_vm1, %v5717_v15  ;;  %v5833_v35 = vld [vmem:[%s6439_s21 + $0x81] sm:$0xff]  ;;  %v5852_v38 = vld [vmem:[%s6439_s21 + $0x91] sm:$0xff] }
  0x1f   : > { %6042 = vmatmul.mubr.msk.f32.vlgmr.msra.gmra.mrb[6].mxu1 %vm191_vm1, %v5719_v16  ;;  %6045 = vmatpush3.msra.mxu0 %v6510_v17  ;;  %v5835_v36 = vld [vmem:[%s6439_s21 + $0x82] sm:$0xff]  ;;  %v5854_v39 = vld [vmem:[%s6439_s21 + $0x92] sm:$0xff] }
  0x20   : > { %6050 = vmatpush3.msra.mxu1 %v6416_v0  ;;  %6046 = vmatprep.mubr.msk.f32.mxu0 %vm6384_vm0, %v6383_v2 }
  0x21   : > { %6051 = vmatprep.mubr.msk.f32.mxu1 %vm6384_vm0, %v6383_v2  ;;  %6054 = vmatprep.subr.mxu0 %v6383_v2 }
  0x22   : > { %6059 = vmatprep.subr.mxu1 %v6383_v2  ;;  %6047 = vmatmul.mubr.msk.f32.vlgmr.msra.gmra.mrb[8].mxu0 %vm191_vm1, %v5721_v18 }
  0x23   : > { %6052 = vmatmul.mubr.msk.f32.vlgmr.msra.gmra.mrb[8].mxu1 %vm191_vm1, %v5713_v11  ;;  %6055 = vmatpush3.msra.mxu0 %v6421_v1 }
  0x24   : > { %6060 = vmatpush3.msra.mxu1 %v6444_v3  ;;  %6056 = vmatprep.mubr.msk.f32.mxu0 %vm6384_vm0, %v6383_v2 }
  0x25   : > { %6061 = vmatprep.mubr.msk.f32.mxu1 %vm6384_vm0, %v6383_v2  ;;  %6064 = vmatprep.subr.mxu0 %v6383_v2 }
  0x26   : > { %6069 = vmatprep.subr.mxu1 %v6383_v2  ;;  %6057 = vmatmul.mubr.msk.f32.vlgmr.msra.gmra.mrb[10].mxu0 %vm191_vm1, %v5711_v8 }
  0x27   : > { %6062 = vmatmul.mubr.msk.f32.vlgmr.msra.gmra.mrb[10].mxu1 %vm191_vm1, %v5715_v12  ;;  %6065 = vmatpush3.msra.mxu0 %v6449_v4 }
  0x28   : > { %6070 = vmatpush3.msra.mxu1 %v6466_v9  ;;  %6066 = vmatprep.mubr.msk.f32.mxu0 %vm6384_vm0, %v6383_v2 }
  0x29   : > { %6071 = vmatprep.mubr.msk.f32.mxu1 %vm6384_vm0, %v6383_v2  ;;  %6074 = vmatprep.subr.mxu0 %v6383_v2 }
  0x2a   : > { %6079 = vmatprep.subr.mxu1 %v6383_v2  ;;  %6067 = vmatmul.mubr.msk.f32.vlgmr.msra.gmra.mrb[12].mxu0 %vm191_vm1, %v5717_v15 }
  0x2b   : > { %6072 = vmatmul.mubr.msk.f32.vlgmr.msra.gmra.mrb[12].mxu1 %vm191_vm1, %v5719_v16  ;;  %6075 = vmatpush3.msra.mxu0 %v6471_v10 }
  0x2c   : > { %6080 = vmatpush3.msra.mxu1 %v6488_v13  ;;  %6076 = vmatprep.mubr.msk.f32.mxu0 %vm6384_vm0, %v6383_v2 }
  0x2d   : > { %6081 = vmatprep.mubr.msk.f32.mxu1 %vm6384_vm0, %v6383_v2  ;;  %6084 = vmatprep.subr.mxu0 %v6383_v2 }
  0x2e   : > { %6089 = vmatprep.subr.mxu1 %v6383_v2  ;;  %6077 = vmatmul.mubr.msk.f32.vlgmr.msra.gmra.mrb[14].mxu0 %vm191_vm1, %v5721_v18 }
  0x2f   : > { %6082 = vmatmul.mubr.msk.f32.vlgmr.msra.gmra.mrb[14].mxu1 %vm191_vm1, %v6550_v19  ;;  %6085 = vmatpush3.msra.mxu0 %v6493_v14 }
  0x30   : > { %6090 = vmatpush3.msra.mxu1 %v6510_v17  ;;  %6086 = vmatprep.mubr.msk.f32.mxu0 %vm6384_vm0, %v6383_v2 }
  0x31   : > { %6091 = vmatprep.mubr.msk.f32.mxu1 %vm6384_vm0, %v6383_v2  ;;  %6094 = vmatprep.subr.mxu0 %v6383_v2 }
  0x32   : > { %6099 = vmatprep.subr.mxu1 %v6383_v2  ;;  %6087 = vmatmul.mubr.msk.f32.vlgmr.msra.gmra.mrb[16].mxu0 %vm191_vm1, %v5738_v20 }
  0x33   : > { %6092 = vmatmul.mubr.msk.f32.vlgmr.msra.gmra.mrb[16].mxu1 %vm191_vm1, %v5740_v21  ;;  %6095 = vmatpush3.msra.mxu0 %v6416_v0 }
  0x34   : > { %6100 = vmatpush3.msra.mxu1 %v6421_v1  ;;  %6096 = vmatprep.mubr.msk.f32.mxu0 %vm6384_vm0, %v6383_v2 }
  0x35   : > { %6101 = vmatprep.mubr.msk.f32.mxu1 %vm6384_vm0, %v6383_v2  ;;  %6104 = vmatprep.subr.mxu0 %v6383_v2 }
  0x36   : > { %6109 = vmatprep.subr.mxu1 %v6383_v2  ;;  %6097 = vmatmul.mubr.msk.f32.vlgmr.msra.gmra.mrb[18].mxu0 %vm191_vm1, %v5719_v16 }
  0x37   : > { %6102 = vmatmul.mubr.msk.f32.vlgmr.msra.gmra.mrb[18].mxu1 %vm191_vm1, %v5717_v15  ;;  %6105 = vmatpush3.msra.mxu0 %v6444_v3 }
  0x38   : > { %6110 = vmatpush3.msra.mxu1 %v6449_v4  ;;  %6106 = vmatprep.mubr.msk.f32.mxu0 %vm6384_vm0, %v6383_v2 }
  0x39   : > { %6111 = vmatprep.mubr.msk.f32.mxu1 %vm6384_vm0, %v6383_v2  ;;  %6114 = vmatprep.subr.mxu0 %v6383_v2 }
  0x3a   : > { %6119 = vmatprep.subr.mxu1 %v6383_v2  ;;  %6107 = vmatmul.mubr.msk.f32.vlgmr.msra.gmra.mrb[20].mxu0 %vm191_vm1, %v5721_v18 }
  0x3b   : > { %6112 = vmatmul.mubr.msk.f32.vlgmr.msra.gmra.mrb[20].mxu1 %vm191_vm1, %v6550_v19  ;;  %6115 = vmatpush3.msra.mxu0 %v6466_v9 }
  0x3c   : > { %6120 = vmatpush3.msra.mxu1 %v6471_v10  ;;  %6116 = vmatprep.mubr.msk.f32.mxu0 %vm6384_vm0, %v6383_v2 }
  0x3d   : > { %6121 = vmatprep.mubr.msk.f32.mxu1 %vm6384_vm0, %v6383_v2  ;;  %6124 = vmatprep.subr.mxu0 %v6383_v2 }
  0x3e   : > { %6129 = vmatprep.subr.mxu1 %v6383_v2  ;;  %6117 = vmatmul.mubr.msk.f32.vlgmr.msra.gmra.mrb[22].mxu0 %vm191_vm1, %v5738_v20 }
  0x3f   : > { %6122 = vmatmul.mubr.msk.f32.vlgmr.msra.gmra.mrb[22].mxu1 %vm191_vm1, %v5740_v21  ;;  %6125 = vmatpush3.msra.mxu0 %v6488_v13 }
  0x40   : > { %6130 = vmatpush3.msra.mxu1 %v6493_v14  ;;  %6126 = vmatprep.mubr.msk.f32.mxu0 %vm6384_vm0, %v6383_v2 }
  0x41   : > { %6131 = vmatprep.mubr.msk.f32.mxu1 %vm6384_vm0, %v6383_v2  ;;  %6134 = vmatprep.subr.mxu0 %v6383_v2 }
  0x42   : > { %6139 = vmatprep.subr.mxu1 %v6383_v2  ;;  %6127 = vmatmul.mubr.msk.f32.vlgmr.msra.gmra.mrb[24].mxu0 %vm191_vm1, %v5755_v22 }
  0x43   : > { %6132 = vmatmul.mubr.msk.f32.vlgmr.msra.gmra.mrb[24].mxu1 %vm191_vm1, %v5757_v23  ;;  %6135 = vmatpush3.msra.mxu0 %v6510_v17 }
  0x44   : > { %6140 = vmatpush3.msra.mxu1 %v6416_v0  ;;  %6136 = vmatprep.mubr.msk.f32.mxu0 %vm6384_vm0, %v6383_v2 }
  0x45   : > { %6141 = vmatprep.mubr.msk.f32.mxu1 %vm6384_vm0, %v6383_v2  ;;  %6144 = vmatprep.subr.mxu0 %v6383_v2 }
  0x46   : > { %6149 = vmatprep.subr.mxu1 %v6383_v2  ;;  %6137 = vmatmul.mubr.msk.f32.vlgmr.msra.gmra.mrb[26].mxu0 %vm191_vm1, %v5759_v24 }
  0x47   : > { %6142 = vmatmul.mubr.msk.f32.vlgmr.msra.gmra.mrb[26].mxu1 %vm191_vm1, %v5738_v20  ;;  %6145 = vmatpush3.msra.mxu0 %v6421_v1 }
  0x48   : > { %6150 = vmatpush3.msra.mxu1 %v6444_v3  ;;  %6146 = vmatprep.mubr.msk.f32.mxu0 %vm6384_vm0, %v6383_v2 }
  0x49   : > { %6151 = vmatprep.mubr.msk.f32.mxu1 %vm6384_vm0, %v6383_v2  ;;  %6154 = vmatprep.subr.mxu0 %v6383_v2 }
  0x4a   : > { %6159 = vmatprep.subr.mxu1 %v6383_v2  ;;  %6147 = vmatmul.mubr.msk.f32.vlgmr.msra.gmra.mrb[28].mxu0 %vm191_vm1, %v6550_v19 }
  0x4b   : > { %6152 = vmatmul.mubr.msk.f32.vlgmr.msra.gmra.mrb[28].mxu1 %vm191_vm1, %v5740_v21  ;;  %6155 = vmatpush3.msra.mxu0 %v6449_v4 }
  0x4c   : > { %6160 = vmatpush3.msra.mxu1 %v6466_v9  ;;  %6156 = vmatprep.mubr.msk.f32.mxu0 %vm6384_vm0, %v6383_v2 }
  0x4d   : > { %6161 = vmatprep.mubr.msk.f32.mxu1 %vm6384_vm0, %v6383_v2  ;;  %6164 = vmatprep.subr.mxu0 %v6383_v2 }
  0x4e   : > { %6169 = vmatprep.subr.mxu1 %v6383_v2  ;;  %6157 = vmatmul.mubr.msk.f32.vlgmr.msra.gmra.mrb[30].mxu0 %vm191_vm1, %v5755_v22 }
  0x4f   : > { %6162 = vmatmul.mubr.msk.f32.vlgmr.msra.gmra.mrb[30].mxu1 %vm191_vm1, %v5757_v23  ;;  %6165 = vmatpush3.msra.mxu0 %v6471_v10 }
  0x50   : > { %6170 = vmatpush3.msra.mxu1 %v6488_v13  ;;  %6166 = vmatprep.mubr.msk.f32.mxu0 %vm6384_vm0, %v6383_v2 }
  0x51   : > { %6171 = vmatprep.mubr.msk.f32.mxu1 %vm6384_vm0, %v6383_v2  ;;  %6174 = vmatprep.subr.mxu0 %v6383_v2 }
  0x52   : > { %6179 = vmatprep.subr.mxu1 %v6383_v2  ;;  %6167 = vmatmul.mubr.msk.f32.vlgmr.msra.gmra.mrb[32].mxu0 %vm191_vm1, %v5759_v24 }
  0x53   : > { %6172 = vmatmul.mubr.msk.f32.vlgmr.msra.gmra.mrb[32].mxu1 %vm191_vm1, %v6651_v25  ;;  %6175 = vmatpush3.msra.mxu0 %v6493_v14 }
  0x54   : > { %6180 = vmatpush3.msra.mxu1 %v6510_v17  ;;  %6176 = vmatprep.mubr.msk.f32.mxu0 %vm6384_vm0, %v6383_v2 }
  0x55   : > { %6181 = vmatprep.mubr.msk.f32.mxu1 %vm6384_vm0, %v6383_v2  ;;  %6184 = vmatprep.subr.mxu0 %v6383_v2 }
  0x56   : > { %6189 = vmatprep.subr.mxu1 %v6383_v2  ;;  %6177 = vmatmul.mubr.msk.f32.vlgmr.msra.gmra.mrb[34].mxu0 %vm191_vm1, %v5776_v26 }
  0x57   : > { %6182 = vmatmul.mubr.msk.f32.vlgmr.msra.gmra.mrb[34].mxu1 %vm191_vm1, %v5778_v27  ;;  %6185 = vmatpush3.msra.mxu0 %v6416_v0 }
  0x58   : > { %6190 = vmatpush3.msra.mxu1 %v6421_v1  ;;  %6186 = vmatprep.mubr.msk.f32.mxu0 %vm6384_vm0, %v6383_v2 }
  0x59   : > { %6191 = vmatprep.mubr.msk.f32.mxu1 %vm6384_vm0, %v6383_v2  ;;  %6194 = vmatprep.subr.mxu0 %v6383_v2 }
  0x5a   : > { %6199 = vmatprep.subr.mxu1 %v6383_v2  ;;  %6187 = vmatmul.mubr.msk.f32.vlgmr.msra.gmra.mrb[36].mxu0 %vm191_vm1, %v5757_v23 }
  0x5b   : > { %6192 = vmatmul.mubr.msk.f32.vlgmr.msra.gmra.mrb[36].mxu1 %vm191_vm1, %v5755_v22  ;;  %6195 = vmatpush3.msra.mxu0 %v6444_v3 }
  0x5c   : > { %6200 = vmatpush3.msra.mxu1 %v6449_v4  ;;  %6196 = vmatprep.mubr.msk.f32.mxu0 %vm6384_vm0, %v6383_v2 }
  0x5d   : > { %6201 = vmatprep.mubr.msk.f32.mxu1 %vm6384_vm0, %v6383_v2  ;;  %6204 = vmatprep.subr.mxu0 %v6383_v2 }
  0x5e   : > { %6209 = vmatprep.subr.mxu1 %v6383_v2  ;;  %6197 = vmatmul.mubr.msk.f32.vlgmr.msra.gmra.mrb[38].mxu0 %vm191_vm1, %v5759_v24 }
  0x5f   : > { %6202 = vmatmul.mubr.msk.f32.vlgmr.msra.gmra.mrb[38].mxu1 %vm191_vm1, %v6651_v25  ;;  %6205 = vmatpush3.msra.mxu0 %v6466_v9 }
  0x60   : > { %6210 = vmatpush3.msra.mxu1 %v6471_v10  ;;  %6206 = vmatprep.mubr.msk.f32.mxu0 %vm6384_vm0, %v6383_v2 }
  0x61   : > { %6211 = vmatprep.mubr.msk.f32.mxu1 %vm6384_vm0, %v6383_v2  ;;  %6214 = vmatprep.subr.mxu0 %v6383_v2 }
  0x62   : > { %6219 = vmatprep.subr.mxu1 %v6383_v2  ;;  %6207 = vmatmul.mubr.msk.f32.vlgmr.msra.gmra.mrb[40].mxu0 %vm191_vm1, %v5776_v26 }
  0x63   : > { %6212 = vmatmul.mubr.msk.f32.vlgmr.msra.gmra.mrb[40].mxu1 %vm191_vm1, %v5778_v27  ;;  %6215 = vmatpush3.msra.mxu0 %v6488_v13 }
  0x64   : > { %6220 = vmatpush3.msra.mxu1 %v6493_v14  ;;  %6216 = vmatprep.mubr.msk.f32.mxu0 %vm6384_vm0, %v6383_v2 }
  0x65   : > { %6221 = vmatprep.mubr.msk.f32.mxu1 %vm6384_vm0, %v6383_v2  ;;  %6224 = vmatprep.subr.mxu0 %v6383_v2 }
  0x66   : > { %6229 = vmatprep.subr.mxu1 %v6383_v2  ;;  %6217 = vmatmul.mubr.msk.f32.vlgmr.msra.gmra.mrb[42].mxu0 %vm191_vm1, %v5793_v28 }
  0x67   : > { %6222 = vmatmul.mubr.msk.f32.vlgmr.msra.gmra.mrb[42].mxu1 %vm191_vm1, %v5795_v29  ;;  %6225 = vmatpush3.msra.mxu0 %v6510_v17 }
  0x68   : > { %6230 = vmatpush3.msra.mxu1 %v6416_v0  ;;  %6226 = vmatprep.mubr.msk.f32.mxu0 %vm6384_vm0, %v6383_v2 }
  0x69   : > { %6231 = vmatprep.mubr.msk.f32.mxu1 %vm6384_vm0, %v6383_v2  ;;  %6234 = vmatprep.subr.mxu0 %v6383_v2 }
  0x6a   : > { %6239 = vmatprep.subr.mxu1 %v6383_v2  ;;  %6227 = vmatmul.mubr.msk.f32.vlgmr.msra.gmra.mrb[44].mxu0 %vm191_vm1, %v5797_v30 }
  0x6b   : > { %6232 = vmatmul.mubr.msk.f32.vlgmr.msra.gmra.mrb[44].mxu1 %vm191_vm1, %v5776_v26  ;;  %6235 = vmatpush3.msra.mxu0 %v6421_v1 }
  0x6c   : > { %6240 = vmatpush3.msra.mxu1 %v6444_v3  ;;  %6236 = vmatprep.mubr.msk.f32.mxu0 %vm6384_vm0, %v6383_v2 }
  0x6d   : > { %6241 = vmatprep.mubr.msk.f32.mxu1 %vm6384_vm0, %v6383_v2  ;;  %6244 = vmatprep.subr.mxu0 %v6383_v2 }
  0x6e   : > { %6249 = vmatprep.subr.mxu1 %v6383_v2  ;;  %6237 = vmatmul.mubr.msk.f32.vlgmr.msra.gmra.mrb[46].mxu0 %vm191_vm1, %v6651_v25 }
  0x6f   : > { %6242 = vmatmul.mubr.msk.f32.vlgmr.msra.gmra.mrb[46].mxu1 %vm191_vm1, %v5778_v27  ;;  %6245 = vmatpush3.msra.mxu0 %v6449_v4 }
  0x70   : > { %6250 = vmatpush3.msra.mxu1 %v6466_v9  ;;  %6246 = vmatprep.mubr.msk.f32.mxu0 %vm6384_vm0, %v6383_v2 }
  0x71   : > { %6251 = vmatprep.mubr.msk.f32.mxu1 %vm6384_vm0, %v6383_v2  ;;  %6254 = vmatprep.subr.mxu0 %v6383_v2 }
  0x72   : > { %6259 = vmatprep.subr.mxu1 %v6383_v2  ;;  %6247 = vmatmul.mubr.msk.f32.vlgmr.msra.gmra.mrb[48].mxu0 %vm191_vm1, %v5793_v28 }
  0x73   : > { %6252 = vmatmul.mubr.msk.f32.vlgmr.msra.gmra.mrb[48].mxu1 %vm191_vm1, %v5795_v29  ;;  %6255 = vmatpush3.msra.mxu0 %v6471_v10 }
  0x74   : > { %6260 = vmatpush3.msra.mxu1 %v6488_v13  ;;  %6256 = vmatprep.mubr.msk.f32.mxu0 %vm6384_vm0, %v6383_v2 }
  0x75   : > { %6261 = vmatprep.mubr.msk.f32.mxu1 %vm6384_vm0, %v6383_v2  ;;  %6264 = vmatprep.subr.mxu0 %v6383_v2 }
  0x76   : > { %6269 = vmatprep.subr.mxu1 %v6383_v2  ;;  %6257 = vmatmul.mubr.msk.f32.vlgmr.msra.gmra.mrb[50].mxu0 %vm191_vm1, %v5797_v30 }
  0x77   : > { %6262 = vmatmul.mubr.msk.f32.vlgmr.msra.gmra.mrb[50].mxu1 %vm191_vm1, %v6752_v31  ;;  %6265 = vmatpush3.msra.mxu0 %v6493_v14 }
  0x78   : > { %6270 = vmatpush3.msra.mxu1 %v6510_v17  ;;  %6266 = vmatprep.mubr.msk.f32.mxu0 %vm6384_vm0, %v6383_v2 }
  0x79   : > { %6271 = vmatprep.mubr.msk.f32.mxu1 %vm6384_vm0, %v6383_v2  ;;  %6274 = vmatprep.subr.mxu0 %v6383_v2 }
  0x7a   : > { %6279 = vmatprep.subr.mxu1 %v6383_v2  ;;  %6267 = vmatmul.mubr.msk.f32.vlgmr.msra.gmra.mrb[52].mxu0 %vm191_vm1, %v5814_v32 }
  0x7b   : > { %6272 = vmatmul.mubr.msk.f32.vlgmr.msra.gmra.mrb[52].mxu1 %vm191_vm1, %v5816_v33  ;;  %6275 = vmatpush3.msra.mxu0 %v6416_v0 }
  0x7c   : > { %6280 = vmatpush3.msra.mxu1 %v6421_v1  ;;  %6276 = vmatprep.mubr.msk.f32.mxu0 %vm6384_vm0, %v6383_v2 }
  0x7d   : > { %6281 = vmatprep.mubr.msk.f32.mxu1 %vm6384_vm0, %v6383_v2  ;;  %6284 = vmatprep.subr.mxu0 %v6383_v2 }
  0x7e   : > { %6289 = vmatprep.subr.mxu1 %v6383_v2  ;;  %6277 = vmatmul.mubr.msk.f32.vlgmr.msra.gmra.mrb[54].mxu0 %vm191_vm1, %v5795_v29 }
  0x7f   : > { %6282 = vmatmul.mubr.msk.f32.vlgmr.msra.gmra.mrb[54].mxu1 %vm191_vm1, %v5793_v28  ;;  %6285 = vmatpush3.msra.mxu0 %v6444_v3 }
  0x80   : > { %6290 = vmatpush3.msra.mxu1 %v6449_v4  ;;  %6286 = vmatprep.mubr.msk.f32.mxu0 %vm6384_vm0, %v6383_v2 }
  0x81   : > { %6294 = vmatprep.subr.mxu0 %v6383_v2  ;;  %6291 = vmatprep.mubr.msk.f32.mxu1 %vm6384_vm0, %v6383_v2 }
  0x82   : > { %6299 = vmatprep.subr.mxu1 %v6383_v2  ;;  %6287 = vmatmul.mubr.msk.f32.vlgmr.msra.gmra.mrb[56].mxu0 %vm191_vm1, %v5797_v30 }
  0x83   : > { %6292 = vmatmul.mubr.msk.f32.vlgmr.msra.gmra.mrb[56].mxu1 %vm191_vm1, %v6752_v31  ;;  %6295 = vmatpush3.msra.mxu0 %v6466_v9 }
  0x84   : > { %6300 = vmatpush3.msra.mxu1 %v6471_v10  ;;  %6296 = vmatprep.mubr.msk.f32.mxu0 %vm6384_vm0, %v6383_v2 }
  0x85   : > { %6304 = vmatprep.subr.mxu0 %v6383_v2  ;;  %6301 = vmatprep.mubr.msk.f32.mxu1 %vm6384_vm0, %v6383_v2 }
  0x86   : > { %6309 = vmatprep.subr.mxu1 %v6383_v2  ;;  %6297 = vmatmul.mubr.msk.f32.vlgmr.msra.gmra.mrb[58].mxu0 %vm191_vm1, %v5814_v32 }
  0x87   : > { %6302 = vmatmul.mubr.msk.f32.vlgmr.msra.gmra.mrb[58].mxu1 %vm191_vm1, %v5816_v33  ;;  %6305 = vmatpush3.msra.mxu0 %v6488_v13 }
  0x88   : > { %6310 = vmatpush3.msra.mxu1 %v6493_v14  ;;  %6306 = vmatprep.mubr.msk.f32.mxu0 %vm6384_vm0, %v6383_v2 }
  0x89   : > { %6314 = vmatprep.subr.mxu0 %v6383_v2  ;;  %6311 = vmatprep.mubr.msk.f32.mxu1 %vm6384_vm0, %v6383_v2 }
  0x8a   : > { %6319 = vmatprep.subr.mxu1 %v6383_v2  ;;  %6307 = vmatmul.mubr.msk.f32.vlgmr.msra.gmra.mrb[60].mxu0 %vm191_vm1, %v5831_v34 }
  0x8b   : > { %6312 = vmatmul.mubr.msk.f32.vlgmr.msra.gmra.mrb[60].mxu1 %vm191_vm1, %v5833_v35  ;;  %6315 = vmatpush3.msra.mxu0 %v6510_v17 }
  0x8c   : > { %6320 = vmatpush3.msra.mxu1 %v6416_v0  ;;  %6316 = vmatprep.mubr.msk.f32.mxu0 %vm6384_vm0, %v6383_v2 }
  0x8d   : > { %6324 = vmatprep.subr.mxu0 %v6383_v2  ;;  %6321 = vmatprep.mubr.msk.f32.mxu1 %vm6384_vm0, %v6383_v2 }
  0x8e   : > { %6329 = vmatprep.subr.mxu1 %v6383_v2  ;;  %6317 = vmatmul.mubr.msk.f32.vlgmr.msra.gmra.mrb[62].mxu0 %vm191_vm1, %v5835_v36 }
  0x8f   : > { %6322 = vmatmul.mubr.msk.f32.vlgmr.msra.gmra.mrb[62].mxu1 %vm191_vm1, %v5814_v32  ;;  %6325 = vmatpush3.msra.mxu0 %v6421_v1 }
  0x90   : > { %6330 = vmatpush3.msra.mxu1 %v6444_v3  ;;  %6326 = vmatprep.mubr.msk.f32.mxu0 %vm6384_vm0, %v6383_v2 }
  0x91   : > { %6334 = vmatprep.subr.mxu0 %v6383_v2  ;;  %6331 = vmatprep.mubr.msk.f32.mxu1 %vm6384_vm0, %v6383_v2 }
  0x92   : > { %6339 = vmatprep.subr.mxu1 %v6383_v2  ;;  %6327 = vmatmul.mubr.msk.f32.vlgmr.msra.gmra.mrb[64].mxu0 %vm191_vm1, %v6752_v31 }
  0x93   : > { %6332 = vmatmul.mubr.msk.f32.vlgmr.msra.gmra.mrb[64].mxu1 %vm191_vm1, %v5816_v33  ;;  %6335 = vmatpush3.msra.mxu0 %v6449_v4 }
  0x94   : > { %6340 = vmatpush3.msra.mxu1 %v6466_v9  ;;  %6336 = vmatprep.mubr.msk.f32.mxu0 %vm6384_vm0, %v6383_v2 }
  0x95   : > { %6344 = vmatprep.subr.mxu0 %v6383_v2  ;;  %6341 = vmatprep.mubr.msk.f32.mxu1 %vm6384_vm0, %v6383_v2 }
  0x96   : > { %6349 = vmatprep.subr.mxu1 %v6383_v2  ;;  %6337 = vmatmul.mubr.msk.f32.vlgmr.msra.gmra.mrb[66].mxu0 %vm191_vm1, %v5831_v34 }
  0x97   : > { %6342 = vmatmul.mubr.msk.f32.vlgmr.msra.gmra.mrb[66].mxu1 %vm191_vm1, %v5833_v35  ;;  %6345 = vmatpush3.msra.mxu0 %v6471_v10 }
  0x98   : > { %6350 = vmatpush3.msra.mxu1 %v6488_v13  ;;  %6346 = vmatprep.mubr.msk.f32.mxu0 %vm6384_vm0, %v6383_v2 }
  0x99   : > { %6354 = vmatprep.subr.mxu0 %v6383_v2  ;;  %6351 = vmatprep.mubr.msk.f32.mxu1 %vm6384_vm0, %v6383_v2 }
  0x9a   : > { %6359 = vmatprep.subr.mxu1 %v6383_v2  ;;  %6347 = vmatmul.mubr.msk.f32.vlgmr.msra.gmra.mrb[68].mxu0 %vm191_vm1, %v5835_v36 }
  0x9b   : > { %6352 = vmatmul.mubr.msk.f32.vlgmr.msra.gmra.mrb[68].mxu1 %vm191_vm1, %v5850_v37  ;;  %6355 = vmatpush3.msra.mxu0 %v6493_v14 }
  0x9c   : > { %6360 = vmatpush3.msra.mxu1 %v6510_v17  ;;  %6356 = vmatprep.mubr.msk.f32.mxu0 %vm6384_vm0, %v6383_v2 }
  0x9d   : > { %6361 = vmatprep.mubr.msk.f32.mxu1 %vm6384_vm0, %v6383_v2 }
  0x9e   : > { %6357 = vmatmul.mubr.msk.f32.vlgmr.msra.gmra.mrb[70].mxu0 %vm191_vm1, %v5852_v38 }
  0x9f   : > { %6362 = vmatmul.mubr.msk.f32.vlgmr.msra.gmra.mrb[70].mxu1 %vm191_vm1, %v5854_v39 }
  0xe5   : > { %v261_v40 = vpop.f32.mrb[0].mxu0 }
  0xe6   : > { %v334_v41 = vpop.f32.mrb[0].mxu1  ;;  %v6008_v43 = vpop.f32.mrb[1].mxu0 }
  0xe7   : > { %v335_v42 = vadd.f32 %v334_v41, %v261_v40  ;;  %v6013_v44 = vpop.f32.mrb[1].mxu1 }
  0xe9   : > { %v408_v45 = vpop.f32.mrb[2].mxu0 }
  0xea   : > { %v484_v46 = vpop.f32.mrb[2].mxu1  ;;  %v412_v47 = vadd.f32 %v408_v45, %v335_v42  ;;  %v6018_v48 = vpop.f32.mrb[3].mxu0 }
  0xeb   : > { %v6023_v49 = vpop.f32.mrb[3].mxu1 }
  0xec   : > { %v488_v50 = vadd.f32 %v484_v46, %v412_v47 }
  0xed   : > { %v559_v51 = vpop.f32.mrb[4].mxu0 }
  0xee   : > { %v634_v52 = vpop.f32.mrb[4].mxu1  ;;  %v563_v53 = vadd.f32 %v559_v51, %v488_v50  ;;  %v6028_v54 = vpop.f32.mrb[5].mxu0 }
  0xef   : > { %v6033_v55 = vpop.f32.mrb[5].mxu1 }
  0xf0   : > { %v638_v56 = vadd.f32 %v634_v52, %v563_v53 }
  0xf1   : > { %v710_v57 = vpop.f32.mrb[6].mxu0 }
  0xf2   : > { %v785_v58 = vpop.f32.mrb[6].mxu1  ;;  %v714_v59 = vadd.f32 %v710_v57, %v638_v56  ;;  %v6038_v60 = vpop.f32.mrb[7].mxu0 }
  0xf3   : > { %v6043_v61 = vpop.f32.mrb[7].mxu1 }
  0xf4   : > { %v789_v62 = vadd.f32 %v785_v58, %v714_v59 }
  0xf5   : > { %v860_v0 = vpop.f32.mrb[8].mxu0 }
  0xf6   : > { %v948_v1 = vpop.f32.mrb[8].mxu1  ;;  %v864_v2 = vadd.f32 %v860_v0, %v789_v62  ;;  %v6048_v3 = vpop.f32.mrb[9].mxu0 }
  0xf7   : > { %v6053_v4 = vpop.f32.mrb[9].mxu1 }
  0xf8   : > { %v871_v5 = vadd.f32 %v6874_v63, %v864_v2 }
  0xf9   : > { %v1021_v6 = vpop.f32.mrb[10].mxu0 }
  0xfa   : > { %v1095_v7 = vpop.f32.mrb[10].mxu1  ;;  %vm872_vm2 = vcmp.ge.f32.partialorder %v871_v5, 0.0  ;;  %v873_v8 = vmul.f32 0.2, %v871_v5  ;;  %v1022_v9 = vadd.f32 %v1021_v6, %v948_v1  ;;  %v6058_v10 = vpop.f32.mrb[11].mxu0 }
  0xfb   : > { %v6063_v11 = vpop.f32.mrb[11].mxu1 }
  0xfc   : > { %v874_v12 = vsel %vm872_vm2, %v871_v5, %v873_v8  ;;  %v1099_v13 = vadd.f32 %v1095_v7, %v1022_v9 }
  0xfd   : > { %876 = vst.msk [vmem:[%s6881_s16] sm:$0xff] %vm875_vm3, %v874_v12  ;;  %v1170_v14 = vpop.f32.mrb[12].mxu0 }
  0xfe   : > { %v1245_v15 = vpop.f32.mrb[12].mxu1  ;;  %v1174_v16 = vadd.f32 %v1170_v14, %v1099_v13  ;;  %v6068_v17 = vpop.f32.mrb[13].mxu0 }
  0xff   : > { %v6073_v18 = vpop.f32.mrb[13].mxu1 }
 0x100   : > { %v1249_v19 = vadd.f32 %v1245_v15, %v1174_v16 }
 0x101   : > { %v1320_v20 = vpop.f32.mrb[14].mxu0 }
 0x102   : > { %v1396_v21 = vpop.f32.mrb[14].mxu1  ;;  %v1324_v22 = vadd.f32 %v1320_v20, %v1249_v19  ;;  %v6078_v23 = vpop.f32.mrb[15].mxu0 }
 0x103   : > { %v6083_v24 = vpop.f32.mrb[15].mxu1 }
 0x104   : > { %v1400_v25 = vadd.f32 %v1396_v21, %v1324_v22 }
 0x105   : > { %v1471_v26 = vpop.f32.mrb[16].mxu0 }
 0x106   : > { %v1546_v27 = vpop.f32.mrb[16].mxu1  ;;  %v1475_v28 = vadd.f32 %v1471_v26, %v1400_v25  ;;  %v6088_v29 = vpop.f32.mrb[17].mxu0 }
 0x107   : > { %v6093_v30 = vpop.f32.mrb[17].mxu1 }
 0x108   : > { %v1550_v31 = vadd.f32 %v1546_v27, %v1475_v28 }
 0x109   : > { %v1628_v32 = vpop.f32.mrb[18].mxu0 }
 0x10a   : > { %v1701_v33 = vpop.f32.mrb[18].mxu1  ;;  %v1551_v34 = vadd.f32 %v6874_v63, %v1550_v31  ;;  %v6098_v36 = vpop.f32.mrb[19].mxu0 }
 0x10b   : > { %v1702_v35 = vadd.f32 %v1701_v33, %v1628_v32  ;;  %v6103_v37 = vpop.f32.mrb[19].mxu1 }
 0x10c   : > { %vm1552_vm4 = vcmp.ge.f32.partialorder %v1551_v34, 0.0  ;;  %v1553_v38 = vmul.f32 0.2, %v1551_v34 }
 0x10d   : > { %v1775_v39 = vpop.f32.mrb[20].mxu0 }
 0x10e   : > { %v1850_v40 = vpop.f32.mrb[20].mxu1  ;;  %v1554_v41 = vsel %vm1552_vm4, %v1551_v34, %v1553_v38  ;;  %v1779_v42 = vadd.f32 %v1775_v39, %v1702_v35  ;;  %v6108_v43 = vpop.f32.mrb[21].mxu0 }
 0x10f   : > { %v6113_v44 = vpop.f32.mrb[21].mxu1  ;;  %5742 = vst.msk [vmem:[%s6881_s16 + $0x8] sm:$0xff] %vm875_vm3, %v1554_v41 }
 0x110   : > { %v1854_v45 = vadd.f32 %v1850_v40, %v1779_v42 }
 0x111   : > { %v1925_v46 = vpop.f32.mrb[22].mxu0 }
 0x112   : > { %v2000_v47 = vpop.f32.mrb[22].mxu1  ;;  %v1929_v48 = vadd.f32 %v1925_v46, %v1854_v45  ;;  %v6118_v49 = vpop.f32.mrb[23].mxu0 }
 0x113   : > { %v6123_v50 = vpop.f32.mrb[23].mxu1 }
 0x114   : > { %v2004_v51 = vadd.f32 %v2000_v47, %v1929_v48 }
 0x115   : > { %v2076_v52 = vpop.f32.mrb[24].mxu0 }
 0x116   : > { %v2151_v53 = vpop.f32.mrb[24].mxu1  ;;  %v2080_v54 = vadd.f32 %v2076_v52, %v2004_v51  ;;  %v6128_v55 = vpop.f32.mrb[25].mxu0 }
 0x117   : > { %v6133_v56 = vpop.f32.mrb[25].mxu1 }
 0x118   : > { %v2155_v57 = vadd.f32 %v2151_v53, %v2080_v54 }
 0x119   : > { %v2226_v58 = vpop.f32.mrb[26].mxu0 }
 0x11a   : > { %v2308_v59 = vpop.f32.mrb[26].mxu1  ;;  %v2230_v60 = vadd.f32 %v2226_v58, %v2155_v57  ;;  %v6138_v61 = vpop.f32.mrb[27].mxu0 }
 0x11b   : > { %v6143_v62 = vpop.f32.mrb[27].mxu1 }
 0x11c   : > { %v2231_v0 = vadd.f32 %v6874_v63, %v2230_v60 }
 0x11d   : > { %v2381_v1 = vpop.f32.mrb[28].mxu0 }
 0x11e   : > { %v2455_v2 = vpop.f32.mrb[28].mxu1  ;;  %vm2232_vm5 = vcmp.ge.f32.partialorder %v2231_v0, 0.0  ;;  %v2233_v3 = vmul.f32 0.2, %v2231_v0  ;;  %v2382_v4 = vadd.f32 %v2381_v1, %v2308_v59  ;;  %v6148_v5 = vpop.f32.mrb[29].mxu0 }
 0x11f   : > { %v6153_v6 = vpop.f32.mrb[29].mxu1 }
 0x120   : > { %v2234_v7 = vsel %vm2232_vm5, %v2231_v0, %v2233_v3  ;;  %v2459_v8 = vadd.f32 %v2455_v2, %v2382_v4 }
 0x121   : > { %5761 = vst.msk [vmem:[%s6881_s16 + $0x10] sm:$0xff] %vm875_vm3, %v2234_v7  ;;  %v2530_v9 = vpop.f32.mrb[30].mxu0 }
 0x122   : > { %v2605_v10 = vpop.f32.mrb[30].mxu1  ;;  %v2534_v11 = vadd.f32 %v2530_v9, %v2459_v8  ;;  %v6158_v12 = vpop.f32.mrb[31].mxu0 }
 0x123   : > { %v6163_v13 = vpop.f32.mrb[31].mxu1 }
 0x124   : > { %v2609_v14 = vadd.f32 %v2605_v10, %v2534_v11 }
 0x125   : > { %v2680_v15 = vpop.f32.mrb[32].mxu0 }
 0x126   : > { %v2756_v16 = vpop.f32.mrb[32].mxu1  ;;  %v2684_v17 = vadd.f32 %v2680_v15, %v2609_v14  ;;  %v6168_v18 = vpop.f32.mrb[33].mxu0 }
 0x127   : > { %v6173_v19 = vpop.f32.mrb[33].mxu1 }
 0x128   : > { %v2760_v20 = vadd.f32 %v2756_v16, %v2684_v17 }
 0x129   : > { %v2831_v21 = vpop.f32.mrb[34].mxu0 }
 0x12a   : > { %v2906_v22 = vpop.f32.mrb[34].mxu1  ;;  %v2835_v23 = vadd.f32 %v2831_v21, %v2760_v20  ;;  %v6178_v24 = vpop.f32.mrb[35].mxu0 }
 0x12b   : > { %v6183_v25 = vpop.f32.mrb[35].mxu1 }
 0x12c   : > { %v2910_v26 = vadd.f32 %v2906_v22, %v2835_v23 }
 0x12d   : > { %v2988_v27 = vpop.f32.mrb[36].mxu0 }
 0x12e   : > { %v3061_v28 = vpop.f32.mrb[36].mxu1  ;;  %v2911_v29 = vadd.f32 %v6874_v63, %v2910_v26  ;;  %v6188_v31 = vpop.f32.mrb[37].mxu0 }
 0x12f   : > { %v3062_v30 = vadd.f32 %v3061_v28, %v2988_v27  ;;  %v6193_v32 = vpop.f32.mrb[37].mxu1 }
 0x130   : > { %vm2912_vm6 = vcmp.ge.f32.partialorder %v2911_v29, 0.0  ;;  %v2913_v33 = vmul.f32 0.2, %v2911_v29 }
 0x131   : > { %v3135_v34 = vpop.f32.mrb[38].mxu0 }
 0x132   : > { %v3210_v35 = vpop.f32.mrb[38].mxu1  ;;  %v2914_v36 = vsel %vm2912_vm6, %v2911_v29, %v2913_v33  ;;  %v3139_v37 = vadd.f32 %v3135_v34, %v3062_v30  ;;  %v6198_v38 = vpop.f32.mrb[39].mxu0 }
 0x133   : > { %v6203_v39 = vpop.f32.mrb[39].mxu1  ;;  %5780 = vst.msk [vmem:[%s6881_s16 + $0x18] sm:$0xff] %vm875_vm3, %v2914_v36 }
 0x134   : > { %v3214_v40 = vadd.f32 %v3210_v35, %v3139_v37 }
 0x135   : > { %v3285_v41 = vpop.f32.mrb[40].mxu0 }
 0x136   : > { %v3360_v42 = vpop.f32.mrb[40].mxu1  ;;  %v3289_v43 = vadd.f32 %v3285_v41, %v3214_v40  ;;  %v6208_v44 = vpop.f32.mrb[41].mxu0 }
 0x137   : > { %v6213_v45 = vpop.f32.mrb[41].mxu1 }
 0x138   : > { %v3364_v46 = vadd.f32 %v3360_v42, %v3289_v43 }
 0x139   : > { %v3436_v47 = vpop.f32.mrb[42].mxu0 }
 0x13a   : > { %v3511_v48 = vpop.f32.mrb[42].mxu1  ;;  %v3440_v49 = vadd.f32 %v3436_v47, %v3364_v46  ;;  %v6218_v50 = vpop.f32.mrb[43].mxu0 }
 0x13b   : > { %v6223_v51 = vpop.f32.mrb[43].mxu1 }
 0x13c   : > { %v3515_v52 = vadd.f32 %v3511_v48, %v3440_v49 }
 0x13d   : > { %v3586_v53 = vpop.f32.mrb[44].mxu0 }
 0x13e   : > { %v3668_v54 = vpop.f32.mrb[44].mxu1  ;;  %v3590_v55 = vadd.f32 %v3586_v53, %v3515_v52  ;;  %v6228_v56 = vpop.f32.mrb[45].mxu0 }
 0x13f   : > { %v6233_v57 = vpop.f32.mrb[45].mxu1 }
 0x140   : > { %v3591_v58 = vadd.f32 %v6874_v63, %v3590_v55 }
 0x141   : > { %v3741_v59 = vpop.f32.mrb[46].mxu0 }
 0x142   : > { %v3815_v60 = vpop.f32.mrb[46].mxu1  ;;  %vm3592_vm7 = vcmp.ge.f32.partialorder %v3591_v58, 0.0  ;;  %v3593_v61 = vmul.f32 0.2, %v3591_v58  ;;  %v3742_v62 = vadd.f32 %v3741_v59, %v3668_v54  ;;  %v6238_v0 = vpop.f32.mrb[47].mxu0 }
 0x143   : > { %v6243_v1 = vpop.f32.mrb[47].mxu1 }
 0x144   : > { %v3594_v2 = vsel %vm3592_vm7, %v3591_v58, %v3593_v61  ;;  %v3819_v3 = vadd.f32 %v3815_v60, %v3742_v62 }
 0x145   : > { %5799 = vst.msk [vmem:[%s6881_s16 + $0x20] sm:$0xff] %vm875_vm3, %v3594_v2  ;;  %v3890_v4 = vpop.f32.mrb[48].mxu0 }
 0x146   : > { %v3965_v5 = vpop.f32.mrb[48].mxu1  ;;  %v3894_v6 = vadd.f32 %v3890_v4, %v3819_v3  ;;  %v6248_v7 = vpop.f32.mrb[49].mxu0 }
 0x147   : > { %v6253_v8 = vpop.f32.mrb[49].mxu1 }
 0x148   : > { %v3969_v9 = vadd.f32 %v3965_v5, %v3894_v6 }
 0x149   : > { %v4040_v10 = vpop.f32.mrb[50].mxu0 }
 0x14a   : > { %v4116_v11 = vpop.f32.mrb[50].mxu1  ;;  %v4044_v12 = vadd.f32 %v4040_v10, %v3969_v9  ;;  %v6258_v13 = vpop.f32.mrb[51].mxu0 }
 0x14b   : > { %v6263_v14 = vpop.f32.mrb[51].mxu1 }
 0x14c   : > { %v4120_v15 = vadd.f32 %v4116_v11, %v4044_v12 }
 0x14d   : > { %v4191_v16 = vpop.f32.mrb[52].mxu0 }
 0x14e   : > { %v4266_v17 = vpop.f32.mrb[52].mxu1  ;;  %v4195_v18 = vadd.f32 %v4191_v16, %v4120_v15  ;;  %v6268_v19 = vpop.f32.mrb[53].mxu0 }
 0x14f   : > { %v6273_v20 = vpop.f32.mrb[53].mxu1 }
 0x150   : > { %v4270_v21 = vadd.f32 %v4266_v17, %v4195_v18 }
 0x151   : > { %v4348_v22 = vpop.f32.mrb[54].mxu0 }
 0x152   : > { %v4421_v23 = vpop.f32.mrb[54].mxu1  ;;  %v4271_v24 = vadd.f32 %v6874_v63, %v4270_v21  ;;  %v6278_v26 = vpop.f32.mrb[55].mxu0 }
 0x153   : > { %v4422_v25 = vadd.f32 %v4421_v23, %v4348_v22  ;;  %v6283_v27 = vpop.f32.mrb[55].mxu1 }
 0x154   : > { %vm4272_vm8 = vcmp.ge.f32.partialorder %v4271_v24, 0.0  ;;  %v4273_v28 = vmul.f32 0.2, %v4271_v24 }
 0x155   : > { %v4495_v29 = vpop.f32.mrb[56].mxu0 }
 0x156   : > { %v4570_v30 = vpop.f32.mrb[56].mxu1  ;;  %v4274_v31 = vsel %vm4272_vm8, %v4271_v24, %v4273_v28  ;;  %v4499_v32 = vadd.f32 %v4495_v29, %v4422_v25  ;;  %v6288_v33 = vpop.f32.mrb[57].mxu0 }
 0x157   : > { %v6293_v34 = vpop.f32.mrb[57].mxu1  ;;  %5818 = vst.msk [vmem:[%s6881_s16 + $0x28] sm:$0xff] %vm875_vm3, %v4274_v31 }
 0x158   : > { %v4574_v35 = vadd.f32 %v4570_v30, %v4499_v32 }
 0x159   : > { %v4645_v36 = vpop.f32.mrb[58].mxu0 }
 0x15a   : > { %v4720_v37 = vpop.f32.mrb[58].mxu1  ;;  %v4649_v38 = vadd.f32 %v4645_v36, %v4574_v35  ;;  %v6298_v39 = vpop.f32.mrb[59].mxu0 }
 0x15b   : > { %v6303_v40 = vpop.f32.mrb[59].mxu1 }
 0x15c   : > { %v4724_v41 = vadd.f32 %v4720_v37, %v4649_v38 }
 0x15d   : > { %v4796_v42 = vpop.f32.mrb[60].mxu0 }
 0x15e   : > { %v4871_v43 = vpop.f32.mrb[60].mxu1  ;;  %v4800_v44 = vadd.f32 %v4796_v42, %v4724_v41  ;;  %v6308_v45 = vpop.f32.mrb[61].mxu0 }
 0x15f   : > { %v6313_v46 = vpop.f32.mrb[61].mxu1 }
 0x160   : > { %v4875_v47 = vadd.f32 %v4871_v43, %v4800_v44 }
 0x161   : > { %v4946_v48 = vpop.f32.mrb[62].mxu0 }
 0x162   : > { %v5028_v49 = vpop.f32.mrb[62].mxu1  ;;  %v4950_v50 = vadd.f32 %v4946_v48, %v4875_v47  ;;  %v6318_v51 = vpop.f32.mrb[63].mxu0 }
 0x163   : > { %v6323_v52 = vpop.f32.mrb[63].mxu1 }
 0x164   : > { %v4951_v53 = vadd.f32 %v6874_v63, %v4950_v50 }
 0x165   : > { %v5101_v54 = vpop.f32.mrb[64].mxu0 }
 0x166   : > { %v5175_v55 = vpop.f32.mrb[64].mxu1  ;;  %vm4952_vm9 = vcmp.ge.f32.partialorder %v4951_v53, 0.0  ;;  %v4953_v56 = vmul.f32 0.2, %v4951_v53  ;;  %v5102_v57 = vadd.f32 %v5101_v54, %v5028_v49  ;;  %v6328_v58 = vpop.f32.mrb[65].mxu0 }
 0x167   : > { %v6333_v59 = vpop.f32.mrb[65].mxu1 }
 0x168   : > { %v4954_v60 = vsel %vm4952_vm9, %v4951_v53, %v4953_v56  ;;  %v5179_v61 = vadd.f32 %v5175_v55, %v5102_v57 }
 0x169   : > { %5837 = vst.msk [vmem:[%s6881_s16 + $0x30] sm:$0xff] %vm875_vm3, %v4954_v60  ;;  %v5250_v62 = vpop.f32.mrb[66].mxu0 }
 0x16a   : > { %v5325_v0 = vpop.f32.mrb[66].mxu1  ;;  %v5254_v1 = vadd.f32 %v5250_v62, %v5179_v61  ;;  %v6338_v2 = vpop.f32.mrb[67].mxu0 }
 0x16b   : > { %v6343_v3 = vpop.f32.mrb[67].mxu1 }
 0x16c   : > { %v5329_v4 = vadd.f32 %v5325_v0, %v5254_v1 }
 0x16d   : > { %v5400_v5 = vpop.f32.mrb[68].mxu0 }
 0x16e   : > { %v5476_v6 = vpop.f32.mrb[68].mxu1  ;;  %v5404_v7 = vadd.f32 %v5400_v5, %v5329_v4  ;;  %v6348_v8 = vpop.f32.mrb[69].mxu0 }
 0x16f   : > { %v6353_v9 = vpop.f32.mrb[69].mxu1 }
 0x170   : > { %v5480_v10 = vadd.f32 %v5476_v6, %v5404_v7 }
 0x171   : > { %v5551_v11 = vpop.f32.mrb[70].mxu0 }
 0x172   : > { %v5626_v12 = vpop.f32.mrb[70].mxu1  ;;  %v5555_v13 = vadd.f32 %v5551_v11, %v5480_v10  ;;  %v6358_v14 = vpop.f32.mrb[71].mxu0 }
 0x173   : > { %v6363_v15 = vpop.f32.mrb[71].mxu1 }
 0x174   : > { %v5630_v16 = vadd.f32 %v5626_v12, %v5555_v13 }
 0x176   : > { %v5631_v17 = vadd.f32 %v6874_v63, %v5630_v16 }
 0x178   : > { %vm5632_vm10 = vcmp.ge.f32.partialorder %v5631_v17, 0.0  ;;  %v5633_v18 = vmul.f32 0.2, %v5631_v17 }
 0x17a   : > { %v5634_v19 = vsel %vm5632_vm10, %v5631_v17, %v5633_v18 }
 0x17b   : > { %5856 = vst.msk [vmem:[%s6881_s16 + $0x38] sm:$0xff] %vm875_vm3, %v5634_v19 }
 0x17c PF: > { %s13_s12 = sadd.s32 1, %s6381_s12  }
 0x17d   : > { %p10_p4 = scmp.ge.s32.totalorder %s13_s12, 4  }
 0x17f   :  { %12 = sbr.rel (!%p10_p4) target bundleno = 1 (0x1), region = 86 }

// kernel: pallas_forward.7
= control target key start
LH: loop header
LB: loop body
LE: loop exit
PB: predicated region body
PF: predicated region fallthrough
CT: control target
= control target key end

     0   :  { %s6430_s12 = smov 0   ;;  %s6940_s0 = inlined_call_operand.vmem [shape: f32[2,4,9,9,8], index: 0, kind: input, shape index: {}]   ;;  %s6941_s1 = inlined_call_operand.vmem [shape: f32[3,3,8,4], index: 1, kind: input, shape index: {}]   ;;  %s6942_s2 = inlined_call_operand.vmem [shape: f32[1,4], index: 2, kind: input, shape index: {}]   ;;  %s6943_s3 = inlined_call_operand.vmem [shape: f32[2,8,8,4], index: 3, kind: output, shape index: {}]  }
   0x1 LB: > { %s5716_s13 = sadd.s32 4294967295, %s6406_s12   ;;  %p5720_p0 = scmp.ge.s32.totalorder %s6406_s12, 1  ;;  %s6406_s12 = sphi %s6430_s12, %s13_s12  }
   0x2   : > { %p137_p1 = scmp.lt.s32.totalorder %s6406_s12, 3 }
   0x4   : > { %p138_p2 = pnand %p5720_p0, %p137_p1 }
   0x5   : > { %v6441_v0 = vld [vmem:[%s6941_s1 + $0x8] sm:$0xff] (!%p138_p2)  ;;  %v6446_v1 = vld [vmem:[%s6941_s1] sm:$0xff] (!%p138_p2)  ;;  %p161_p3 = scmp.lt.s32.totalorder (!%p138_p2), %s5716_s13, 1  ;;  %v6408_v2 = vmov (!%p138_p2), 0.0   ;;  %vm6409_vm0 = vmmov (!%p138_p2), 0   ;;  %vm192_vm1 = vcmask (!%p138_p2), 64512  }
   0x6   : > { %141 = sbr.rel (%p138_p2) target bundleno = 380 (0x17c), region = 32  ;;  %6029 = vmatprep.subr.mxu0 (!%p138_p2), %v6408_v2  ;;  %6034 = vmatprep.subr.mxu1 (!%p138_p2), %v6408_v2  ;;  %v6469_v3 = vld [vmem:[%s6941_s1 + $0x10] sm:$0xff] (!%p138_p2)  ;;  %v6474_v4 = vld [vmem:[%s6941_s1 + $0x18] sm:$0xff] (!%p138_p2)  ;;  %v6491_v9 = vld [vmem:[%s6941_s1 + $0x20] sm:$0xff] (!%p138_p2)  ;;  %vm878_vm3 = vcmask (!%p138_p2), 31744  }
   0x7   : > { %6030 = vmatpush3.msra.mxu0 (!%p138_p2), %v6441_v0  ;;  %6031 = vmatprep.mubr.msk.f32.mxu0 (!%p138_p2), %vm6409_vm0, %v6408_v2  ;;  %v6496_v10 = vld [vmem:[%s6941_s1 + $0x28] sm:$0xff] (!%p138_p2)  ;;  %v6513_v13 = vld [vmem:[%s6941_s1 + $0x30] sm:$0xff] (!%p138_p2)  ;;  %v6518_v14 = vld [vmem:[%s6941_s1 + $0x38] sm:$0xff] (!%p138_p2) }
   0x8   : > { %6035 = vmatpush3.msra.mxu1 (!%p138_p2), %v6446_v1  ;;  %6036 = vmatprep.mubr.msk.f32.mxu1 (!%p138_p2), %vm6409_vm0, %v6408_v2  ;;  %v6535_v17 = vld [vmem:[%s6941_s1 + $0x40] sm:$0xff] (!%p138_p2) }
   0x9   : > { %6039 = vmatprep.subr.mxu0 (!%p138_p2), %v6408_v2  ;;  %6044 = vmatprep.subr.mxu1 (!%p138_p2), %v6408_v2 }
   0xd   : > { %s6945_s13 = smov (!%p161_p3, %s5716_s13), 1 }
   0xe   : > { %s6389_s18 = smul.u32 576, %s6945_s13  ;;  %s5884_s11 = sshll.u32 %s6945_s13, 6 }
   0xf   : > { %s6912_s16 = scalar_lea.vmem %s6943_s3, %s5884_s11 }
  0x10   : > { %s6464_s21 = scalar_lea.vmem %s6940_s0, %s6389_s18 }
  0x11   : > { %v5732_v5 = vld [vmem:[%s6464_s21 + $0x90] sm:$0xff]  ;;  %v189_v6 = vld [vmem:[%s6464_s21] sm:$0xff] }
  0x12   : > { %6032 = vmatmul.mubr.msk.f32.vlgmr.msra.gmra.mrb[0].mxu0 %vm192_vm1, %v5732_v5  ;;  %6037 = vmatmul.mubr.msk.f32.vlgmr.msra.gmra.mrb[0].mxu1 %vm192_vm1, %v189_v6  ;;  %v339_v7 = vld [vmem:[%s6464_s21 + $0x1] sm:$0xff]  ;;  %v5738_v11 = vld [vmem:[%s6464_s21 + $0x1b0] sm:$0xff] }
  0x13   : > { %6040 = vmatpush3.msra.mxu0 %v6469_v3  ;;  %6045 = vmatpush3.msra.mxu1 %v6474_v4  ;;  %v5736_v8 = vld [vmem:[%s6464_s21 + $0x120] sm:$0xff]  ;;  %v5742_v15 = vld [vmem:[%s6464_s21 + $0x10] sm:$0xff] }
  0x14   : > { %6041 = vmatprep.mubr.msk.f32.mxu0 %vm6409_vm0, %v6408_v2  ;;  %6046 = vmatprep.mubr.msk.f32.mxu1 %vm6409_vm0, %v6408_v2  ;;  %v5740_v12 = vld [vmem:[%s6464_s21 + $0x121] sm:$0xff]  ;;  %v5746_v18 = vld [vmem:[%s6464_s21 + $0x11] sm:$0xff] }
  0x15   : > { %6049 = vmatprep.subr.mxu0 %v6408_v2  ;;  %6054 = vmatprep.subr.mxu1 %v6408_v2  ;;  %v5744_v16 = vld [vmem:[%s6464_s21 + $0xa0] sm:$0xff]  ;;  %v5755_v19 = vld [vmem:[%s6464_s21 + $0x130] sm:$0xff] }
  0x16   : > { %6042 = vmatmul.mubr.msk.f32.vlgmr.msra.gmra.mrb[2].mxu0 %vm192_vm1, %v339_v7  ;;  %6047 = vmatmul.mubr.msk.f32.vlgmr.msra.gmra.mrb[2].mxu1 %vm192_vm1, %v5736_v8  ;;  %v5757_v20 = vld [vmem:[%s6464_s21 + $0x1c0] sm:$0xff]  ;;  %v5759_v21 = vld [vmem:[%s6464_s21 + $0x131] sm:$0xff] }
  0x17   : > { %6050 = vmatpush3.msra.mxu0 %v6491_v9  ;;  %6055 = vmatpush3.msra.mxu1 %v6496_v10  ;;  %v5761_v22 = vld [vmem:[%s6464_s21 + $0x20] sm:$0xff]  ;;  %v5763_v23 = vld [vmem:[%s6464_s21 + $0xb0] sm:$0xff] }
  0x18   : > { %6051 = vmatprep.mubr.msk.f32.mxu0 %vm6409_vm0, %v6408_v2  ;;  %6056 = vmatprep.mubr.msk.f32.mxu1 %vm6409_vm0, %v6408_v2  ;;  %v5765_v24 = vld [vmem:[%s6464_s21 + $0x21] sm:$0xff]  ;;  %v5776_v26 = vld [vmem:[%s6464_s21 + $0x1d0] sm:$0xff] }
  0x19   : > { %6059 = vmatprep.subr.mxu0 %v6408_v2  ;;  %6064 = vmatprep.subr.mxu1 %v6408_v2  ;;  %v5774_v25 = vld [vmem:[%s6464_s21 + $0x140] sm:$0xff]  ;;  %v5780_v28 = vld [vmem:[%s6464_s21 + $0x30] sm:$0xff] }
  0x1a   : > { %6052 = vmatmul.mubr.msk.f32.vlgmr.msra.gmra.mrb[4].mxu0 %vm192_vm1, %v5738_v11  ;;  %6057 = vmatmul.mubr.msk.f32.vlgmr.msra.gmra.mrb[4].mxu1 %vm192_vm1, %v5740_v12  ;;  %v5778_v27 = vld [vmem:[%s6464_s21 + $0x141] sm:$0xff]  ;;  %v5784_v30 = vld [vmem:[%s6464_s21 + $0x31] sm:$0xff] }
  0x1b   : > { %6060 = vmatpush3.msra.mxu0 %v6513_v13  ;;  %6065 = vmatpush3.msra.mxu1 %v6518_v14  ;;  %v5782_v29 = vld [vmem:[%s6464_s21 + $0xc0] sm:$0xff]  ;;  %v5793_v31 = vld [vmem:[%s6464_s21 + $0x150] sm:$0xff] }
  0x1c   : > { %6061 = vmatprep.mubr.msk.f32.mxu0 %vm6409_vm0, %v6408_v2  ;;  %6066 = vmatprep.mubr.msk.f32.mxu1 %vm6409_vm0, %v6408_v2  ;;  %v5795_v32 = vld [vmem:[%s6464_s21 + $0x1e0] sm:$0xff]  ;;  %v5797_v33 = vld [vmem:[%s6464_s21 + $0x151] sm:$0xff] }
  0x1d   : > { %6069 = vmatprep.subr.mxu0 %v6408_v2  ;;  %6074 = vmatprep.subr.mxu1 %v6408_v2  ;;  %v5799_v34 = vld [vmem:[%s6464_s21 + $0x40] sm:$0xff]  ;;  %v5801_v35 = vld [vmem:[%s6464_s21 + $0xd0] sm:$0xff] }
  0x1e   : > { %6062 = vmatmul.mubr.msk.f32.vlgmr.msra.gmra.mrb[6].mxu0 %vm192_vm1, %v5742_v15  ;;  %6067 = vmatmul.mubr.msk.f32.vlgmr.msra.gmra.mrb[6].mxu1 %vm192_vm1, %v5744_v16  ;;  %v5803_v36 = vld [vmem:[%s6464_s21 + $0x41] sm:$0xff]  ;;  %v5814_v38 = vld [vmem:[%s6464_s21 + $0x1f0] sm:$0xff] }
  0x1f   : > { %6070 = vmatpush3.msra.mxu0 %v6535_v17  ;;  %6075 = vmatpush3.msra.mxu1 %v6441_v0  ;;  %v5812_v37 = vld [vmem:[%s6464_s21 + $0x160] sm:$0xff]  ;;  %v5818_v40 = vld [vmem:[%s6464_s21 + $0x50] sm:$0xff] }
  0x20   : > { %6071 = vmatprep.mubr.msk.f32.mxu0 %vm6409_vm0, %v6408_v2  ;;  %6076 = vmatprep.mubr.msk.f32.mxu1 %vm6409_vm0, %v6408_v2  ;;  %v5816_v39 = vld [vmem:[%s6464_s21 + $0x161] sm:$0xff]  ;;  %v5822_v42 = vld [vmem:[%s6464_s21 + $0x51] sm:$0xff] }
  0x21   : > { %6079 = vmatprep.subr.mxu0 %v6408_v2  ;;  %6084 = vmatprep.subr.mxu1 %v6408_v2  ;;  %v5820_v41 = vld [vmem:[%s6464_s21 + $0xe0] sm:$0xff]  ;;  %v5831_v43 = vld [vmem:[%s6464_s21 + $0x170] sm:$0xff] }
  0x22   : > { %6072 = vmatmul.mubr.msk.f32.vlgmr.msra.gmra.mrb[8].mxu0 %vm192_vm1, %v5746_v18  ;;  %6077 = vmatmul.mubr.msk.f32.vlgmr.msra.gmra.mrb[8].mxu1 %vm192_vm1, %v5744_v16  ;;  %v5833_v44 = vld [vmem:[%s6464_s21 + $0x200] sm:$0xff]  ;;  %v5835_v45 = vld [vmem:[%s6464_s21 + $0x171] sm:$0xff] }
  0x23   : > { %6080 = vmatpush3.msra.mxu0 %v6446_v1  ;;  %6085 = vmatpush3.msra.mxu1 %v6469_v3  ;;  %v5837_v46 = vld [vmem:[%s6464_s21 + $0x60] sm:$0xff]  ;;  %v5839_v47 = vld [vmem:[%s6464_s21 + $0xf0] sm:$0xff] }
  0x24   : > { %6081 = vmatprep.mubr.msk.f32.mxu0 %vm6409_vm0, %v6408_v2  ;;  %6086 = vmatprep.mubr.msk.f32.mxu1 %vm6409_vm0, %v6408_v2  ;;  %v5841_v48 = vld [vmem:[%s6464_s21 + $0x61] sm:$0xff]  ;;  %v5852_v50 = vld [vmem:[%s6464_s21 + $0x210] sm:$0xff] }
  0x25   : > { %6089 = vmatprep.subr.mxu0 %v6408_v2  ;;  %6094 = vmatprep.subr.mxu1 %v6408_v2  ;;  %v5850_v49 = vld [vmem:[%s6464_s21 + $0x180] sm:$0xff]  ;;  %v5856_v52 = vld [vmem:[%s6464_s21 + $0x70] sm:$0xff] }
  0x26   : > { %6082 = vmatmul.mubr.msk.f32.vlgmr.msra.gmra.mrb[10].mxu0 %vm192_vm1, %v5742_v15  ;;  %6087 = vmatmul.mubr.msk.f32.vlgmr.msra.gmra.mrb[10].mxu1 %vm192_vm1, %v5746_v18  ;;  %v5854_v51 = vld [vmem:[%s6464_s21 + $0x181] sm:$0xff]  ;;  %v5860_v54 = vld [vmem:[%s6464_s21 + $0x71] sm:$0xff] }
  0x27   : > { %6090 = vmatpush3.msra.mxu0 %v6474_v4  ;;  %6095 = vmatpush3.msra.mxu1 %v6491_v9  ;;  %v5858_v53 = vld [vmem:[%s6464_s21 + $0x100] sm:$0xff]  ;;  %v5869_v55 = vld [vmem:[%s6464_s21 + $0x190] sm:$0xff] }
  0x28   : > { %6091 = vmatprep.mubr.msk.f32.mxu0 %vm6409_vm0, %v6408_v2  ;;  %6096 = vmatprep.mubr.msk.f32.mxu1 %vm6409_vm0, %v6408_v2  ;;  %v5871_v56 = vld [vmem:[%s6464_s21 + $0x220] sm:$0xff]  ;;  %v5873_v57 = vld [vmem:[%s6464_s21 + $0x191] sm:$0xff] }
  0x29   : > { %6099 = vmatprep.subr.mxu0 %v6408_v2  ;;  %6104 = vmatprep.subr.mxu1 %v6408_v2  ;;  %v5875_v58 = vld [vmem:[%s6464_s21 + $0x80] sm:$0xff]  ;;  %v5877_v59 = vld [vmem:[%s6464_s21 + $0x110] sm:$0xff] }
  0x2a   : > { %6092 = vmatmul.mubr.msk.f32.vlgmr.msra.gmra.mrb[12].mxu0 %vm192_vm1, %v5755_v19  ;;  %6097 = vmatmul.mubr.msk.f32.vlgmr.msra.gmra.mrb[12].mxu1 %vm192_vm1, %v5757_v20  ;;  %v5879_v60 = vld [vmem:[%s6464_s21 + $0x81] sm:$0xff]  ;;  %v6905_v20 = vld [vmem:[%s6942_s2] ss:$0 sm:$0xff] }
  0x2b   : > { %6100 = vmatpush3.msra.mxu0 %v6496_v10  ;;  %6105 = vmatpush3.msra.mxu1 %v6513_v13 }
  0x2c   : > { %6101 = vmatprep.mubr.msk.f32.mxu0 %vm6409_vm0, %v6408_v2  ;;  %6106 = vmatprep.mubr.msk.f32.mxu1 %vm6409_vm0, %v6408_v2 }
  0x2d   : > { %6109 = vmatprep.subr.mxu0 %v6408_v2  ;;  %6114 = vmatprep.subr.mxu1 %v6408_v2 }
  0x2e   : > { %6102 = vmatmul.mubr.msk.f32.vlgmr.msra.gmra.mrb[14].mxu0 %vm192_vm1, %v5759_v21  ;;  %6107 = vmatmul.mubr.msk.f32.vlgmr.msra.gmra.mrb[14].mxu1 %vm192_vm1, %v5761_v22 }
  0x2f   : > { %6110 = vmatpush3.msra.mxu0 %v6518_v14  ;;  %6115 = vmatpush3.msra.mxu1 %v6535_v17 }
  0x30   : > { %6111 = vmatprep.mubr.msk.f32.mxu0 %vm6409_vm0, %v6408_v2  ;;  %6116 = vmatprep.mubr.msk.f32.mxu1 %vm6409_vm0, %v6408_v2 }
  0x31   : > { %6119 = vmatprep.subr.mxu0 %v6408_v2  ;;  %6124 = vmatprep.subr.mxu1 %v6408_v2 }
  0x32   : > { %6112 = vmatmul.mubr.msk.f32.vlgmr.msra.gmra.mrb[16].mxu0 %vm192_vm1, %v5763_v23  ;;  %6117 = vmatmul.mubr.msk.f32.vlgmr.msra.gmra.mrb[16].mxu1 %vm192_vm1, %v5765_v24 }
  0x33   : > { %6120 = vmatpush3.msra.mxu0 %v6441_v0  ;;  %6125 = vmatpush3.msra.mxu1 %v6446_v1 }
  0x34   : > { %6121 = vmatprep.mubr.msk.f32.mxu0 %vm6409_vm0, %v6408_v2  ;;  %6126 = vmatprep.mubr.msk.f32.mxu1 %vm6409_vm0, %v6408_v2 }
  0x35   : > { %6129 = vmatprep.subr.mxu0 %v6408_v2  ;;  %6134 = vmatprep.subr.mxu1 %v6408_v2 }
  0x36   : > { %6122 = vmatmul.mubr.msk.f32.vlgmr.msra.gmra.mrb[18].mxu0 %vm192_vm1, %v5763_v23  ;;  %6127 = vmatmul.mubr.msk.f32.vlgmr.msra.gmra.mrb[18].mxu1 %vm192_vm1, %v5761_v22 }
  0x37   : > { %6130 = vmatpush3.msra.mxu0 %v6469_v3  ;;  %6135 = vmatpush3.msra.mxu1 %v6474_v4 }
  0x38   : > { %6131 = vmatprep.mubr.msk.f32.mxu0 %vm6409_vm0, %v6408_v2  ;;  %6136 = vmatprep.mubr.msk.f32.mxu1 %vm6409_vm0, %v6408_v2 }
  0x39   : > { %6139 = vmatprep.subr.mxu0 %v6408_v2  ;;  %6144 = vmatprep.subr.mxu1 %v6408_v2 }
  0x3a   : > { %6132 = vmatmul.mubr.msk.f32.vlgmr.msra.gmra.mrb[20].mxu0 %vm192_vm1, %v5765_v24  ;;  %6137 = vmatmul.mubr.msk.f32.vlgmr.msra.gmra.mrb[20].mxu1 %vm192_vm1, %v5774_v25 }
  0x3b   : > { %6140 = vmatpush3.msra.mxu0 %v6491_v9  ;;  %6145 = vmatpush3.msra.mxu1 %v6496_v10 }
  0x3c   : > { %6141 = vmatprep.mubr.msk.f32.mxu0 %vm6409_vm0, %v6408_v2  ;;  %6146 = vmatprep.mubr.msk.f32.mxu1 %vm6409_vm0, %v6408_v2 }
  0x3d   : > { %6149 = vmatprep.subr.mxu0 %v6408_v2  ;;  %6154 = vmatprep.subr.mxu1 %v6408_v2 }
  0x3e   : > { %6142 = vmatmul.mubr.msk.f32.vlgmr.msra.gmra.mrb[22].mxu0 %vm192_vm1, %v5776_v26  ;;  %6147 = vmatmul.mubr.msk.f32.vlgmr.msra.gmra.mrb[22].mxu1 %vm192_vm1, %v5778_v27 }
  0x3f   : > { %6150 = vmatpush3.msra.mxu0 %v6513_v13  ;;  %6155 = vmatpush3.msra.mxu1 %v6518_v14 }
  0x40   : > { %6151 = vmatprep.mubr.msk.f32.mxu0 %vm6409_vm0, %v6408_v2  ;;  %6156 = vmatprep.mubr.msk.f32.mxu1 %vm6409_vm0, %v6408_v2 }
  0x41   : > { %6159 = vmatprep.subr.mxu0 %v6408_v2  ;;  %6164 = vmatprep.subr.mxu1 %v6408_v2 }
  0x42   : > { %6152 = vmatmul.mubr.msk.f32.vlgmr.msra.gmra.mrb[24].mxu0 %vm192_vm1, %v5780_v28  ;;  %6157 = vmatmul.mubr.msk.f32.vlgmr.msra.gmra.mrb[24].mxu1 %vm192_vm1, %v5782_v29 }
  0x43   : > { %6160 = vmatpush3.msra.mxu0 %v6535_v17  ;;  %6165 = vmatpush3.msra.mxu1 %v6441_v0 }
  0x44   : > { %6161 = vmatprep.mubr.msk.f32.mxu0 %vm6409_vm0, %v6408_v2  ;;  %6166 = vmatprep.mubr.msk.f32.mxu1 %vm6409_vm0, %v6408_v2 }
  0x45   : > { %6169 = vmatprep.subr.mxu0 %v6408_v2  ;;  %6174 = vmatprep.subr.mxu1 %v6408_v2 }
  0x46   : > { %6162 = vmatmul.mubr.msk.f32.vlgmr.msra.gmra.mrb[26].mxu0 %vm192_vm1, %v5784_v30  ;;  %6167 = vmatmul.mubr.msk.f32.vlgmr.msra.gmra.mrb[26].mxu1 %vm192_vm1, %v5782_v29 }
  0x47   : > { %6170 = vmatpush3.msra.mxu0 %v6446_v1  ;;  %6175 = vmatpush3.msra.mxu1 %v6469_v3 }
  0x48   : > { %6171 = vmatprep.mubr.msk.f32.mxu0 %vm6409_vm0, %v6408_v2  ;;  %6176 = vmatprep.mubr.msk.f32.mxu1 %vm6409_vm0, %v6408_v2 }
  0x49   : > { %6179 = vmatprep.subr.mxu0 %v6408_v2  ;;  %6184 = vmatprep.subr.mxu1 %v6408_v2 }
  0x4a   : > { %6172 = vmatmul.mubr.msk.f32.vlgmr.msra.gmra.mrb[28].mxu0 %vm192_vm1, %v5780_v28  ;;  %6177 = vmatmul.mubr.msk.f32.vlgmr.msra.gmra.mrb[28].mxu1 %vm192_vm1, %v5784_v30 }
  0x4b   : > { %6180 = vmatpush3.msra.mxu0 %v6474_v4  ;;  %6185 = vmatpush3.msra.mxu1 %v6491_v9 }
  0x4c   : > { %6181 = vmatprep.mubr.msk.f32.mxu0 %vm6409_vm0, %v6408_v2  ;;  %6186 = vmatprep.mubr.msk.f32.mxu1 %vm6409_vm0, %v6408_v2 }
  0x4d   : > { %6189 = vmatprep.subr.mxu0 %v6408_v2  ;;  %6194 = vmatprep.subr.mxu1 %v6408_v2 }
  0x4e   : > { %6182 = vmatmul.mubr.msk.f32.vlgmr.msra.gmra.mrb[30].mxu0 %vm192_vm1, %v5793_v31  ;;  %6187 = vmatmul.mubr.msk.f32.vlgmr.msra.gmra.mrb[30].mxu1 %vm192_vm1, %v5795_v32 }
  0x4f   : > { %6190 = vmatpush3.msra.mxu0 %v6496_v10  ;;  %6195 = vmatpush3.msra.mxu1 %v6513_v13 }
  0x50   : > { %6191 = vmatprep.mubr.msk.f32.mxu0 %vm6409_vm0, %v6408_v2  ;;  %6196 = vmatprep.mubr.msk.f32.mxu1 %vm6409_vm0, %v6408_v2 }
  0x51   : > { %6199 = vmatprep.subr.mxu0 %v6408_v2  ;;  %6204 = vmatprep.subr.mxu1 %v6408_v2 }
  0x52   : > { %6192 = vmatmul.mubr.msk.f32.vlgmr.msra.gmra.mrb[32].mxu0 %vm192_vm1, %v5797_v33  ;;  %6197 = vmatmul.mubr.msk.f32.vlgmr.msra.gmra.mrb[32].mxu1 %vm192_vm1, %v5799_v34 }
  0x53   : > { %6200 = vmatpush3.msra.mxu0 %v6518_v14  ;;  %6205 = vmatpush3.msra.mxu1 %v6535_v17 }
  0x54   : > { %6201 = vmatprep.mubr.msk.f32.mxu0 %vm6409_vm0, %v6408_v2  ;;  %6206 = vmatprep.mubr.msk.f32.mxu1 %vm6409_vm0, %v6408_v2 }
  0x55   : > { %6209 = vmatprep.subr.mxu0 %v6408_v2  ;;  %6214 = vmatprep.subr.mxu1 %v6408_v2 }
  0x56   : > { %6202 = vmatmul.mubr.msk.f32.vlgmr.msra.gmra.mrb[34].mxu0 %vm192_vm1, %v5801_v35  ;;  %6207 = vmatmul.mubr.msk.f32.vlgmr.msra.gmra.mrb[34].mxu1 %vm192_vm1, %v5803_v36 }
  0x57   : > { %6210 = vmatpush3.msra.mxu0 %v6441_v0  ;;  %6215 = vmatpush3.msra.mxu1 %v6446_v1 }
  0x58   : > { %6211 = vmatprep.mubr.msk.f32.mxu0 %vm6409_vm0, %v6408_v2  ;;  %6216 = vmatprep.mubr.msk.f32.mxu1 %vm6409_vm0, %v6408_v2 }
  0x59   : > { %6219 = vmatprep.subr.mxu0 %v6408_v2  ;;  %6224 = vmatprep.subr.mxu1 %v6408_v2 }
  0x5a   : > { %6212 = vmatmul.mubr.msk.f32.vlgmr.msra.gmra.mrb[36].mxu0 %vm192_vm1, %v5801_v35  ;;  %6217 = vmatmul.mubr.msk.f32.vlgmr.msra.gmra.mrb[36].mxu1 %vm192_vm1, %v5799_v34 }
  0x5b   : > { %6220 = vmatpush3.msra.mxu0 %v6469_v3  ;;  %6225 = vmatpush3.msra.mxu1 %v6474_v4 }
  0x5c   : > { %6221 = vmatprep.mubr.msk.f32.mxu0 %vm6409_vm0, %v6408_v2  ;;  %6226 = vmatprep.mubr.msk.f32.mxu1 %vm6409_vm0, %v6408_v2 }
  0x5d   : > { %6229 = vmatprep.subr.mxu0 %v6408_v2  ;;  %6234 = vmatprep.subr.mxu1 %v6408_v2 }
  0x5e   : > { %6222 = vmatmul.mubr.msk.f32.vlgmr.msra.gmra.mrb[38].mxu0 %vm192_vm1, %v5803_v36  ;;  %6227 = vmatmul.mubr.msk.f32.vlgmr.msra.gmra.mrb[38].mxu1 %vm192_vm1, %v5812_v37 }
  0x5f   : > { %6230 = vmatpush3.msra.mxu0 %v6491_v9  ;;  %6235 = vmatpush3.msra.mxu1 %v6496_v10 }
  0x60   : > { %6231 = vmatprep.mubr.msk.f32.mxu0 %vm6409_vm0, %v6408_v2  ;;  %6236 = vmatprep.mubr.msk.f32.mxu1 %vm6409_vm0, %v6408_v2 }
  0x61   : > { %6239 = vmatprep.subr.mxu0 %v6408_v2  ;;  %6244 = vmatprep.subr.mxu1 %v6408_v2 }
  0x62   : > { %6232 = vmatmul.mubr.msk.f32.vlgmr.msra.gmra.mrb[40].mxu0 %vm192_vm1, %v5814_v38  ;;  %6237 = vmatmul.mubr.msk.f32.vlgmr.msra.gmra.mrb[40].mxu1 %vm192_vm1, %v5816_v39 }
  0x63   : > { %6240 = vmatpush3.msra.mxu0 %v6513_v13  ;;  %6245 = vmatpush3.msra.mxu1 %v6518_v14 }
  0x64   : > { %6241 = vmatprep.mubr.msk.f32.mxu0 %vm6409_vm0, %v6408_v2  ;;  %6246 = vmatprep.mubr.msk.f32.mxu1 %vm6409_vm0, %v6408_v2 }
  0x65   : > { %6249 = vmatprep.subr.mxu0 %v6408_v2  ;;  %6254 = vmatprep.subr.mxu1 %v6408_v2 }
  0x66   : > { %6242 = vmatmul.mubr.msk.f32.vlgmr.msra.gmra.mrb[42].mxu0 %vm192_vm1, %v5818_v40  ;;  %6247 = vmatmul.mubr.msk.f32.vlgmr.msra.gmra.mrb[42].mxu1 %vm192_vm1, %v5820_v41 }
  0x67   : > { %6250 = vmatpush3.msra.mxu0 %v6535_v17  ;;  %6255 = vmatpush3.msra.mxu1 %v6441_v0 }
  0x68   : > { %6251 = vmatprep.mubr.msk.f32.mxu0 %vm6409_vm0, %v6408_v2  ;;  %6256 = vmatprep.mubr.msk.f32.mxu1 %vm6409_vm0, %v6408_v2 }
  0x69   : > { %6259 = vmatprep.subr.mxu0 %v6408_v2  ;;  %6264 = vmatprep.subr.mxu1 %v6408_v2 }
  0x6a   : > { %6252 = vmatmul.mubr.msk.f32.vlgmr.msra.gmra.mrb[44].mxu0 %vm192_vm1, %v5822_v42  ;;  %6257 = vmatmul.mubr.msk.f32.vlgmr.msra.gmra.mrb[44].mxu1 %vm192_vm1, %v5820_v41 }
  0x6b   : > { %6260 = vmatpush3.msra.mxu0 %v6446_v1  ;;  %6265 = vmatpush3.msra.mxu1 %v6469_v3 }
  0x6c   : > { %6261 = vmatprep.mubr.msk.f32.mxu0 %vm6409_vm0, %v6408_v2  ;;  %6266 = vmatprep.mubr.msk.f32.mxu1 %vm6409_vm0, %v6408_v2 }
  0x6d   : > { %6269 = vmatprep.subr.mxu0 %v6408_v2  ;;  %6274 = vmatprep.subr.mxu1 %v6408_v2 }
  0x6e   : > { %6262 = vmatmul.mubr.msk.f32.vlgmr.msra.gmra.mrb[46].mxu0 %vm192_vm1, %v5818_v40  ;;  %6267 = vmatmul.mubr.msk.f32.vlgmr.msra.gmra.mrb[46].mxu1 %vm192_vm1, %v5822_v42 }
  0x6f   : > { %6270 = vmatpush3.msra.mxu0 %v6474_v4  ;;  %6275 = vmatpush3.msra.mxu1 %v6491_v9 }
  0x70   : > { %6271 = vmatprep.mubr.msk.f32.mxu0 %vm6409_vm0, %v6408_v2  ;;  %6276 = vmatprep.mubr.msk.f32.mxu1 %vm6409_vm0, %v6408_v2 }
  0x71   : > { %6279 = vmatprep.subr.mxu0 %v6408_v2  ;;  %6284 = vmatprep.subr.mxu1 %v6408_v2 }
  0x72   : > { %6272 = vmatmul.mubr.msk.f32.vlgmr.msra.gmra.mrb[48].mxu0 %vm192_vm1, %v5831_v43  ;;  %6277 = vmatmul.mubr.msk.f32.vlgmr.msra.gmra.mrb[48].mxu1 %vm192_vm1, %v5833_v44 }
  0x73   : > { %6280 = vmatpush3.msra.mxu0 %v6496_v10  ;;  %6285 = vmatpush3.msra.mxu1 %v6513_v13 }
  0x74   : > { %6281 = vmatprep.mubr.msk.f32.mxu0 %vm6409_vm0, %v6408_v2  ;;  %6286 = vmatprep.mubr.msk.f32.mxu1 %vm6409_vm0, %v6408_v2 }
  0x75   : > { %6289 = vmatprep.subr.mxu0 %v6408_v2  ;;  %6294 = vmatprep.subr.mxu1 %v6408_v2 }
  0x76   : > { %6282 = vmatmul.mubr.msk.f32.vlgmr.msra.gmra.mrb[50].mxu0 %vm192_vm1, %v5835_v45  ;;  %6287 = vmatmul.mubr.msk.f32.vlgmr.msra.gmra.mrb[50].mxu1 %vm192_vm1, %v5837_v46 }
  0x77   : > { %6290 = vmatpush3.msra.mxu0 %v6518_v14  ;;  %6295 = vmatpush3.msra.mxu1 %v6535_v17 }
  0x78   : > { %6291 = vmatprep.mubr.msk.f32.mxu0 %vm6409_vm0, %v6408_v2  ;;  %6296 = vmatprep.mubr.msk.f32.mxu1 %vm6409_vm0, %v6408_v2 }
  0x79   : > { %6299 = vmatprep.subr.mxu0 %v6408_v2  ;;  %6304 = vmatprep.subr.mxu1 %v6408_v2 }
  0x7a   : > { %6292 = vmatmul.mubr.msk.f32.vlgmr.msra.gmra.mrb[52].mxu0 %vm192_vm1, %v5839_v47  ;;  %6297 = vmatmul.mubr.msk.f32.vlgmr.msra.gmra.mrb[52].mxu1 %vm192_vm1, %v5841_v48 }
  0x7b   : > { %6300 = vmatpush3.msra.mxu0 %v6441_v0  ;;  %6305 = vmatpush3.msra.mxu1 %v6446_v1 }
  0x7c   : > { %6301 = vmatprep.mubr.msk.f32.mxu0 %vm6409_vm0, %v6408_v2  ;;  %6306 = vmatprep.mubr.msk.f32.mxu1 %vm6409_vm0, %v6408_v2 }
  0x7d   : > { %6309 = vmatprep.subr.mxu0 %v6408_v2  ;;  %6314 = vmatprep.subr.mxu1 %v6408_v2 }
  0x7e   : > { %6302 = vmatmul.mubr.msk.f32.vlgmr.msra.gmra.mrb[54].mxu0 %vm192_vm1, %v5839_v47  ;;  %6307 = vmatmul.mubr.msk.f32.vlgmr.msra.gmra.mrb[54].mxu1 %vm192_vm1, %v5837_v46 }
  0x7f   : > { %6310 = vmatpush3.msra.mxu0 %v6469_v3  ;;  %6315 = vmatpush3.msra.mxu1 %v6474_v4 }
  0x80   : > { %6311 = vmatprep.mubr.msk.f32.mxu0 %vm6409_vm0, %v6408_v2  ;;  %6319 = vmatprep.subr.mxu0 %v6408_v2 }
  0x81   : > { %6316 = vmatprep.mubr.msk.f32.mxu1 %vm6409_vm0, %v6408_v2  ;;  %6324 = vmatprep.subr.mxu1 %v6408_v2 }
  0x82   : > { %6312 = vmatmul.mubr.msk.f32.vlgmr.msra.gmra.mrb[56].mxu0 %vm192_vm1, %v5841_v48  ;;  %6317 = vmatmul.mubr.msk.f32.vlgmr.msra.gmra.mrb[56].mxu1 %vm192_vm1, %v5850_v49 }
  0x83   : > { %6320 = vmatpush3.msra.mxu0 %v6491_v9  ;;  %6325 = vmatpush3.msra.mxu1 %v6496_v10 }
  0x84   : > { %6321 = vmatprep.mubr.msk.f32.mxu0 %vm6409_vm0, %v6408_v2  ;;  %6329 = vmatprep.subr.mxu0 %v6408_v2 }
  0x85   : > { %6326 = vmatprep.mubr.msk.f32.mxu1 %vm6409_vm0, %v6408_v2  ;;  %6334 = vmatprep.subr.mxu1 %v6408_v2 }
  0x86   : > { %6322 = vmatmul.mubr.msk.f32.vlgmr.msra.gmra.mrb[58].mxu0 %vm192_vm1, %v5852_v50  ;;  %6327 = vmatmul.mubr.msk.f32.vlgmr.msra.gmra.mrb[58].mxu1 %vm192_vm1, %v5854_v51 }
  0x87   : > { %6330 = vmatpush3.msra.mxu0 %v6513_v13  ;;  %6335 = vmatpush3.msra.mxu1 %v6518_v14 }
  0x88   : > { %6331 = vmatprep.mubr.msk.f32.mxu0 %vm6409_vm0, %v6408_v2  ;;  %6339 = vmatprep.subr.mxu0 %v6408_v2 }
  0x89   : > { %6336 = vmatprep.mubr.msk.f32.mxu1 %vm6409_vm0, %v6408_v2  ;;  %6344 = vmatprep.subr.mxu1 %v6408_v2 }
  0x8a   : > { %6332 = vmatmul.mubr.msk.f32.vlgmr.msra.gmra.mrb[60].mxu0 %vm192_vm1, %v5856_v52  ;;  %6337 = vmatmul.mubr.msk.f32.vlgmr.msra.gmra.mrb[60].mxu1 %vm192_vm1, %v5858_v53 }
  0x8b   : > { %6340 = vmatpush3.msra.mxu0 %v6535_v17  ;;  %6345 = vmatpush3.msra.mxu1 %v6441_v0 }
  0x8c   : > { %6341 = vmatprep.mubr.msk.f32.mxu0 %vm6409_vm0, %v6408_v2  ;;  %6349 = vmatprep.subr.mxu0 %v6408_v2 }
  0x8d   : > { %6346 = vmatprep.mubr.msk.f32.mxu1 %vm6409_vm0, %v6408_v2  ;;  %6354 = vmatprep.subr.mxu1 %v6408_v2 }
  0x8e   : > { %6342 = vmatmul.mubr.msk.f32.vlgmr.msra.gmra.mrb[62].mxu0 %vm192_vm1, %v5860_v54  ;;  %6347 = vmatmul.mubr.msk.f32.vlgmr.msra.gmra.mrb[62].mxu1 %vm192_vm1, %v5858_v53 }
  0x8f   : > { %6350 = vmatpush3.msra.mxu0 %v6446_v1  ;;  %6355 = vmatpush3.msra.mxu1 %v6469_v3 }
  0x90   : > { %6351 = vmatprep.mubr.msk.f32.mxu0 %vm6409_vm0, %v6408_v2  ;;  %6359 = vmatprep.subr.mxu0 %v6408_v2 }
  0x91   : > { %6356 = vmatprep.mubr.msk.f32.mxu1 %vm6409_vm0, %v6408_v2  ;;  %6364 = vmatprep.subr.mxu1 %v6408_v2 }
  0x92   : > { %6352 = vmatmul.mubr.msk.f32.vlgmr.msra.gmra.mrb[64].mxu0 %vm192_vm1, %v5856_v52  ;;  %6357 = vmatmul.mubr.msk.f32.vlgmr.msra.gmra.mrb[64].mxu1 %vm192_vm1, %v5860_v54 }
  0x93   : > { %6360 = vmatpush3.msra.mxu0 %v6474_v4  ;;  %6365 = vmatpush3.msra.mxu1 %v6491_v9 }
  0x94   : > { %6361 = vmatprep.mubr.msk.f32.mxu0 %vm6409_vm0, %v6408_v2  ;;  %6369 = vmatprep.subr.mxu0 %v6408_v2 }
  0x95   : > { %6366 = vmatprep.mubr.msk.f32.mxu1 %vm6409_vm0, %v6408_v2  ;;  %6374 = vmatprep.subr.mxu1 %v6408_v2 }
  0x96   : > { %6362 = vmatmul.mubr.msk.f32.vlgmr.msra.gmra.mrb[66].mxu0 %vm192_vm1, %v5869_v55  ;;  %6367 = vmatmul.mubr.msk.f32.vlgmr.msra.gmra.mrb[66].mxu1 %vm192_vm1, %v5871_v56 }
  0x97   : > { %6370 = vmatpush3.msra.mxu0 %v6496_v10  ;;  %6375 = vmatpush3.msra.mxu1 %v6513_v13 }
  0x98   : > { %6371 = vmatprep.mubr.msk.f32.mxu0 %vm6409_vm0, %v6408_v2  ;;  %6379 = vmatprep.subr.mxu0 %v6408_v2 }
  0x99   : > { %6376 = vmatprep.mubr.msk.f32.mxu1 %vm6409_vm0, %v6408_v2  ;;  %6384 = vmatprep.subr.mxu1 %v6408_v2 }
  0x9a   : > { %6372 = vmatmul.mubr.msk.f32.vlgmr.msra.gmra.mrb[68].mxu0 %vm192_vm1, %v5873_v57  ;;  %6377 = vmatmul.mubr.msk.f32.vlgmr.msra.gmra.mrb[68].mxu1 %vm192_vm1, %v5875_v58 }
  0x9b   : > { %6380 = vmatpush3.msra.mxu0 %v6518_v14  ;;  %6385 = vmatpush3.msra.mxu1 %v6535_v17 }
  0x9c   : > { %6381 = vmatprep.mubr.msk.f32.mxu0 %vm6409_vm0, %v6408_v2  ;;  %6386 = vmatprep.mubr.msk.f32.mxu1 %vm6409_vm0, %v6408_v2 }
  0x9e   : > { %6382 = vmatmul.mubr.msk.f32.vlgmr.msra.gmra.mrb[70].mxu0 %vm192_vm1, %v5877_v59  ;;  %6387 = vmatmul.mubr.msk.f32.vlgmr.msra.gmra.mrb[70].mxu1 %vm192_vm1, %v5879_v60 }
  0xe5   : > { %v262_v61 = vpop.f32.mrb[0].mxu0  ;;  %v335_v62 = vpop.f32.mrb[0].mxu1 }
  0xe6   : > { %v336_v63 = vadd.f32 %v335_v62, %v262_v61  ;;  %v6033_v0 = vpop.f32.mrb[1].mxu0  ;;  %v6038_v1 = vpop.f32.mrb[1].mxu1 }
  0xe9   : > { %v409_v3 = vpop.f32.mrb[2].mxu0  ;;  %v485_v4 = vpop.f32.mrb[2].mxu1 }
  0xea   : > { %v413_v5 = vadd.f32 %v409_v3, %v336_v63  ;;  %v6043_v6 = vpop.f32.mrb[3].mxu0  ;;  %v6048_v7 = vpop.f32.mrb[3].mxu1 }
  0xec   : > { %v489_v8 = vadd.f32 %v485_v4, %v413_v5 }
  0xed   : > { %v561_v9 = vpop.f32.mrb[4].mxu0  ;;  %v636_v10 = vpop.f32.mrb[4].mxu1 }
  0xee   : > { %v565_v11 = vadd.f32 %v561_v9, %v489_v8  ;;  %v6053_v2 = vpop.f32.mrb[5].mxu0  ;;  %v6058_v12 = vpop.f32.mrb[5].mxu1 }
  0xf0   : > { %v640_v13 = vadd.f32 %v636_v10, %v565_v11 }
  0xf1   : > { %v712_v14 = vpop.f32.mrb[6].mxu0  ;;  %v788_v15 = vpop.f32.mrb[6].mxu1 }
  0xf2   : > { %v716_v16 = vadd.f32 %v712_v14, %v640_v13  ;;  %v6063_v17 = vpop.f32.mrb[7].mxu0  ;;  %v6068_v18 = vpop.f32.mrb[7].mxu1 }
  0xf4   : > { %v792_v19 = vadd.f32 %v788_v15, %v716_v16 }
  0xf5   : > { %v863_v21 = vpop.f32.mrb[8].mxu0  ;;  %v951_v22 = vpop.f32.mrb[8].mxu1 }
  0xf6   : > { %v867_v23 = vadd.f32 %v863_v21, %v792_v19  ;;  %v6073_v24 = vpop.f32.mrb[9].mxu0  ;;  %v6078_v25 = vpop.f32.mrb[9].mxu1 }
  0xf8   : > { %v874_v26 = vadd.f32 %v6905_v20, %v867_v23 }
  0xf9   : > { %v1024_v27 = vpop.f32.mrb[10].mxu0  ;;  %v1098_v28 = vpop.f32.mrb[10].mxu1 }
  0xfa   : > { %vm875_vm2 = vcmp.ge.f32.partialorder %v874_v26, 0.0  ;;  %v876_v29 = vmul.f32 0.2, %v874_v26  ;;  %v1025_v30 = vadd.f32 %v1024_v27, %v951_v22  ;;  %v6083_v31 = vpop.f32.mrb[11].mxu0  ;;  %v6088_v32 = vpop.f32.mrb[11].mxu1 }
  0xfc   : > { %v877_v33 = vsel %vm875_vm2, %v874_v26, %v876_v29  ;;  %v1102_v34 = vadd.f32 %v1098_v28, %v1025_v30 }
  0xfd   : > { %879 = vst.msk [vmem:[%s6912_s16] sm:$0xff] %vm878_vm3, %v877_v33  ;;  %v1174_v35 = vpop.f32.mrb[12].mxu0  ;;  %v1250_v36 = vpop.f32.mrb[12].mxu1 }
  0xfe   : > { %v1178_v37 = vadd.f32 %v1174_v35, %v1102_v34  ;;  %v6093_v38 = vpop.f32.mrb[13].mxu0  ;;  %v6098_v39 = vpop.f32.mrb[13].mxu1 }
 0x100   : > { %v1254_v40 = vadd.f32 %v1250_v36, %v1178_v37 }
 0x101   : > { %v1325_v41 = vpop.f32.mrb[14].mxu0  ;;  %v1401_v42 = vpop.f32.mrb[14].mxu1 }
 0x102   : > { %v1329_v43 = vadd.f32 %v1325_v41, %v1254_v40  ;;  %v6103_v44 = vpop.f32.mrb[15].mxu0  ;;  %v6108_v45 = vpop.f32.mrb[15].mxu1 }
 0x104   : > { %v1405_v46 = vadd.f32 %v1401_v42, %v1329_v43 }
 0x105   : > { %v1477_v47 = vpop.f32.mrb[16].mxu0  ;;  %v1552_v48 = vpop.f32.mrb[16].mxu1 }
 0x106   : > { %v1481_v49 = vadd.f32 %v1477_v47, %v1405_v46  ;;  %v6113_v50 = vpop.f32.mrb[17].mxu0  ;;  %v6118_v51 = vpop.f32.mrb[17].mxu1 }
 0x108   : > { %v1556_v52 = vadd.f32 %v1552_v48, %v1481_v49 }
 0x109   : > { %v1634_v53 = vpop.f32.mrb[18].mxu0  ;;  %v1707_v54 = vpop.f32.mrb[18].mxu1 }
 0x10a   : > { %v1557_v55 = vadd.f32 %v6905_v20, %v1556_v52  ;;  %v1708_v56 = vadd.f32 %v1707_v54, %v1634_v53  ;;  %v6123_v57 = vpop.f32.mrb[19].mxu0  ;;  %v6128_v58 = vpop.f32.mrb[19].mxu1 }
 0x10c   : > { %vm1558_vm4 = vcmp.ge.f32.partialorder %v1557_v55, 0.0  ;;  %v1559_v59 = vmul.f32 0.2, %v1557_v55 }
 0x10d   : > { %v1781_v60 = vpop.f32.mrb[20].mxu0  ;;  %v1857_v61 = vpop.f32.mrb[20].mxu1 }
 0x10e   : > { %v1560_v62 = vsel %vm1558_vm4, %v1557_v55, %v1559_v59  ;;  %v1785_v63 = vadd.f32 %v1781_v60, %v1708_v56  ;;  %v6133_v0 = vpop.f32.mrb[21].mxu0  ;;  %v6138_v1 = vpop.f32.mrb[21].mxu1 }
 0x10f   : > { %5767 = vst.msk [vmem:[%s6912_s16 + $0x8] sm:$0xff] %vm878_vm3, %v1560_v62 }
 0x110   : > { %v1861_v3 = vadd.f32 %v1857_v61, %v1785_v63 }
 0x111   : > { %v1933_v4 = vpop.f32.mrb[22].mxu0  ;;  %v2008_v5 = vpop.f32.mrb[22].mxu1 }
 0x112   : > { %v1937_v6 = vadd.f32 %v1933_v4, %v1861_v3  ;;  %v6143_v7 = vpop.f32.mrb[23].mxu0  ;;  %v6148_v8 = vpop.f32.mrb[23].mxu1 }
 0x114   : > { %v2012_v9 = vadd.f32 %v2008_v5, %v1937_v6 }
 0x115   : > { %v2084_v10 = vpop.f32.mrb[24].mxu0  ;;  %v2160_v11 = vpop.f32.mrb[24].mxu1 }
 0x116   : > { %v2088_v2 = vadd.f32 %v2084_v10, %v2012_v9  ;;  %v6153_v12 = vpop.f32.mrb[25].mxu0  ;;  %v6158_v13 = vpop.f32.mrb[25].mxu1 }
 0x118   : > { %v2164_v14 = vadd.f32 %v2160_v11, %v2088_v2 }
 0x119   : > { %v2235_v15 = vpop.f32.mrb[26].mxu0  ;;  %v2317_v16 = vpop.f32.mrb[26].mxu1 }
 0x11a   : > { %v2239_v17 = vadd.f32 %v2235_v15, %v2164_v14  ;;  %v6163_v18 = vpop.f32.mrb[27].mxu0  ;;  %v6168_v19 = vpop.f32.mrb[27].mxu1 }
 0x11c   : > { %v2240_v21 = vadd.f32 %v6905_v20, %v2239_v17 }
 0x11d   : > { %v2390_v22 = vpop.f32.mrb[28].mxu0  ;;  %v2464_v23 = vpop.f32.mrb[28].mxu1 }
 0x11e   : > { %vm2241_vm5 = vcmp.ge.f32.partialorder %v2240_v21, 0.0  ;;  %v2242_v24 = vmul.f32 0.2, %v2240_v21  ;;  %v2391_v25 = vadd.f32 %v2390_v22, %v2317_v16  ;;  %v6173_v26 = vpop.f32.mrb[29].mxu0  ;;  %v6178_v27 = vpop.f32.mrb[29].mxu1 }
 0x120   : > { %v2243_v28 = vsel %vm2241_vm5, %v2240_v21, %v2242_v24  ;;  %v2468_v29 = vadd.f32 %v2464_v23, %v2391_v25 }
 0x121   : > { %5786 = vst.msk [vmem:[%s6912_s16 + $0x10] sm:$0xff] %vm878_vm3, %v2243_v28  ;;  %v2540_v30 = vpop.f32.mrb[30].mxu0  ;;  %v2616_v31 = vpop.f32.mrb[30].mxu1 }
 0x122   : > { %v2544_v32 = vadd.f32 %v2540_v30, %v2468_v29  ;;  %v6183_v33 = vpop.f32.mrb[31].mxu0  ;;  %v6188_v34 = vpop.f32.mrb[31].mxu1 }
 0x124   : > { %v2620_v35 = vadd.f32 %v2616_v31, %v2544_v32 }
 0x125   : > { %v2691_v36 = vpop.f32.mrb[32].mxu0  ;;  %v2767_v37 = vpop.f32.mrb[32].mxu1 }
 0x126   : > { %v2695_v38 = vadd.f32 %v2691_v36, %v2620_v35  ;;  %v6193_v39 = vpop.f32.mrb[33].mxu0  ;;  %v6198_v40 = vpop.f32.mrb[33].mxu1 }
 0x128   : > { %v2771_v41 = vadd.f32 %v2767_v37, %v2695_v38 }
 0x129   : > { %v2843_v42 = vpop.f32.mrb[34].mxu0  ;;  %v2918_v43 = vpop.f32.mrb[34].mxu1 }
 0x12a   : > { %v2847_v44 = vadd.f32 %v2843_v42, %v2771_v41  ;;  %v6203_v45 = vpop.f32.mrb[35].mxu0  ;;  %v6208_v46 = vpop.f32.mrb[35].mxu1 }
 0x12c   : > { %v2922_v47 = vadd.f32 %v2918_v43, %v2847_v44 }
 0x12d   : > { %v3000_v48 = vpop.f32.mrb[36].mxu0  ;;  %v3073_v49 = vpop.f32.mrb[36].mxu1 }
 0x12e   : > { %v2923_v50 = vadd.f32 %v6905_v20, %v2922_v47  ;;  %v3074_v51 = vadd.f32 %v3073_v49, %v3000_v48  ;;  %v6213_v52 = vpop.f32.mrb[37].mxu0  ;;  %v6218_v53 = vpop.f32.mrb[37].mxu1 }
 0x130   : > { %vm2924_vm6 = vcmp.ge.f32.partialorder %v2923_v50, 0.0  ;;  %v2925_v54 = vmul.f32 0.2, %v2923_v50 }
 0x131   : > { %v3147_v55 = vpop.f32.mrb[38].mxu0  ;;  %v3223_v56 = vpop.f32.mrb[38].mxu1 }
 0x132   : > { %v2926_v57 = vsel %vm2924_vm6, %v2923_v50, %v2925_v54  ;;  %v3151_v58 = vadd.f32 %v3147_v55, %v3074_v51  ;;  %v6223_v59 = vpop.f32.mrb[39].mxu0  ;;  %v6228_v60 = vpop.f32.mrb[39].mxu1 }
 0x133   : > { %5805 = vst.msk [vmem:[%s6912_s16 + $0x18] sm:$0xff] %vm878_vm3, %v2926_v57 }
 0x134   : > { %v3227_v61 = vadd.f32 %v3223_v56, %v3151_v58 }
 0x135   : > { %v3299_v62 = vpop.f32.mrb[40].mxu0  ;;  %v3374_v63 = vpop.f32.mrb[40].mxu1 }
 0x136   : > { %v3303_v0 = vadd.f32 %v3299_v62, %v3227_v61  ;;  %v6233_v1 = vpop.f32.mrb[41].mxu0  ;;  %v6238_v3 = vpop.f32.mrb[41].mxu1 }
 0x138   : > { %v3378_v4 = vadd.f32 %v3374_v63, %v3303_v0 }
 0x139   : > { %v3450_v5 = vpop.f32.mrb[42].mxu0  ;;  %v3526_v6 = vpop.f32.mrb[42].mxu1 }
 0x13a   : > { %v3454_v7 = vadd.f32 %v3450_v5, %v3378_v4  ;;  %v6243_v8 = vpop.f32.mrb[43].mxu0  ;;  %v6248_v9 = vpop.f32.mrb[43].mxu1 }
 0x13c   : > { %v3530_v10 = vadd.f32 %v3526_v6, %v3454_v7 }
 0x13d   : > { %v3601_v11 = vpop.f32.mrb[44].mxu0  ;;  %v3683_v2 = vpop.f32.mrb[44].mxu1 }
 0x13e   : > { %v3605_v12 = vadd.f32 %v3601_v11, %v3530_v10  ;;  %v6253_v13 = vpop.f32.mrb[45].mxu0  ;;  %v6258_v14 = vpop.f32.mrb[45].mxu1 }
 0x140   : > { %v3606_v15 = vadd.f32 %v6905_v20, %v3605_v12 }
 0x141   : > { %v3756_v16 = vpop.f32.mrb[46].mxu0  ;;  %v3830_v17 = vpop.f32.mrb[46].mxu1 }
 0x142   : > { %vm3607_vm7 = vcmp.ge.f32.partialorder %v3606_v15, 0.0  ;;  %v3608_v18 = vmul.f32 0.2, %v3606_v15  ;;  %v3757_v19 = vadd.f32 %v3756_v16, %v3683_v2  ;;  %v6263_v21 = vpop.f32.mrb[47].mxu0  ;;  %v6268_v22 = vpop.f32.mrb[47].mxu1 }
 0x144   : > { %v3609_v23 = vsel %vm3607_vm7, %v3606_v15, %v3608_v18  ;;  %v3834_v24 = vadd.f32 %v3830_v17, %v3757_v19 }
 0x145   : > { %5824 = vst.msk [vmem:[%s6912_s16 + $0x20] sm:$0xff] %vm878_vm3, %v3609_v23  ;;  %v3906_v25 = vpop.f32.mrb[48].mxu0  ;;  %v3982_v26 = vpop.f32.mrb[48].mxu1 }
 0x146   : > { %v3910_v27 = vadd.f32 %v3906_v25, %v3834_v24  ;;  %v6273_v28 = vpop.f32.mrb[49].mxu0  ;;  %v6278_v29 = vpop.f32.mrb[49].mxu1 }
 0x148   : > { %v3986_v30 = vadd.f32 %v3982_v26, %v3910_v27 }
 0x149   : > { %v4057_v31 = vpop.f32.mrb[50].mxu0  ;;  %v4133_v32 = vpop.f32.mrb[50].mxu1 }
 0x14a   : > { %v4061_v33 = vadd.f32 %v4057_v31, %v3986_v30  ;;  %v6283_v34 = vpop.f32.mrb[51].mxu0  ;;  %v6288_v35 = vpop.f32.mrb[51].mxu1 }
 0x14c   : > { %v4137_v36 = vadd.f32 %v4133_v32, %v4061_v33 }
 0x14d   : > { %v4209_v37 = vpop.f32.mrb[52].mxu0  ;;  %v4284_v38 = vpop.f32.mrb[52].mxu1 }
 0x14e   : > { %v4213_v39 = vadd.f32 %v4209_v37, %v4137_v36  ;;  %v6293_v40 = vpop.f32.mrb[53].mxu0  ;;  %v6298_v41 = vpop.f32.mrb[53].mxu1 }
 0x150   : > { %v4288_v42 = vadd.f32 %v4284_v38, %v4213_v39 }
 0x151   : > { %v4366_v43 = vpop.f32.mrb[54].mxu0  ;;  %v4439_v44 = vpop.f32.mrb[54].mxu1 }
 0x152   : > { %v4289_v45 = vadd.f32 %v6905_v20, %v4288_v42  ;;  %v4440_v46 = vadd.f32 %v4439_v44, %v4366_v43  ;;  %v6303_v47 = vpop.f32.mrb[55].mxu0  ;;  %v6308_v48 = vpop.f32.mrb[55].mxu1 }
 0x154   : > { %vm4290_vm8 = vcmp.ge.f32.partialorder %v4289_v45, 0.0  ;;  %v4291_v49 = vmul.f32 0.2, %v4289_v45 }
 0x155   : > { %v4513_v50 = vpop.f32.mrb[56].mxu0  ;;  %v4589_v51 = vpop.f32.mrb[56].mxu1 }
 0x156   : > { %v4292_v52 = vsel %vm4290_vm8, %v4289_v45, %v4291_v49  ;;  %v4517_v53 = vadd.f32 %v4513_v50, %v4440_v46  ;;  %v6313_v54 = vpop.f32.mrb[57].mxu0  ;;  %v6318_v55 = vpop.f32.mrb[57].mxu1 }
 0x157   : > { %5843 = vst.msk [vmem:[%s6912_s16 + $0x28] sm:$0xff] %vm878_vm3, %v4292_v52 }
 0x158   : > { %v4593_v56 = vadd.f32 %v4589_v51, %v4517_v53 }
 0x159   : > { %v4665_v57 = vpop.f32.mrb[58].mxu0  ;;  %v4740_v58 = vpop.f32.mrb[58].mxu1 }
 0x15a   : > { %v4669_v59 = vadd.f32 %v4665_v57, %v4593_v56  ;;  %v6323_v60 = vpop.f32.mrb[59].mxu0  ;;  %v6328_v61 = vpop.f32.mrb[59].mxu1 }
 0x15c   : > { %v4744_v62 = vadd.f32 %v4740_v58, %v4669_v59 }
 0x15d   : > { %v4816_v63 = vpop.f32.mrb[60].mxu0  ;;  %v4892_v0 = vpop.f32.mrb[60].mxu1 }
 0x15e   : > { %v4820_v1 = vadd.f32 %v4816_v63, %v4744_v62  ;;  %v6333_v3 = vpop.f32.mrb[61].mxu0  ;;  %v6338_v4 = vpop.f32.mrb[61].mxu1 }
 0x160   : > { %v4896_v5 = vadd.f32 %v4892_v0, %v4820_v1 }
 0x161   : > { %v4967_v6 = vpop.f32.mrb[62].mxu0  ;;  %v5049_v7 = vpop.f32.mrb[62].mxu1 }
 0x162   : > { %v4971_v8 = vadd.f32 %v4967_v6, %v4896_v5  ;;  %v6343_v9 = vpop.f32.mrb[63].mxu0  ;;  %v6348_v10 = vpop.f32.mrb[63].mxu1 }
 0x164   : > { %v4972_v11 = vadd.f32 %v6905_v20, %v4971_v8 }
 0x165   : > { %v5122_v2 = vpop.f32.mrb[64].mxu0  ;;  %v5196_v12 = vpop.f32.mrb[64].mxu1 }
 0x166   : > { %vm4973_vm9 = vcmp.ge.f32.partialorder %v4972_v11, 0.0  ;;  %v4974_v13 = vmul.f32 0.2, %v4972_v11  ;;  %v5123_v14 = vadd.f32 %v5122_v2, %v5049_v7  ;;  %v6353_v15 = vpop.f32.mrb[65].mxu0  ;;  %v6358_v16 = vpop.f32.mrb[65].mxu1 }
 0x168   : > { %v4975_v17 = vsel %vm4973_vm9, %v4972_v11, %v4974_v13  ;;  %v5200_v18 = vadd.f32 %v5196_v12, %v5123_v14 }
 0x169   : > { %5862 = vst.msk [vmem:[%s6912_s16 + $0x30] sm:$0xff] %vm878_vm3, %v4975_v17  ;;  %v5272_v19 = vpop.f32.mrb[66].mxu0  ;;  %v5348_v21 = vpop.f32.mrb[66].mxu1 }
 0x16a   : > { %v5276_v22 = vadd.f32 %v5272_v19, %v5200_v18  ;;  %v6363_v23 = vpop.f32.mrb[67].mxu0  ;;  %v6368_v24 = vpop.f32.mrb[67].mxu1 }
 0x16c   : > { %v5352_v25 = vadd.f32 %v5348_v21, %v5276_v22 }
 0x16d   : > { %v5423_v26 = vpop.f32.mrb[68].mxu0  ;;  %v5499_v27 = vpop.f32.mrb[68].mxu1 }
 0x16e   : > { %v5427_v28 = vadd.f32 %v5423_v26, %v5352_v25  ;;  %v6373_v29 = vpop.f32.mrb[69].mxu0  ;;  %v6378_v30 = vpop.f32.mrb[69].mxu1 }
 0x170   : > { %v5503_v31 = vadd.f32 %v5499_v27, %v5427_v28 }
 0x171   : > { %v5575_v32 = vpop.f32.mrb[70].mxu0  ;;  %v5650_v33 = vpop.f32.mrb[70].mxu1 }
 0x172   : > { %v5579_v34 = vadd.f32 %v5575_v32, %v5503_v31  ;;  %v6383_v35 = vpop.f32.mrb[71].mxu0  ;;  %v6388_v36 = vpop.f32.mrb[71].mxu1 }
 0x174   : > { %v5654_v37 = vadd.f32 %v5650_v33, %v5579_v34 }
 0x176   : > { %v5655_v38 = vadd.f32 %v6905_v20, %v5654_v37 }
 0x178   : > { %vm5656_vm10 = vcmp.ge.f32.partialorder %v5655_v38, 0.0  ;;  %v5657_v39 = vmul.f32 0.2, %v5655_v38 }
 0x17a   : > { %v5658_v40 = vsel %vm5656_vm10, %v5655_v38, %v5657_v39 }
 0x17b   : > { %5881 = vst.msk [vmem:[%s6912_s16 + $0x38] sm:$0xff] %vm878_vm3, %v5658_v40 }
 0x17c PF: > { %s13_s12 = sadd.s32 1, %s6406_s12  }
 0x17d   : > { %p10_p4 = scmp.ge.s32.totalorder %s13_s12, 4  }
 0x17f   :  { %12 = sbr.rel (!%p10_p4) target bundleno = 1 (0x1), region = 110 }

// kernel: pallas_forward.12
= control target key start
LH: loop header
LB: loop body
LE: loop exit
PB: predicated region body
PF: predicated region fallthrough
CT: control target
= control target key end

     0   :  { %vm18_vm0 = vcmask 523264   ;;  %v171_v0 = vmov 0.0|0.0   ;;  %v172_v4 = vmov 0.0   ;;  %vm173_vm1 = vmmov 0   ;;  %s231_s1 = inlined_call_operand.vmem [shape: f32[64,64], index: 1, kind: input, shape index: {}]   ;;  %s232_s0 = inlined_call_operand.vmem [shape: f32[8,64], index: 0, kind: input, shape index: {}]   ;;  %s233_s2 = inlined_call_operand.vmem [shape: f32[1,64], index: 2, kind: input, shape index: {}]   ;;  %s234_s3 = inlined_call_operand.vmem [shape: f32[8,64], index: 3, kind: output, shape index: {}]  }
   0x1   :  { %156 = vmatprep.subr.bf16.mxu0 %v171_v0  ;;  %v22_v1 = vld [vmem:[%s231_s1] sm:$0xff]  ;;  %v23_v2 = vld [vmem:[%s231_s1 + $0x8] sm:$0xff]  ;;  %v24_v3 = vld [vmem:[%s231_s1 + $0x10] sm:$0xff]  ;;  %19 = vst.msk [vmem:[#allocation2] sm:$0xff] %vm18_vm0, %v172_v4  ;;  %153 = vmatprep.mubr.msk.f32.mxu0 %vm173_vm1, %v172_v4 }
   0x2   :  { %v157_v5 = vpack.c.bf16 %v23_v2, %v22_v1  ;;  %v25_v6 = vld [vmem:[%s231_s1 + $0x18] sm:$0xff]  ;;  %v26_v8 = vld [vmem:[%s231_s1 + $0x20] sm:$0xff]  ;;  %v27_v9 = vld [vmem:[%s231_s1 + $0x28] sm:$0xff] }
   0x3   :  { %v160_v7 = vpack.c.bf16 %v25_v6, %v24_v3  ;;  %v163_v10 = vpack.c.bf16 %v27_v9, %v26_v8  ;;  %v28_v11 = vld [vmem:[%s231_s1 + $0x30] sm:$0xff]  ;;  %v29_v12 = vld [vmem:[%s231_s1 + $0x38] sm:$0xff]  ;;  %v21_v14 = vld [vmem:[%s232_s0] sm:$0xff] }
   0x4   :  { %158 = vmatpush3.bf16.msra.mxu0 %v157_v5  ;;  %v166_v13 = vpack.c.bf16 %v29_v12, %v28_v11  ;;  %v127_v19 = vld [vmem:[%s233_s2] ss:$0 sm:$0xff] }
   0x5   :  { %159 = vmatprep.subr.bf16.mxu0 %v171_v0 }
   0x8   :  { %161 = vmatpush3.bf16.msra.mxu0 %v160_v7  ;;  %v20_v15 = vld [vmem:[#allocation2] sm:$0xff] }
   0x9   :  { %162 = vmatprep.subr.bf16.mxu0 %v171_v0 }
   0xc   :  { %164 = vmatpush3.bf16.msra.mxu0 %v163_v10 }
   0xd   :  { %165 = vmatprep.subr.bf16.mxu0 %v171_v0 }
  0x10   :  { %167 = vmatpush3.bf16.msra.mxu0 %v166_v13 }
  0x13   :  { %154 = vmatmul.mubr.msk.f32.vlgmr.msra.gmra.mrb[0].mxu0 %vm18_vm0, %v21_v14 }
  0xe6   :  { %v100_v16 = vpop.f32.mrb[0].mxu0 }
  0xe7   :  { %v104_v17 = vadd.f32 %v100_v16, %v20_v15  ;;  %v155_v18 = vpop.f32.mrb[1].mxu0 }
  0xe9   :  { %105 = vst.msk [vmem:[#allocation2] sm:$0xff] %vm18_vm0, %v104_v17 }
  0xf0   :  { %v109_v20 = vld [vmem:[#allocation2] sm:$0xff] }
  0xf1   :  { %v117_v21 = vadd.f32 %v127_v19, %v109_v20 }
  0xf3   :  { %vm118_vm2 = vcmp.ge.f32.partialorder %v117_v21, 0.0  ;;  %v119_v22 = vmul.f32 0.2, %v117_v21 }
  0xf5   :  { %v120_v23 = vsel %vm118_vm2, %v117_v21, %v119_v22 }
  0xf6   :  { %121 = vst.msk [vmem:[%s234_s3] sm:$0xff] %vm18_vm0, %v120_v23 }

// kernel: pallas_forward.13
= control target key start
LH: loop header
LB: loop body
LE: loop exit
PB: predicated region body
PF: predicated region fallthrough
CT: control target
= control target key end

     0   :  { %vm18_vm0 = vcmask 261120   ;;  %v169_v0 = vmov 0.0|0.0   ;;  %v170_v4 = vmov 0.0   ;;  %vm171_vm1 = vmmov 0   ;;  %s228_s1 = inlined_call_operand.vmem [shape: f32[64,32], index: 1, kind: input, shape index: {}]   ;;  %s229_s0 = inlined_call_operand.vmem [shape: f32[8,64], index: 0, kind: input, shape index: {}]   ;;  %s230_s2 = inlined_call_operand.vmem [shape: f32[1,32], index: 2, kind: input, shape index: {}]   ;;  %s231_s3 = inlined_call_operand.vmem [shape: f32[8,32], index: 3, kind: output, shape index: {}]  }
   0x1   :  { %154 = vmatprep.subr.bf16.mxu0 %v169_v0  ;;  %v22_v1 = vld [vmem:[%s228_s1] sm:$0xff]  ;;  %v23_v2 = vld [vmem:[%s228_s1 + $0x8] sm:$0xff]  ;;  %v24_v3 = vld [vmem:[%s228_s1 + $0x10] sm:$0xff]  ;;  %19 = vst.msk [vmem:[#allocation2] sm:$0xff] %vm18_vm0, %v170_v4  ;;  %151 = vmatprep.mubr.msk.f32.mxu0 %vm171_vm1, %v170_v4  ;;  %vm30_vm2 = vcmask 523264  }
   0x2   :  { %v155_v5 = vpack.c.bf16 %v23_v2, %v22_v1  ;;  %v25_v6 = vld [vmem:[%s228_s1 + $0x18] sm:$0xff]  ;;  %v26_v8 = vld [vmem:[%s228_s1 + $0x20] sm:$0xff]  ;;  %v27_v9 = vld [vmem:[%s228_s1 + $0x28] sm:$0xff] }
   0x3   :  { %v158_v7 = vpack.c.bf16 %v25_v6, %v24_v3  ;;  %v161_v10 = vpack.c.bf16 %v27_v9, %v26_v8  ;;  %v28_v11 = vld [vmem:[%s228_s1 + $0x30] sm:$0xff]  ;;  %v29_v12 = vld [vmem:[%s228_s1 + $0x38] sm:$0xff]  ;;  %v21_v14 = vld [vmem:[%s229_s0] sm:$0xff] }
   0x4   :  { %156 = vmatpush3.bf16.msra.mxu0 %v155_v5  ;;  %v164_v13 = vpack.c.bf16 %v29_v12, %v28_v11  ;;  %v125_v19 = vld [vmem:[%s230_s2] ss:$0 sm:$0xff] }
   0x5   :  { %157 = vmatprep.subr.bf16.mxu0 %v169_v0 }
   0x8   :  { %159 = vmatpush3.bf16.msra.mxu0 %v158_v7  ;;  %v20_v15 = vld [vmem:[#allocation2] sm:$0xff] }
   0x9   :  { %160 = vmatprep.subr.bf16.mxu0 %v169_v0 }
   0xc   :  { %162 = vmatpush3.bf16.msra.mxu0 %v161_v10 }
   0xd   :  { %163 = vmatprep.subr.bf16.mxu0 %v169_v0 }
  0x10   :  { %165 = vmatpush3.bf16.msra.mxu0 %v164_v13 }
  0x13   :  { %152 = vmatmul.mubr.msk.f32.vlgmr.msra.gmra.mrb[0].mxu0 %vm30_vm2, %v21_v14 }
  0xe6   :  { %v100_v16 = vpop.f32.mrb[0].mxu0 }
  0xe7   :  { %v104_v17 = vadd.f32 %v100_v16, %v20_v15  ;;  %v153_v18 = vpop.f32.mrb[1].mxu0 }
  0xe9   :  { %106 = vst.msk [vmem:[#allocation2] sm:$0xff] %vm18_vm0, %v104_v17 }
  0xf0   :  { %v110_v20 = vld [vmem:[#allocation2] sm:$0xff] }
  0xf1   :  { %v118_v21 = vadd.f32 %v125_v19, %v110_v20 }
  0xf3   :  { %119 = vst.msk [vmem:[%s231_s3] sm:$0xff] %vm18_vm0, %v118_v21 }

// kernel: pallas_forward.11
= control target key start
LH: loop header
LB: loop body
LE: loop exit
PB: predicated region body
PF: predicated region fallthrough
CT: control target
= control target key end

     0   :  { %s1840_s12 = smov 0   ;;  %s1993_s0 = inlined_call_operand.vmem [shape: f32[2,4,3,3,8], index: 0, kind: input, shape index: {}]   ;;  %s1994_s1 = inlined_call_operand.vmem [shape: f32[3,3,8,16], index: 1, kind: input, shape index: {}]   ;;  %s1995_s2 = inlined_call_operand.vmem [shape: f32[1,16], index: 2, kind: input, shape index: {}]   ;;  %s1996_s3 = inlined_call_operand.vmem [shape: f32[2,2,2,16], index: 3, kind: output, shape index: {}]  }
   0x1 LB: > { %s1618_s13 = sadd.s32 4294967295, %s1816_s12   ;;  %p1622_p0 = scmp.ge.s32.totalorder %s1816_s12, 1  ;;  %s1816_s12 = sphi %s1840_s12, %s13_s12  }
   0x2   : > { %p137_p1 = scmp.lt.s32.totalorder %s1816_s12, 3 }
   0x4   : > { %p138_p2 = pnand %p1622_p0, %p137_p1 }
   0x5   : > { %v1626_v0 = vld [vmem:[%s1994_s1 + $0x8] sm:$0xff] (!%p138_p2)  ;;  %v1854_v1 = vld [vmem:[%s1994_s1] sm:$0xff] (!%p138_p2)  ;;  %p161_p3 = scmp.lt.s32.totalorder (!%p138_p2), %s1618_s13, 1  ;;  %v1818_v2 = vmov (!%p138_p2), 0.0   ;;  %vm1819_vm0 = vmmov (!%p138_p2), 0   ;;  %vm192_vm1 = vcmask (!%p138_p2), 64512  }
   0x6   : > { %141 = sbr.rel (%p138_p2) target bundleno = 272 (0x110), region = 32  ;;  %1709 = vmatprep.subr.mxu0 (!%p138_p2), %v1818_v2  ;;  %1714 = vmatprep.subr.mxu1 (!%p138_p2), %v1818_v2  ;;  %v1627_v3 = vld [vmem:[%s1994_s1 + $0x10] sm:$0xff] (!%p138_p2)  ;;  %v1628_v4 = vld [vmem:[%s1994_s1 + $0x18] sm:$0xff] (!%p138_p2)  ;;  %v1629_v9 = vld [vmem:[%s1994_s1 + $0x20] sm:$0xff] (!%p138_p2)  ;;  %vm878_vm3 = vcmask (!%p138_p2), 123904  }
   0x7   : > { %1710 = vmatpush3.msra.mxu0 (!%p138_p2), %v1626_v0  ;;  %1711 = vmatprep.mubr.msk.f32.mxu0 (!%p138_p2), %vm1819_vm0, %v1818_v2  ;;  %v1630_v10 = vld [vmem:[%s1994_s1 + $0x28] sm:$0xff] (!%p138_p2)  ;;  %v1631_v13 = vld [vmem:[%s1994_s1 + $0x30] sm:$0xff] (!%p138_p2)  ;;  %v1632_v14 = vld [vmem:[%s1994_s1 + $0x38] sm:$0xff] (!%p138_p2) }
   0x8   : > { %1715 = vmatpush3.msra.mxu1 (!%p138_p2), %v1854_v1  ;;  %1716 = vmatprep.mubr.msk.f32.mxu1 (!%p138_p2), %vm1819_vm0, %v1818_v2  ;;  %v1633_v17 = vld [vmem:[%s1994_s1 + $0x40] sm:$0xff] (!%p138_p2) }
   0x9   : > { %1719 = vmatprep.subr.mxu0 (!%p138_p2), %v1818_v2  ;;  %1724 = vmatprep.subr.mxu1 (!%p138_p2), %v1818_v2  ;;  %v1650_v51 = vld [vmem:[%s1995_s2] ss:$0 sm:$0xff] (!%p138_p2) }
   0xd   : > { %s1998_s13 = smov (!%p161_p3, %s1618_s13), 1 }
   0xe   : > { %s1799_s18 = smul.u32 48, %s1998_s13  ;;  %s1672_s11 = sshll.u32 %s1998_s13, 2 }
   0xf   : > { %s1984_s16 = scalar_lea.vmem %s1996_s3, %s1672_s11 }
  0x10   : > { %s1871_s21 = scalar_lea.vmem %s1993_s0, %s1799_s18 }
  0x11   : > { %v1634_v5 = vld [vmem:[%s1871_s21 + $0xc] sm:$0x3]  ;;  %v189_v6 = vld [vmem:[%s1871_s21] sm:$0x3]  ;;  %v1638_v8 = vld [vmem:[%s1871_s21 + $0x18] sm:$0x3] }
  0x12   : > { %1712 = vmatmul.mubr.msk.f32.vlgmr.msra.gmra.mrb[0].mxu0 %vm192_vm1, %v1634_v5  ;;  %1717 = vmatmul.mubr.msk.f32.vlgmr.msra.gmra.mrb[0].mxu1 %vm192_vm1, %v189_v6  ;;  %v339_v7 = vld [vmem:[%s1871_s21 + $0x1] sm:$0x3]  ;;  %v1640_v11 = vld [vmem:[%s1871_s21 + $0x24] sm:$0x3]  ;;  %v1642_v12 = vld [vmem:[%s1871_s21 + $0x19] sm:$0x3] }
  0x13   : > { %1720 = vmatpush3.msra.mxu0 %v1627_v3  ;;  %1725 = vmatpush3.msra.mxu1 %v1628_v4  ;;  %v1644_v15 = vld [vmem:[%s1871_s21 + $0x4] sm:$0x3]  ;;  %v1646_v16 = vld [vmem:[%s1871_s21 + $0x10] sm:$0x3]  ;;  %v1657_v22 = vld [vmem:[%s1871_s21 + $0x1c] sm:$0x3] }
  0x14   : > { %1721 = vmatprep.mubr.msk.f32.mxu0 %vm1819_vm0, %v1818_v2  ;;  %1729 = vmatprep.subr.mxu0 %v1818_v2  ;;  %v1648_v18 = vld [vmem:[%s1871_s21 + $0x5] sm:$0x3]  ;;  %v1652_v19 = vld [vmem:[%s1871_s21 + $0x10] sm:$0x3]  ;;  %v1659_v23 = vld [vmem:[%s1871_s21 + $0x28] sm:$0x3] }
  0x15   : > { %1726 = vmatprep.mubr.msk.f32.mxu1 %vm1819_vm0, %v1818_v2  ;;  %1734 = vmatprep.subr.mxu1 %v1818_v2  ;;  %v1651_v20 = vld [vmem:[%s1871_s21 + $0x4] sm:$0x3]  ;;  %v1661_v24 = vld [vmem:[%s1871_s21 + $0x1d] sm:$0x3]  ;;  %v1663_v25 = vld [vmem:[%s1871_s21 + $0x8] sm:$0x3] }
  0x16   : > { %1722 = vmatmul.mubr.msk.f32.vlgmr.msra.gmra.mrb[2].mxu0 %vm192_vm1, %v339_v7  ;;  %1727 = vmatmul.mubr.msk.f32.vlgmr.msra.gmra.mrb[2].mxu1 %vm192_vm1, %v1638_v8  ;;  %v1655_v21 = vld [vmem:[%s1871_s21 + $0x5] sm:$0x3]  ;;  %v1665_v26 = vld [vmem:[%s1871_s21 + $0x14] sm:$0x3]  ;;  %v1667_v27 = vld [vmem:[%s1871_s21 + $0x9] sm:$0x3] }
  0x17   : > { %1730 = vmatpush3.msra.mxu0 %v1629_v9  ;;  %1735 = vmatpush3.msra.mxu1 %v1630_v10 }
  0x18   : > { %1731 = vmatprep.mubr.msk.f32.mxu0 %vm1819_vm0, %v1818_v2  ;;  %1739 = vmatprep.subr.mxu0 %v1818_v2 }
  0x19   : > { %1736 = vmatprep.mubr.msk.f32.mxu1 %vm1819_vm0, %v1818_v2  ;;  %1744 = vmatprep.subr.mxu1 %v1818_v2 }
  0x1a   : > { %1732 = vmatmul.mubr.msk.f32.vlgmr.msra.gmra.mrb[4].mxu0 %vm192_vm1, %v1640_v11  ;;  %1737 = vmatmul.mubr.msk.f32.vlgmr.msra.gmra.mrb[4].mxu1 %vm192_vm1, %v1642_v12 }
  0x1b   : > { %1740 = vmatpush3.msra.mxu0 %v1631_v13  ;;  %1745 = vmatpush3.msra.mxu1 %v1632_v14 }
  0x1c   : > { %1741 = vmatprep.mubr.msk.f32.mxu0 %vm1819_vm0, %v1818_v2  ;;  %1749 = vmatprep.subr.mxu0 %v1818_v2 }
  0x1d   : > { %1746 = vmatprep.mubr.msk.f32.mxu1 %vm1819_vm0, %v1818_v2  ;;  %1754 = vmatprep.subr.mxu1 %v1818_v2 }
  0x1e   : > { %1742 = vmatmul.mubr.msk.f32.vlgmr.msra.gmra.mrb[6].mxu0 %vm192_vm1, %v1644_v15  ;;  %1747 = vmatmul.mubr.msk.f32.vlgmr.msra.gmra.mrb[6].mxu1 %vm192_vm1, %v1646_v16 }
  0x1f   : > { %1750 = vmatpush3.msra.mxu0 %v1633_v17  ;;  %1755 = vmatpush3.msra.mxu1 %v1626_v0 }
  0x20   : > { %1751 = vmatprep.mubr.msk.f32.mxu0 %vm1819_vm0, %v1818_v2  ;;  %1759 = vmatprep.subr.mxu0 %v1818_v2 }
  0x21   : > { %1756 = vmatprep.mubr.msk.f32.mxu1 %vm1819_vm0, %v1818_v2  ;;  %1764 = vmatprep.subr.mxu1 %v1818_v2 }
  0x22   : > { %1752 = vmatmul.mubr.msk.f32.vlgmr.msra.gmra.mrb[8].mxu0 %vm192_vm1, %v1648_v18  ;;  %1757 = vmatmul.mubr.msk.f32.vlgmr.msra.gmra.mrb[8].mxu1 %vm192_vm1, %v1652_v19 }
  0x23   : > { %1760 = vmatpush3.msra.mxu0 %v1854_v1  ;;  %1765 = vmatpush3.msra.mxu1 %v1627_v3 }
  0x24   : > { %1761 = vmatprep.mubr.msk.f32.mxu0 %vm1819_vm0, %v1818_v2  ;;  %1769 = vmatprep.subr.mxu0 %v1818_v2 }
  0x25   : > { %1766 = vmatprep.mubr.msk.f32.mxu1 %vm1819_vm0, %v1818_v2  ;;  %1774 = vmatprep.subr.mxu1 %v1818_v2 }
  0x26   : > { %1762 = vmatmul.mubr.msk.f32.vlgmr.msra.gmra.mrb[10].mxu0 %vm192_vm1, %v1651_v20  ;;  %1767 = vmatmul.mubr.msk.f32.vlgmr.msra.gmra.mrb[10].mxu1 %vm192_vm1, %v1655_v21 }
  0x27   : > { %1770 = vmatpush3.msra.mxu0 %v1628_v4  ;;  %1775 = vmatpush3.msra.mxu1 %v1629_v9 }
  0x28   : > { %1771 = vmatprep.mubr.msk.f32.mxu0 %vm1819_vm0, %v1818_v2  ;;  %1779 = vmatprep.subr.mxu0 %v1818_v2 }
  0x29   : > { %1776 = vmatprep.mubr.msk.f32.mxu1 %vm1819_vm0, %v1818_v2  ;;  %1784 = vmatprep.subr.mxu1 %v1818_v2 }
  0x2a   : > { %1772 = vmatmul.mubr.msk.f32.vlgmr.msra.gmra.mrb[12].mxu0 %vm192_vm1, %v1657_v22  ;;  %1777 = vmatmul.mubr.msk.f32.vlgmr.msra.gmra.mrb[12].mxu1 %vm192_vm1, %v1659_v23 }
  0x2b   : > { %1780 = vmatpush3.msra.mxu0 %v1630_v10  ;;  %1785 = vmatpush3.msra.mxu1 %v1631_v13 }
  0x2c   : > { %1781 = vmatprep.mubr.msk.f32.mxu0 %vm1819_vm0, %v1818_v2  ;;  %1789 = vmatprep.subr.mxu0 %v1818_v2 }
  0x2d   : > { %1786 = vmatprep.mubr.msk.f32.mxu1 %vm1819_vm0, %v1818_v2  ;;  %1794 = vmatprep.subr.mxu1 %v1818_v2 }
  0x2e   : > { %1782 = vmatmul.mubr.msk.f32.vlgmr.msra.gmra.mrb[14].mxu0 %vm192_vm1, %v1661_v24  ;;  %1787 = vmatmul.mubr.msk.f32.vlgmr.msra.gmra.mrb[14].mxu1 %vm192_vm1, %v1663_v25 }
  0x2f   : > { %1790 = vmatpush3.msra.mxu0 %v1632_v14  ;;  %1795 = vmatpush3.msra.mxu1 %v1633_v17 }
  0x30   : > { %1791 = vmatprep.mubr.msk.f32.mxu0 %vm1819_vm0, %v1818_v2  ;;  %1796 = vmatprep.mubr.msk.f32.mxu1 %vm1819_vm0, %v1818_v2 }
  0x32   : > { %1792 = vmatmul.mubr.msk.f32.vlgmr.msra.gmra.mrb[16].mxu0 %vm192_vm1, %v1665_v26  ;;  %1797 = vmatmul.mubr.msk.f32.vlgmr.msra.gmra.mrb[16].mxu1 %vm192_vm1, %v1667_v27 }
  0xe5   : > { %v262_v28 = vpop.f32.mrb[0].mxu0  ;;  %v335_v29 = vpop.f32.mrb[0].mxu1 }
  0xe6   : > { %v336_v30 = vadd.f32 %v335_v29, %v262_v28  ;;  %v1713_v31 = vpop.f32.mrb[1].mxu0  ;;  %v1718_v32 = vpop.f32.mrb[1].mxu1 }
  0xe9   : > { %v409_v33 = vpop.f32.mrb[2].mxu0  ;;  %v485_v34 = vpop.f32.mrb[2].mxu1 }
  0xea   : > { %v413_v35 = vadd.f32 %v409_v33, %v336_v30  ;;  %v1723_v36 = vpop.f32.mrb[3].mxu0  ;;  %v1728_v37 = vpop.f32.mrb[3].mxu1 }
  0xec   : > { %v489_v38 = vadd.f32 %v485_v34, %v413_v35 }
  0xed   : > { %v561_v39 = vpop.f32.mrb[4].mxu0  ;;  %v636_v40 = vpop.f32.mrb[4].mxu1 }
  0xee   : > { %v565_v41 = vadd.f32 %v561_v39, %v489_v38  ;;  %v1733_v42 = vpop.f32.mrb[5].mxu0  ;;  %v1738_v43 = vpop.f32.mrb[5].mxu1 }
  0xf0   : > { %v640_v44 = vadd.f32 %v636_v40, %v565_v41 }
  0xf1   : > { %v712_v45 = vpop.f32.mrb[6].mxu0  ;;  %v788_v46 = vpop.f32.mrb[6].mxu1 }
  0xf2   : > { %v716_v47 = vadd.f32 %v712_v45, %v640_v44  ;;  %v1743_v48 = vpop.f32.mrb[7].mxu0  ;;  %v1748_v49 = vpop.f32.mrb[7].mxu1 }
  0xf4   : > { %v792_v50 = vadd.f32 %v788_v46, %v716_v47 }
  0xf5   : > { %v863_v52 = vpop.f32.mrb[8].mxu0  ;;  %v951_v53 = vpop.f32.mrb[8].mxu1 }
  0xf6   : > { %v867_v54 = vadd.f32 %v863_v52, %v792_v50  ;;  %v1753_v55 = vpop.f32.mrb[9].mxu0  ;;  %v1758_v56 = vpop.f32.mrb[9].mxu1 }
  0xf8   : > { %v874_v57 = vadd.f32 %v1650_v51, %v867_v54 }
  0xf9   : > { %v1024_v58 = vpop.f32.mrb[10].mxu0  ;;  %v1098_v59 = vpop.f32.mrb[10].mxu1 }
  0xfa   : > { %vm875_vm2 = vcmp.ge.f32.partialorder %v874_v57, 0.0  ;;  %v876_v60 = vmul.f32 0.2, %v874_v57  ;;  %v1025_v61 = vadd.f32 %v1024_v58, %v951_v53  ;;  %v1763_v62 = vpop.f32.mrb[11].mxu0  ;;  %v1768_v63 = vpop.f32.mrb[11].mxu1 }
  0xfc   : > { %v877_v0 = vsel %vm875_vm2, %v874_v57, %v876_v60  ;;  %v1102_v1 = vadd.f32 %v1098_v59, %v1025_v61 }
  0xfd   : > { %879 = vst.msk [vmem:[%s1984_s16] sm:$0x3] %vm878_vm3, %v877_v0  ;;  %v1174_v2 = vpop.f32.mrb[12].mxu0  ;;  %v1250_v3 = vpop.f32.mrb[12].mxu1 }
  0xfe   : > { %v1178_v4 = vadd.f32 %v1174_v2, %v1102_v1  ;;  %v1773_v5 = vpop.f32.mrb[13].mxu0  ;;  %v1778_v6 = vpop.f32.mrb[13].mxu1 }
 0x100   : > { %v1254_v7 = vadd.f32 %v1250_v3, %v1178_v4 }
 0x101   : > { %v1325_v8 = vpop.f32.mrb[14].mxu0  ;;  %v1401_v9 = vpop.f32.mrb[14].mxu1 }
 0x102   : > { %v1329_v10 = vadd.f32 %v1325_v8, %v1254_v7  ;;  %v1783_v11 = vpop.f32.mrb[15].mxu0  ;;  %v1788_v12 = vpop.f32.mrb[15].mxu1 }
 0x104   : > { %v1405_v13 = vadd.f32 %v1401_v9, %v1329_v10 }
 0x105   : > { %v1477_v14 = vpop.f32.mrb[16].mxu0  ;;  %v1552_v15 = vpop.f32.mrb[16].mxu1 }
 0x106   : > { %v1481_v16 = vadd.f32 %v1477_v14, %v1405_v13  ;;  %v1793_v17 = vpop.f32.mrb[17].mxu0  ;;  %v1798_v18 = vpop.f32.mrb[17].mxu1 }
 0x108   : > { %v1556_v19 = vadd.f32 %v1552_v15, %v1481_v16 }
 0x10a   : > { %v1557_v20 = vadd.f32 %v1650_v51, %v1556_v19 }
 0x10c   : > { %vm1558_vm4 = vcmp.ge.f32.partialorder %v1557_v20, 0.0  ;;  %v1559_v21 = vmul.f32 0.2, %v1557_v20 }
 0x10e   : > { %v1560_v22 = vsel %vm1558_vm4, %v1557_v20, %v1559_v21 }
 0x10f   : > { %1669 = vst.msk [vmem:[%s1984_s16 + $0x2] sm:$0x3] %vm878_vm3, %v1560_v22 }
 0x110 PF: > { %s13_s12 = sadd.s32 1, %s1816_s12  }
 0x111   : > { %p10_p4 = scmp.ge.s32.totalorder %s13_s12, 4  }
 0x113   :  { %12 = sbr.rel (!%p10_p4) target bundleno = 1 (0x1), region = 80 }

</bundles_post_ra>
